<compile_context>
chip_gen: v7x
topology: tpu7x:2x2x1
jax: 0.10.0
libtpu: 0.0.40
codegen_flags: <defaults>
</compile_context>

<pallas_src>
import jax
import jax.numpy as jnp
from jax import lax
from jax.experimental import pallas as pl
from jax.experimental.pallas import tpu as pltpu

EMBED_DIM = 300
NUM_HIDDEN = 200          # PyTorch hidden size
NUM_LAYERS = 3
NUM_CLASSES = 2

E_PAD = 384               # embedding padded to 3*128 lanes
H_PAD = 256               # hidden padded to 2*128 lanes
G_PAD = 4 * H_PAD         # 4 gates
C_PAD = 128               # classifier padded to one full lane width

VMEM = pltpu.MemorySpace.VMEM


# ---------------------------------------------------------------------------
# Pallas kernel: 3-layer LSTM + Linear + Softmax for one batch tile
# ---------------------------------------------------------------------------
def _lstm_cls_kernel(x_ref, wih0_ref, whh0_ref, b0_ref,
                     wih1_ref, whh1_ref, b1_ref,
                     wih2_ref, whh2_ref, b2_ref,
                     wfc_ref, bfc_ref,
                     out_ref, seq_ref, gchunk_ref):
    """x_ref   : (T*B, E_PAD) bf16  embeddings, time-major within the tile.
       wih*    : (E_PAD|Hp, 4Hp) bf16  input projections (gate-block padded).
       whh*    : (Hp, 4Hp) bf16        recurrent weights.
       b*      : (1, 4Hp)  f32         combined b_ih + b_hh per layer.
       wfc/bfc : (Hp, C_PAD) bf16 / (1, C_PAD) f32 classifier.
       out_ref : (B, C_PAD) f32        softmax probabilities (cols >= 2 are 0).
       seq_ref : (T*B, Hp)  f32 scratch hidden sequence of the current layer.
       gchunk_ref: (T_CHUNK*B, 4Hp) f32 scratch input gates for a time chunk.
    """
    f32, bf16 = jnp.float32, jnp.bfloat16
    B = out_ref.shape[0]
    TB = x_ref.shape[0]
    T = TB // B
    Hp = whh0_ref.shape[0]
    TC = gchunk_ref.shape[0] // B                  # time steps per gate chunk
    GEMM_ROWS = B * max(1, 32 // B)                # M sub-block (spill guard)

    def cell(gates, c):
        # PyTorch gate order [i, f, g, o]; slices are 256-lane aligned.
        i_g = jax.nn.sigmoid(gates[:, 0 * Hp:1 * Hp])
        f_g = jax.nn.sigmoid(gates[:, 1 * Hp:2 * Hp])
        g_g = jnp.tanh(gates[:, 2 * Hp:3 * Hp])
        o_g = jax.nn.sigmoid(gates[:, 3 * Hp:4 * Hp])
        c_new = f_g * c + i_g * g_g
        h_new = o_g * jnp.tanh(c_new)
        return h_new, c_new

    layers = ((x_ref, wih0_ref, whh0_ref, b0_ref, False),
              (seq_ref, wih1_ref, whh1_ref, b1_ref, False),
              (seq_ref, wih2_ref, whh2_ref, b2_ref, True))

    h = None
    for in_ref, wih_ref, whh_ref, b_ref, is_last in layers:
        h = jnp.zeros((B, Hp), f32)
        c = jnp.zeros((B, Hp), f32)
        for t0 in range(0, T, TC):
            tc = min(TC, T - t0)
            rows = tc * B

            # Hoisted input-projection GEMM for this time chunk, in M
            # sub-blocks; bias added per step instead (hides under the MXU).
            for r0 in range(0, rows, GEMM_ROWS):
                rr = min(GEMM_ROWS, rows - r0)
                xin = in_ref[pl.ds(t0 * B + r0, rr), :].astype(bf16)
                gchunk_ref[pl.ds(r0, rr), :] = jnp.dot(
                    xin, wih_ref[...], preferred_element_type=f32)

            # Serial recurrence through the chunk.
            if t0 == 0:
                # Peel t=0: h == c == 0, so skip the h @ W_hh matmul.
                gates0 = gchunk_ref[pl.ds(0, B), :] + b_ref[...]
                h, c = cell(gates0, c)
                if not is_last:
                    seq_ref[pl.ds(0, B), :] = h
                lo = 1
            else:
                lo = 0

            def step(lt, carry, *, t0=t0, whh=whh_ref, bias=b_ref,
                     write=not is_last):
                hh, cc = carry
                row = pl.multiple_of(lt * B, 8)
                # TODO(synk): re-streams W_hh each step; latch it via
                # pltpu.matmul_push_rhs/acc_lhs/pop for T-fold less traffic.
                gates = (gchunk_ref[pl.ds(row, B), :] + bias[...] +
                         jnp.dot(hh.astype(bf16), whh[...],
                                 preferred_element_type=f32))
                hh, cc = cell(gates, cc)
                if write:
                    grow = pl.multiple_of((t0 + lt) * B, 8)
                    seq_ref[pl.ds(grow, B), :] = hh
                return hh, cc

            h, c = lax.fori_loop(lo, tc, step, (h, c))

    # ---- classifier on the last layer's final hidden state ------------------
    logits = jnp.dot(h.astype(bf16), wfc_ref[...],
                     preferred_element_type=f32) + bfc_ref[...]
    col = lax.broadcasted_iota(jnp.int32, logits.shape, 1)
    logits = jnp.where(col < NUM_CLASSES, logits, -1e30)
    m = jnp.max(logits, axis=1, keepdims=True)
    e = jnp.exp(logits - m)
    out_ref[...] = e / jnp.sum(e, axis=1, keepdims=True)


# ---------------------------------------------------------------------------
# pallas_call wrapper: batch-tile grid, weights VMEM-resident per program
# ---------------------------------------------------------------------------
def fused_lstm_classifier(x_tiles, w, *, b_tile, t_chunk):
    nb, tb, ep = x_tiles.shape

    def full(arr):
        return pl.BlockSpec(arr.shape, lambda i, _n=arr.ndim: (0,) * _n,
                            memory_space=VMEM)

    in_specs = [
        pl.BlockSpec((None, tb, ep), lambda i: (i, 0, 0), memory_space=VMEM),
        full(w["wih0"]), full(w["whh0"]), full(w["b0"]),
        full(w["wih1"]), full(w["whh1"]), full(w["b1"]),
        full(w["wih2"]), full(w["whh2"]), full(w["b2"]),
        full(w["wfc"]), full(w["bfc"]),
    ]
    out_specs = pl.BlockSpec((b_tile, C_PAD), lambda i: (i, 0),
                             memory_space=VMEM)
    return pl.pallas_call(
        _lstm_cls_kernel,
        out_shape=jax.ShapeDtypeStruct((nb * b_tile, C_PAD), jnp.float32),
        grid=(nb,),
        in_specs=in_specs,
        out_specs=out_specs,
        scratch_shapes=[
            pltpu.VMEM((tb, H_PAD), jnp.float32),               # hidden seq
            pltpu.VMEM((t_chunk * b_tile, G_PAD), jnp.float32),  # gate chunk
        ],
        compiler_params=pltpu.CompilerParams(
            dimension_semantics=("parallel",),     # shards across v7x's 2 TCs
            vmem_limit_bytes=48 * 1024 * 1024),
    )(x_tiles, w["wih0"], w["whh0"], w["b0"],
      w["wih1"], w["whh1"], w["b1"],
      w["wih2"], w["whh2"], w["b2"],
      w["wfc"], w["bfc"])


def _round_up(x, m):
    return (x + m - 1) // m * m


# ---------------------------------------------------------------------------
# Forward wrapper
# ---------------------------------------------------------------------------
@jax.jit
def method_rnn_forward(token_ids, prepped):
    """token_ids: (B, T) int32. Returns class probabilities (B, 2)."""
    B, T = token_ids.shape
    # Dropout(p=0.2) is identity in eval mode.
    bp = _round_up(B, 8)
    b_tile = bp if bp <= 128 else 128              # >=128 rows/tile when big
    bp = _round_up(bp, b_tile)
    nb = bp // b_tile
    t_chunk = min(T, 16)                           # bounds gate-scratch VMEM

    ids = token_ids
    if bp != B:
        ids = jnp.pad(ids, ((0, bp - B), (0, 0)))  # pad rows use token 0
    # (nb, T*b_tile): time-major row order inside each batch tile.
    ids_tiles = ids.reshape(nb, b_tile, T).transpose(0, 2, 1).reshape(
        nb, T * b_tile)
    # Gather raw bf16 embeddings (no pre-fused vocab x 4H table).
    x_tiles = jnp.take(prepped["emb"], ids_tiles, axis=0)   # (nb, T*Bt, E_PAD)

    probs = fused_lstm_classifier(x_tiles, prepped, b_tile=b_tile,
                                  t_chunk=t_chunk)
    return probs[:B, :NUM_CLASSES]


# ---------------------------------------------------------------------------
# Parameter preparation (padding / bf16 casting) — done once
# ---------------------------------------------------------------------------
def _pad_gate_cols(w, h, hp):
    """(..., 4h) -> (..., 4hp): zero-pad each of the 4 gate blocks to hp."""
    parts = jnp.split(w, 4, axis=-1)
    pad = [(0, 0)] * (w.ndim - 1) + [(0, hp - h)]
    return jnp.concatenate([jnp.pad(p, pad) for p in parts], axis=-1)


def _pad_rows(w, rows):
    return jnp.pad(w, ((0, rows - w.shape[0]), (0, 0)))


def prepare_params(params):
    """Zero-pad to lane-friendly shapes (results unchanged) and cast MXU
    operands (embedding + weights) to bf16; biases stay f32."""
    H, Hp = NUM_HIDDEN, H_PAD
    bf16 = jnp.bfloat16
    prep = {}

    # Embedding: pad 300 -> 384 lanes, bf16 (halves gather/DMA bytes).
    prep["emb"] = jnp.pad(
        params["embedding"], ((0, 0), (0, E_PAD - EMBED_DIM))).astype(bf16)

    prep["wih0"] = _pad_rows(
        _pad_gate_cols(params["w_ih_0"], H, Hp), E_PAD).astype(bf16)
    prep["whh0"] = _pad_rows(
        _pad_gate_cols(params["w_hh_0"], H, Hp), Hp).astype(bf16)
    prep["b0"] = _pad_gate_cols(params["b_0"], H, Hp)
    for l in (1, 2):
        prep[f"wih{l}"] = _pad_rows(
            _pad_gate_cols(params[f"w_ih_{l}"], H, Hp), Hp).astype(bf16)
        prep[f"whh{l}"] = _pad_rows(
            _pad_gate_cols(params[f"w_hh_{l}"], H, Hp), Hp).astype(bf16)
        prep[f"b{l}"] = _pad_gate_cols(params[f"b_{l}"], H, Hp)

    wfc = jnp.pad(params["w_fc"], ((0, 0), (0, C_PAD - NUM_CLASSES)))
    prep["wfc"] = _pad_rows(wfc, Hp).astype(bf16)
    prep["bfc"] = jnp.pad(params["b_fc"], ((0, 0), (0, C_PAD - NUM_CLASSES)))
    return prep


# ---------------------------------------------------------------------------
# Deterministic parameter init (matches the module's declared shapes)
# ---------------------------------------------------------------------------
def init_params(key, vocab_size):
    keys = jax.random.split(key, 3 * NUM_LAYERS + 3)
    k_iter = iter(keys)
    params = {}

    # nn.Embedding(vocab_size, 300, padding_idx=0): N(0,1), row 0 zeroed.
    emb = jax.random.normal(next(k_iter), (vocab_size, EMBED_DIM), jnp.float32)
    params["embedding"] = emb.at[0].set(0.0)

    # nn.LSTM(300, 200, num_layers=3): uniform(-1/sqrt(H), 1/sqrt(H)).
    bound = 1.0 / jnp.sqrt(jnp.float32(NUM_HIDDEN))
    for layer in range(NUM_LAYERS):
        in_dim = EMBED_DIM if layer == 0 else NUM_HIDDEN
        params[f"w_ih_{layer}"] = jax.random.uniform(
            next(k_iter), (in_dim, 4 * NUM_HIDDEN), jnp.float32, -bound, bound)
        params[f"w_hh_{layer}"] = jax.random.uniform(
            next(k_iter), (NUM_HIDDEN, 4 * NUM_HIDDEN), jnp.float32, -bound, bound)
        params[f"b_{layer}"] = jax.random.uniform(
            next(k_iter), (1, 4 * NUM_HIDDEN), jnp.float32, -bound, bound)

    # nn.Linear(200, 2)
    fc_bound = 1.0 / jnp.sqrt(jnp.float32(NUM_HIDDEN))
    params["w_fc"] = jax.random.uniform(
        next(k_iter), (NUM_HIDDEN, NUM_CLASSES), jnp.float32, -fc_bound, fc_bound)
    params["b_fc"] = jax.random.uniform(
        next(k_iter), (1, NUM_CLASSES), jnp.float32, -fc_bound, fc_bound)
    return params


# ---------------------------------------------------------------------------
# Pure-JAX f32 reference (PyTorch eval-mode semantics) for validation
# ---------------------------------------------------------------------------
def reference_forward(token_ids, params):
    emb = jnp.take(params["embedding"], token_ids, axis=0)   # (B, T, 300)
    x = jnp.transpose(emb, (1, 0, 2))                        # (T, B, 300)
    H = NUM_HIDDEN
    for l in range(NUM_LAYERS):
        w_ih, w_hh, b = params[f"w_ih_{l}"], params[f"w_hh_{l}"], params[f"b_{l}"]
        T, B, _ = x.shape
        h = jnp.zeros((B, H), jnp.float32)
        c = jnp.zeros((B, H), jnp.float32)
        outs = []
        for t in range(T):
            gates = x[t] @ w_ih + h @ w_hh + b
            i = jax.nn.sigmoid(gates[:, 0:H])
            f = jax.nn.sigmoid(gates[:, H:2 * H])
            g = jnp.tanh(gates[:, 2 * H:3 * H])
            o = jax.nn.sigmoid(gates[:, 3 * H:4 * H])
            c = f * c + i * g
            h = o * jnp.tanh(c)
            outs.append(h)
        x = jnp.stack(outs, axis=0)
    logits = x[-1] @ params["w_fc"] + params["b_fc"]
    return jax.nn.softmax(logits, axis=1)


# ---------------------------------------------------------------------------
if __name__ == "__main__":
    key = jax.random.PRNGKey(0)
    k_param, k_tok = jax.random.split(key)

    vocab_size = 50
    batch = 8
    seq_len = 8

    params = init_params(k_param, vocab_size)
    prepped = prepare_params(params)
    token_ids = jax.random.randint(k_tok, (batch, seq_len), 0, vocab_size,
                                   jnp.int32)

    probs = method_rnn_forward(token_ids, prepped)
    probs = jax.block_until_ready(probs)

    assert probs.shape == (batch, NUM_CLASSES)
    # softmax rows sum to 1 (exact divide)
    assert bool(jnp.all(jnp.abs(jnp.sum(probs, axis=1) - 1.0) < 1e-3))
    # matches the f32 reference forward (loose tol: bf16 MXU operands)
    ref = reference_forward(token_ids, params)
    assert bool(jnp.max(jnp.abs(probs - ref)) < 5e-2)

    print("KERNEL_OK")
</pallas_src>

<mosaic_0001>
module attributes {stable_mosaic.version = 11 : i64} {
  func.func @_lstm_cls_kernel(%arg0: i32, %arg1: memref<1x64x384xbf16, #tpu.memory_space<vmem>>, %arg2: memref<384x1024xbf16, #tpu.memory_space<vmem>>, %arg3: memref<256x1024xbf16, #tpu.memory_space<vmem>>, %arg4: memref<1x1024xf32, #tpu.memory_space<vmem>>, %arg5: memref<256x1024xbf16, #tpu.memory_space<vmem>>, %arg6: memref<256x1024xbf16, #tpu.memory_space<vmem>>, %arg7: memref<1x1024xf32, #tpu.memory_space<vmem>>, %arg8: memref<256x1024xbf16, #tpu.memory_space<vmem>>, %arg9: memref<256x1024xbf16, #tpu.memory_space<vmem>>, %arg10: memref<1x1024xf32, #tpu.memory_space<vmem>>, %arg11: memref<256x128xbf16, #tpu.memory_space<vmem>>, %arg12: memref<1x128xf32, #tpu.memory_space<vmem>>, %arg13: memref<8x128xf32, #tpu.memory_space<vmem>>, %arg14: memref<64x256xf32, #tpu.memory_space<vmem>>, %arg15: memref<64x1024xf32, #tpu.memory_space<vmem>>) attributes {dimension_semantics = [#tpu.dimension_semantics<parallel>], iteration_bounds = array<i64: 1>, scalar_prefetch = 0 : i64, scratch_operands = 2 : i64, tpu.core_type = #tpu.core_type<tc>, window_params = [{transform_indices = @transform_0, window_bounds = array<i64: 1, 64, 384>}, {pipeline_mode = #tpu.pipeline_mode<synchronous>, transform_indices = @transform_1, window_bounds = array<i64: 384, 1024>}, {pipeline_mode = #tpu.pipeline_mode<synchronous>, transform_indices = @transform_2, window_bounds = array<i64: 256, 1024>}, {pipeline_mode = #tpu.pipeline_mode<synchronous>, transform_indices = @transform_3, window_bounds = array<i64: 1, 1024>}, {pipeline_mode = #tpu.pipeline_mode<synchronous>, transform_indices = @transform_4, window_bounds = array<i64: 256, 1024>}, {pipeline_mode = #tpu.pipeline_mode<synchronous>, transform_indices = @transform_5, window_bounds = array<i64: 256, 1024>}, {pipeline_mode = #tpu.pipeline_mode<synchronous>, transform_indices = @transform_6, window_bounds = array<i64: 1, 1024>}, {pipeline_mode = #tpu.pipeline_mode<synchronous>, transform_indices = @transform_7, window_bounds = array<i64: 256, 1024>}, {pipeline_mode = #tpu.pipeline_mode<synchronous>, transform_indices = @transform_8, window_bounds = array<i64: 256, 1024>}, {pipeline_mode = #tpu.pipeline_mode<synchronous>, transform_indices = @transform_9, window_bounds = array<i64: 1, 1024>}, {pipeline_mode = #tpu.pipeline_mode<synchronous>, transform_indices = @transform_10, window_bounds = array<i64: 256, 128>}, {pipeline_mode = #tpu.pipeline_mode<synchronous>, transform_indices = @transform_11, window_bounds = array<i64: 1, 128>}, {transform_indices = @transform_12, window_bounds = array<i64: 8, 128>}]} {
    %cst = arith.constant 0.000000e+00 : f32
    %0 = vector.broadcast %cst : f32 to vector<8x256xf32>
    %c0 = arith.constant 0 : index
    %c0_0 = arith.constant 0 : index
    %c0_1 = arith.constant 0 : index
    %1 = vector.load %arg1[%c0, %c0_0, %c0_1] : memref<1x64x384xbf16, #tpu.memory_space<vmem>>, vector<1x32x384xbf16>
    %2 = vector.shape_cast %1 : vector<1x32x384xbf16> to vector<32x384xbf16>
    %c0_2 = arith.constant 0 : index
    %c0_3 = arith.constant 0 : index
    %3 = vector.load %arg2[%c0_2, %c0_3] : memref<384x1024xbf16, #tpu.memory_space<vmem>>, vector<384x1024xbf16>
    %cst_4 = arith.constant dense<0.000000e+00> : vector<32x1024xf32>
    %4 = tpu.matmul %2, %3, %cst_4 {dimension_numbers = #tpu.dot_dimension_numbers<[1], [0], [0], [1], [0, 0, 1, 1], [], []>} : vector<32x384xbf16>, vector<384x1024xbf16>, vector<32x1024xf32> -> vector<32x1024xf32>
    %c0_5 = arith.constant 0 : index
    %c0_6 = arith.constant 0 : index
    %5 = vector.load %arg15[%c0_5, %c0_6] : memref<64x1024xf32, #tpu.memory_space<vmem>>, vector<32x1024xf32>
    tpu.vector_store %arg15[%c0_5, %c0_6], %4 {strides = array<i32>} : memref<64x1024xf32, #tpu.memory_space<vmem>>, vector<32x1024xf32>,
    %c0_7 = arith.constant 0 : index
    %c32 = arith.constant 32 : index
    %c0_8 = arith.constant 0 : index
    %6 = vector.load %arg1[%c0_7, %c32, %c0_8] : memref<1x64x384xbf16, #tpu.memory_space<vmem>>, vector<1x32x384xbf16>
    %7 = vector.shape_cast %6 : vector<1x32x384xbf16> to vector<32x384xbf16>
    %c0_9 = arith.constant 0 : index
    %c0_10 = arith.constant 0 : index
    %8 = vector.load %arg2[%c0_9, %c0_10] : memref<384x1024xbf16, #tpu.memory_space<vmem>>, vector<384x1024xbf16>
    %cst_11 = arith.constant dense<0.000000e+00> : vector<32x1024xf32>
    %9 = tpu.matmul %7, %8, %cst_11 {dimension_numbers = #tpu.dot_dimension_numbers<[1], [0], [0], [1], [0, 0, 1, 1], [], []>} : vector<32x384xbf16>, vector<384x1024xbf16>, vector<32x1024xf32> -> vector<32x1024xf32>
    %c32_12 = arith.constant 32 : index
    %c0_13 = arith.constant 0 : index
    %10 = vector.load %arg15[%c32_12, %c0_13] : memref<64x1024xf32, #tpu.memory_space<vmem>>, vector<32x1024xf32>
    tpu.vector_store %arg15[%c32_12, %c0_13], %9 {strides = array<i32>} : memref<64x1024xf32, #tpu.memory_space<vmem>>, vector<32x1024xf32>,
    %c0_14 = arith.constant 0 : index
    %c0_15 = arith.constant 0 : index
    %11 = vector.load %arg15[%c0_14, %c0_15] : memref<64x1024xf32, #tpu.memory_space<vmem>>, vector<8x1024xf32>
    %c0_16 = arith.constant 0 : index
    %c0_17 = arith.constant 0 : index
    %12 = vector.load %arg4[%c0_16, %c0_17] : memref<1x1024xf32, #tpu.memory_space<vmem>>, vector<1x1024xf32>
    %13 = vector.broadcast %12 : vector<1x1024xf32> to vector<8x1024xf32>
    %14 = arith.addf %11, %13 : vector<8x1024xf32>
    %15 = vector.extract_strided_slice %14 {offsets = [0, 0], sizes = [8, 256], strides = [1, 1]} : vector<8x1024xf32> to vector<8x256xf32>
    %16 = arith.negf %15 : vector<8x256xf32>
    %17 = math.exp %16 : vector<8x256xf32>
    %cst_18 = arith.constant 1.000000e+00 : f32
    %18 = vector.broadcast %cst_18 : f32 to vector<8x256xf32>
    %19 = arith.addf %18, %17 : vector<8x256xf32>
    %20 = arith.divf %18, %19 : vector<8x256xf32>
    %21 = vector.extract_strided_slice %14 {offsets = [0, 256], sizes = [8, 256], strides = [1, 1]} : vector<8x1024xf32> to vector<8x256xf32>
    %22 = arith.negf %21 : vector<8x256xf32>
    %23 = math.exp %22 : vector<8x256xf32>
    %cst_19 = arith.constant 1.000000e+00 : f32
    %24 = vector.broadcast %cst_19 : f32 to vector<8x256xf32>
    %25 = arith.addf %24, %23 : vector<8x256xf32>
    %26 = arith.divf %24, %25 : vector<8x256xf32>
    %27 = vector.extract_strided_slice %14 {offsets = [0, 512], sizes = [8, 256], strides = [1, 1]} : vector<8x1024xf32> to vector<8x256xf32>
    %28 = math.tanh %27 : vector<8x256xf32>
    %29 = vector.extract_strided_slice %14 {offsets = [0, 768], sizes = [8, 256], strides = [1, 1]} : vector<8x1024xf32> to vector<8x256xf32>
    %30 = arith.negf %29 : vector<8x256xf32>
    %31 = math.exp %30 : vector<8x256xf32>
    %cst_20 = arith.constant 1.000000e+00 : f32
    %32 = vector.broadcast %cst_20 : f32 to vector<8x256xf32>
    %33 = arith.addf %32, %31 : vector<8x256xf32>
    %34 = arith.divf %32, %33 : vector<8x256xf32>
    %35 = arith.mulf %26, %0 : vector<8x256xf32>
    %36 = arith.mulf %20, %28 : vector<8x256xf32>
    %37 = arith.addf %35, %36 : vector<8x256xf32>
    %38 = math.tanh %37 : vector<8x256xf32>
    %39 = arith.mulf %34, %38 : vector<8x256xf32>
    %c0_21 = arith.constant 0 : index
    %c0_22 = arith.constant 0 : index
    %40 = vector.load %arg14[%c0_21, %c0_22] : memref<64x256xf32, #tpu.memory_space<vmem>>, vector<8x256xf32>
    tpu.vector_store %arg14[%c0_21, %c0_22], %39 {strides = array<i32>} : memref<64x256xf32, #tpu.memory_space<vmem>>, vector<8x256xf32>,
    %c1_i32 = arith.constant 1 : i32
    %c7_i32 = arith.constant 7 : i32
    %41 = arith.addi %c1_i32, %c7_i32 : i32
    %c1_i32_23 = arith.constant 1 : i32
    %42:2 = scf.for %arg16 = %c1_i32 to %41 step %c1_i32_23 iter_args(%arg17 = %39, %arg18 = %37) -> (vector<8x256xf32>, vector<8x256xf32>)  : i32 {
      %c8_i32 = arith.constant 8 : i32
      %149 = arith.muli %arg16, %c8_i32 : i32
      %150 = tpu.assume_multiple %149, 8 : i32
      %151 = arith.index_cast %150 : i32 to index
      %c0_89 = arith.constant 0 : index
      %152 = vector.load %arg15[%151, %c0_89] : memref<64x1024xf32, #tpu.memory_space<vmem>>, vector<8x1024xf32>
      %c0_90 = arith.constant 0 : index
      %c0_91 = arith.constant 0 : index
      %153 = vector.load %arg4[%c0_90, %c0_91] : memref<1x1024xf32, #tpu.memory_space<vmem>>, vector<1x1024xf32>
      %154 = vector.broadcast %153 : vector<1x1024xf32> to vector<8x1024xf32>
      %155 = arith.addf %152, %154 : vector<8x1024xf32>
      %156 = arith.truncf %arg17 : vector<8x256xf32> to vector<8x256xbf16>
      %c0_92 = arith.constant 0 : index
      %c0_93 = arith.constant 0 : index
      %157 = vector.load %arg3[%c0_92, %c0_93] : memref<256x1024xbf16, #tpu.memory_space<vmem>>, vector<256x1024xbf16>
      %cst_94 = arith.constant dense<0.000000e+00> : vector<8x1024xf32>
      %158 = tpu.matmul %156, %157, %cst_94 {dimension_numbers = #tpu.dot_dimension_numbers<[1], [0], [0], [1], [0, 0, 1, 1], [], []>} : vector<8x256xbf16>, vector<256x1024xbf16>, vector<8x1024xf32> -> vector<8x1024xf32>
      %159 = arith.addf %155, %158 : vector<8x1024xf32>
      %160 = vector.extract_strided_slice %159 {offsets = [0, 0], sizes = [8, 256], strides = [1, 1]} : vector<8x1024xf32> to vector<8x256xf32>
      %161 = arith.negf %160 : vector<8x256xf32>
      %162 = math.exp %161 : vector<8x256xf32>
      %cst_95 = arith.constant 1.000000e+00 : f32
      %163 = vector.broadcast %cst_95 : f32 to vector<8x256xf32>
      %164 = arith.addf %163, %162 : vector<8x256xf32>
      %165 = arith.divf %163, %164 : vector<8x256xf32>
      %166 = vector.extract_strided_slice %159 {offsets = [0, 256], sizes = [8, 256], strides = [1, 1]} : vector<8x1024xf32> to vector<8x256xf32>
      %167 = arith.negf %166 : vector<8x256xf32>
      %168 = math.exp %167 : vector<8x256xf32>
      %cst_96 = arith.constant 1.000000e+00 : f32
      %169 = vector.broadcast %cst_96 : f32 to vector<8x256xf32>
      %170 = arith.addf %169, %168 : vector<8x256xf32>
      %171 = arith.divf %169, %170 : vector<8x256xf32>
      %172 = vector.extract_strided_slice %159 {offsets = [0, 512], sizes = [8, 256], strides = [1, 1]} : vector<8x1024xf32> to vector<8x256xf32>
      %173 = math.tanh %172 : vector<8x256xf32>
      %174 = vector.extract_strided_slice %159 {offsets = [0, 768], sizes = [8, 256], strides = [1, 1]} : vector<8x1024xf32> to vector<8x256xf32>
      %175 = arith.negf %174 : vector<8x256xf32>
      %176 = math.exp %175 : vector<8x256xf32>
      %cst_97 = arith.constant 1.000000e+00 : f32
      %177 = vector.broadcast %cst_97 : f32 to vector<8x256xf32>
      %178 = arith.addf %177, %176 : vector<8x256xf32>
      %179 = arith.divf %177, %178 : vector<8x256xf32>
      %180 = arith.mulf %171, %arg18 : vector<8x256xf32>
      %181 = arith.mulf %165, %173 : vector<8x256xf32>
      %182 = arith.addf %180, %181 : vector<8x256xf32>
      %183 = math.tanh %182 : vector<8x256xf32>
      %184 = arith.mulf %179, %183 : vector<8x256xf32>
      %c0_i32 = arith.constant 0 : i32
      %185 = arith.addi %c0_i32, %arg16 : i32
      %c8_i32_98 = arith.constant 8 : i32
      %186 = arith.muli %185, %c8_i32_98 : i32
      %187 = tpu.assume_multiple %186, 8 : i32
      %188 = arith.index_cast %187 : i32 to index
      %c0_99 = arith.constant 0 : index
      %189 = vector.load %arg14[%188, %c0_99] : memref<64x256xf32, #tpu.memory_space<vmem>>, vector<8x256xf32>
      tpu.vector_store %arg14[%188, %c0_99], %184 {strides = array<i32>} : memref<64x256xf32, #tpu.memory_space<vmem>>, vector<8x256xf32>,
      scf.yield %184, %182 : vector<8x256xf32>, vector<8x256xf32>
    }
    %c7_i32_24 = arith.constant 7 : i32
    %cst_25 = arith.constant 0.000000e+00 : f32
    %43 = vector.broadcast %cst_25 : f32 to vector<8x256xf32>
    %c0_26 = arith.constant 0 : index
    %c0_27 = arith.constant 0 : index
    %44 = vector.load %arg14[%c0_26, %c0_27] : memref<64x256xf32, #tpu.memory_space<vmem>>, vector<32x256xf32>
    %45 = arith.truncf %44 : vector<32x256xf32> to vector<32x256xbf16>
    %c0_28 = arith.constant 0 : index
    %c0_29 = arith.constant 0 : index
    %46 = vector.load %arg5[%c0_28, %c0_29] : memref<256x1024xbf16, #tpu.memory_space<vmem>>, vector<256x1024xbf16>
    %cst_30 = arith.constant dense<0.000000e+00> : vector<32x1024xf32>
    %47 = tpu.matmul %45, %46, %cst_30 {dimension_numbers = #tpu.dot_dimension_numbers<[1], [0], [0], [1], [0, 0, 1, 1], [], []>} : vector<32x256xbf16>, vector<256x1024xbf16>, vector<32x1024xf32> -> vector<32x1024xf32>
    %c0_31 = arith.constant 0 : index
    %c0_32 = arith.constant 0 : index
    %48 = vector.load %arg15[%c0_31, %c0_32] : memref<64x1024xf32, #tpu.memory_space<vmem>>, vector<32x1024xf32>
    tpu.vector_store %arg15[%c0_31, %c0_32], %47 {strides = array<i32>} : memref<64x1024xf32, #tpu.memory_space<vmem>>, vector<32x1024xf32>,
    %c32_33 = arith.constant 32 : index
    %c0_34 = arith.constant 0 : index
    %49 = vector.load %arg14[%c32_33, %c0_34] : memref<64x256xf32, #tpu.memory_space<vmem>>, vector<32x256xf32>
    %50 = arith.truncf %49 : vector<32x256xf32> to vector<32x256xbf16>
    %c0_35 = arith.constant 0 : index
    %c0_36 = arith.constant 0 : index
    %51 = vector.load %arg5[%c0_35, %c0_36] : memref<256x1024xbf16, #tpu.memory_space<vmem>>, vector<256x1024xbf16>
    %cst_37 = arith.constant dense<0.000000e+00> : vector<32x1024xf32>
    %52 = tpu.matmul %50, %51, %cst_37 {dimension_numbers = #tpu.dot_dimension_numbers<[1], [0], [0], [1], [0, 0, 1, 1], [], []>} : vector<32x256xbf16>, vector<256x1024xbf16>, vector<32x1024xf32> -> vector<32x1024xf32>
    %c32_38 = arith.constant 32 : index
    %c0_39 = arith.constant 0 : index
    %53 = vector.load %arg15[%c32_38, %c0_39] : memref<64x1024xf32, #tpu.memory_space<vmem>>, vector<32x1024xf32>
    tpu.vector_store %arg15[%c32_38, %c0_39], %52 {strides = array<i32>} : memref<64x1024xf32, #tpu.memory_space<vmem>>, vector<32x1024xf32>,
    %c0_40 = arith.constant 0 : index
    %c0_41 = arith.constant 0 : index
    %54 = vector.load %arg15[%c0_40, %c0_41] : memref<64x1024xf32, #tpu.memory_space<vmem>>, vector<8x1024xf32>
    %c0_42 = arith.constant 0 : index
    %c0_43 = arith.constant 0 : index
    %55 = vector.load %arg7[%c0_42, %c0_43] : memref<1x1024xf32, #tpu.memory_space<vmem>>, vector<1x1024xf32>
    %56 = vector.broadcast %55 : vector<1x1024xf32> to vector<8x1024xf32>
    %57 = arith.addf %54, %56 : vector<8x1024xf32>
    %58 = vector.extract_strided_slice %57 {offsets = [0, 0], sizes = [8, 256], strides = [1, 1]} : vector<8x1024xf32> to vector<8x256xf32>
    %59 = arith.negf %58 : vector<8x256xf32>
    %60 = math.exp %59 : vector<8x256xf32>
    %cst_44 = arith.constant 1.000000e+00 : f32
    %61 = vector.broadcast %cst_44 : f32 to vector<8x256xf32>
    %62 = arith.addf %61, %60 : vector<8x256xf32>
    %63 = arith.divf %61, %62 : vector<8x256xf32>
    %64 = vector.extract_strided_slice %57 {offsets = [0, 256], sizes = [8, 256], strides = [1, 1]} : vector<8x1024xf32> to vector<8x256xf32>
    %65 = arith.negf %64 : vector<8x256xf32>
    %66 = math.exp %65 : vector<8x256xf32>
    %cst_45 = arith.constant 1.000000e+00 : f32
    %67 = vector.broadcast %cst_45 : f32 to vector<8x256xf32>
    %68 = arith.addf %67, %66 : vector<8x256xf32>
    %69 = arith.divf %67, %68 : vector<8x256xf32>
    %70 = vector.extract_strided_slice %57 {offsets = [0, 512], sizes = [8, 256], strides = [1, 1]} : vector<8x1024xf32> to vector<8x256xf32>
    %71 = math.tanh %70 : vector<8x256xf32>
    %72 = vector.extract_strided_slice %57 {offsets = [0, 768], sizes = [8, 256], strides = [1, 1]} : vector<8x1024xf32> to vector<8x256xf32>
    %73 = arith.negf %72 : vector<8x256xf32>
    %74 = math.exp %73 : vector<8x256xf32>
    %cst_46 = arith.constant 1.000000e+00 : f32
    %75 = vector.broadcast %cst_46 : f32 to vector<8x256xf32>
    %76 = arith.addf %75, %74 : vector<8x256xf32>
    %77 = arith.divf %75, %76 : vector<8x256xf32>
    %78 = arith.mulf %69, %43 : vector<8x256xf32>
    %79 = arith.mulf %63, %71 : vector<8x256xf32>
    %80 = arith.addf %78, %79 : vector<8x256xf32>
    %81 = math.tanh %80 : vector<8x256xf32>
    %82 = arith.mulf %77, %81 : vector<8x256xf32>
    %c0_47 = arith.constant 0 : index
    %c0_48 = arith.constant 0 : index
    %83 = vector.load %arg14[%c0_47, %c0_48] : memref<64x256xf32, #tpu.memory_space<vmem>>, vector<8x256xf32>
    tpu.vector_store %arg14[%c0_47, %c0_48], %82 {strides = array<i32>} : memref<64x256xf32, #tpu.memory_space<vmem>>, vector<8x256xf32>,
    %c1_i32_49 = arith.constant 1 : i32
    %c7_i32_50 = arith.constant 7 : i32
    %84 = arith.addi %c1_i32_49, %c7_i32_50 : i32
    %c1_i32_51 = arith.constant 1 : i32
    %85:2 = scf.for %arg16 = %c1_i32_49 to %84 step %c1_i32_51 iter_args(%arg17 = %82, %arg18 = %80) -> (vector<8x256xf32>, vector<8x256xf32>)  : i32 {
      %c8_i32 = arith.constant 8 : i32
      %149 = arith.muli %arg16, %c8_i32 : i32
      %150 = tpu.assume_multiple %149, 8 : i32
      %151 = arith.index_cast %150 : i32 to index
      %c0_89 = arith.constant 0 : index
      %152 = vector.load %arg15[%151, %c0_89] : memref<64x1024xf32, #tpu.memory_space<vmem>>, vector<8x1024xf32>
      %c0_90 = arith.constant 0 : index
      %c0_91 = arith.constant 0 : index
      %153 = vector.load %arg7[%c0_90, %c0_91] : memref<1x1024xf32, #tpu.memory_space<vmem>>, vector<1x1024xf32>
      %154 = vector.broadcast %153 : vector<1x1024xf32> to vector<8x1024xf32>
      %155 = arith.addf %152, %154 : vector<8x1024xf32>
      %156 = arith.truncf %arg17 : vector<8x256xf32> to vector<8x256xbf16>
      %c0_92 = arith.constant 0 : index
      %c0_93 = arith.constant 0 : index
      %157 = vector.load %arg6[%c0_92, %c0_93] : memref<256x1024xbf16, #tpu.memory_space<vmem>>, vector<256x1024xbf16>
      %cst_94 = arith.constant dense<0.000000e+00> : vector<8x1024xf32>
      %158 = tpu.matmul %156, %157, %cst_94 {dimension_numbers = #tpu.dot_dimension_numbers<[1], [0], [0], [1], [0, 0, 1, 1], [], []>} : vector<8x256xbf16>, vector<256x1024xbf16>, vector<8x1024xf32> -> vector<8x1024xf32>
      %159 = arith.addf %155, %158 : vector<8x1024xf32>
      %160 = vector.extract_strided_slice %159 {offsets = [0, 0], sizes = [8, 256], strides = [1, 1]} : vector<8x1024xf32> to vector<8x256xf32>
      %161 = arith.negf %160 : vector<8x256xf32>
      %162 = math.exp %161 : vector<8x256xf32>
      %cst_95 = arith.constant 1.000000e+00 : f32
      %163 = vector.broadcast %cst_95 : f32 to vector<8x256xf32>
      %164 = arith.addf %163, %162 : vector<8x256xf32>
      %165 = arith.divf %163, %164 : vector<8x256xf32>
      %166 = vector.extract_strided_slice %159 {offsets = [0, 256], sizes = [8, 256], strides = [1, 1]} : vector<8x1024xf32> to vector<8x256xf32>
      %167 = arith.negf %166 : vector<8x256xf32>
      %168 = math.exp %167 : vector<8x256xf32>
      %cst_96 = arith.constant 1.000000e+00 : f32
      %169 = vector.broadcast %cst_96 : f32 to vector<8x256xf32>
      %170 = arith.addf %169, %168 : vector<8x256xf32>
      %171 = arith.divf %169, %170 : vector<8x256xf32>
      %172 = vector.extract_strided_slice %159 {offsets = [0, 512], sizes = [8, 256], strides = [1, 1]} : vector<8x1024xf32> to vector<8x256xf32>
      %173 = math.tanh %172 : vector<8x256xf32>
      %174 = vector.extract_strided_slice %159 {offsets = [0, 768], sizes = [8, 256], strides = [1, 1]} : vector<8x1024xf32> to vector<8x256xf32>
      %175 = arith.negf %174 : vector<8x256xf32>
      %176 = math.exp %175 : vector<8x256xf32>
      %cst_97 = arith.constant 1.000000e+00 : f32
      %177 = vector.broadcast %cst_97 : f32 to vector<8x256xf32>
      %178 = arith.addf %177, %176 : vector<8x256xf32>
      %179 = arith.divf %177, %178 : vector<8x256xf32>
      %180 = arith.mulf %171, %arg18 : vector<8x256xf32>
      %181 = arith.mulf %165, %173 : vector<8x256xf32>
      %182 = arith.addf %180, %181 : vector<8x256xf32>
      %183 = math.tanh %182 : vector<8x256xf32>
      %184 = arith.mulf %179, %183 : vector<8x256xf32>
      %c0_i32 = arith.constant 0 : i32
      %185 = arith.addi %c0_i32, %arg16 : i32
      %c8_i32_98 = arith.constant 8 : i32
      %186 = arith.muli %185, %c8_i32_98 : i32
      %187 = tpu.assume_multiple %186, 8 : i32
      %188 = arith.index_cast %187 : i32 to index
      %c0_99 = arith.constant 0 : index
      %189 = vector.load %arg14[%188, %c0_99] : memref<64x256xf32, #tpu.memory_space<vmem>>, vector<8x256xf32>
      tpu.vector_store %arg14[%188, %c0_99], %184 {strides = array<i32>} : memref<64x256xf32, #tpu.memory_space<vmem>>, vector<8x256xf32>,
      scf.yield %184, %182 : vector<8x256xf32>, vector<8x256xf32>
    }
    %c7_i32_52 = arith.constant 7 : i32
    %cst_53 = arith.constant 0.000000e+00 : f32
    %86 = vector.broadcast %cst_53 : f32 to vector<8x256xf32>
    %c0_54 = arith.constant 0 : index
    %c0_55 = arith.constant 0 : index
    %87 = vector.load %arg14[%c0_54, %c0_55] : memref<64x256xf32, #tpu.memory_space<vmem>>, vector<32x256xf32>
    %88 = arith.truncf %87 : vector<32x256xf32> to vector<32x256xbf16>
    %c0_56 = arith.constant 0 : index
    %c0_57 = arith.constant 0 : index
    %89 = vector.load %arg8[%c0_56, %c0_57] : memref<256x1024xbf16, #tpu.memory_space<vmem>>, vector<256x1024xbf16>
    %cst_58 = arith.constant dense<0.000000e+00> : vector<32x1024xf32>
    %90 = tpu.matmul %88, %89, %cst_58 {dimension_numbers = #tpu.dot_dimension_numbers<[1], [0], [0], [1], [0, 0, 1, 1], [], []>} : vector<32x256xbf16>, vector<256x1024xbf16>, vector<32x1024xf32> -> vector<32x1024xf32>
    %c0_59 = arith.constant 0 : index
    %c0_60 = arith.constant 0 : index
    %91 = vector.load %arg15[%c0_59, %c0_60] : memref<64x1024xf32, #tpu.memory_space<vmem>>, vector<32x1024xf32>
    tpu.vector_store %arg15[%c0_59, %c0_60], %90 {strides = array<i32>} : memref<64x1024xf32, #tpu.memory_space<vmem>>, vector<32x1024xf32>,
    %c32_61 = arith.constant 32 : index
    %c0_62 = arith.constant 0 : index
    %92 = vector.load %arg14[%c32_61, %c0_62] : memref<64x256xf32, #tpu.memory_space<vmem>>, vector<32x256xf32>
    %93 = arith.truncf %92 : vector<32x256xf32> to vector<32x256xbf16>
    %c0_63 = arith.constant 0 : index
    %c0_64 = arith.constant 0 : index
    %94 = vector.load %arg8[%c0_63, %c0_64] : memref<256x1024xbf16, #tpu.memory_space<vmem>>, vector<256x1024xbf16>
    %cst_65 = arith.constant dense<0.000000e+00> : vector<32x1024xf32>
    %95 = tpu.matmul %93, %94, %cst_65 {dimension_numbers = #tpu.dot_dimension_numbers<[1], [0], [0], [1], [0, 0, 1, 1], [], []>} : vector<32x256xbf16>, vector<256x1024xbf16>, vector<32x1024xf32> -> vector<32x1024xf32>
    %c32_66 = arith.constant 32 : index
    %c0_67 = arith.constant 0 : index
    %96 = vector.load %arg15[%c32_66, %c0_67] : memref<64x1024xf32, #tpu.memory_space<vmem>>, vector<32x1024xf32>
    tpu.vector_store %arg15[%c32_66, %c0_67], %95 {strides = array<i32>} : memref<64x1024xf32, #tpu.memory_space<vmem>>, vector<32x1024xf32>,
    %c0_68 = arith.constant 0 : index
    %c0_69 = arith.constant 0 : index
    %97 = vector.load %arg15[%c0_68, %c0_69] : memref<64x1024xf32, #tpu.memory_space<vmem>>, vector<8x1024xf32>
    %c0_70 = arith.constant 0 : index
    %c0_71 = arith.constant 0 : index
    %98 = vector.load %arg10[%c0_70, %c0_71] : memref<1x1024xf32, #tpu.memory_space<vmem>>, vector<1x1024xf32>
    %99 = vector.broadcast %98 : vector<1x1024xf32> to vector<8x1024xf32>
    %100 = arith.addf %97, %99 : vector<8x1024xf32>
    %101 = vector.extract_strided_slice %100 {offsets = [0, 0], sizes = [8, 256], strides = [1, 1]} : vector<8x1024xf32> to vector<8x256xf32>
    %102 = arith.negf %101 : vector<8x256xf32>
    %103 = math.exp %102 : vector<8x256xf32>
    %cst_72 = arith.constant 1.000000e+00 : f32
    %104 = vector.broadcast %cst_72 : f32 to vector<8x256xf32>
    %105 = arith.addf %104, %103 : vector<8x256xf32>
    %106 = arith.divf %104, %105 : vector<8x256xf32>
    %107 = vector.extract_strided_slice %100 {offsets = [0, 256], sizes = [8, 256], strides = [1, 1]} : vector<8x1024xf32> to vector<8x256xf32>
    %108 = arith.negf %107 : vector<8x256xf32>
    %109 = math.exp %108 : vector<8x256xf32>
    %cst_73 = arith.constant 1.000000e+00 : f32
    %110 = vector.broadcast %cst_73 : f32 to vector<8x256xf32>
    %111 = arith.addf %110, %109 : vector<8x256xf32>
    %112 = arith.divf %110, %111 : vector<8x256xf32>
    %113 = vector.extract_strided_slice %100 {offsets = [0, 512], sizes = [8, 256], strides = [1, 1]} : vector<8x1024xf32> to vector<8x256xf32>
    %114 = math.tanh %113 : vector<8x256xf32>
    %115 = vector.extract_strided_slice %100 {offsets = [0, 768], sizes = [8, 256], strides = [1, 1]} : vector<8x1024xf32> to vector<8x256xf32>
    %116 = arith.negf %115 : vector<8x256xf32>
    %117 = math.exp %116 : vector<8x256xf32>
    %cst_74 = arith.constant 1.000000e+00 : f32
    %118 = vector.broadcast %cst_74 : f32 to vector<8x256xf32>
    %119 = arith.addf %118, %117 : vector<8x256xf32>
    %120 = arith.divf %118, %119 : vector<8x256xf32>
    %121 = arith.mulf %112, %86 : vector<8x256xf32>
    %122 = arith.mulf %106, %114 : vector<8x256xf32>
    %123 = arith.addf %121, %122 : vector<8x256xf32>
    %124 = math.tanh %123 : vector<8x256xf32>
    %125 = arith.mulf %120, %124 : vector<8x256xf32>
    %c1_i32_75 = arith.constant 1 : i32
    %c7_i32_76 = arith.constant 7 : i32
    %126 = arith.addi %c1_i32_75, %c7_i32_76 : i32
    %c1_i32_77 = arith.constant 1 : i32
    %127:2 = scf.for %arg16 = %c1_i32_75 to %126 step %c1_i32_77 iter_args(%arg17 = %125, %arg18 = %123) -> (vector<8x256xf32>, vector<8x256xf32>)  : i32 {
      %c8_i32 = arith.constant 8 : i32
      %149 = arith.muli %arg16, %c8_i32 : i32
      %150 = tpu.assume_multiple %149, 8 : i32
      %151 = arith.index_cast %150 : i32 to index
      %c0_89 = arith.constant 0 : index
      %152 = vector.load %arg15[%151, %c0_89] : memref<64x1024xf32, #tpu.memory_space<vmem>>, vector<8x1024xf32>
      %c0_90 = arith.constant 0 : index
      %c0_91 = arith.constant 0 : index
      %153 = vector.load %arg10[%c0_90, %c0_91] : memref<1x1024xf32, #tpu.memory_space<vmem>>, vector<1x1024xf32>
      %154 = vector.broadcast %153 : vector<1x1024xf32> to vector<8x1024xf32>
      %155 = arith.addf %152, %154 : vector<8x1024xf32>
      %156 = arith.truncf %arg17 : vector<8x256xf32> to vector<8x256xbf16>
      %c0_92 = arith.constant 0 : index
      %c0_93 = arith.constant 0 : index
      %157 = vector.load %arg9[%c0_92, %c0_93] : memref<256x1024xbf16, #tpu.memory_space<vmem>>, vector<256x1024xbf16>
      %cst_94 = arith.constant dense<0.000000e+00> : vector<8x1024xf32>
      %158 = tpu.matmul %156, %157, %cst_94 {dimension_numbers = #tpu.dot_dimension_numbers<[1], [0], [0], [1], [0, 0, 1, 1], [], []>} : vector<8x256xbf16>, vector<256x1024xbf16>, vector<8x1024xf32> -> vector<8x1024xf32>
      %159 = arith.addf %155, %158 : vector<8x1024xf32>
      %160 = vector.extract_strided_slice %159 {offsets = [0, 0], sizes = [8, 256], strides = [1, 1]} : vector<8x1024xf32> to vector<8x256xf32>
      %161 = arith.negf %160 : vector<8x256xf32>
      %162 = math.exp %161 : vector<8x256xf32>
      %cst_95 = arith.constant 1.000000e+00 : f32
      %163 = vector.broadcast %cst_95 : f32 to vector<8x256xf32>
      %164 = arith.addf %163, %162 : vector<8x256xf32>
      %165 = arith.divf %163, %164 : vector<8x256xf32>
      %166 = vector.extract_strided_slice %159 {offsets = [0, 256], sizes = [8, 256], strides = [1, 1]} : vector<8x1024xf32> to vector<8x256xf32>
      %167 = arith.negf %166 : vector<8x256xf32>
      %168 = math.exp %167 : vector<8x256xf32>
      %cst_96 = arith.constant 1.000000e+00 : f32
      %169 = vector.broadcast %cst_96 : f32 to vector<8x256xf32>
      %170 = arith.addf %169, %168 : vector<8x256xf32>
      %171 = arith.divf %169, %170 : vector<8x256xf32>
      %172 = vector.extract_strided_slice %159 {offsets = [0, 512], sizes = [8, 256], strides = [1, 1]} : vector<8x1024xf32> to vector<8x256xf32>
      %173 = math.tanh %172 : vector<8x256xf32>
      %174 = vector.extract_strided_slice %159 {offsets = [0, 768], sizes = [8, 256], strides = [1, 1]} : vector<8x1024xf32> to vector<8x256xf32>
      %175 = arith.negf %174 : vector<8x256xf32>
      %176 = math.exp %175 : vector<8x256xf32>
      %cst_97 = arith.constant 1.000000e+00 : f32
      %177 = vector.broadcast %cst_97 : f32 to vector<8x256xf32>
      %178 = arith.addf %177, %176 : vector<8x256xf32>
      %179 = arith.divf %177, %178 : vector<8x256xf32>
      %180 = arith.mulf %171, %arg18 : vector<8x256xf32>
      %181 = arith.mulf %165, %173 : vector<8x256xf32>
      %182 = arith.addf %180, %181 : vector<8x256xf32>
      %183 = math.tanh %182 : vector<8x256xf32>
      %184 = arith.mulf %179, %183 : vector<8x256xf32>
      scf.yield %184, %182 : vector<8x256xf32>, vector<8x256xf32>
    }
    %c7_i32_78 = arith.constant 7 : i32
    %128 = arith.truncf %127#0 : vector<8x256xf32> to vector<8x256xbf16>
    %c0_79 = arith.constant 0 : index
    %c0_80 = arith.constant 0 : index
    %129 = vector.load %arg11[%c0_79, %c0_80] : memref<256x128xbf16, #tpu.memory_space<vmem>>, vector<256x128xbf16>
    %cst_81 = arith.constant dense<0.000000e+00> : vector<8x128xf32>
    %130 = tpu.matmul %128, %129, %cst_81 {dimension_numbers = #tpu.dot_dimension_numbers<[1], [0], [0], [1], [0, 0, 1, 1], [], []>} : vector<8x256xbf16>, vector<256x128xbf16>, vector<8x128xf32> -> vector<8x128xf32>
    %c0_82 = arith.constant 0 : index
    %c0_83 = arith.constant 0 : index
    %131 = vector.load %arg12[%c0_82, %c0_83] : memref<1x128xf32, #tpu.memory_space<vmem>>, vector<1x128xf32>
    %132 = vector.broadcast %131 : vector<1x128xf32> to vector<8x128xf32>
    %133 = arith.addf %130, %132 : vector<8x128xf32>
    %134 = tpu.iota {dimensions = array<i32: 1>} : vector<8x128xi32>
    %c2_i32 = arith.constant 2 : i32
    %135 = vector.broadcast %c2_i32 : i32 to vector<8x128xi32>
    %136 = arith.cmpi slt, %134, %135 : vector<8x128xi32>
    %cst_84 = arith.constant -1.000000e+30 : f32
    %137 = vector.broadcast %cst_84 : f32 to vector<8x128xf32>
    %138 = arith.select %136, %133, %137 : vector<8x128xi1>, vector<8x128xf32>
    %cst_85 = arith.constant dense<0xFF800000> : vector<8xf32>
    %139 = vector.multi_reduction <maximumf>, %138, %cst_85 [1] : vector<8x128xf32> to vector<8xf32>
    %140 = vector.shape_cast %139 : vector<8xf32> to vector<8x1xf32>
    %141 = vector.broadcast %140 : vector<8x1xf32> to vector<8x128xf32>
    %142 = arith.subf %138, %141 : vector<8x128xf32>
    %143 = math.exp %142 : vector<8x128xf32>
    %cst_86 = arith.constant dense<0.000000e+00> : vector<8xf32>
    %144 = vector.multi_reduction <add>, %143, %cst_86 [1] : vector<8x128xf32> to vector<8xf32>
    %145 = vector.shape_cast %144 : vector<8xf32> to vector<8x1xf32>
    %146 = vector.broadcast %145 : vector<8x1xf32> to vector<8x128xf32>
    %147 = arith.divf %143, %146 : vector<8x128xf32>
    %c0_87 = arith.constant 0 : index
    %c0_88 = arith.constant 0 : index
    %148 = vector.load %arg13[%c0_87, %c0_88] : memref<8x128xf32, #tpu.memory_space<vmem>>, vector<8x128xf32>
    tpu.vector_store %arg13[%c0_87, %c0_88], %147 {strides = array<i32>} : memref<8x128xf32, #tpu.memory_space<vmem>>, vector<8x128xf32>,
    return
  }
  func.func @transform_0(%arg0: i32) -> (i32, i32, i32) {
    %c0_i32 = arith.constant 0 : i32
    %c0_i32_0 = arith.constant 0 : i32
    %c0_i32_1 = arith.constant 0 : i32
    return %arg0, %c0_i32, %c0_i32_0 : i32, i32, i32
  }
  func.func @transform_1(%arg0: i32) -> (i32, i32) {
    %c0_i32 = arith.constant 0 : i32
    %c0_i32_0 = arith.constant 0 : i32
    %c0_i32_1 = arith.constant 0 : i32
    return %c0_i32, %c0_i32_0 : i32, i32
  }
  func.func @transform_2(%arg0: i32) -> (i32, i32) {
    %c0_i32 = arith.constant 0 : i32
    %c0_i32_0 = arith.constant 0 : i32
    %c0_i32_1 = arith.constant 0 : i32
    return %c0_i32, %c0_i32_0 : i32, i32
  }
  func.func @transform_3(%arg0: i32) -> (i32, i32) {
    %c0_i32 = arith.constant 0 : i32
    %c0_i32_0 = arith.constant 0 : i32
    %c0_i32_1 = arith.constant 0 : i32
    return %c0_i32, %c0_i32_0 : i32, i32
  }
  func.func @transform_4(%arg0: i32) -> (i32, i32) {
    %c0_i32 = arith.constant 0 : i32
    %c0_i32_0 = arith.constant 0 : i32
    %c0_i32_1 = arith.constant 0 : i32
    return %c0_i32, %c0_i32_0 : i32, i32
  }
  func.func @transform_5(%arg0: i32) -> (i32, i32) {
    %c0_i32 = arith.constant 0 : i32
    %c0_i32_0 = arith.constant 0 : i32
    %c0_i32_1 = arith.constant 0 : i32
    return %c0_i32, %c0_i32_0 : i32, i32
  }
  func.func @transform_6(%arg0: i32) -> (i32, i32) {
    %c0_i32 = arith.constant 0 : i32
    %c0_i32_0 = arith.constant 0 : i32
    %c0_i32_1 = arith.constant 0 : i32
    return %c0_i32, %c0_i32_0 : i32, i32
  }
  func.func @transform_7(%arg0: i32) -> (i32, i32) {
    %c0_i32 = arith.constant 0 : i32
    %c0_i32_0 = arith.constant 0 : i32
    %c0_i32_1 = arith.constant 0 : i32
    return %c0_i32, %c0_i32_0 : i32, i32
  }
  func.func @transform_8(%arg0: i32) -> (i32, i32) {
    %c0_i32 = arith.constant 0 : i32
    %c0_i32_0 = arith.constant 0 : i32
    %c0_i32_1 = arith.constant 0 : i32
    return %c0_i32, %c0_i32_0 : i32, i32
  }
  func.func @transform_9(%arg0: i32) -> (i32, i32) {
    %c0_i32 = arith.constant 0 : i32
    %c0_i32_0 = arith.constant 0 : i32
    %c0_i32_1 = arith.constant 0 : i32
    return %c0_i32, %c0_i32_0 : i32, i32
  }
  func.func @transform_10(%arg0: i32) -> (i32, i32) {
    %c0_i32 = arith.constant 0 : i32
    %c0_i32_0 = arith.constant 0 : i32
    %c0_i32_1 = arith.constant 0 : i32
    return %c0_i32, %c0_i32_0 : i32, i32
  }
  func.func @transform_11(%arg0: i32) -> (i32, i32) {
    %c0_i32 = arith.constant 0 : i32
    %c0_i32_0 = arith.constant 0 : i32
    %c0_i32_1 = arith.constant 0 : i32
    return %c0_i32, %c0_i32_0 : i32, i32
  }
  func.func @transform_12(%arg0: i32) -> (i32, i32) {
    %c0_i32 = arith.constant 0 : i32
    %c0_i32_0 = arith.constant 0 : i32
    return %arg0, %c0_i32 : i32, i32
  }
}

</mosaic_0001>

<bundles_post_ra>
// kernel: method_rnn_forward.1
= control target key start
LH: loop header
LB: loop body
LE: loop exit
PB: predicated region body
PF: predicated region fallthrough
CT: control target
= control target key end

     0   :  { %17 = vsyncpa [#allocation5], 0  ;;  %s15543_s0 = inlined_call_operand.vmem [shape: bf16[1,64,384], index: 0, kind: input, shape index: {}]   ;;  %s15544_s1 = inlined_call_operand.hbm [shape: bf16[384,1024], index: 1, kind: input, shape index: {}]   ;;  %s15545_s2 = inlined_call_operand.vmem [shape: bf16[256,1024], index: 2, kind: input, shape index: {}]   ;;  %s15546_s3 = inlined_call_operand.vmem [shape: f32[1,1024], index: 3, kind: input, shape index: {}]   ;;  %s15547_s4 = inlined_call_operand.hbm [shape: bf16[256,1024], index: 4, kind: input, shape index: {}]   ;;  %s15548_s5 = inlined_call_operand.hbm [shape: bf16[256,1024], index: 5, kind: input, shape index: {}]   ;;  %s15549_s6 = inlined_call_operand.vmem [shape: f32[1,1024], index: 6, kind: input, shape index: {}]   ;;  %s15550_s7 = inlined_call_operand.hbm [shape: bf16[256,1024], index: 7, kind: input, shape index: {}]   ;;  %s15551_s8 = inlined_call_operand.hbm [shape: bf16[256,1024], index: 8, kind: input, shape index: {}]   ;;  %s15552_s9 = inlined_call_operand.vmem [shape: f32[1,1024], index: 9, kind: input, shape index: {}]   ;;  %s15553_s10 = inlined_call_operand.hbm [shape: bf16[256,128], index: 10, kind: input, shape index: {}]   ;;  %s15554_s11 = inlined_call_operand.vmem [shape: f32[1,128], index: 11, kind: input, shape index: {}]   ;;  %s15555_s12 = inlined_call_operand.vmem [shape: f32[8,128], index: 12, kind: output, shape index: {}]  }
   0x1   :  { %18 = vsyncpa [#allocation7], 0 }
   0x2   :  { %19 = vsyncpa [#allocation10], 0 }
   0x3   :  { %20 = vsyncpa [#allocation13], 0  ;;  %s13368_s21 = smov [#allocation6]   ;;  %s13369_s23 = smov [#allocation9]  }
   0x4   :  { %s44_s22 = sshll.u32 %s13368_s21, 4  ;;  %s70_s24 = sshll.u32 %s13369_s23, 4  ;;  %s45_s22 = int_to_ptr.vmem [resolvable:$true] %s44_s22  ;;  %s13444_s24 = int_to_ptr.vmem [resolvable:$true] %s70_s24 }
   0x5   :  { %s13108_s27 = scalar_lea.hbm %s15547_s4, 16384 }
   0x6   :  { %p13109_p0 = scmp.ne.s32.totalorder %s15547_s4, %s13108_s27  ;;  %p13112_p1 = scmp.lt.u32.totalorder %s13108_s27, %s15547_s4 }
   0x8   :  { %p13114_p2 = pnand %p13112_p1, %p13109_p0 }
   0xa   :  { %13117 = shalt.err (!%p13114_p2)
}
   0xb   :  { %s13118_s14 = scalar_lea.vmem %s45_s22, 16384  ;;  %p13123_p4 = scmp.lt.s32.totalorder %s45_s22, %s45_s22 }
   0xc   :  { %p13119_p3 = scmp.ne.s32.totalorder %s45_s22, %s13118_s14  ;;  %p13124_p5 = scmp.lt.s32.totalorder %s13118_s14, %s13118_s14 }
   0xe   :  { %p13125_p6 = por %p13124_p5, %p13123_p4 }
  0x10   :  { %p13126_p7 = pnand %p13125_p6, %p13119_p3 }
  0x12   :  { %13129 = shalt.err (!%p13126_p7)
}
  0x13   :  { %s13370_s15 = smov 512   ;;  %s13371_s16 = smov 32  }
  0x14   :  { %50 = dma.hbm_to_vmem [thread:$0]  %s15547_s4, 16384, %s45_s22, [#allocation7], %s13370_s15, %s13370_s15, %s13371_s16  }
  0x15   :  { %s13130_s21 = scalar_lea.hbm %s15550_s7, 16384 }
  0x16   :  { %p13131_p8 = scmp.ne.s32.totalorder %s15550_s7, %s13130_s21  ;;  %p13134_p9 = scmp.lt.u32.totalorder %s13130_s21, %s15550_s7 }
  0x18   :  { %p13136_p10 = pnand %p13134_p9, %p13131_p8 }
  0x1a   :  { %13139 = shalt.err (!%p13136_p10)
}
  0x1b   :  { %s13140_s28 = scalar_lea.vmem %s13444_s24, 16384  ;;  %p13145_p12 = scmp.lt.s32.totalorder %s13444_s24, %s13444_s24 }
  0x1c   :  { %p13141_p11 = scmp.ne.s32.totalorder %s13444_s24, %s13140_s28  ;;  %p13146_p13 = scmp.lt.s32.totalorder %s13140_s28, %s13140_s28 }
  0x1e   :  { %p13147_p0 = por %p13146_p13, %p13145_p12 }
  0x20   :  { %p13148_p1 = pnand %p13147_p0, %p13141_p11 }
  0x22   :  { %13151 = shalt.err (!%p13148_p1)
}
  0x23   :  { %76 = dma.hbm_to_vmem [thread:$0]  %s15550_s7, 16384, %s13444_s24, [#allocation10], %s13370_s15, %s13370_s15, %s13371_s16  }
  0x24   :  { %s13372_s29 = smov [#allocation4]   ;;  %s13373_s13 = smov [#allocation8]  }
  0x25   :  { %s28_s30 = sshll.u32 %s13372_s29, 4  ;;  %s56_s14 = sshll.u32 %s13373_s13, 4  ;;  %s29_s30 = int_to_ptr.vmem [resolvable:$true] %s28_s30  ;;  %s13481_s14 = int_to_ptr.vmem [resolvable:$true] %s56_s14 }
  0x26   :  { %s13152_s19 = scalar_lea.hbm %s15544_s1, 24576 }
  0x27   :  { %p13153_p2 = scmp.ne.s32.totalorder %s15544_s1, %s13152_s19  ;;  %p13156_p3 = scmp.lt.u32.totalorder %s13152_s19, %s15544_s1 }
  0x29   :  { %p13158_p4 = pnand %p13156_p3, %p13153_p2 }
  0x2b   :  { %13161 = shalt.err (!%p13158_p4)
}
  0x2c   :  { %s13162_s7 = scalar_lea.vmem %s29_s30, 24576  ;;  %p13167_p6 = scmp.lt.s32.totalorder %s29_s30, %s29_s30 }
  0x2d   :  { %p13163_p5 = scmp.ne.s32.totalorder %s29_s30, %s13162_s7  ;;  %p13168_p7 = scmp.lt.s32.totalorder %s13162_s7, %s13162_s7 }
  0x2f   :  { %p13169_p8 = por %p13168_p7, %p13167_p6 }
  0x31   :  { %p13170_p9 = pnand %p13169_p8, %p13163_p5 }
  0x33   :  { %13173 = shalt.err (!%p13170_p9)
}
  0x34   :  { %34 = dma.hbm_to_vmem [thread:$0]  %s15544_s1, 24576, %s29_s30, [#allocation5], %s13370_s15, %s13370_s15, %s13371_s16  }
  0x35   :  { %s13174_s4 = scalar_lea.hbm %s15548_s5, 16384 }
  0x36   :  { %p13175_p10 = scmp.ne.s32.totalorder %s15548_s5, %s13174_s4  ;;  %p13178_p11 = scmp.lt.u32.totalorder %s13174_s4, %s15548_s5 }
  0x38   :  { %p13180_p12 = pnand %p13178_p11, %p13175_p10 }
  0x3a   :  { %13183 = shalt.err (!%p13180_p12)
}
  0x3b   :  { %s13184_s18 = scalar_lea.vmem %s13481_s14, 16384  ;;  %p13189_p0 = scmp.lt.s32.totalorder %s13481_s14, %s13481_s14 }
  0x3c   :  { %p13185_p13 = scmp.ne.s32.totalorder %s13481_s14, %s13184_s18  ;;  %p13190_p1 = scmp.lt.s32.totalorder %s13184_s18, %s13184_s18 }
  0x3e   :  { %p13191_p2 = por %p13190_p1, %p13189_p0 }
  0x40   :  { %p13192_p3 = pnand %p13191_p2, %p13185_p13 }
  0x42   :  { %13195 = shalt.err (!%p13192_p3)
}
  0x43   :  { %62 = dma.hbm_to_vmem [thread:$0]  %s15548_s5, 16384, %s13481_s14, [#allocation7], %s13370_s15, %s13370_s15, %s13371_s16  }
  0x44   :  { %s13374_s19 = smov [#allocation11]   ;;  %s13375_s21 = smov [#allocation12]  }
  0x45   :  { %s82_s20 = sshll.u32 %s13374_s19, 4  ;;  %s96_s23 = sshll.u32 %s13375_s21, 4  ;;  %s83_s20 = int_to_ptr.vmem [resolvable:$true] %s82_s20  ;;  %s13518_s23 = int_to_ptr.vmem [resolvable:$true] %s96_s23 }
  0x46   :  { %s13196_s24 = scalar_lea.hbm %s15551_s8, 16384 }
  0x47   :  { %p13197_p4 = scmp.ne.s32.totalorder %s15551_s8, %s13196_s24  ;;  %p13200_p5 = scmp.lt.u32.totalorder %s13196_s24, %s15551_s8 }
  0x49   :  { %p13202_p6 = pnand %p13200_p5, %p13197_p4 }
  0x4b   :  { %13205 = shalt.err (!%p13202_p6)
}
  0x4c   :  { %s13206_s5 = scalar_lea.vmem %s83_s20, 16384  ;;  %p13211_p8 = scmp.lt.s32.totalorder %s83_s20, %s83_s20 }
  0x4d   :  { %p13207_p7 = scmp.ne.s32.totalorder %s83_s20, %s13206_s5  ;;  %p13212_p9 = scmp.lt.s32.totalorder %s13206_s5, %s13206_s5 }
  0x4f   :  { %p13213_p10 = por %p13212_p9, %p13211_p8 }
  0x51   :  { %p13214_p11 = pnand %p13213_p10, %p13207_p7 }
  0x53   :  { %13217 = shalt.err (!%p13214_p11)
}
  0x54   :  { %88 = dma.hbm_to_vmem [thread:$0]  %s15551_s8, 16384, %s83_s20, [#allocation10], %s13370_s15, %s13370_s15, %s13371_s16  }
  0x55   :  { %s13218_s17 = scalar_lea.hbm %s15553_s10, 2048 }
  0x56   :  { %p13219_p12 = scmp.ne.s32.totalorder %s15553_s10, %s13218_s17  ;;  %p13222_p13 = scmp.lt.u32.totalorder %s13218_s17, %s15553_s10 }
  0x58   :  { %p13224_p0 = pnand %p13222_p13, %p13219_p12 }
  0x5a   :  { %13227 = shalt.err (!%p13224_p0)
}
  0x5b   :  { %s13228_s21 = scalar_lea.vmem %s13518_s23, 2048  ;;  %p13233_p2 = scmp.lt.s32.totalorder %s13518_s23, %s13518_s23 }
  0x5c   :  { %p13229_p1 = scmp.ne.s32.totalorder %s13518_s23, %s13228_s21  ;;  %p13234_p3 = scmp.lt.s32.totalorder %s13228_s21, %s13228_s21 }
  0x5e   :  { %p13235_p4 = por %p13234_p3, %p13233_p2 }
  0x60   :  { %p13236_p5 = pnand %p13235_p4, %p13229_p1 }
  0x62   :  { %13239 = shalt.err (!%p13236_p5)
}
  0x63   :  { %s13376_s8 = smov 64   ;;  %s13377_s15 = smov 4  }
  0x64   :  { %102 = dma.hbm_to_vmem [thread:$0]  %s15553_s10, 2048, %s13518_s23, [#allocation13], %s13376_s8, %s13376_s8, %s13377_s15  }
  0x65   :  { %13300 = dma.done.wait [#allocation5], 24576  }
  0x66   :  { %13301 = vsyncadd [#allocation5], 4294942720 }
  0x67   :  { %13302 = dma.done.wait [#allocation7], 32768  }
  0x68   :  { %13303 = vsyncadd [#allocation7], 4294934528 }
  0x69   :  { %13304 = dma.done.wait [#allocation10], 32768  }
  0x6a   :  { %13305 = vsyncadd [#allocation10], 4294934528 }
  0x6b   :  { %13306 = dma.done.wait [#allocation13], 2048  }
  0x6c   :  { %13307 = vsyncadd [#allocation13], 4294965248  ;;  %v132_v0 = vld [vmem:[#allocation4] sm:$0xff]  ;;  %v133_v2 = vld [vmem:[#allocation4 + $0x8] sm:$0xff]  ;;  %s13764_s23 = smov 1  }
  0x6d   :  { %v136_v1 = vld [vmem:[#allocation4 + $0x20] sm:$0xff]  ;;  %v137_v4 = vld [vmem:[#allocation4 + $0x28] sm:$0xff] }
  0x6e   :  { %v11307_v3 = vcombine.high %v132_v0, %v136_v1  ;;  %v11306_v5 = vcombine.low %v132_v0, %v136_v1  ;;  %v140_v6 = vld [vmem:[#allocation4 + $0x40] sm:$0xff]  ;;  %v11309_v8 = vcombine.high %v133_v2, %v137_v4  ;;  %v11308_v9 = vcombine.low %v133_v2, %v137_v4  ;;  %v141_v11 = vld [vmem:[#allocation4 + $0x48] sm:$0xff] }
  0x6f   :  { %v144_v7 = vld [vmem:[#allocation4 + $0x60] sm:$0xff]  ;;  %v145_v12 = vld [vmem:[#allocation4 + $0x68] sm:$0xff] }
  0x70   :  { %v11315_v10 = vcombine.high %v140_v6, %v144_v7  ;;  %v148_v13 = vld [vmem:[#allocation4 + $0x80] sm:$0xff]  ;;  %1316 = vmatprep.subr.bf16.mxu0 %v11307_v3  ;;  %v11317_v14 = vcombine.high %v141_v11, %v145_v12  ;;  %v149_v16 = vld [vmem:[#allocation4 + $0x88] sm:$0xff]  ;;  %1422 = vmatprep.subr.bf16.mxu1 %v11309_v8  ;;  %v11314_v18 = vcombine.low %v140_v6, %v144_v7 }
  0x71   :  { %v152_v15 = vld [vmem:[#allocation4 + $0xa0] sm:$0xff]  ;;  %v153_v17 = vld [vmem:[#allocation4 + $0xa8] sm:$0xff]  ;;  %1317 = vmatpush1.bf16.msra.mxu0 %v11306_v5  ;;  %1423 = vmatpush1.bf16.msra.mxu1 %v11308_v9  ;;  %v11316_v19 = vcombine.low %v141_v11, %v145_v12 }
  0x72   :  { %1318 = vmatprep.subr.bf16.mxu0 %v11315_v10  ;;  %v11323_v20 = vcombine.high %v148_v13, %v152_v15  ;;  %1424 = vmatprep.subr.bf16.mxu1 %v11317_v14  ;;  %v11325_v21 = vcombine.high %v149_v16, %v153_v17  ;;  %v156_v22 = vld [vmem:[#allocation4 + $0xc0] sm:$0xff]  ;;  %v157_v24 = vld [vmem:[#allocation4 + $0xc8] sm:$0xff]  ;;  %v11322_v26 = vcombine.low %v148_v13, %v152_v15 }
  0x73   :  { %v160_v23 = vld [vmem:[#allocation4 + $0xe0] sm:$0xff]  ;;  %v161_v25 = vld [vmem:[#allocation4 + $0xe8] sm:$0xff]  ;;  %v11324_v27 = vcombine.low %v149_v16, %v153_v17 }
  0x74   :  { %v11331_v28 = vcombine.high %v156_v22, %v160_v23  ;;  %v11333_v29 = vcombine.high %v157_v24, %v161_v25  ;;  %v164_v30 = vld [vmem:[#allocation4 + $0x100] sm:$0xff]  ;;  %v165_v32 = vld [vmem:[#allocation4 + $0x108] sm:$0xff]  ;;  %v11330_v34 = vcombine.low %v156_v22, %v160_v23  ;;  %v11332_v35 = vcombine.low %v157_v24, %v161_v25 }
  0x75   :  { %1319 = vmatpush1.bf16.msra.mxu0 %v11314_v18  ;;  %1425 = vmatpush1.bf16.msra.mxu1 %v11316_v19  ;;  %v168_v31 = vld [vmem:[#allocation4 + $0x120] sm:$0xff]  ;;  %v169_v33 = vld [vmem:[#allocation4 + $0x128] sm:$0xff] }
  0x76   :  { %1320 = vmatprep.subr.bf16.mxu0 %v11323_v20  ;;  %1426 = vmatprep.subr.bf16.mxu1 %v11325_v21  ;;  %v11339_v36 = vcombine.high %v164_v30, %v168_v31  ;;  %v11341_v37 = vcombine.high %v165_v32, %v169_v33  ;;  %v172_v38 = vld [vmem:[#allocation4 + $0x140] sm:$0xff]  ;;  %v173_v40 = vld [vmem:[#allocation4 + $0x148] sm:$0xff]  ;;  %v11338_v42 = vcombine.low %v164_v30, %v168_v31 }
  0x77   :  { %v176_v39 = vld [vmem:[#allocation4 + $0x160] sm:$0xff]  ;;  %v177_v41 = vld [vmem:[#allocation4 + $0x168] sm:$0xff]  ;;  %v11340_v43 = vcombine.low %v165_v32, %v169_v33 }
  0x78   :  { %v11347_v44 = vcombine.high %v172_v38, %v176_v39  ;;  %v11349_v45 = vcombine.high %v173_v40, %v177_v41  ;;  %v180_v46 = vld [vmem:[#allocation4 + $0x180] sm:$0xff]  ;;  %v181_v48 = vld [vmem:[#allocation4 + $0x188] sm:$0xff]  ;;  %v11346_v50 = vcombine.low %v172_v38, %v176_v39  ;;  %v11348_v51 = vcombine.low %v173_v40, %v177_v41 }
  0x79   :  { %1321 = vmatpush1.bf16.msra.mxu0 %v11322_v26  ;;  %1427 = vmatpush1.bf16.msra.mxu1 %v11324_v27  ;;  %v184_v47 = vld [vmem:[#allocation4 + $0x1a0] sm:$0xff]  ;;  %v185_v49 = vld [vmem:[#allocation4 + $0x1a8] sm:$0xff] }
  0x7a   :  { %1322 = vmatprep.subr.bf16.mxu0 %v11331_v28  ;;  %1428 = vmatprep.subr.bf16.mxu1 %v11333_v29  ;;  %v11355_v52 = vcombine.high %v180_v46, %v184_v47  ;;  %v11357_v53 = vcombine.high %v181_v48, %v185_v49  ;;  %v188_v54 = vld [vmem:[#allocation4 + $0x1c0] sm:$0xff]  ;;  %v189_v57 = vld [vmem:[#allocation4 + $0x1c8] sm:$0xff]  ;;  %v11354_v59 = vcombine.low %v180_v46, %v184_v47 }
  0x7b   :  { %v192_v55 = vld [vmem:[#allocation4 + $0x1e0] sm:$0xff]  ;;  %v193_v58 = vld [vmem:[#allocation4 + $0x1e8] sm:$0xff]  ;;  %v11356_v60 = vcombine.low %v181_v48, %v185_v49 }
  0x7c   :  { %v13555_v56 = vld [vmem:[%s15543_s0 + $0x4] ss:$12 sps:$4 sm:$0xff]   ;;  %v11363_v61 = vcombine.high %v188_v54, %v192_v55  ;;  %v11365_v62 = vcombine.high %v189_v57, %v193_v58  ;;  %v197_v1 = vld [vmem:[#allocation4 + $0x208] sm:$0xff]  ;;  %v11362_v3 = vcombine.low %v188_v54, %v192_v55  ;;  %v11364_v4 = vcombine.low %v189_v57, %v193_v58 }
  0x7d   :  { %1323 = vmatpush1.bf16.msra.mxu0 %v11330_v34  ;;  %1429 = vmatpush1.bf16.msra.mxu1 %v11332_v35  ;;  %v196_v63 = vld [vmem:[#allocation4 + $0x200] sm:$0xff]  ;;  %v201_v2 = vld [vmem:[#allocation4 + $0x228] sm:$0xff] }
  0x7e   :  { %1324 = vmatprep.subr.bf16.mxu0 %v11339_v36  ;;  %1430 = vmatprep.subr.bf16.mxu1 %v11341_v37  ;;  %v200_v0 = vld [vmem:[#allocation4 + $0x220] sm:$0xff]  ;;  %v11373_v6 = vcombine.high %v197_v1, %v201_v2  ;;  %v205_v9 = vld [vmem:[#allocation4 + $0x248] sm:$0xff]  ;;  %v11372_v12 = vcombine.low %v197_v1, %v201_v2 }
  0x7f   :  { %1348 = vmatprep.mubr.bf16.mxu0 %v13555_v56  ;;  %1454 = vmatprep.mubr.bf16.mxu1 %v13555_v56  ;;  %v11371_v5 = vcombine.high %v196_v63, %v200_v0  ;;  %v204_v7 = vld [vmem:[#allocation4 + $0x240] sm:$0xff]  ;;  %v209_v10 = vld [vmem:[#allocation4 + $0x268] sm:$0xff]  ;;  %v11370_v11 = vcombine.low %v196_v63, %v200_v0 }
  0x80   :  { %v208_v8 = vld [vmem:[#allocation4 + $0x260] sm:$0xff]  ;;  %v11381_v14 = vcombine.high %v205_v9, %v209_v10  ;;  %v213_v17 = vld [vmem:[#allocation4 + $0x288] sm:$0xff]  ;;  %v11380_v20 = vcombine.low %v205_v9, %v209_v10 }
  0x81   :  { %1325 = vmatpush1.bf16.msra.mxu0 %v11338_v42  ;;  %1431 = vmatpush1.bf16.msra.mxu1 %v11340_v43  ;;  %v11379_v13 = vcombine.high %v204_v7, %v208_v8  ;;  %v212_v15 = vld [vmem:[#allocation4 + $0x280] sm:$0xff]  ;;  %v217_v18 = vld [vmem:[#allocation4 + $0x2a8] sm:$0xff]  ;;  %v11378_v19 = vcombine.low %v204_v7, %v208_v8 }
  0x82   :  { %1326 = vmatprep.subr.bf16.mxu0 %v11347_v44  ;;  %1432 = vmatprep.subr.bf16.mxu1 %v11349_v45  ;;  %v216_v16 = vld [vmem:[#allocation4 + $0x2a0] sm:$0xff]  ;;  %v11389_v23 = vcombine.high %v213_v17, %v217_v18  ;;  %v221_v25 = vld [vmem:[#allocation4 + $0x2c8] sm:$0xff]  ;;  %v11388_v28 = vcombine.low %v213_v17, %v217_v18 }
  0x83   :  { %v11387_v21 = vcombine.high %v212_v15, %v216_v16  ;;  %v220_v22 = vld [vmem:[#allocation4 + $0x2c0] sm:$0xff]  ;;  %v225_v26 = vld [vmem:[#allocation4 + $0x2e8] sm:$0xff]  ;;  %v11386_v27 = vcombine.low %v212_v15, %v216_v16 }
  0x84   :  { %v224_v24 = vld [vmem:[#allocation4 + $0x2e0] sm:$0xff]  ;;  %v11397_v30 = vcombine.high %v221_v25, %v225_v26  ;;  %v229_v33 = vld [vmem:[#allocation4 + $0x308] sm:$0xff]  ;;  %v11396_v36 = vcombine.low %v221_v25, %v225_v26 }
  0x85   :  { %1327 = vmatpush1.bf16.msra.mxu0 %v11346_v50  ;;  %1433 = vmatpush1.bf16.msra.mxu1 %v11348_v51  ;;  %v11395_v29 = vcombine.high %v220_v22, %v224_v24  ;;  %v228_v31 = vld [vmem:[#allocation4 + $0x300] sm:$0xff]  ;;  %v233_v34 = vld [vmem:[#allocation4 + $0x328] sm:$0xff]  ;;  %v11394_v35 = vcombine.low %v220_v22, %v224_v24 }
  0x86   :  { %1328 = vmatprep.subr.bf16.mxu0 %v11355_v52  ;;  %1434 = vmatprep.subr.bf16.mxu1 %v11357_v53  ;;  %v232_v32 = vld [vmem:[#allocation4 + $0x320] sm:$0xff]  ;;  %v11405_v38 = vcombine.high %v229_v33, %v233_v34  ;;  %v237_v41 = vld [vmem:[#allocation4 + $0x348] sm:$0xff]  ;;  %v11404_v44 = vcombine.low %v229_v33, %v233_v34 }
  0x87   :  { %v11403_v37 = vcombine.high %v228_v31, %v232_v32  ;;  %v236_v39 = vld [vmem:[#allocation4 + $0x340] sm:$0xff]  ;;  %v241_v42 = vld [vmem:[#allocation4 + $0x368] sm:$0xff]  ;;  %v11402_v43 = vcombine.low %v228_v31, %v232_v32 }
  0x88   :  { %v240_v40 = vld [vmem:[#allocation4 + $0x360] sm:$0xff]  ;;  %v11413_v46 = vcombine.high %v237_v41, %v241_v42  ;;  %v245_v49 = vld [vmem:[#allocation4 + $0x388] sm:$0xff]  ;;  %v11412_v52 = vcombine.low %v237_v41, %v241_v42 }
  0x89   :  { %1329 = vmatpush1.bf16.msra.mxu0 %v11354_v59  ;;  %1435 = vmatpush1.bf16.msra.mxu1 %v11356_v60  ;;  %v11411_v45 = vcombine.high %v236_v39, %v240_v40  ;;  %v244_v47 = vld [vmem:[#allocation4 + $0x380] sm:$0xff]  ;;  %v249_v50 = vld [vmem:[#allocation4 + $0x3a8] sm:$0xff]  ;;  %v11410_v51 = vcombine.low %v236_v39, %v240_v40 }
  0x8a   :  { %1330 = vmatprep.subr.bf16.mxu0 %v11363_v61  ;;  %1436 = vmatprep.subr.bf16.mxu1 %v11365_v62  ;;  %v248_v48 = vld [vmem:[#allocation4 + $0x3a0] sm:$0xff]  ;;  %v11421_v54 = vcombine.high %v245_v49, %v249_v50  ;;  %v253_v58 = vld [vmem:[#allocation4 + $0x3c8] sm:$0xff]  ;;  %v11420_v61 = vcombine.low %v245_v49, %v249_v50 }
  0x8b   :  { %v11419_v53 = vcombine.high %v244_v47, %v248_v48  ;;  %v252_v55 = vld [vmem:[#allocation4 + $0x3c0] sm:$0xff]  ;;  %v257_v59 = vld [vmem:[#allocation4 + $0x3e8] sm:$0xff]  ;;  %v11418_v60 = vcombine.low %v244_v47, %v248_v48 }
  0x8c   :  { %v256_v57 = vld [vmem:[#allocation4 + $0x3e0] sm:$0xff]  ;;  %v11429_v63 = vcombine.high %v253_v58, %v257_v59  ;;  %v261_v2 = vld [vmem:[#allocation4 + $0x408] sm:$0xff] }
  0x8d   :  { %1331 = vmatpush1.bf16.msra.mxu0 %v11362_v3  ;;  %1437 = vmatpush1.bf16.msra.mxu1 %v11364_v4  ;;  %v11427_v62 = vcombine.high %v252_v55, %v256_v57  ;;  %v260_v0 = vld [vmem:[#allocation4 + $0x400] sm:$0xff]  ;;  %v265_v3 = vld [vmem:[#allocation4 + $0x428] sm:$0xff]  ;;  %v11426_v4 = vcombine.low %v252_v55, %v256_v57 }
  0x8e   :  { %1332 = vmatprep.subr.bf16.mxu0 %v11371_v5  ;;  %1438 = vmatprep.subr.bf16.mxu1 %v11373_v6  ;;  %v264_v1 = vld [vmem:[#allocation4 + $0x420] sm:$0xff]  ;;  %v11428_v5 = vcombine.low %v253_v58, %v257_v59  ;;  %v11437_v7 = vcombine.high %v261_v2, %v265_v3  ;;  %v305_v47 = vld [vmem:[#allocation4 + $0x568] sm:$0xff] }
  0x8f   :  { %v11435_v6 = vcombine.high %v260_v0, %v264_v1  ;;  %v268_v8 = vld [vmem:[#allocation4 + $0x440] sm:$0xff]  ;;  %v313_v55 = vld [vmem:[#allocation4 + $0x5a8] sm:$0xff] }
  0x90   :  { %v272_v9 = vld [vmem:[#allocation4 + $0x460] sm:$0xff] }
  0x91   :  { %1333 = vmatpush1.bf16.msra.mxu0 %v11370_v11  ;;  %1439 = vmatpush1.bf16.msra.mxu1 %v11372_v12  ;;  %v13562_v10 = vld [vmem:[%s15543_s0] ss:$12 sps:$4 sm:$0xff]   ;;  %v11443_v15 = vcombine.high %v268_v8, %v272_v9  ;;  %v11442_v22 = vcombine.low %v268_v8, %v272_v9  ;;  %v139_v8 = vld [vmem:[#allocation4 + $0x38] sm:$0xff] }
  0x92   :  { %1334 = vmatprep.subr.bf16.mxu0 %v11379_v13  ;;  %1440 = vmatprep.subr.bf16.mxu1 %v11381_v14  ;;  %v269_v11 = vld [vmem:[#allocation4 + $0x448] sm:$0xff]  ;;  %v11434_v13 = vcombine.low %v260_v0, %v264_v1  ;;  %v11436_v14 = vcombine.low %v261_v2, %v265_v3  ;;  %v276_v17 = vld [vmem:[#allocation4 + $0x480] sm:$0xff] }
  0x93   :  { %v273_v12 = vld [vmem:[#allocation4 + $0x468] sm:$0xff]  ;;  %v280_v18 = vld [vmem:[#allocation4 + $0x4a0] sm:$0xff] }
  0x94   :  { %v11445_v16 = vcombine.high %v269_v11, %v273_v12  ;;  %v11451_v24 = vcombine.high %v276_v17, %v280_v18  ;;  %v284_v25 = vld [vmem:[#allocation4 + $0x4c0] sm:$0xff]  ;;  %v11450_v31 = vcombine.low %v276_v17, %v280_v18  ;;  %v321_v0 = vld [vmem:[#allocation4 + $0x5e8] sm:$0xff]  ;;  %v143_v17 = vld [vmem:[#allocation4 + $0x58] sm:$0xff] }
  0x95   :  { %1335 = vmatpush1.bf16.msra.mxu0 %v11378_v19  ;;  %1441 = vmatpush1.bf16.msra.mxu1 %v11380_v20  ;;  %v13567_v19 = vld [vmem:[%s15543_s0 + $0x1c] ss:$12 sps:$4 sm:$0xff]   ;;  %v292_v34 = vld [vmem:[#allocation4 + $0x500] sm:$0xff] }
  0x96   :  { %1336 = vmatprep.subr.bf16.mxu0 %v11387_v21  ;;  %1442 = vmatprep.subr.bf16.mxu1 %v11389_v23  ;;  %v277_v20 = vld [vmem:[#allocation4 + $0x488] sm:$0xff]  ;;  %v11444_v23 = vcombine.low %v269_v11, %v273_v12  ;;  %v147_v18 = vld [vmem:[#allocation4 + $0x78] sm:$0xff] }
  0x97   :  { %v281_v21 = vld [vmem:[#allocation4 + $0x4a8] sm:$0xff] }
  0x98   :  { %v11453_v26 = vcombine.high %v277_v20, %v281_v21  ;;  %v11452_v32 = vcombine.low %v277_v20, %v281_v21 }
  0x99   :  { %1337 = vmatpush1.bf16.msra.mxu0 %v11386_v27  ;;  %1443 = vmatpush1.bf16.msra.mxu1 %v11388_v28  ;;  %v288_v27 = vld [vmem:[#allocation4 + $0x4e0] sm:$0xff]  ;;  %v285_v28 = vld [vmem:[#allocation4 + $0x4c8] sm:$0xff] }
  0x9a   :  { %1338 = vmatprep.subr.bf16.mxu0 %v11395_v29  ;;  %1444 = vmatprep.subr.bf16.mxu1 %v11397_v30  ;;  %v289_v29 = vld [vmem:[#allocation4 + $0x4e8] sm:$0xff]  ;;  %v13576_v30 = vld [vmem:[%s15543_s0 + $0x18] ss:$12 sps:$4 sm:$0xff]   ;;  %v11459_v33 = vcombine.high %v284_v25, %v288_v27  ;;  %v11458_v39 = vcombine.low %v284_v25, %v288_v27  ;;  %v154_v25 = vld [vmem:[#allocation4 + $0xb0] sm:$0xff] }
  0x9b   :  { %v11460_v40 = vcombine.low %v285_v28, %v289_v29  ;;  %v155_v27 = vld [vmem:[#allocation4 + $0xb8] sm:$0xff] }
  0x9d   :  { %1339 = vmatpush1.bf16.msra.mxu0 %v11394_v35  ;;  %1445 = vmatpush1.bf16.msra.mxu1 %v11396_v36  ;;  %v11461_v35 = vcombine.high %v285_v28, %v289_v29  ;;  %v296_v36 = vld [vmem:[#allocation4 + $0x520] sm:$0xff]  ;;  %v11320_v29 = vcombine.low %v143_v17, %v147_v18 }
  0x9e   :  { %1340 = vmatprep.subr.bf16.mxu0 %v11403_v37  ;;  %1446 = vmatprep.subr.bf16.mxu1 %v11405_v38  ;;  %v293_v37 = vld [vmem:[#allocation4 + $0x508] sm:$0xff]  ;;  %v11467_v41 = vcombine.high %v292_v34, %v296_v36  ;;  %v11466_v48 = vcombine.low %v292_v34, %v296_v36  ;;  %v162_v34 = vld [vmem:[#allocation4 + $0xf0] sm:$0xff]  ;;  %v159_v36 = vld [vmem:[#allocation4 + $0xd8] sm:$0xff] }
  0x9f   :  { %v297_v38 = vld [vmem:[#allocation4 + $0x528] sm:$0xff] }
  0xa0   :  { %v11469_v42 = vcombine.high %v293_v37, %v297_v38  ;;  %v11468_v49 = vcombine.low %v293_v37, %v297_v38  ;;  %v163_v37 = vld [vmem:[#allocation4 + $0xf8] sm:$0xff] }
  0xa1   :  { %1341 = vmatpush1.bf16.msra.mxu0 %v11402_v43  ;;  %1447 = vmatpush1.bf16.msra.mxu1 %v11404_v44  ;;  %v300_v43 = vld [vmem:[#allocation4 + $0x540] sm:$0xff] }
  0xa2   :  { %1342 = vmatprep.subr.bf16.mxu0 %v11411_v45  ;;  %1448 = vmatprep.subr.bf16.mxu1 %v11413_v46  ;;  %v304_v44 = vld [vmem:[#allocation4 + $0x560] sm:$0xff]  ;;  %v13378_v45 = vmov 0   ;;  %v301_v46 = vld [vmem:[#allocation4 + $0x548] sm:$0xff] }
  0xa3   :  { %v11475_v50 = vcombine.high %v300_v43, %v304_v44  ;;  %v11474_v57 = vcombine.low %v300_v43, %v304_v44  ;;  %v11476_v58 = vcombine.low %v301_v46, %v305_v47  ;;  %v170_v43 = vld [vmem:[#allocation4 + $0x130] sm:$0xff]  ;;  %v167_v44 = vld [vmem:[#allocation4 + $0x118] sm:$0xff] }
  0xa5   :  { %1343 = vmatpush1.bf16.msra.mxu0 %v11410_v51  ;;  %1449 = vmatpush1.bf16.msra.mxu1 %v11412_v52  ;;  %v11477_v51 = vcombine.high %v301_v46, %v305_v47  ;;  %v308_v52 = vld [vmem:[#allocation4 + $0x580] sm:$0xff]  ;;  %v171_v46 = vld [vmem:[#allocation4 + $0x138] sm:$0xff] }
  0xa6   :  { %1344 = vmatprep.subr.bf16.mxu0 %v11419_v53  ;;  %1450 = vmatprep.subr.bf16.mxu1 %v11421_v54  ;;  %v312_v53 = vld [vmem:[#allocation4 + $0x5a0] sm:$0xff]  ;;  %v309_v54 = vld [vmem:[#allocation4 + $0x588] sm:$0xff] }
  0xa7   :  { %v11483_v59 = vcombine.high %v308_v52, %v312_v53  ;;  %v11482_v1 = vcombine.low %v308_v52, %v312_v53  ;;  %v11484_v2 = vcombine.low %v309_v54, %v313_v55  ;;  %v178_v52 = vld [vmem:[#allocation4 + $0x170] sm:$0xff]  ;;  %v175_v53 = vld [vmem:[#allocation4 + $0x158] sm:$0xff] }
  0xa9   :  { %1345 = vmatpush1.bf16.msra.mxu0 %v11418_v60  ;;  %1451 = vmatpush1.bf16.msra.mxu1 %v11420_v61  ;;  %v11485_v60 = vcombine.high %v309_v54, %v313_v55  ;;  %v316_v61 = vld [vmem:[#allocation4 + $0x5c0] sm:$0xff]  ;;  %v179_v54 = vld [vmem:[#allocation4 + $0x178] sm:$0xff] }
  0xaa   :  { %1346 = vmatprep.subr.bf16.mxu0 %v11427_v62  ;;  %1452 = vmatprep.subr.bf16.mxu1 %v11429_v63  ;;  %v320_v62 = vld [vmem:[#allocation4 + $0x5e0] sm:$0xff]  ;;  %v317_v63 = vld [vmem:[#allocation4 + $0x5c8] sm:$0xff] }
  0xab   :  { %v11491_v3 = vcombine.high %v316_v61, %v320_v62  ;;  %v11490_v9 = vcombine.low %v316_v61, %v320_v62  ;;  %v11492_v11 = vcombine.low %v317_v63, %v321_v0  ;;  %v186_v61 = vld [vmem:[#allocation4 + $0x1b0] sm:$0xff]  ;;  %v183_v62 = vld [vmem:[#allocation4 + $0x198] sm:$0xff] }
  0xad   :  { %1347 = vmatpush1.bf16.msra.mxu0 %v11426_v4  ;;  %1453 = vmatpush1.bf16.msra.mxu1 %v11428_v5  ;;  %v11493_v4 = vcombine.high %v317_v63, %v321_v0  ;;  %v134_v5 = vld [vmem:[#allocation4 + $0x10] sm:$0xff]  ;;  %v187_v63 = vld [vmem:[#allocation4 + $0x1b8] sm:$0xff] }
  0xae   :  { %1369 = vmatprep.subr.bf16.mxu0 %v11435_v6  ;;  %1475 = vmatprep.subr.bf16.mxu1 %v11437_v7  ;;  %v138_v6 = vld [vmem:[#allocation4 + $0x30] sm:$0xff]  ;;  %v135_v7 = vld [vmem:[#allocation4 + $0x18] sm:$0xff] }
  0xaf   :  { %v11311_v12 = vcombine.high %v134_v5, %v138_v6  ;;  %v11310_v20 = vcombine.low %v134_v5, %v138_v6  ;;  %v11312_v21 = vcombine.low %v135_v7, %v139_v8  ;;  %v191_v5 = vld [vmem:[#allocation4 + $0x1d8] sm:$0xff] }
  0xb0   :  { %1349 = vmatmul.mubr.bf16.vlgmr.msra.gmra.mrb[0].mxu0 %v13562_v10  ;;  %1455 = vmatmul.mubr.bf16.vlgmr.msra.gmra.mrb[0].mxu1 %v13562_v10  ;;  %v195_v6 = vld [vmem:[#allocation4 + $0x1f8] sm:$0xff] }
  0xb1   :  { %1370 = vmatpush1.bf16.msra.mxu0 %v11434_v13  ;;  %1476 = vmatpush1.bf16.msra.mxu1 %v11436_v14  ;;  %v11313_v13 = vcombine.high %v135_v7, %v139_v8  ;;  %v142_v14 = vld [vmem:[#allocation4 + $0x50] sm:$0xff]  ;;  %v11360_v8 = vcombine.low %v183_v62, %v187_v63 }
  0xb2   :  { %1371 = vmatprep.subr.bf16.mxu0 %v11443_v15  ;;  %1477 = vmatprep.subr.bf16.mxu1 %v11445_v16  ;;  %v146_v15 = vld [vmem:[#allocation4 + $0x70] sm:$0xff] }
  0xb3   :  { %1358 = vmatprep.mubr.bf16.mxu0 %v13567_v19  ;;  %1464 = vmatprep.mubr.bf16.mxu1 %v13567_v19  ;;  %v13585_v16 = vld [vmem:[%s15543_s0 + $0x8] ss:$12 sps:$4 sm:$0xff]   ;;  %v11318_v28 = vcombine.low %v142_v14, %v146_v15 }
  0xb5   :  { %1372 = vmatpush1.bf16.msra.mxu0 %v11442_v22  ;;  %1478 = vmatpush1.bf16.msra.mxu1 %v11444_v23  ;;  %v11319_v22 = vcombine.high %v142_v14, %v146_v15  ;;  %v11321_v23 = vcombine.high %v143_v17, %v147_v18  ;;  %v199_v14 = vld [vmem:[#allocation4 + $0x218] sm:$0xff]  ;;  %v11368_v18 = vcombine.low %v191_v5, %v195_v6 }
  0xb6   :  { %1373 = vmatprep.subr.bf16.mxu0 %v11451_v24  ;;  %1479 = vmatprep.subr.bf16.mxu1 %v11453_v26  ;;  %v150_v24 = vld [vmem:[#allocation4 + $0x90] sm:$0xff]  ;;  %v151_v26 = vld [vmem:[#allocation4 + $0x98] sm:$0xff] }
  0xb7   :  { %v11326_v38 = vcombine.low %v150_v24, %v154_v25  ;;  %v203_v15 = vld [vmem:[#allocation4 + $0x238] sm:$0xff] }
  0xb8   :  { %1359 = vmatmul.mubr.bf16.gmra.mrb[4].mxu0 %v13576_v30  ;;  %1465 = vmatmul.mubr.bf16.gmra.mrb[4].mxu1 %v13576_v30 }
  0xb9   :  { %1374 = vmatpush1.bf16.msra.mxu0 %v11450_v31  ;;  %1480 = vmatpush1.bf16.msra.mxu1 %v11452_v32  ;;  %v11327_v31 = vcombine.high %v150_v24, %v154_v25  ;;  %v11329_v32 = vcombine.high %v151_v26, %v155_v27  ;;  %v207_v24 = vld [vmem:[#allocation4 + $0x258] sm:$0xff] }
  0xba   :  { %1375 = vmatprep.subr.bf16.mxu0 %v11459_v33  ;;  %1481 = vmatprep.subr.bf16.mxu1 %v11461_v35  ;;  %v158_v33 = vld [vmem:[#allocation4 + $0xd0] sm:$0xff]  ;;  %v13594_v35 = vld [vmem:[%s15543_s0 + $0x20] ss:$12 sps:$4 sm:$0xff]   ;;  %v211_v25 = vld [vmem:[#allocation4 + $0x278] sm:$0xff] }
  0xbb   :  { %1401 = vmatprep.mubr.bf16.mxu0 %v13378_v45  ;;  %1507 = vmatprep.mubr.bf16.mxu1 %v13378_v45  ;;  %v11334_v47 = vcombine.low %v158_v33, %v162_v34 }
  0xbd   :  { %1376 = vmatpush1.bf16.msra.mxu0 %v11458_v39  ;;  %1482 = vmatpush1.bf16.msra.mxu1 %v11460_v40  ;;  %v11328_v39 = vcombine.low %v151_v26, %v155_v27  ;;  %v11335_v40 = vcombine.high %v158_v33, %v162_v34  ;;  %v11376_v27 = vcombine.low %v199_v14, %v203_v15  ;;  %v215_v33 = vld [vmem:[#allocation4 + $0x298] sm:$0xff] }
  0xbe   :  { %1377 = vmatprep.subr.bf16.mxu0 %v11467_v41  ;;  %1483 = vmatprep.subr.bf16.mxu1 %v11469_v42  ;;  %v11337_v41 = vcombine.high %v159_v36, %v163_v37  ;;  %v166_v42 = vld [vmem:[#allocation4 + $0x110] sm:$0xff]  ;;  %v219_v34 = vld [vmem:[#allocation4 + $0x2b8] sm:$0xff] }
  0xbf   :  { %v11342_v55 = vcombine.low %v166_v42, %v170_v43 }
  0xc1   :  { %1378 = vmatpush1.bf16.msra.mxu0 %v11466_v48  ;;  %1484 = vmatpush1.bf16.msra.mxu1 %v11468_v49  ;;  %v11336_v48 = vcombine.low %v159_v36, %v163_v37  ;;  %v11343_v49 = vcombine.high %v166_v42, %v170_v43  ;;  %v11384_v37 = vcombine.low %v207_v24, %v211_v25  ;;  %v223_v42 = vld [vmem:[#allocation4 + $0x2d8] sm:$0xff] }
  0xc2   :  { %1379 = vmatprep.subr.bf16.mxu0 %v11475_v50  ;;  %1485 = vmatprep.subr.bf16.mxu1 %v11477_v51  ;;  %v11345_v50 = vcombine.high %v167_v44, %v171_v46  ;;  %v174_v51 = vld [vmem:[#allocation4 + $0x150] sm:$0xff]  ;;  %v227_v43 = vld [vmem:[#allocation4 + $0x2f8] sm:$0xff] }
  0xc3   :  { %v11350_v0 = vcombine.low %v174_v51, %v178_v52 }
  0xc5   :  { %1380 = vmatpush1.bf16.msra.mxu0 %v11474_v57  ;;  %1486 = vmatpush1.bf16.msra.mxu1 %v11476_v58  ;;  %v11344_v57 = vcombine.low %v167_v44, %v171_v46  ;;  %v11351_v58 = vcombine.high %v174_v51, %v178_v52  ;;  %v11392_v46 = vcombine.low %v215_v33, %v219_v34  ;;  %v231_v51 = vld [vmem:[#allocation4 + $0x318] sm:$0xff] }
  0xc6   :  { %1381 = vmatprep.subr.bf16.mxu0 %v11483_v59  ;;  %1487 = vmatprep.subr.bf16.mxu1 %v11485_v60  ;;  %v11353_v59 = vcombine.high %v175_v53, %v179_v54  ;;  %v182_v60 = vld [vmem:[#allocation4 + $0x190] sm:$0xff]  ;;  %v235_v52 = vld [vmem:[#allocation4 + $0x338] sm:$0xff] }
  0xc7   :  { %v11358_v7 = vcombine.low %v182_v60, %v186_v61 }
  0xc9   :  { %1382 = vmatpush1.bf16.msra.mxu0 %v11482_v1  ;;  %1488 = vmatpush1.bf16.msra.mxu1 %v11484_v2  ;;  %v11352_v1 = vcombine.low %v175_v53, %v179_v54  ;;  %v11359_v2 = vcombine.high %v182_v60, %v186_v61  ;;  %v11400_v54 = vcombine.low %v223_v42, %v227_v43  ;;  %v239_v60 = vld [vmem:[#allocation4 + $0x358] sm:$0xff] }
  0xca   :  { %1383 = vmatprep.subr.bf16.mxu0 %v11491_v3  ;;  %1489 = vmatprep.subr.bf16.mxu1 %v11493_v4  ;;  %v190_v3 = vld [vmem:[#allocation4 + $0x1d0] sm:$0xff]  ;;  %v243_v61 = vld [vmem:[#allocation4 + $0x378] sm:$0xff] }
  0xcb   :  { %v194_v4 = vld [vmem:[#allocation4 + $0x1f0] sm:$0xff] }
  0xcc   :  { %v11366_v17 = vcombine.low %v190_v3, %v194_v4 }
  0xcd   :  { %1384 = vmatpush1.bf16.msra.mxu0 %v11490_v9  ;;  %1490 = vmatpush1.bf16.msra.mxu1 %v11492_v11  ;;  %v11367_v9 = vcombine.high %v190_v3, %v194_v4  ;;  %v11369_v11 = vcombine.high %v191_v5, %v195_v6  ;;  %v247_v3 = vld [vmem:[#allocation4 + $0x398] sm:$0xff]  ;;  %v11416_v6 = vcombine.low %v239_v60, %v243_v61 }
  0xce   :  { %1528 = vmatprep.subr.bf16.mxu0 %v11311_v12  ;;  %1634 = vmatprep.subr.bf16.mxu1 %v11313_v13  ;;  %v198_v12 = vld [vmem:[#allocation4 + $0x210] sm:$0xff]  ;;  %v251_v4 = vld [vmem:[#allocation4 + $0x3b8] sm:$0xff] }
  0xcf   :  { %v202_v13 = vld [vmem:[#allocation4 + $0x230] sm:$0xff] }
  0xd0   :  { %1402 = vmatmul.mubr.bf16.vlgmr.msra.gmra.mrb[0].mxu0 %v13585_v16  ;;  %1508 = vmatmul.mubr.bf16.vlgmr.msra.gmra.mrb[0].mxu1 %v13585_v16  ;;  %v11374_v26 = vcombine.low %v198_v12, %v202_v13 }
  0xd1   :  { %1529 = vmatpush1.bf16.msra.mxu0 %v11310_v20  ;;  %1635 = vmatpush1.bf16.msra.mxu1 %v11312_v21  ;;  %v11375_v20 = vcombine.high %v198_v12, %v202_v13  ;;  %v11377_v21 = vcombine.high %v199_v14, %v203_v15  ;;  %v255_v12 = vld [vmem:[#allocation4 + $0x3d8] sm:$0xff]  ;;  %v11424_v15 = vcombine.low %v247_v3, %v251_v4 }
  0xd2   :  { %1530 = vmatprep.subr.bf16.mxu0 %v11319_v22  ;;  %1636 = vmatprep.subr.bf16.mxu1 %v11321_v23  ;;  %v206_v22 = vld [vmem:[#allocation4 + $0x250] sm:$0xff]  ;;  %v259_v13 = vld [vmem:[#allocation4 + $0x3f8] sm:$0xff] }
  0xd3   :  { %1411 = vmatprep.mubr.bf16.mxu0 %v13378_v45  ;;  %1517 = vmatprep.mubr.bf16.mxu1 %v13378_v45  ;;  %v210_v23 = vld [vmem:[#allocation4 + $0x270] sm:$0xff] }
  0xd4   :  { %v11382_v36 = vcombine.low %v206_v22, %v210_v23 }
  0xd5   :  { %1531 = vmatpush1.bf16.msra.mxu0 %v11318_v28  ;;  %1637 = vmatpush1.bf16.msra.mxu1 %v11320_v29  ;;  %v11383_v28 = vcombine.high %v206_v22, %v210_v23  ;;  %v11385_v29 = vcombine.high %v207_v24, %v211_v25  ;;  %v263_v22 = vld [vmem:[#allocation4 + $0x418] sm:$0xff]  ;;  %v11432_v25 = vcombine.low %v255_v12, %v259_v13 }
  0xd6   :  { %1532 = vmatprep.subr.bf16.mxu0 %v11327_v31  ;;  %1638 = vmatprep.subr.bf16.mxu1 %v11329_v32  ;;  %v214_v31 = vld [vmem:[#allocation4 + $0x290] sm:$0xff]  ;;  %v267_v23 = vld [vmem:[#allocation4 + $0x438] sm:$0xff] }
  0xd7   :  { %v218_v32 = vld [vmem:[#allocation4 + $0x2b0] sm:$0xff] }
  0xd8   :  { %1412 = vmatmul.mubr.bf16.gmra.mrb[4].mxu0 %v13594_v35  ;;  %1518 = vmatmul.mubr.bf16.gmra.mrb[4].mxu1 %v13594_v35  ;;  %v11390_v44 = vcombine.low %v214_v31, %v218_v32 }
  0xd9   :  { %1533 = vmatpush1.bf16.msra.mxu0 %v11326_v38  ;;  %1639 = vmatpush1.bf16.msra.mxu1 %v11328_v39  ;;  %v11391_v38 = vcombine.high %v214_v31, %v218_v32  ;;  %v11393_v39 = vcombine.high %v215_v33, %v219_v34  ;;  %v271_v31 = vld [vmem:[#allocation4 + $0x458] sm:$0xff]  ;;  %v11440_v34 = vcombine.low %v263_v22, %v267_v23 }
  0xda   :  { %1534 = vmatprep.subr.bf16.mxu0 %v11335_v40  ;;  %1640 = vmatprep.subr.bf16.mxu1 %v11337_v41  ;;  %v222_v40 = vld [vmem:[#allocation4 + $0x2d0] sm:$0xff]  ;;  %v275_v32 = vld [vmem:[#allocation4 + $0x478] sm:$0xff] }
  0xdb   :  { %1560 = vmatprep.mubr.bf16.mxu0 %v13555_v56  ;;  %1666 = vmatprep.mubr.bf16.mxu1 %v13555_v56  ;;  %v11361_v56 = vcombine.high %v183_v62, %v187_v63  ;;  %v226_v41 = vld [vmem:[#allocation4 + $0x2f0] sm:$0xff]  ;;  %v11408_v63 = vcombine.low %v231_v51, %v235_v52 }
  0xdc   :  { %v11398_v53 = vcombine.low %v222_v40, %v226_v41 }
  0xdd   :  { %1535 = vmatpush1.bf16.msra.mxu0 %v11334_v47  ;;  %1641 = vmatpush1.bf16.msra.mxu1 %v11336_v48  ;;  %v11399_v47 = vcombine.high %v222_v40, %v226_v41  ;;  %v11401_v48 = vcombine.high %v223_v42, %v227_v43  ;;  %v279_v40 = vld [vmem:[#allocation4 + $0x498] sm:$0xff]  ;;  %v11448_v43 = vcombine.low %v271_v31, %v275_v32 }
  0xde   :  { %1536 = vmatprep.subr.bf16.mxu0 %v11343_v49  ;;  %1642 = vmatprep.subr.bf16.mxu1 %v11345_v50  ;;  %v230_v49 = vld [vmem:[#allocation4 + $0x310] sm:$0xff]  ;;  %v283_v41 = vld [vmem:[#allocation4 + $0x4b8] sm:$0xff] }
  0xdf   :  { %v234_v50 = vld [vmem:[#allocation4 + $0x330] sm:$0xff] }
  0xe0   :  { %v11406_v62 = vcombine.low %v230_v49, %v234_v50 }
  0xe1   :  { %1537 = vmatpush1.bf16.msra.mxu0 %v11342_v55  ;;  %1643 = vmatpush1.bf16.msra.mxu1 %v11344_v57  ;;  %v11407_v55 = vcombine.high %v230_v49, %v234_v50  ;;  %v11409_v57 = vcombine.high %v231_v51, %v235_v52  ;;  %v287_v49 = vld [vmem:[#allocation4 + $0x4d8] sm:$0xff] }
  0xe2   :  { %1538 = vmatprep.subr.bf16.mxu0 %v11351_v58  ;;  %1644 = vmatprep.subr.bf16.mxu1 %v11353_v59  ;;  %v238_v58 = vld [vmem:[#allocation4 + $0x350] sm:$0xff]  ;;  %v291_v50 = vld [vmem:[#allocation4 + $0x4f8] sm:$0xff] }
  0xe3   :  { %v242_v59 = vld [vmem:[#allocation4 + $0x370] sm:$0xff] }
  0xe4   :  { %v11414_v5 = vcombine.low %v238_v58, %v242_v59 }
  0xe5   :  { %1539 = vmatpush1.bf16.msra.mxu0 %v11350_v0  ;;  %1645 = vmatpush1.bf16.msra.mxu1 %v11352_v1  ;;  %v11415_v0 = vcombine.high %v238_v58, %v242_v59  ;;  %v11417_v1 = vcombine.high %v239_v60, %v243_v61  ;;  %v299_v58 = vld [vmem:[#allocation4 + $0x538] sm:$0xff] }
  0xe6   :  { %1540 = vmatprep.subr.bf16.mxu0 %v11359_v2  ;;  %1646 = vmatprep.subr.bf16.mxu1 %v11361_v56  ;;  %v246_v2 = vld [vmem:[#allocation4 + $0x390] sm:$0xff] }
  0xe7   :  { %v250_v56 = vld [vmem:[#allocation4 + $0x3b0] sm:$0xff] }
  0xe8   :  { %v11422_v14 = vcombine.low %v246_v2, %v250_v56 }
  0xe9   :  { %1541 = vmatpush1.bf16.msra.mxu0 %v11358_v7  ;;  %1647 = vmatpush1.bf16.msra.mxu1 %v11360_v8  ;;  %v11423_v7 = vcombine.high %v246_v2, %v250_v56  ;;  %v11425_v8 = vcombine.high %v247_v3, %v251_v4  ;;  %v310_v4 = vld [vmem:[#allocation4 + $0x590] sm:$0xff] }
  0xea   :  { %1542 = vmatprep.subr.bf16.mxu0 %v11367_v9  ;;  %1648 = vmatprep.subr.bf16.mxu1 %v11369_v11  ;;  %v254_v9 = vld [vmem:[#allocation4 + $0x3d0] sm:$0xff] }
  0xeb   :  { %v258_v11 = vld [vmem:[#allocation4 + $0x3f0] sm:$0xff] }
  0xec   :  { %v11430_v24 = vcombine.low %v254_v9, %v258_v11 }
  0xed   :  { %1543 = vmatpush1.bf16.msra.mxu0 %v11366_v17  ;;  %1649 = vmatpush1.bf16.msra.mxu1 %v11368_v18  ;;  %v11431_v17 = vcombine.high %v254_v9, %v258_v11  ;;  %v11433_v18 = vcombine.high %v255_v12, %v259_v13  ;;  %v318_v13 = vld [vmem:[#allocation4 + $0x5d0] sm:$0xff] }
  0xee   :  { %1544 = vmatprep.subr.bf16.mxu0 %v11375_v20  ;;  %1650 = vmatprep.subr.bf16.mxu1 %v11377_v21  ;;  %v262_v20 = vld [vmem:[#allocation4 + $0x410] sm:$0xff] }
  0xef   :  { %v266_v21 = vld [vmem:[#allocation4 + $0x430] sm:$0xff] }
  0xf0   :  { %v11438_v33 = vcombine.low %v262_v20, %v266_v21 }
  0xf1   :  { %1545 = vmatpush1.bf16.msra.mxu0 %v11374_v26  ;;  %1651 = vmatpush1.bf16.msra.mxu1 %v11376_v27  ;;  %v11439_v26 = vcombine.high %v262_v20, %v266_v21  ;;  %v11441_v27 = vcombine.high %v263_v22, %v267_v23  ;;  %v1780_v23 = vld [vmem:[#allocation4] sm:$0xff] }
  0xf2   :  { %1546 = vmatprep.subr.bf16.mxu0 %v11383_v28  ;;  %1652 = vmatprep.subr.bf16.mxu1 %v11385_v29  ;;  %v270_v28 = vld [vmem:[#allocation4 + $0x450] sm:$0xff] }
  0xf3   :  { %v274_v29 = vld [vmem:[#allocation4 + $0x470] sm:$0xff] }
  0xf4   :  { %v11446_v42 = vcombine.low %v270_v28, %v274_v29 }
  0xf5   :  { %1547 = vmatpush1.bf16.msra.mxu0 %v11382_v36  ;;  %1653 = vmatpush1.bf16.msra.mxu1 %v11384_v37  ;;  %v11447_v36 = vcombine.high %v270_v28, %v274_v29  ;;  %v11449_v37 = vcombine.high %v271_v31, %v275_v32  ;;  %v1788_v32 = vld [vmem:[#allocation4 + $0x40] sm:$0xff] }
  0xf6   :  { %1548 = vmatprep.subr.bf16.mxu0 %v11391_v38  ;;  %1654 = vmatprep.subr.bf16.mxu1 %v11393_v39  ;;  %v278_v38 = vld [vmem:[#allocation4 + $0x490] sm:$0xff] }
  0xf7   :  { %v282_v39 = vld [vmem:[#allocation4 + $0x4b0] sm:$0xff] }
  0xf8   :  { %v11454_v51 = vcombine.low %v278_v38, %v282_v39 }
  0xf9   :  { %1549 = vmatpush1.bf16.msra.mxu0 %v11390_v44  ;;  %1655 = vmatpush1.bf16.msra.mxu1 %v11392_v46  ;;  %v11455_v44 = vcombine.high %v278_v38, %v282_v39  ;;  %v11457_v46 = vcombine.high %v279_v40, %v283_v41 }
  0xfa   :  { %1550 = vmatprep.subr.bf16.mxu0 %v11399_v47  ;;  %1656 = vmatprep.subr.bf16.mxu1 %v11401_v48  ;;  %v286_v47 = vld [vmem:[#allocation4 + $0x4d0] sm:$0xff] }
  0xfb   :  { %v290_v48 = vld [vmem:[#allocation4 + $0x4f0] sm:$0xff] }
  0xfc   :  { %v11463_v52 = vcombine.high %v286_v47, %v290_v48  ;;  %v11462_v59 = vcombine.low %v286_v47, %v290_v48 }
  0xfd   :  { %1551 = vmatpush1.bf16.msra.mxu0 %v11398_v53  ;;  %1657 = vmatpush1.bf16.msra.mxu1 %v11400_v54  ;;  %v11465_v53 = vcombine.high %v287_v49, %v291_v50  ;;  %v294_v54 = vld [vmem:[#allocation4 + $0x510] sm:$0xff] }
  0xfe   :  { %1552 = vmatprep.subr.bf16.mxu0 %v11407_v55  ;;  %1658 = vmatprep.subr.bf16.mxu1 %v11409_v57  ;;  %v298_v55 = vld [vmem:[#allocation4 + $0x530] sm:$0xff]  ;;  %v295_v57 = vld [vmem:[#allocation4 + $0x518] sm:$0xff] }
  0xff   :  { %v11471_v60 = vcombine.high %v294_v54, %v298_v55  ;;  %v11473_v61 = vcombine.high %v295_v57, %v299_v58  ;;  %v11470_v2 = vcombine.low %v294_v54, %v298_v55  ;;  %v11472_v56 = vcombine.low %v295_v57, %v299_v58  ;;  %v1812_v57 = vld [vmem:[#allocation4 + $0x100] sm:$0xff] }
 0x100   :  { %v1816_v58 = vld [vmem:[#allocation4 + $0x120] sm:$0xff] }
 0x101   :  { %1553 = vmatpush1.bf16.msra.mxu0 %v11406_v62  ;;  %1659 = vmatpush1.bf16.msra.mxu1 %v11408_v63  ;;  %v302_v62 = vld [vmem:[#allocation4 + $0x550] sm:$0xff] }
 0x102   :  { %1554 = vmatprep.subr.bf16.mxu0 %v11415_v0  ;;  %1660 = vmatprep.subr.bf16.mxu1 %v11417_v1  ;;  %v306_v63 = vld [vmem:[#allocation4 + $0x570] sm:$0xff]  ;;  %v303_v0 = vld [vmem:[#allocation4 + $0x558] sm:$0xff] }
 0x103   :  { %v307_v1 = vld [vmem:[#allocation4 + $0x578] sm:$0xff] }
 0x104   :  { %v11481_v3 = vcombine.high %v303_v0, %v307_v1  ;;  %v11480_v9 = vcombine.low %v303_v0, %v307_v1  ;;  %v1820_v1 = vld [vmem:[#allocation4 + $0x140] sm:$0xff] }
 0x105   :  { %1555 = vmatpush1.bf16.msra.mxu0 %v11414_v5  ;;  %1661 = vmatpush1.bf16.msra.mxu1 %v11416_v6  ;;  %v314_v5 = vld [vmem:[#allocation4 + $0x5b0] sm:$0xff]  ;;  %v311_v6 = vld [vmem:[#allocation4 + $0x598] sm:$0xff] }
 0x106   :  { %1556 = vmatprep.subr.bf16.mxu0 %v11423_v7  ;;  %1662 = vmatprep.subr.bf16.mxu1 %v11425_v8  ;;  %v315_v7 = vld [vmem:[#allocation4 + $0x5b8] sm:$0xff]  ;;  %v11478_v8 = vcombine.low %v302_v62, %v306_v63  ;;  %v11487_v11 = vcombine.high %v310_v4, %v314_v5 }
 0x107   :  { %v11489_v12 = vcombine.high %v311_v6, %v315_v7  ;;  %v11488_v20 = vcombine.low %v311_v6, %v315_v7  ;;  %v1828_v6 = vld [vmem:[#allocation4 + $0x180] sm:$0xff] }
 0x108   :  { %v1832_v7 = vld [vmem:[#allocation4 + $0x1a0] sm:$0xff] }
 0x109   :  { %1557 = vmatpush1.bf16.msra.mxu0 %v11422_v14  ;;  %1663 = vmatpush1.bf16.msra.mxu1 %v11424_v15  ;;  %v322_v14 = vld [vmem:[#allocation4 + $0x5f0] sm:$0xff]  ;;  %v319_v15 = vld [vmem:[#allocation4 + $0x5d8] sm:$0xff] }
 0x10a   :  { %1558 = vmatprep.subr.bf16.mxu0 %v11431_v17  ;;  %1664 = vmatprep.subr.bf16.mxu1 %v11433_v18  ;;  %v323_v17 = vld [vmem:[#allocation4 + $0x5f8] sm:$0xff]  ;;  %v11486_v18 = vcombine.low %v310_v4, %v314_v5  ;;  %v11495_v21 = vcombine.high %v318_v13, %v322_v14 }
 0x10b   :  { %v11497_v22 = vcombine.high %v319_v15, %v323_v17  ;;  %v11496_v28 = vcombine.low %v319_v15, %v323_v17  ;;  %v1836_v15 = vld [vmem:[#allocation4 + $0x1c0] sm:$0xff] }
 0x10c   :  { %v1840_v17 = vld [vmem:[#allocation4 + $0x1e0] sm:$0xff] }
 0x10d   :  { %1559 = vmatpush1.bf16.msra.mxu0 %v11430_v24  ;;  %1665 = vmatpush1.bf16.msra.mxu1 %v11432_v25  ;;  %v1784_v24 = vld [vmem:[#allocation4 + $0x20] sm:$0xff]  ;;  %v1781_v25 = vld [vmem:[#allocation4 + $0x8] sm:$0xff] }
 0x10e   :  { %1581 = vmatprep.subr.bf16.mxu0 %v11439_v26  ;;  %1687 = vmatprep.subr.bf16.mxu1 %v11441_v27  ;;  %v1785_v26 = vld [vmem:[#allocation4 + $0x28] sm:$0xff]  ;;  %v11494_v27 = vcombine.low %v318_v13, %v322_v14  ;;  %v11505_v29 = vcombine.high %v1780_v23, %v1784_v24  ;;  %v11553_v13 = vcombine.high %v1828_v6, %v1832_v7 }
 0x10f   :  { %v11507_v31 = vcombine.high %v1781_v25, %v1785_v26  ;;  %v11506_v38 = vcombine.low %v1781_v25, %v1785_v26  ;;  %v1844_v25 = vld [vmem:[#allocation4 + $0x200] sm:$0xff] }
 0x110   :  { %1561 = vmatmul.mubr.bf16.vlgmr.msra.gmra.mrb[8].mxu0 %v13562_v10  ;;  %1667 = vmatmul.mubr.bf16.vlgmr.msra.gmra.mrb[8].mxu1 %v13562_v10  ;;  %v11456_v10 = vcombine.low %v279_v40, %v283_v41  ;;  %v1796_v41 = vld [vmem:[#allocation4 + $0x80] sm:$0xff] }
 0x111   :  { %1582 = vmatpush1.bf16.msra.mxu0 %v11438_v33  ;;  %1688 = vmatpush1.bf16.msra.mxu1 %v11440_v34  ;;  %v1792_v33 = vld [vmem:[#allocation4 + $0x60] sm:$0xff]  ;;  %v1789_v34 = vld [vmem:[#allocation4 + $0x48] sm:$0xff] }
 0x112   :  { %1583 = vmatprep.subr.bf16.mxu0 %v11447_v36  ;;  %1689 = vmatprep.subr.bf16.mxu1 %v11449_v37  ;;  %v1793_v36 = vld [vmem:[#allocation4 + $0x68] sm:$0xff]  ;;  %v11504_v37 = vcombine.low %v1780_v23, %v1784_v24  ;;  %v11513_v39 = vcombine.high %v1788_v32, %v1792_v33  ;;  %v11561_v23 = vcombine.high %v1836_v15, %v1840_v17  ;;  %v1848_v26 = vld [vmem:[#allocation4 + $0x220] sm:$0xff] }
 0x113   :  { %1570 = vmatprep.mubr.bf16.mxu0 %v13567_v19  ;;  %1676 = vmatprep.mubr.bf16.mxu1 %v13567_v19  ;;  %v11464_v19 = vcombine.low %v287_v49, %v291_v50  ;;  %v11515_v40 = vcombine.high %v1789_v34, %v1793_v36  ;;  %v11514_v47 = vcombine.low %v1789_v34, %v1793_v36  ;;  %v1804_v50 = vld [vmem:[#allocation4 + $0xc0] sm:$0xff] }
 0x114   :  { %v1852_v34 = vld [vmem:[#allocation4 + $0x240] sm:$0xff] }
 0x115   :  { %1584 = vmatpush1.bf16.msra.mxu0 %v11446_v42  ;;  %1690 = vmatpush1.bf16.msra.mxu1 %v11448_v43  ;;  %v1800_v42 = vld [vmem:[#allocation4 + $0xa0] sm:$0xff]  ;;  %v1797_v43 = vld [vmem:[#allocation4 + $0x88] sm:$0xff] }
 0x116   :  { %1585 = vmatprep.subr.bf16.mxu0 %v11455_v44  ;;  %1691 = vmatprep.subr.bf16.mxu1 %v11457_v46  ;;  %v1801_v44 = vld [vmem:[#allocation4 + $0xa8] sm:$0xff]  ;;  %v11512_v46 = vcombine.low %v1788_v32, %v1792_v33  ;;  %v11521_v48 = vcombine.high %v1796_v41, %v1800_v42  ;;  %v11569_v32 = vcombine.high %v1844_v25, %v1848_v26  ;;  %v1856_v36 = vld [vmem:[#allocation4 + $0x260] sm:$0xff] }
 0x117   :  { %v11523_v49 = vcombine.high %v1797_v43, %v1801_v44 }
 0x118   :  { %1571 = vmatmul.mubr.bf16.gmra.mrb[12].mxu0 %v13576_v30  ;;  %1677 = vmatmul.mubr.bf16.gmra.mrb[12].mxu1 %v13576_v30  ;;  %v11479_v30 = vcombine.high %v302_v62, %v306_v63  ;;  %v11537_v63 = vcombine.high %v1812_v57, %v1816_v58 }
 0x119   :  { %1586 = vmatpush1.bf16.msra.mxu0 %v11454_v51  ;;  %1692 = vmatpush1.bf16.msra.mxu1 %v11456_v10  ;;  %v1808_v51 = vld [vmem:[#allocation4 + $0xe0] sm:$0xff]  ;;  %v1805_v10 = vld [vmem:[#allocation4 + $0xc8] sm:$0xff] }
 0x11a   :  { %1587 = vmatprep.subr.bf16.mxu0 %v11463_v52  ;;  %1693 = vmatprep.subr.bf16.mxu1 %v11465_v53  ;;  %v1809_v52 = vld [vmem:[#allocation4 + $0xe8] sm:$0xff]  ;;  %v11520_v53 = vcombine.low %v1796_v41, %v1800_v42  ;;  %v11529_v54 = vcombine.high %v1804_v50, %v1808_v51  ;;  %v11577_v41 = vcombine.high %v1852_v34, %v1856_v36 }
 0x11b   :  { %1613 = vmatprep.mubr.bf16.mxu0 %v13378_v45  ;;  %1719 = vmatprep.mubr.bf16.mxu1 %v13378_v45  ;;  %v11531_v55 = vcombine.high %v1805_v10, %v1809_v52  ;;  %v11530_v62 = vcombine.low %v1805_v10, %v1809_v52  ;;  %v1868_v10 = vld [vmem:[#allocation4 + $0x2c0] sm:$0xff] }
 0x11c   :  { %v1872_v52 = vld [vmem:[#allocation4 + $0x2e0] sm:$0xff] }
 0x11d   :  { %1588 = vmatpush1.bf16.msra.mxu0 %v11462_v59  ;;  %1694 = vmatpush1.bf16.msra.mxu1 %v11464_v19  ;;  %v13615_v59 = vld [vmem:[%s15543_s0 + $0x34] ss:$12 sps:$4 sm:$0xff]   ;;  %v1813_v19 = vld [vmem:[#allocation4 + $0x108] sm:$0xff] }
 0x11e   :  { %1589 = vmatprep.subr.bf16.mxu0 %v11471_v60  ;;  %1695 = vmatprep.subr.bf16.mxu1 %v11473_v61  ;;  %v1817_v60 = vld [vmem:[#allocation4 + $0x128] sm:$0xff]  ;;  %v11528_v61 = vcombine.low %v1804_v50, %v1808_v51 }
 0x11f   :  { %v11539_v0 = vcombine.high %v1813_v19, %v1817_v60 }
 0x121   :  { %1590 = vmatpush1.bf16.msra.mxu0 %v11470_v2  ;;  %1696 = vmatpush1.bf16.msra.mxu1 %v11472_v56  ;;  %v1824_v2 = vld [vmem:[#allocation4 + $0x160] sm:$0xff]  ;;  %v1821_v56 = vld [vmem:[#allocation4 + $0x148] sm:$0xff] }
 0x122   :  { %1591 = vmatprep.subr.bf16.mxu0 %v11479_v30  ;;  %1697 = vmatprep.subr.bf16.mxu1 %v11481_v3  ;;  %v1825_v30 = vld [vmem:[#allocation4 + $0x168] sm:$0xff]  ;;  %v11536_v3 = vcombine.low %v1812_v57, %v1816_v58  ;;  %v11545_v4 = vcombine.high %v1820_v1, %v1824_v2  ;;  %v11593_v57 = vcombine.high %v1868_v10, %v1872_v52 }
 0x123   :  { %v11547_v5 = vcombine.high %v1821_v56, %v1825_v30 }
 0x125   :  { %1592 = vmatpush1.bf16.msra.mxu0 %v11478_v8  ;;  %1698 = vmatpush1.bf16.msra.mxu1 %v11480_v9  ;;  %v1829_v8 = vld [vmem:[#allocation4 + $0x188] sm:$0xff] }
 0x126   :  { %1593 = vmatprep.subr.bf16.mxu0 %v11487_v11  ;;  %1699 = vmatprep.subr.bf16.mxu1 %v11489_v12  ;;  %v1833_v9 = vld [vmem:[#allocation4 + $0x1a8] sm:$0xff]  ;;  %v11544_v11 = vcombine.low %v1820_v1, %v1824_v2  ;;  %v11546_v12 = vcombine.low %v1821_v56, %v1825_v30  ;;  %v1884_v56 = vld [vmem:[#allocation4 + $0x340] sm:$0xff] }
 0x127   :  { %v11555_v14 = vcombine.high %v1829_v8, %v1833_v9  ;;  %v1888_v30 = vld [vmem:[#allocation4 + $0x360] sm:$0xff] }
 0x129   :  { %1594 = vmatpush1.bf16.msra.mxu0 %v11486_v18  ;;  %1700 = vmatpush1.bf16.msra.mxu1 %v11488_v20  ;;  %v1837_v18 = vld [vmem:[#allocation4 + $0x1c8] sm:$0xff] }
 0x12a   :  { %1595 = vmatprep.subr.bf16.mxu0 %v11495_v21  ;;  %1701 = vmatprep.subr.bf16.mxu1 %v11497_v22  ;;  %v1841_v20 = vld [vmem:[#allocation4 + $0x1e8] sm:$0xff]  ;;  %v11552_v21 = vcombine.low %v1828_v6, %v1832_v7  ;;  %v11554_v22 = vcombine.low %v1829_v8, %v1833_v9  ;;  %v11609_v6 = vcombine.high %v1884_v56, %v1888_v30  ;;  %v1892_v8 = vld [vmem:[#allocation4 + $0x380] sm:$0xff] }
 0x12b   :  { %v11563_v24 = vcombine.high %v1837_v18, %v1841_v20  ;;  %v1896_v9 = vld [vmem:[#allocation4 + $0x3a0] sm:$0xff] }
 0x12d   :  { %1596 = vmatpush1.bf16.msra.mxu0 %v11494_v27  ;;  %1702 = vmatpush1.bf16.msra.mxu1 %v11496_v28  ;;  %v1845_v27 = vld [vmem:[#allocation4 + $0x208] sm:$0xff] }
 0x12e   :  { %2964 = vmatprep.subr.bf16.mxu0 %v11505_v29  ;;  %3070 = vmatprep.subr.bf16.mxu1 %v11507_v31  ;;  %v1849_v28 = vld [vmem:[#allocation4 + $0x228] sm:$0xff]  ;;  %v11560_v29 = vcombine.low %v1836_v15, %v1840_v17  ;;  %v11562_v31 = vcombine.low %v1837_v18, %v1841_v20  ;;  %v11617_v15 = vcombine.high %v1892_v8, %v1896_v9  ;;  %v1900_v18 = vld [vmem:[#allocation4 + $0x3c0] sm:$0xff] }
 0x12f   :  { %v11571_v33 = vcombine.high %v1845_v27, %v1849_v28  ;;  %v1904_v20 = vld [vmem:[#allocation4 + $0x3e0] sm:$0xff] }
 0x130   :  { %1614 = vmatmul.mubr.bf16.vlgmr.msra.gmra.mrb[8].mxu0 %v13585_v16  ;;  %1720 = vmatmul.mubr.bf16.vlgmr.msra.gmra.mrb[8].mxu1 %v13585_v16  ;;  %v11522_v16 = vcombine.low %v1797_v43, %v1801_v44  ;;  %v1860_v43 = vld [vmem:[#allocation4 + $0x280] sm:$0xff] }
 0x131   :  { %2965 = vmatpush1.bf16.msra.mxu0 %v11504_v37  ;;  %3071 = vmatpush1.bf16.msra.mxu1 %v11506_v38  ;;  %v1853_v37 = vld [vmem:[#allocation4 + $0x248] sm:$0xff]  ;;  %v1864_v44 = vld [vmem:[#allocation4 + $0x2a0] sm:$0xff] }
 0x132   :  { %2966 = vmatprep.subr.bf16.mxu0 %v11513_v39  ;;  %3072 = vmatprep.subr.bf16.mxu1 %v11515_v40  ;;  %v1857_v38 = vld [vmem:[#allocation4 + $0x268] sm:$0xff]  ;;  %v11568_v39 = vcombine.low %v1844_v25, %v1848_v26  ;;  %v11570_v40 = vcombine.low %v1845_v27, %v1849_v28  ;;  %v11585_v50 = vcombine.high %v1860_v43, %v1864_v44  ;;  %v1908_v27 = vld [vmem:[#allocation4 + $0x400] sm:$0xff] }
 0x133   :  { %1623 = vmatprep.mubr.bf16.mxu0 %v13378_v45  ;;  %1729 = vmatprep.mubr.bf16.mxu1 %v13378_v45  ;;  %v11579_v42 = vcombine.high %v1853_v37, %v1857_v38  ;;  %v11625_v25 = vcombine.high %v1900_v18, %v1904_v20  ;;  %v1912_v28 = vld [vmem:[#allocation4 + $0x420] sm:$0xff] }
 0x135   :  { %2967 = vmatpush1.bf16.msra.mxu0 %v11512_v46  ;;  %3073 = vmatpush1.bf16.msra.mxu1 %v11514_v47  ;;  %v1861_v46 = vld [vmem:[#allocation4 + $0x288] sm:$0xff] }
 0x136   :  { %2968 = vmatprep.subr.bf16.mxu0 %v11521_v48  ;;  %3074 = vmatprep.subr.bf16.mxu1 %v11523_v49  ;;  %v1865_v47 = vld [vmem:[#allocation4 + $0x2a8] sm:$0xff]  ;;  %v11576_v48 = vcombine.low %v1852_v34, %v1856_v36  ;;  %v11578_v49 = vcombine.low %v1853_v37, %v1857_v38  ;;  %v11633_v34 = vcombine.high %v1908_v27, %v1912_v28  ;;  %v1916_v37 = vld [vmem:[#allocation4 + $0x440] sm:$0xff] }
 0x137   :  { %v11587_v51 = vcombine.high %v1861_v46, %v1865_v47  ;;  %v1920_v38 = vld [vmem:[#allocation4 + $0x460] sm:$0xff] }
 0x138   :  { %1624 = vmatmul.mubr.bf16.gmra.mrb[12].mxu0 %v13594_v35  ;;  %1730 = vmatmul.mubr.bf16.gmra.mrb[12].mxu1 %v13594_v35  ;;  %v11538_v35 = vcombine.low %v1813_v19, %v1817_v60  ;;  %v1876_v19 = vld [vmem:[#allocation4 + $0x300] sm:$0xff] }
 0x139   :  { %2969 = vmatpush1.bf16.msra.mxu0 %v11520_v53  ;;  %3075 = vmatpush1.bf16.msra.mxu1 %v11522_v16  ;;  %v1869_v53 = vld [vmem:[#allocation4 + $0x2c8] sm:$0xff]  ;;  %v1880_v60 = vld [vmem:[#allocation4 + $0x320] sm:$0xff] }
 0x13a   :  { %2970 = vmatprep.subr.bf16.mxu0 %v11529_v54  ;;  %3076 = vmatprep.subr.bf16.mxu1 %v11531_v55  ;;  %v1873_v16 = vld [vmem:[#allocation4 + $0x2e8] sm:$0xff]  ;;  %v11584_v54 = vcombine.low %v1860_v43, %v1864_v44  ;;  %v11586_v55 = vcombine.low %v1861_v46, %v1865_v47  ;;  %v11601_v1 = vcombine.high %v1876_v19, %v1880_v60  ;;  %v1924_v47 = vld [vmem:[#allocation4 + $0x480] sm:$0xff] }
 0x13b   :  { %2996 = vmatprep.mubr.bf16.mxu0 %v13615_v59  ;;  %3102 = vmatprep.mubr.bf16.mxu1 %v13615_v59  ;;  %v11595_v58 = vcombine.high %v1869_v53, %v1873_v16  ;;  %v11641_v44 = vcombine.high %v1916_v37, %v1920_v38 }
 0x13d   :  { %2971 = vmatpush1.bf16.msra.mxu0 %v11528_v61  ;;  %3077 = vmatpush1.bf16.msra.mxu1 %v11530_v62  ;;  %v1877_v61 = vld [vmem:[#allocation4 + $0x308] sm:$0xff] }
 0x13e   :  { %2972 = vmatprep.subr.bf16.mxu0 %v11537_v63  ;;  %3078 = vmatprep.subr.bf16.mxu1 %v11539_v0  ;;  %v1881_v62 = vld [vmem:[#allocation4 + $0x328] sm:$0xff]  ;;  %v11592_v63 = vcombine.low %v1868_v10, %v1872_v52  ;;  %v11594_v0 = vcombine.low %v1869_v53, %v1873_v16  ;;  %v11640_v10 = vcombine.low %v1916_v37, %v1920_v38  ;;  %v1787_v37 = vld [vmem:[#allocation4 + $0x38] sm:$0xff] }
 0x13f   :  { %v11603_v2 = vcombine.high %v1877_v61, %v1881_v62 }
 0x141   :  { %2973 = vmatpush1.bf16.msra.mxu0 %v11536_v3  ;;  %3079 = vmatpush1.bf16.msra.mxu1 %v11538_v35  ;;  %v1885_v3 = vld [vmem:[#allocation4 + $0x348] sm:$0xff] }
 0x142   :  { %2974 = vmatprep.subr.bf16.mxu0 %v11545_v4  ;;  %3080 = vmatprep.subr.bf16.mxu1 %v11547_v5  ;;  %v1889_v35 = vld [vmem:[#allocation4 + $0x368] sm:$0xff]  ;;  %v11600_v4 = vcombine.low %v1876_v19, %v1880_v60  ;;  %v11602_v5 = vcombine.low %v1877_v61, %v1881_v62 }
 0x143   :  { %v11611_v7 = vcombine.high %v1885_v3, %v1889_v35  ;;  %v13638_v19 = vld [vmem:[%s15543_s0 + $0x48] ss:$12 sps:$4 sm:$0xff]  }
 0x145   :  { %2975 = vmatpush1.bf16.msra.mxu0 %v11544_v11  ;;  %3081 = vmatpush1.bf16.msra.mxu1 %v11546_v12  ;;  %v1893_v11 = vld [vmem:[#allocation4 + $0x388] sm:$0xff] }
 0x146   :  { %2976 = vmatprep.subr.bf16.mxu0 %v11553_v13  ;;  %3082 = vmatprep.subr.bf16.mxu1 %v11555_v14  ;;  %v1897_v12 = vld [vmem:[#allocation4 + $0x3a8] sm:$0xff]  ;;  %v11608_v13 = vcombine.low %v1884_v56, %v1888_v30  ;;  %v11610_v14 = vcombine.low %v1885_v3, %v1889_v35 }
 0x147   :  { %v11619_v17 = vcombine.high %v1893_v11, %v1897_v12  ;;  %v1945_v56 = vld [vmem:[#allocation4 + $0x528] sm:$0xff] }
 0x149   :  { %2977 = vmatpush1.bf16.msra.mxu0 %v11552_v21  ;;  %3083 = vmatpush1.bf16.msra.mxu1 %v11554_v22  ;;  %v1901_v21 = vld [vmem:[#allocation4 + $0x3c8] sm:$0xff] }
 0x14a   :  { %2978 = vmatprep.subr.bf16.mxu0 %v11561_v23  ;;  %3084 = vmatprep.subr.bf16.mxu1 %v11563_v24  ;;  %v1905_v22 = vld [vmem:[#allocation4 + $0x3e8] sm:$0xff]  ;;  %v11616_v23 = vcombine.low %v1892_v8, %v1896_v9  ;;  %v11618_v24 = vcombine.low %v1893_v11, %v1897_v12 }
 0x14b   :  { %v11627_v26 = vcombine.high %v1901_v21, %v1905_v22  ;;  %v1953_v8 = vld [vmem:[#allocation4 + $0x568] sm:$0xff] }
 0x14d   :  { %2979 = vmatpush1.bf16.msra.mxu0 %v11560_v29  ;;  %3085 = vmatpush1.bf16.msra.mxu1 %v11562_v31  ;;  %v1909_v29 = vld [vmem:[#allocation4 + $0x408] sm:$0xff] }
 0x14e   :  { %2980 = vmatprep.subr.bf16.mxu0 %v11569_v32  ;;  %3086 = vmatprep.subr.bf16.mxu1 %v11571_v33  ;;  %v1913_v31 = vld [vmem:[#allocation4 + $0x428] sm:$0xff]  ;;  %v11624_v32 = vcombine.low %v1900_v18, %v1904_v20  ;;  %v11626_v33 = vcombine.low %v1901_v21, %v1905_v22 }
 0x14f   :  { %v11635_v36 = vcombine.high %v1909_v29, %v1913_v31  ;;  %v11634_v43 = vcombine.low %v1909_v29, %v1913_v31  ;;  %v1961_v18 = vld [vmem:[#allocation4 + $0x5a8] sm:$0xff] }
 0x151   :  { %2981 = vmatpush1.bf16.msra.mxu0 %v11568_v39  ;;  %3087 = vmatpush1.bf16.msra.mxu1 %v11570_v40  ;;  %v13624_v39 = vld [vmem:[%s15543_s0 + $0x30] ss:$12 sps:$4 sm:$0xff]   ;;  %v1917_v40 = vld [vmem:[#allocation4 + $0x448] sm:$0xff] }
 0x152   :  { %2982 = vmatprep.subr.bf16.mxu0 %v11577_v41  ;;  %3088 = vmatprep.subr.bf16.mxu1 %v11579_v42  ;;  %v1921_v41 = vld [vmem:[#allocation4 + $0x468] sm:$0xff]  ;;  %v11632_v42 = vcombine.low %v1908_v27, %v1912_v28 }
 0x153   :  { %v11643_v46 = vcombine.high %v1917_v40, %v1921_v41  ;;  %v11642_v52 = vcombine.low %v1917_v40, %v1921_v41  ;;  %v1969_v27 = vld [vmem:[#allocation4 + $0x5e8] sm:$0xff] }
 0x155   :  { %2983 = vmatpush1.bf16.msra.mxu0 %v11576_v48  ;;  %3089 = vmatpush1.bf16.msra.mxu1 %v11578_v49  ;;  %v1928_v48 = vld [vmem:[#allocation4 + $0x4a0] sm:$0xff]  ;;  %v13629_v49 = vld [vmem:[%s15543_s0 + $0x4c] ss:$12 sps:$4 sm:$0xff]  }
 0x156   :  { %2984 = vmatprep.subr.bf16.mxu0 %v11585_v50  ;;  %3090 = vmatprep.subr.bf16.mxu1 %v11587_v51  ;;  %v1925_v50 = vld [vmem:[#allocation4 + $0x488] sm:$0xff]  ;;  %v11649_v53 = vcombine.high %v1924_v47, %v1928_v48  ;;  %v11648_v60 = vcombine.low %v1924_v47, %v1928_v48  ;;  %v1791_v47 = vld [vmem:[#allocation4 + $0x58] sm:$0xff] }
 0x157   :  { %v1929_v51 = vld [vmem:[#allocation4 + $0x4a8] sm:$0xff]  ;;  %v1795_v48 = vld [vmem:[#allocation4 + $0x78] sm:$0xff] }
 0x158   :  { %v11651_v16 = vcombine.high %v1925_v50, %v1929_v51  ;;  %v11650_v61 = vcombine.low %v1925_v50, %v1929_v51 }
 0x159   :  { %2985 = vmatpush1.bf16.msra.mxu0 %v11584_v54  ;;  %3091 = vmatpush1.bf16.msra.mxu1 %v11586_v55  ;;  %v1932_v54 = vld [vmem:[#allocation4 + $0x4c0] sm:$0xff] }
 0x15a   :  { %2986 = vmatprep.subr.bf16.mxu0 %v11593_v57  ;;  %3092 = vmatprep.subr.bf16.mxu1 %v11595_v58  ;;  %v1936_v55 = vld [vmem:[#allocation4 + $0x4e0] sm:$0xff]  ;;  %v1933_v57 = vld [vmem:[#allocation4 + $0x4c8] sm:$0xff] }
 0x15b   :  { %v1937_v58 = vld [vmem:[#allocation4 + $0x4e8] sm:$0xff]  ;;  %v11657_v62 = vcombine.high %v1932_v54, %v1936_v55  ;;  %v11656_v30 = vcombine.low %v1932_v54, %v1936_v55  ;;  %v1799_v54 = vld [vmem:[#allocation4 + $0x98] sm:$0xff] }
 0x15c   :  { %v11658_v3 = vcombine.low %v1933_v57, %v1937_v58  ;;  %v1803_v55 = vld [vmem:[#allocation4 + $0xb8] sm:$0xff] }
 0x15d   :  { %2987 = vmatpush1.bf16.msra.mxu0 %v11592_v63  ;;  %3093 = vmatpush1.bf16.msra.mxu1 %v11594_v0  ;;  %v11659_v63 = vcombine.high %v1933_v57, %v1937_v58  ;;  %v1940_v0 = vld [vmem:[#allocation4 + $0x500] sm:$0xff]  ;;  %v11518_v58 = vcombine.low %v1791_v47, %v1795_v48 }
 0x15e   :  { %2988 = vmatprep.subr.bf16.mxu0 %v11601_v1  ;;  %3094 = vmatprep.subr.bf16.mxu1 %v11603_v2  ;;  %v1944_v1 = vld [vmem:[#allocation4 + $0x520] sm:$0xff]  ;;  %v1941_v2 = vld [vmem:[#allocation4 + $0x508] sm:$0xff] }
 0x15f   :  { %v11665_v35 = vcombine.high %v1940_v0, %v1944_v1  ;;  %v11664_v9 = vcombine.low %v1940_v0, %v1944_v1  ;;  %v11666_v11 = vcombine.low %v1941_v2, %v1945_v56  ;;  %v13656_v0 = vld [vmem:[%s15543_s0 + $0x50] ss:$12 sps:$4 sm:$0xff]  }
 0x160   :  { %v1807_v1 = vld [vmem:[#allocation4 + $0xd8] sm:$0xff] }
 0x161   :  { %2989 = vmatpush1.bf16.msra.mxu0 %v11600_v4  ;;  %3095 = vmatpush1.bf16.msra.mxu1 %v11602_v5  ;;  %v11667_v4 = vcombine.high %v1941_v2, %v1945_v56  ;;  %v1948_v5 = vld [vmem:[#allocation4 + $0x540] sm:$0xff]  ;;  %v1811_v2 = vld [vmem:[#allocation4 + $0xf8] sm:$0xff] }
 0x162   :  { %2990 = vmatprep.subr.bf16.mxu0 %v11609_v6  ;;  %3096 = vmatprep.subr.bf16.mxu1 %v11611_v7  ;;  %v1952_v6 = vld [vmem:[#allocation4 + $0x560] sm:$0xff]  ;;  %v1949_v7 = vld [vmem:[#allocation4 + $0x548] sm:$0xff] }
 0x163   :  { %v11673_v12 = vcombine.high %v1948_v5, %v1952_v6  ;;  %v11672_v20 = vcombine.low %v1948_v5, %v1952_v6  ;;  %v11674_v21 = vcombine.low %v1949_v7, %v1953_v8  ;;  %v1818_v5 = vld [vmem:[#allocation4 + $0x130] sm:$0xff]  ;;  %v1815_v6 = vld [vmem:[#allocation4 + $0x118] sm:$0xff] }
 0x165   :  { %2991 = vmatpush1.bf16.msra.mxu0 %v11608_v13  ;;  %3097 = vmatpush1.bf16.msra.mxu1 %v11610_v14  ;;  %v11675_v13 = vcombine.high %v1949_v7, %v1953_v8  ;;  %v1956_v14 = vld [vmem:[#allocation4 + $0x580] sm:$0xff]  ;;  %v1819_v7 = vld [vmem:[#allocation4 + $0x138] sm:$0xff] }
 0x166   :  { %2992 = vmatprep.subr.bf16.mxu0 %v11617_v15  ;;  %3098 = vmatprep.subr.bf16.mxu1 %v11619_v17  ;;  %v1960_v15 = vld [vmem:[#allocation4 + $0x5a0] sm:$0xff]  ;;  %v1957_v17 = vld [vmem:[#allocation4 + $0x588] sm:$0xff] }
 0x167   :  { %v11681_v22 = vcombine.high %v1956_v14, %v1960_v15  ;;  %v11680_v28 = vcombine.low %v1956_v14, %v1960_v15  ;;  %v11682_v29 = vcombine.low %v1957_v17, %v1961_v18  ;;  %v1826_v14 = vld [vmem:[#allocation4 + $0x170] sm:$0xff]  ;;  %v1823_v15 = vld [vmem:[#allocation4 + $0x158] sm:$0xff] }
 0x169   :  { %2993 = vmatpush1.bf16.msra.mxu0 %v11616_v23  ;;  %3099 = vmatpush1.bf16.msra.mxu1 %v11618_v24  ;;  %v11683_v23 = vcombine.high %v1957_v17, %v1961_v18  ;;  %v1964_v24 = vld [vmem:[#allocation4 + $0x5c0] sm:$0xff]  ;;  %v1827_v17 = vld [vmem:[#allocation4 + $0x178] sm:$0xff] }
 0x16a   :  { %2994 = vmatprep.subr.bf16.mxu0 %v11625_v25  ;;  %3100 = vmatprep.subr.bf16.mxu1 %v11627_v26  ;;  %v1968_v25 = vld [vmem:[#allocation4 + $0x5e0] sm:$0xff]  ;;  %v1965_v26 = vld [vmem:[#allocation4 + $0x5c8] sm:$0xff] }
 0x16b   :  { %v11689_v31 = vcombine.high %v1964_v24, %v1968_v25  ;;  %v11688_v38 = vcombine.low %v1964_v24, %v1968_v25  ;;  %v11690_v40 = vcombine.low %v1965_v26, %v1969_v27  ;;  %v1834_v24 = vld [vmem:[#allocation4 + $0x1b0] sm:$0xff]  ;;  %v1831_v25 = vld [vmem:[#allocation4 + $0x198] sm:$0xff] }
 0x16d   :  { %2995 = vmatpush1.bf16.msra.mxu0 %v11624_v32  ;;  %3101 = vmatpush1.bf16.msra.mxu1 %v11626_v33  ;;  %v11691_v32 = vcombine.high %v1965_v26, %v1969_v27  ;;  %v1782_v33 = vld [vmem:[#allocation4 + $0x10] sm:$0xff]  ;;  %v1835_v26 = vld [vmem:[#allocation4 + $0x1b8] sm:$0xff] }
 0x16e   :  { %3017 = vmatprep.subr.bf16.mxu0 %v11633_v34  ;;  %3123 = vmatprep.subr.bf16.mxu1 %v11635_v36  ;;  %v1786_v34 = vld [vmem:[#allocation4 + $0x30] sm:$0xff]  ;;  %v1783_v36 = vld [vmem:[#allocation4 + $0x18] sm:$0xff] }
 0x16f   :  { %v11509_v41 = vcombine.high %v1782_v33, %v1786_v34  ;;  %v11508_v50 = vcombine.low %v1782_v33, %v1786_v34  ;;  %v11510_v51 = vcombine.low %v1783_v36, %v1787_v37  ;;  %v1842_v33 = vld [vmem:[#allocation4 + $0x1f0] sm:$0xff] }
 0x170   :  { %2997 = vmatmul.mubr.bf16.vlgmr.msra.gmra.mrb[16].mxu0 %v13624_v39  ;;  %3103 = vmatmul.mubr.bf16.vlgmr.msra.gmra.mrb[16].mxu1 %v13624_v39 }
 0x171   :  { %3018 = vmatpush1.bf16.msra.mxu0 %v11632_v42  ;;  %3124 = vmatpush1.bf16.msra.mxu1 %v11634_v43  ;;  %v11511_v42 = vcombine.high %v1783_v36, %v1787_v37  ;;  %v1790_v43 = vld [vmem:[#allocation4 + $0x50] sm:$0xff]  ;;  %v1839_v37 = vld [vmem:[#allocation4 + $0x1d8] sm:$0xff] }
 0x172   :  { %3019 = vmatprep.subr.bf16.mxu0 %v11641_v44  ;;  %3125 = vmatprep.subr.bf16.mxu1 %v11643_v46  ;;  %v1794_v44 = vld [vmem:[#allocation4 + $0x70] sm:$0xff]  ;;  %v13647_v46 = vld [vmem:[%s15543_s0 + $0x38] ss:$12 sps:$4 sm:$0xff]  }
 0x173   :  { %3006 = vmatprep.mubr.bf16.mxu0 %v13629_v49  ;;  %3112 = vmatprep.mubr.bf16.mxu1 %v13629_v49  ;;  %v11516_v57 = vcombine.low %v1790_v43, %v1794_v44 }
 0x175   :  { %3020 = vmatpush1.bf16.msra.mxu0 %v11640_v10  ;;  %3126 = vmatpush1.bf16.msra.mxu1 %v11642_v52  ;;  %v11517_v10 = vcombine.high %v1790_v43, %v1794_v44  ;;  %v11519_v52 = vcombine.high %v1791_v47, %v1795_v48  ;;  %v11558_v47 = vcombine.low %v1831_v25, %v1835_v26 }
 0x176   :  { %3021 = vmatprep.subr.bf16.mxu0 %v11649_v53  ;;  %3127 = vmatprep.subr.bf16.mxu1 %v11651_v16  ;;  %v1798_v53 = vld [vmem:[#allocation4 + $0x90] sm:$0xff] }
 0x177   :  { %v1802_v16 = vld [vmem:[#allocation4 + $0xb0] sm:$0xff] }
 0x178   :  { %3007 = vmatmul.mubr.bf16.gmra.mrb[20].mxu0 %v13638_v19  ;;  %3113 = vmatmul.mubr.bf16.gmra.mrb[20].mxu1 %v13638_v19  ;;  %v11524_v56 = vcombine.low %v1798_v53, %v1802_v16 }
 0x179   :  { %3022 = vmatpush1.bf16.msra.mxu0 %v11648_v60  ;;  %3128 = vmatpush1.bf16.msra.mxu1 %v11650_v61  ;;  %v11525_v60 = vcombine.high %v1798_v53, %v1802_v16  ;;  %v11527_v61 = vcombine.high %v1799_v54, %v1803_v55  ;;  %v1847_v53 = vld [vmem:[#allocation4 + $0x218] sm:$0xff] }
 0x17a   :  { %3023 = vmatprep.subr.bf16.mxu0 %v11657_v62  ;;  %3129 = vmatprep.subr.bf16.mxu1 %v11659_v63  ;;  %v1806_v62 = vld [vmem:[#allocation4 + $0xd0] sm:$0xff]  ;;  %v1851_v16 = vld [vmem:[#allocation4 + $0x238] sm:$0xff] }
 0x17b   :  { %3049 = vmatprep.mubr.bf16.mxu0 %v13378_v45  ;;  %3155 = vmatprep.mubr.bf16.mxu1 %v13378_v45  ;;  %v1810_v63 = vld [vmem:[#allocation4 + $0xf0] sm:$0xff] }
 0x17c   :  { %v11532_v8 = vcombine.low %v1806_v62, %v1810_v63 }
 0x17d   :  { %3024 = vmatpush1.bf16.msra.mxu0 %v11656_v30  ;;  %3130 = vmatpush1.bf16.msra.mxu1 %v11658_v3  ;;  %v11526_v30 = vcombine.low %v1799_v54, %v1803_v55  ;;  %v11533_v3 = vcombine.high %v1806_v62, %v1810_v63  ;;  %v1858_v62 = vld [vmem:[#allocation4 + $0x270] sm:$0xff] }
 0x17e   :  { %3025 = vmatprep.subr.bf16.mxu0 %v11665_v35  ;;  %3131 = vmatprep.subr.bf16.mxu1 %v11667_v4  ;;  %v11535_v35 = vcombine.high %v1807_v1, %v1811_v2  ;;  %v1814_v4 = vld [vmem:[#allocation4 + $0x110] sm:$0xff] }
 0x17f   :  { %v11540_v18 = vcombine.low %v1814_v4, %v1818_v5 }
 0x181   :  { %3026 = vmatpush1.bf16.msra.mxu0 %v11664_v9  ;;  %3132 = vmatpush1.bf16.msra.mxu1 %v11666_v11  ;;  %v11534_v9 = vcombine.low %v1807_v1, %v1811_v2  ;;  %v11541_v11 = vcombine.high %v1814_v4, %v1818_v5  ;;  %v1855_v2 = vld [vmem:[#allocation4 + $0x258] sm:$0xff] }
 0x182   :  { %3027 = vmatprep.subr.bf16.mxu0 %v11673_v12  ;;  %3133 = vmatprep.subr.bf16.mxu1 %v11675_v13  ;;  %v11543_v12 = vcombine.high %v1815_v6, %v1819_v7  ;;  %v1822_v13 = vld [vmem:[#allocation4 + $0x150] sm:$0xff] }
 0x183   :  { %v11548_v27 = vcombine.low %v1822_v13, %v1826_v14 }
 0x185   :  { %3028 = vmatpush1.bf16.msra.mxu0 %v11672_v20  ;;  %3134 = vmatpush1.bf16.msra.mxu1 %v11674_v21  ;;  %v11542_v20 = vcombine.low %v1815_v6, %v1819_v7  ;;  %v11549_v21 = vcombine.high %v1822_v13, %v1826_v14  ;;  %v11574_v6 = vcombine.low %v1847_v53, %v1851_v16  ;;  %v1863_v13 = vld [vmem:[#allocation4 + $0x298] sm:$0xff] }
 0x186   :  { %3029 = vmatprep.subr.bf16.mxu0 %v11681_v22  ;;  %3135 = vmatprep.subr.bf16.mxu1 %v11683_v23  ;;  %v11551_v22 = vcombine.high %v1823_v15, %v1827_v17  ;;  %v1830_v23 = vld [vmem:[#allocation4 + $0x190] sm:$0xff]  ;;  %v1867_v14 = vld [vmem:[#allocation4 + $0x2b8] sm:$0xff] }
 0x189   :  { %3030 = vmatpush1.bf16.msra.mxu0 %v11680_v28  ;;  %3136 = vmatpush1.bf16.msra.mxu1 %v11682_v29  ;;  %v11550_v28 = vcombine.low %v1823_v15, %v1827_v17  ;;  %v11557_v29 = vcombine.high %v1830_v23, %v1834_v24 }
 0x18a   :  { %3031 = vmatprep.subr.bf16.mxu0 %v11689_v31  ;;  %3137 = vmatprep.subr.bf16.mxu1 %v11691_v32  ;;  %v1838_v32 = vld [vmem:[#allocation4 + $0x1d0] sm:$0xff] }
 0x18b   :  { %v11565_v48 = vcombine.high %v1838_v32, %v1842_v33  ;;  %v11564_v54 = vcombine.low %v1838_v32, %v1842_v33  ;;  %v1879_v32 = vld [vmem:[#allocation4 + $0x318] sm:$0xff] }
 0x18c   :  { %v1883_v33 = vld [vmem:[#allocation4 + $0x338] sm:$0xff] }
 0x18d   :  { %3032 = vmatpush1.bf16.msra.mxu0 %v11688_v38  ;;  %3138 = vmatpush1.bf16.msra.mxu1 %v11690_v40  ;;  %v1843_v38 = vld [vmem:[#allocation4 + $0x1f8] sm:$0xff] }
 0x18e   :  { %3176 = vmatprep.subr.bf16.mxu0 %v11509_v41  ;;  %3282 = vmatprep.subr.bf16.mxu1 %v11511_v42  ;;  %v11556_v42 = vcombine.low %v1830_v23, %v1834_v24  ;;  %v11566_v55 = vcombine.low %v1839_v37, %v1843_v38  ;;  %v1871_v23 = vld [vmem:[#allocation4 + $0x2d8] sm:$0xff] }
 0x18f   :  { %v1875_v24 = vld [vmem:[#allocation4 + $0x2f8] sm:$0xff] }
 0x190   :  { %3050 = vmatmul.mubr.bf16.vlgmr.msra.gmra.mrb[16].mxu0 %v13647_v46  ;;  %3156 = vmatmul.mubr.bf16.vlgmr.msra.gmra.mrb[16].mxu1 %v13647_v46 }
 0x191   :  { %3177 = vmatpush1.bf16.msra.mxu0 %v11508_v50  ;;  %3283 = vmatpush1.bf16.msra.mxu1 %v11510_v51  ;;  %v11567_v51 = vcombine.high %v1839_v37, %v1843_v38  ;;  %v11598_v38 = vcombine.low %v1871_v23, %v1875_v24 }
 0x192   :  { %3178 = vmatprep.subr.bf16.mxu0 %v11517_v10  ;;  %3284 = vmatprep.subr.bf16.mxu1 %v11519_v52  ;;  %v1846_v10 = vld [vmem:[#allocation4 + $0x210] sm:$0xff] }
 0x193   :  { %3059 = vmatprep.mubr.bf16.mxu0 %v13378_v45  ;;  %3165 = vmatprep.mubr.bf16.mxu1 %v13378_v45  ;;  %v1850_v52 = vld [vmem:[#allocation4 + $0x230] sm:$0xff] }
 0x195   :  { %3179 = vmatpush1.bf16.msra.mxu0 %v11516_v57  ;;  %3285 = vmatpush1.bf16.msra.mxu1 %v11518_v58  ;;  %v11573_v57 = vcombine.high %v1846_v10, %v1850_v52 }
 0x196   :  { %3180 = vmatprep.subr.bf16.mxu0 %v11525_v60  ;;  %3286 = vmatprep.subr.bf16.mxu1 %v11527_v61  ;;  %v11575_v60 = vcombine.high %v1847_v53, %v1851_v16  ;;  %v1854_v61 = vld [vmem:[#allocation4 + $0x250] sm:$0xff] }
 0x197   :  { %v11581_v7 = vcombine.high %v1854_v61, %v1858_v62  ;;  %v11580_v15 = vcombine.low %v1854_v61, %v1858_v62  ;;  %v1894_v53 = vld [vmem:[#allocation4 + $0x390] sm:$0xff] }
 0x198   :  { %3060 = vmatmul.mubr.bf16.gmra.mrb[20].mxu0 %v13656_v0  ;;  %3166 = vmatmul.mubr.bf16.gmra.mrb[20].mxu1 %v13656_v0  ;;  %v1898_v16 = vld [vmem:[#allocation4 + $0x3b0] sm:$0xff] }
 0x199   :  { %3181 = vmatpush1.bf16.msra.mxu0 %v11524_v56  ;;  %3287 = vmatpush1.bf16.msra.mxu1 %v11526_v30  ;;  %v1859_v56 = vld [vmem:[#allocation4 + $0x278] sm:$0xff]  ;;  %v1902_v62 = vld [vmem:[#allocation4 + $0x3d0] sm:$0xff] }
 0x19a   :  { %3182 = vmatprep.subr.bf16.mxu0 %v11533_v3  ;;  %3288 = vmatprep.subr.bf16.mxu1 %v11535_v35  ;;  %v11572_v35 = vcombine.low %v1846_v10, %v1850_v52  ;;  %v11582_v17 = vcombine.low %v1855_v2, %v1859_v56 }
 0x19b   :  { %3208 = vmatprep.mubr.bf16.mxu0 %v13615_v59  ;;  %3314 = vmatprep.mubr.bf16.mxu1 %v13615_v59  ;;  %v11559_v59 = vcombine.high %v1831_v25, %v1835_v26  ;;  %v11590_v26 = vcombine.low %v1863_v13, %v1867_v14 }
 0x19d   :  { %3183 = vmatpush1.bf16.msra.mxu0 %v11532_v8  ;;  %3289 = vmatpush1.bf16.msra.mxu1 %v11534_v9  ;;  %v11583_v9 = vcombine.high %v1855_v2, %v1859_v56  ;;  %v1907_v2 = vld [vmem:[#allocation4 + $0x3f8] sm:$0xff]  ;;  %v11620_v56 = vcombine.low %v1894_v53, %v1898_v16 }
 0x19e   :  { %3184 = vmatprep.subr.bf16.mxu0 %v11541_v11  ;;  %3290 = vmatprep.subr.bf16.mxu1 %v11543_v12  ;;  %v1862_v11 = vld [vmem:[#allocation4 + $0x290] sm:$0xff] }
 0x19f   :  { %v1866_v12 = vld [vmem:[#allocation4 + $0x2b0] sm:$0xff] }
 0x1a0   :  { %v11588_v25 = vcombine.low %v1862_v11, %v1866_v12 }
 0x1a1   :  { %3185 = vmatpush1.bf16.msra.mxu0 %v11540_v18  ;;  %3291 = vmatpush1.bf16.msra.mxu1 %v11542_v20  ;;  %v11589_v18 = vcombine.high %v1862_v11, %v1866_v12  ;;  %v11591_v20 = vcombine.high %v1863_v13, %v1867_v14  ;;  %v1918_v13 = vld [vmem:[#allocation4 + $0x450] sm:$0xff] }
 0x1a2   :  { %3186 = vmatprep.subr.bf16.mxu0 %v11549_v21  ;;  %3292 = vmatprep.subr.bf16.mxu1 %v11551_v22  ;;  %v1870_v21 = vld [vmem:[#allocation4 + $0x2d0] sm:$0xff] }
 0x1a3   :  { %v13662_v31 = vpop.f32.mrb[0].mxu0  ;;  %v13665_v34 = vpop.f32.mrb[0].mxu1  ;;  %v1874_v22 = vld [vmem:[#allocation4 + $0x2f0] sm:$0xff] }
 0x1a4   :  { %1740 = vst [vmem:[#allocation3] sm:$0xff] %v13662_v31  ;;  %v13667_v36 = vpop.f32.mrb[1].mxu0  ;;  %1742 = vst [vmem:[#allocation3 + $0x10] sm:$0xff] %v13665_v34  ;;  %v13671_v40 = vpop.f32.mrb[1].mxu1  ;;  %v11596_v37 = vcombine.low %v1870_v21, %v1874_v22  ;;  %v1922_v14 = vld [vmem:[#allocation4 + $0x470] sm:$0xff] }
 0x1a5   :  { %1741 = vst [vmem:[#allocation3 + $0x8] sm:$0xff] %v13667_v36  ;;  %v1407_v41 = vpop.f32.mrb[2].mxu0  ;;  %3187 = vmatpush1.bf16.msra.mxu0 %v11548_v27  ;;  %1743 = vst [vmem:[#allocation3 + $0x18] sm:$0xff] %v13671_v40  ;;  %v1513_v43 = vpop.f32.mrb[2].mxu1  ;;  %3293 = vmatpush1.bf16.msra.mxu1 %v11550_v28  ;;  %v11597_v27 = vcombine.high %v1870_v21, %v1874_v22  ;;  %v11599_v28 = vcombine.high %v1871_v23, %v1875_v24  ;;  %v1926_v23 = vld [vmem:[#allocation4 + $0x490] sm:$0xff] }
 0x1a6   :  { %1748 = vst [vmem:[#allocation3 + $0x40] sm:$0xff] %v1407_v41  ;;  %v1409_v44 = vpop.f32.mrb[3].mxu0  ;;  %3188 = vmatprep.subr.bf16.mxu0 %v11557_v29  ;;  %1750 = vst [vmem:[#allocation3 + $0x50] sm:$0xff] %v1513_v43  ;;  %v1515_v50 = vpop.f32.mrb[3].mxu1  ;;  %3294 = vmatprep.subr.bf16.mxu1 %v11559_v59  ;;  %v1878_v29 = vld [vmem:[#allocation4 + $0x310] sm:$0xff]  ;;  %v11645_v21 = vcombine.high %v1918_v13, %v1922_v14 }
 0x1a7   :  { %1749 = vst [vmem:[#allocation3 + $0x48] sm:$0xff] %v1409_v44  ;;  %1751 = vst [vmem:[#allocation3 + $0x58] sm:$0xff] %v1515_v50  ;;  %v1882_v59 = vld [vmem:[#allocation4 + $0x330] sm:$0xff] }
 0x1a8   :  { %v11605_v41 = vcombine.high %v1878_v29, %v1882_v59  ;;  %v1886_v43 = vld [vmem:[#allocation4 + $0x350] sm:$0xff]  ;;  %v11604_v50 = vcombine.low %v1878_v29, %v1882_v59 }
 0x1a9   :  { %3189 = vmatpush1.bf16.msra.mxu0 %v11556_v42  ;;  %3295 = vmatpush1.bf16.msra.mxu1 %v11558_v47  ;;  %v11607_v42 = vcombine.high %v1879_v32, %v1883_v33  ;;  %v1890_v44 = vld [vmem:[#allocation4 + $0x370] sm:$0xff]  ;;  %v1887_v47 = vld [vmem:[#allocation4 + $0x358] sm:$0xff] }
 0x1aa   :  { %3190 = vmatprep.subr.bf16.mxu0 %v11565_v48  ;;  %3296 = vmatprep.subr.bf16.mxu1 %v11567_v51  ;;  %v1891_v48 = vld [vmem:[#allocation4 + $0x378] sm:$0xff]  ;;  %v11606_v51 = vcombine.low %v1879_v32, %v1883_v33  ;;  %v11613_v10 = vcombine.high %v1886_v43, %v1890_v44  ;;  %v1930_v24 = vld [vmem:[#allocation4 + $0x4b0] sm:$0xff] }
 0x1ab   :  { %v1413_v58 = vpop.f32.mrb[4].mxu0  ;;  %v1519_v63 = vpop.f32.mrb[4].mxu1  ;;  %v11615_v52 = vcombine.high %v1887_v47, %v1891_v48  ;;  %v11653_v29 = vcombine.high %v1926_v23, %v1930_v24  ;;  %v1934_v32 = vld [vmem:[#allocation4 + $0x4d0] sm:$0xff] }
 0x1ac   :  { %1756 = vst [vmem:[#allocation3 + $0x80] sm:$0xff] %v1413_v58  ;;  %v1415_v1 = vpop.f32.mrb[5].mxu0  ;;  %1758 = vst [vmem:[#allocation3 + $0x90] sm:$0xff] %v1519_v63  ;;  %v1521_v30 = vpop.f32.mrb[5].mxu1  ;;  %v11614_v58 = vcombine.low %v1887_v47, %v1891_v48  ;;  %v1906_v63 = vld [vmem:[#allocation4 + $0x3f0] sm:$0xff]  ;;  %v1943_v48 = vld [vmem:[#allocation4 + $0x518] sm:$0xff] }
 0x1ad   :  { %1757 = vst [vmem:[#allocation3 + $0x88] sm:$0xff] %v1415_v1  ;;  %v1417_v3 = vpop.f32.mrb[6].mxu0  ;;  %3191 = vmatpush1.bf16.msra.mxu0 %v11564_v54  ;;  %1759 = vst [vmem:[#allocation3 + $0x98] sm:$0xff] %v1521_v30  ;;  %v1523_v4 = vpop.f32.mrb[6].mxu1  ;;  %3297 = vmatpush1.bf16.msra.mxu1 %v11566_v55  ;;  %v1895_v54 = vld [vmem:[#allocation4 + $0x398] sm:$0xff]  ;;  %v1938_v33 = vld [vmem:[#allocation4 + $0x4f0] sm:$0xff] }
 0x1ae   :  { %1764 = vst [vmem:[#allocation3 + $0xc0] sm:$0xff] %v1417_v3  ;;  %v1419_v5 = vpop.f32.mrb[7].mxu0  ;;  %3192 = vmatprep.subr.bf16.mxu0 %v11573_v57  ;;  %1766 = vst [vmem:[#allocation3 + $0xd0] sm:$0xff] %v1523_v4  ;;  %v1525_v8 = vpop.f32.mrb[7].mxu1  ;;  %3298 = vmatprep.subr.bf16.mxu1 %v11575_v60  ;;  %v1899_v55 = vld [vmem:[#allocation4 + $0x3b8] sm:$0xff]  ;;  %v11612_v57 = vcombine.low %v1886_v43, %v1890_v44  ;;  %v11621_v60 = vcombine.high %v1894_v53, %v1898_v16  ;;  %v1910_v4 = vld [vmem:[#allocation4 + $0x410] sm:$0xff] }
 0x1af   :  { %1765 = vst [vmem:[#allocation3 + $0xc8] sm:$0xff] %v1419_v5  ;;  %1767 = vst [vmem:[#allocation3 + $0xd8] sm:$0xff] %v1525_v8  ;;  %v11623_v61 = vcombine.high %v1895_v54, %v1899_v55  ;;  %v1903_v1 = vld [vmem:[#allocation4 + $0x3d8] sm:$0xff]  ;;  %v11622_v30 = vcombine.low %v1895_v54, %v1899_v55  ;;  %v11629_v3 = vcombine.high %v1902_v62, %v1906_v63  ;;  %v1914_v5 = vld [vmem:[#allocation4 + $0x430] sm:$0xff] }
 0x1b0   :  { %v11628_v8 = vcombine.low %v1902_v62, %v1906_v63  ;;  %v11637_v11 = vcombine.high %v1910_v4, %v1914_v5  ;;  %v1942_v44 = vld [vmem:[#allocation4 + $0x510] sm:$0xff]  ;;  %v1951_v55 = vld [vmem:[#allocation4 + $0x558] sm:$0xff] }
 0x1b1   :  { %3193 = vmatpush1.bf16.msra.mxu0 %v11572_v35  ;;  %3299 = vmatpush1.bf16.msra.mxu1 %v11574_v6  ;;  %v11631_v35 = vcombine.high %v1903_v1, %v1907_v2  ;;  %v1911_v6 = vld [vmem:[#allocation4 + $0x418] sm:$0xff]  ;;  %v1946_v47 = vld [vmem:[#allocation4 + $0x530] sm:$0xff] }
 0x1b2   :  { %3194 = vmatprep.subr.bf16.mxu0 %v11581_v7  ;;  %3300 = vmatprep.subr.bf16.mxu1 %v11583_v9  ;;  %v1915_v7 = vld [vmem:[#allocation4 + $0x438] sm:$0xff]  ;;  %v11630_v9 = vcombine.low %v1903_v1, %v1907_v2  ;;  %v1950_v16 = vld [vmem:[#allocation4 + $0x550] sm:$0xff] }
 0x1b3   :  { %v11639_v12 = vcombine.high %v1911_v6, %v1915_v7  ;;  %v1954_v54 = vld [vmem:[#allocation4 + $0x570] sm:$0xff]  ;;  %v1959_v2 = vld [vmem:[#allocation4 + $0x598] sm:$0xff] }
 0x1b4   :  { %v1958_v63 = vld [vmem:[#allocation4 + $0x590] sm:$0xff] }
 0x1b5   :  { %3195 = vmatpush1.bf16.msra.mxu0 %v11580_v15  ;;  %3301 = vmatpush1.bf16.msra.mxu1 %v11582_v17  ;;  %v1919_v15 = vld [vmem:[#allocation4 + $0x458] sm:$0xff]  ;;  %v1962_v1 = vld [vmem:[#allocation4 + $0x5b0] sm:$0xff] }
 0x1b6   :  { %3196 = vmatprep.subr.bf16.mxu0 %v11589_v18  ;;  %3302 = vmatprep.subr.bf16.mxu1 %v11591_v20  ;;  %v1923_v17 = vld [vmem:[#allocation4 + $0x478] sm:$0xff]  ;;  %v11636_v18 = vcombine.low %v1910_v4, %v1914_v5  ;;  %v11638_v20 = vcombine.low %v1911_v6, %v1915_v7  ;;  %v11685_v6 = vcombine.high %v1958_v63, %v1962_v1 }
 0x1b7   :  { %v11647_v22 = vcombine.high %v1919_v15, %v1923_v17 }
 0x1b9   :  { %3197 = vmatpush1.bf16.msra.mxu0 %v11588_v25  ;;  %3303 = vmatpush1.bf16.msra.mxu1 %v11590_v26  ;;  %v1927_v25 = vld [vmem:[#allocation4 + $0x498] sm:$0xff] }
 0x1ba   :  { %3198 = vmatprep.subr.bf16.mxu0 %v11597_v27  ;;  %3304 = vmatprep.subr.bf16.mxu1 %v11599_v28  ;;  %v1931_v26 = vld [vmem:[#allocation4 + $0x4b8] sm:$0xff]  ;;  %v11644_v27 = vcombine.low %v1918_v13, %v1922_v14  ;;  %v11646_v28 = vcombine.low %v1919_v15, %v1923_v17  ;;  %v11684_v17 = vcombine.low %v1958_v63, %v1962_v1 }
 0x1bb   :  { %v11655_v59 = vcombine.high %v1927_v25, %v1931_v26  ;;  %v1967_v13 = vld [vmem:[#allocation4 + $0x5d8] sm:$0xff] }
 0x1bc   :  { %v1971_v14 = vld [vmem:[#allocation4 + $0x5f8] sm:$0xff] }
 0x1bd   :  { %3199 = vmatpush1.bf16.msra.mxu0 %v11596_v37  ;;  %3305 = vmatpush1.bf16.msra.mxu1 %v11598_v38  ;;  %v1935_v37 = vld [vmem:[#allocation4 + $0x4d8] sm:$0xff] }
 0x1be   :  { %3200 = vmatprep.subr.bf16.mxu0 %v11605_v41  ;;  %3306 = vmatprep.subr.bf16.mxu1 %v11607_v42  ;;  %v1939_v38 = vld [vmem:[#allocation4 + $0x4f8] sm:$0xff]  ;;  %v11652_v41 = vcombine.low %v1926_v23, %v1930_v24  ;;  %v11661_v42 = vcombine.high %v1934_v32, %v1938_v33  ;;  %v11695_v23 = vcombine.high %v1967_v13, %v1971_v14 }
 0x1bf   :  { %v11663_v43 = vcombine.high %v1935_v37, %v1939_v38 }
 0x1c1   :  { %3201 = vmatpush1.bf16.msra.mxu0 %v11604_v50  ;;  %3307 = vmatpush1.bf16.msra.mxu1 %v11606_v51  ;;  %v1947_v50 = vld [vmem:[#allocation4 + $0x538] sm:$0xff]  ;;  %v15556_v51 = vlaneseq }
 0x1c2   :  { %3202 = vmatprep.subr.bf16.mxu0 %v11613_v10  ;;  %3308 = vmatprep.subr.bf16.mxu1 %v11615_v52  ;;  %v11660_v10 = vcombine.low %v1934_v32, %v1938_v33  ;;  %v11669_v52 = vcombine.high %v1942_v44, %v1946_v47  ;;  %v11671_v53 = vcombine.high %v1943_v48, %v1947_v50 }
 0x1c5   :  { %3203 = vmatpush1.bf16.msra.mxu0 %v11612_v57  ;;  %3309 = vmatpush1.bf16.msra.mxu1 %v11614_v58  ;;  %v1955_v57 = vld [vmem:[#allocation4 + $0x578] sm:$0xff]  ;;  %v13683_v58 = vshrl.u32 %v15556_v51, 7 }
 0x1c6   :  { %3204 = vmatprep.subr.bf16.mxu0 %v11621_v60  ;;  %3310 = vmatprep.subr.bf16.mxu1 %v11623_v61  ;;  %v11668_v60 = vcombine.low %v1942_v44, %v1946_v47  ;;  %v11677_v61 = vcombine.high %v1950_v16, %v1954_v54  ;;  %v11679_v62 = vcombine.high %v1951_v55, %v1955_v57 }
 0x1c7   :  { %v13694_v4 = vsub.s32 2, %v13683_v58  ;;  %v11678_v5 = vcombine.low %v1951_v55, %v1955_v57  ;;  %v13697_v7 = vsub.s32 1, %v13683_v58 }
 0x1c9   :  { %3205 = vmatpush1.bf16.msra.mxu0 %v11620_v56  ;;  %3311 = vmatpush1.bf16.msra.mxu1 %v11622_v30  ;;  %v1963_v56 = vld [vmem:[#allocation4 + $0x5b8] sm:$0xff]  ;;  %v13686_v30 = vsub.s32 0, %v13683_v58  ;;  %15714 = vst [vmem:[#allocation19_spill] sm:$0xff] %v13694_v4  ;;  %15715 = vst [vmem:[#allocation20_spill] sm:$0xff] %v13697_v7 }
 0x1ca   :  { %3206 = vmatprep.subr.bf16.mxu0 %v11629_v3  ;;  %3312 = vmatprep.subr.bf16.mxu1 %v11631_v35  ;;  %v11676_v3 = vcombine.low %v1950_v16, %v1954_v54  ;;  %v13691_v35 = vld [vmem:[%s15546_s3] sm:$0xff] }
 0x1cb   :  { %15713 = vst [vmem:[#allocation18_spill] sm:$0xff] %v13686_v30  ;;  %v3433_v15 = vrot.slane %v13691_v35, %v13686_v30 }
 0x1cd   :  { %3207 = vmatpush1.bf16.msra.mxu0 %v11628_v8  ;;  %3313 = vmatpush1.bf16.msra.mxu1 %v11630_v9  ;;  %v11687_v8 = vcombine.high %v1959_v2, %v1963_v56  ;;  %v1966_v9 = vld [vmem:[#allocation4 + $0x5d0] sm:$0xff] }
 0x1ce   :  { %3229 = vmatprep.subr.bf16.mxu0 %v11637_v11  ;;  %3335 = vmatprep.subr.bf16.mxu1 %v11639_v12  ;;  %v1970_v11 = vld [vmem:[#allocation4 + $0x5f0] sm:$0xff]  ;;  %v13700_v12 = vsub.s32 3, %v13683_v58 }
 0x1d0   :  { %3209 = vmatmul.mubr.bf16.vlgmr.msra.gmra.mrb[24].mxu0 %v13624_v39  ;;  %3315 = vmatmul.mubr.bf16.vlgmr.msra.gmra.mrb[24].mxu1 %v13624_v39  ;;  %v11654_v39 = vcombine.low %v1927_v25, %v1931_v26  ;;  %15716 = vst [vmem:[#allocation21_spill] sm:$0xff] %v13700_v12  ;;  %v3445_v24 = vrot.slane %v13691_v35, %v13700_v12 }
 0x1d1   :  { %3230 = vmatpush1.bf16.msra.mxu0 %v11636_v18  ;;  %3336 = vmatpush1.bf16.msra.mxu1 %v11638_v20  ;;  %v3441_v18 = vrot.slane %v13691_v35, %v13694_v4  ;;  %v11686_v20 = vcombine.low %v1959_v2, %v1963_v56  ;;  %v3470_v25 = vadd.f32 %v3433_v15, %v13662_v31 }
 0x1d2   :  { %3231 = vmatprep.subr.bf16.mxu0 %v11645_v21  ;;  %3337 = vmatprep.subr.bf16.mxu1 %v11647_v22  ;;  %v11693_v21 = vcombine.high %v1966_v9, %v1970_v11  ;;  %v3437_v22 = vrot.slane %v13691_v35, %v13697_v7  ;;  %v11692_v26 = vcombine.low %v1966_v9, %v1970_v11 }
 0x1d3   :  { %3218 = vmatprep.mubr.bf16.mxu0 %v13629_v49  ;;  %3324 = vmatprep.mubr.bf16.mxu1 %v13629_v49  ;;  %v11662_v49 = vcombine.low %v1935_v37, %v1939_v38  ;;  %v11696_v32 = vmul.f32 -1.442695, %v3470_v25 }
 0x1d5   :  { %3232 = vmatpush1.bf16.msra.mxu0 %v11644_v27  ;;  %3338 = vmatpush1.bf16.msra.mxu1 %v11646_v28  ;;  %v3472_v27 = vadd.f32 %v3441_v18, %v13665_v34  ;;  %v11694_v28 = vcombine.low %v1967_v13, %v1971_v14  ;;  %12896 = vpow2.f32 %v11696_v32 }
 0x1d6   :  { %3233 = vmatprep.subr.bf16.mxu0 %v11653_v29  ;;  %3339 = vmatprep.subr.bf16.mxu1 %v11655_v59  ;;  %v3471_v29 = vadd.f32 %v3437_v22, %v13667_v36  ;;  %v3473_v59 = vadd.f32 %v3445_v24, %v13671_v40  ;;  %v13721_v36 = vsub.s32 4, %v13683_v58 }
 0x1d7   :  { %v11698_v33 = vmul.f32 -1.442695, %v3472_v27 }
 0x1d8   :  { %3219 = vmatmul.mubr.bf16.gmra.mrb[28].mxu0 %v13638_v19  ;;  %3325 = vmatmul.mubr.bf16.gmra.mrb[28].mxu1 %v13638_v19  ;;  %v11670_v19 = vcombine.low %v1943_v48, %v1947_v50  ;;  %v11697_v37 = vmul.f32 -1.442695, %v3471_v29  ;;  %v11699_v38 = vmul.f32 -1.442695, %v3473_v59  ;;  %15717 = vst [vmem:[#allocation22_spill] sm:$0xff] %v13721_v36 }
 0x1d9   :  { %3234 = vmatpush1.bf16.msra.mxu0 %v11652_v41  ;;  %3340 = vmatpush1.bf16.msra.mxu1 %v11654_v39  ;;  %12898 = vpow2.f32 %v11698_v33  ;;  %v13724_v41 = vsub.s32 6, %v13683_v58 }
 0x1da   :  { %3235 = vmatprep.subr.bf16.mxu0 %v11661_v42  ;;  %3341 = vmatprep.subr.bf16.mxu1 %v11663_v43  ;;  %12900 = vpow2.f32 %v11697_v37  ;;  %v13730_v42 = vsub.s32 7, %v13683_v58 }
 0x1db   :  { %3261 = vmatprep.mubr.bf16.mxu0 %v13378_v45  ;;  %3367 = vmatprep.mubr.bf16.mxu1 %v13378_v45  ;;  %12902 = vpow2.f32 %v11699_v38  ;;  %15718 = vst [vmem:[#allocation23_spill] sm:$0xff] %v13724_v41  ;;  %v3457_v48 = vrot.slane %v13691_v35, %v13724_v41 }
 0x1dc   :  { %15720 = vst [vmem:[#allocation25_spill] sm:$0xff] %v13730_v42 }
 0x1dd   :  { %3236 = vmatpush1.bf16.msra.mxu0 %v11660_v10  ;;  %3342 = vmatpush1.bf16.msra.mxu1 %v11662_v49  ;;  %v3461_v10 = vrot.slane %v13691_v35, %v13730_v42 }
 0x1de   :  { %3237 = vmatprep.subr.bf16.mxu0 %v11669_v52  ;;  %3343 = vmatprep.subr.bf16.mxu1 %v11671_v53 }
 0x1df   :  { %v12897_v31 = vpop.eup %12896 }
 0x1e1   :  { %3238 = vmatpush1.bf16.msra.mxu0 %v11668_v60  ;;  %3344 = vmatpush1.bf16.msra.mxu1 %v11670_v19 }
 0x1e2   :  { %3239 = vmatprep.subr.bf16.mxu0 %v11677_v61  ;;  %3345 = vmatprep.subr.bf16.mxu1 %v11679_v62 }
 0x1e3   :  { %v12899_v34 = vpop.eup %12898 }
 0x1e4   :  { %v12901_v40 = vpop.eup %12900  ;;  %v3496_v43 = vadd.f32 1.0, %v12899_v34 }
 0x1e5   :  { %3240 = vmatpush1.bf16.msra.mxu0 %v11676_v3  ;;  %3346 = vmatpush1.bf16.msra.mxu1 %v11678_v5  ;;  %v12903_v39 = vpop.eup %12902  ;;  %v3485_v44 = vadd.f32 1.0, %v12901_v40 }
 0x1e6   :  { %3241 = vmatprep.subr.bf16.mxu0 %v11685_v6  ;;  %3347 = vmatprep.subr.bf16.mxu1 %v11687_v8  ;;  %v3497_v47 = vadd.f32 1.0, %v12903_v39 }
 0x1e9   :  { %3242 = vmatpush1.bf16.msra.mxu0 %v11684_v17  ;;  %3348 = vmatpush1.bf16.msra.mxu1 %v11686_v20 }
 0x1ea   :  { %3243 = vmatprep.subr.bf16.mxu0 %v11693_v21  ;;  %3349 = vmatprep.subr.bf16.mxu1 %v11695_v23 }
 0x1ed   :  { %3244 = vmatpush1.bf16.msra.mxu0 %v11692_v26  ;;  %3350 = vmatpush1.bf16.msra.mxu1 %v11694_v28 }
 0x1f0   :  { %3262 = vmatmul.mubr.bf16.vlgmr.msra.gmra.mrb[24].mxu0 %v13647_v46  ;;  %3368 = vmatmul.mubr.bf16.vlgmr.msra.gmra.mrb[24].mxu1 %v13647_v46  ;;  %v13727_v46 = vsub.s32 5, %v13683_v58 }
 0x1f1   :  { %3271 = vmatprep.mubr.bf16.mxu0 %v13378_v45  ;;  %3377 = vmatprep.mubr.bf16.mxu1 %v13378_v45  ;;  %v3484_v45 = vadd.f32 1.0, %v12897_v31 }
 0x1f2   :  { %15719 = vst [vmem:[#allocation24_spill] sm:$0xff] %v13727_v46  ;;  %v3453_v50 = vrot.slane %v13691_v35, %v13727_v46 }
 0x1f3   :  { %12904 = vrcp.f32 %v3484_v45 }
 0x1f4   :  { %12906 = vrcp.f32 %v3496_v43 }
 0x1f5   :  { %12908 = vrcp.f32 %v3485_v44 }
 0x1f6   :  { %12910 = vrcp.f32 %v3497_v47 }
 0x1f8   :  { %3272 = vmatmul.mubr.bf16.gmra.mrb[28].mxu0 %v13656_v0  ;;  %3378 = vmatmul.mubr.bf16.gmra.mrb[28].mxu1 %v13656_v0  ;;  %v3449_v0 = vrot.slane %v13691_v35, %v13721_v36 }
 0x1fd   :  { %v12905_v56 = vpop.eup %12904 }
 0x1fe   :  { %v12907_v5 = vpop.eup %12906 }
 0x1ff   :  { %v12909_v9 = vpop.eup %12908  ;;  %v3516_v20 = vmul.f32 0.0, %v12907_v5 }
 0x200   :  { %v12911_v14 = vpop.eup %12910 }
 0x201   :  { %v3517_v22 = vmul.f32 0.0, %v12911_v14 }
 0x203   :  { %v1615_v49 = vpop.f32.mrb[8].mxu0  ;;  %v1721_v53 = vpop.f32.mrb[8].mxu1 }
 0x204   :  { %1744 = vst [vmem:[#allocation3 + $0x20] sm:$0xff] %v1615_v49  ;;  %v3474_v52 = vadd.f32 %v3449_v0, %v1615_v49  ;;  %v1617_v16 = vpop.f32.mrb[9].mxu0  ;;  %1746 = vst [vmem:[#allocation3 + $0x30] sm:$0xff] %v1721_v53  ;;  %v3476_v54 = vadd.f32 %v3457_v48, %v1721_v53  ;;  %v1723_v57 = vpop.f32.mrb[9].mxu1 }
 0x205   :  { %1745 = vst [vmem:[#allocation3 + $0x28] sm:$0xff] %v1617_v16  ;;  %v3475_v55 = vadd.f32 %v3453_v50, %v1617_v16  ;;  %v1619_v58 = vpop.f32.mrb[10].mxu0  ;;  %1747 = vst [vmem:[#allocation3 + $0x38] sm:$0xff] %v1723_v57  ;;  %v3477_v60 = vadd.f32 %v3461_v10, %v1723_v57  ;;  %v1725_v19 = vpop.f32.mrb[10].mxu1 }
 0x206   :  { %12912 = vtanh.f32 %v3474_v52  ;;  %1752 = vst [vmem:[#allocation3 + $0x60] sm:$0xff] %v1619_v58  ;;  %v1621_v61 = vpop.f32.mrb[11].mxu0  ;;  %v11700_v62 = vmul.f32 -1.442695, %v3476_v54  ;;  %1754 = vst [vmem:[#allocation3 + $0x70] sm:$0xff] %v1725_v19  ;;  %v1727_v63 = vpop.f32.mrb[11].mxu1 }
 0x207   :  { %12914 = vtanh.f32 %v3475_v55  ;;  %1753 = vst [vmem:[#allocation3 + $0x68] sm:$0xff] %v1621_v61  ;;  %v11701_v1 = vmul.f32 -1.442695, %v3477_v60  ;;  %1755 = vst [vmem:[#allocation3 + $0x78] sm:$0xff] %v1727_v63 }
 0x208   :  { %12916 = vpow2.f32 %v11700_v62 }
 0x209   :  { %12918 = vpow2.f32 %v11701_v1 }
 0x20b   :  { %v1625_v2 = vpop.f32.mrb[12].mxu0  ;;  %v1731_v3 = vpop.f32.mrb[12].mxu1 }
 0x20c   :  { %1760 = vst [vmem:[#allocation3 + $0xa0] sm:$0xff] %v1625_v2  ;;  %v1627_v35 = vpop.f32.mrb[13].mxu0  ;;  %1762 = vst [vmem:[#allocation3 + $0xb0] sm:$0xff] %v1731_v3  ;;  %v1733_v6 = vpop.f32.mrb[13].mxu1 }
 0x20d   :  { %1761 = vst [vmem:[#allocation3 + $0xa8] sm:$0xff] %v1627_v35  ;;  %v1629_v8 = vpop.f32.mrb[14].mxu0  ;;  %1763 = vst [vmem:[#allocation3 + $0xb8] sm:$0xff] %v1733_v6  ;;  %v1735_v11 = vpop.f32.mrb[14].mxu1 }
 0x20e   :  { %1768 = vst [vmem:[#allocation3 + $0xe0] sm:$0xff] %v1629_v8  ;;  %v1631_v13 = vpop.f32.mrb[15].mxu0  ;;  %1770 = vst [vmem:[#allocation3 + $0xf0] sm:$0xff] %v1735_v11  ;;  %v1737_v15 = vpop.f32.mrb[15].mxu1 }
 0x20f   :  { %1769 = vst [vmem:[#allocation3 + $0xe8] sm:$0xff] %v1631_v13  ;;  %1771 = vst [vmem:[#allocation3 + $0xf8] sm:$0xff] %v1737_v15 }
 0x210   :  { %v12913_v17 = vpop.eup %12912 }
 0x211   :  { %v12915_v18 = vpop.eup %12914  ;;  %v3518_v21 = vmul.f32 %v12913_v17, %v12905_v56 }
 0x212   :  { %v3519_v23 = vmul.f32 %v12915_v18, %v12909_v9  ;;  %v12917_v24 = vpop.eup %12916 }
 0x213   :  { %v13740_v25 = vadd.f32 %v3518_v21, %v3516_v20   ;;  %v12919_v26 = vpop.eup %12918  ;;  %v3510_v27 = vadd.f32 1.0, %v12917_v24 }
 0x214   :  { %v13742_v28 = vadd.f32 %v3519_v23, %v3517_v22   ;;  %v3511_v29 = vadd.f32 1.0, %v12919_v26 }
 0x215   :  { %12920 = vtanh.f32 %v13740_v25 }
 0x216   :  { %12922 = vrcp.f32 %v3510_v27 }
 0x217   :  { %12924 = vtanh.f32 %v13742_v28 }
 0x218   :  { %12926 = vrcp.f32 %v3511_v29 }
 0x21f   :  { %v12921_v59 = vpop.eup %12920 }
 0x220   :  { %v12923_v32 = vpop.eup %12922 }
 0x221   :  { %v12925_v33 = vpop.eup %12924  ;;  %v13746_v37 = vmul.f32 %v12923_v32, %v12921_v59  }
 0x222   :  { %v12927_v38 = vpop.eup %12926 }
 0x223   :  { %3526 = vst [vmem:[#allocation2] sm:$0xff] %v13746_v37  ;;  %v13749_v31 = vmul.f32 %v12927_v38, %v12925_v33  }
 0x225   :  { %3527 = vst [vmem:[#allocation2 + $0x8] sm:$0xff] %v13749_v31 }
 0x263   :  { %v3051_v34 = vpop.f32.mrb[16].mxu0  ;;  %v3157_v40 = vpop.f32.mrb[16].mxu1 }
 0x264   :  { %3388 = vst [vmem:[#allocation3 + $0x100] sm:$0xff] %v3051_v34  ;;  %v3053_v39 = vpop.f32.mrb[17].mxu0  ;;  %3390 = vst [vmem:[#allocation3 + $0x110] sm:$0xff] %v3157_v40  ;;  %v3159_v45 = vpop.f32.mrb[17].mxu1 }
 0x265   :  { %3389 = vst [vmem:[#allocation3 + $0x108] sm:$0xff] %v3053_v39  ;;  %v3055_v43 = vpop.f32.mrb[18].mxu0  ;;  %3391 = vst [vmem:[#allocation3 + $0x118] sm:$0xff] %v3159_v45  ;;  %v3161_v44 = vpop.f32.mrb[18].mxu1 }
 0x266   :  { %3396 = vst [vmem:[#allocation3 + $0x140] sm:$0xff] %v3055_v43  ;;  %v3057_v0 = vpop.f32.mrb[19].mxu0  ;;  %3398 = vst [vmem:[#allocation3 + $0x150] sm:$0xff] %v3161_v44  ;;  %v3163_v47 = vpop.f32.mrb[19].mxu1 }
 0x267   :  { %3397 = vst [vmem:[#allocation3 + $0x148] sm:$0xff] %v3057_v0  ;;  %3399 = vst [vmem:[#allocation3 + $0x158] sm:$0xff] %v3163_v47 }
 0x26b   :  { %v3061_v48 = vpop.f32.mrb[20].mxu0  ;;  %v3167_v50 = vpop.f32.mrb[20].mxu1 }
 0x26c   :  { %3404 = vst [vmem:[#allocation3 + $0x180] sm:$0xff] %v3061_v48  ;;  %v3063_v10 = vpop.f32.mrb[21].mxu0  ;;  %3406 = vst [vmem:[#allocation3 + $0x190] sm:$0xff] %v3167_v50  ;;  %v3169_v49 = vpop.f32.mrb[21].mxu1 }
 0x26d   :  { %3405 = vst [vmem:[#allocation3 + $0x188] sm:$0xff] %v3063_v10  ;;  %v3065_v52 = vpop.f32.mrb[22].mxu0  ;;  %3407 = vst [vmem:[#allocation3 + $0x198] sm:$0xff] %v3169_v49  ;;  %v3171_v53 = vpop.f32.mrb[22].mxu1 }
 0x26e   :  { %3412 = vst [vmem:[#allocation3 + $0x1c0] sm:$0xff] %v3065_v52  ;;  %v3067_v16 = vpop.f32.mrb[23].mxu0  ;;  %3414 = vst [vmem:[#allocation3 + $0x1d0] sm:$0xff] %v3171_v53  ;;  %v3173_v54 = vpop.f32.mrb[23].mxu1 }
 0x26f   :  { %3413 = vst [vmem:[#allocation3 + $0x1c8] sm:$0xff] %v3067_v16  ;;  %3415 = vst [vmem:[#allocation3 + $0x1d8] sm:$0xff] %v3173_v54 }
 0x2c3   :  { %v3263_v55 = vpop.f32.mrb[24].mxu0  ;;  %v3369_v57 = vpop.f32.mrb[24].mxu1 }
 0x2c4   :  { %3392 = vst [vmem:[#allocation3 + $0x120] sm:$0xff] %v3263_v55  ;;  %v3265_v58 = vpop.f32.mrb[25].mxu0  ;;  %3394 = vst [vmem:[#allocation3 + $0x130] sm:$0xff] %v3369_v57  ;;  %v3371_v60 = vpop.f32.mrb[25].mxu1 }
 0x2c5   :  { %3393 = vst [vmem:[#allocation3 + $0x128] sm:$0xff] %v3265_v58  ;;  %v3267_v19 = vpop.f32.mrb[26].mxu0  ;;  %3395 = vst [vmem:[#allocation3 + $0x138] sm:$0xff] %v3371_v60  ;;  %v3373_v61 = vpop.f32.mrb[26].mxu1 }
 0x2c6   :  { %3400 = vst [vmem:[#allocation3 + $0x160] sm:$0xff] %v3267_v19  ;;  %v3269_v62 = vpop.f32.mrb[27].mxu0  ;;  %3402 = vst [vmem:[#allocation3 + $0x170] sm:$0xff] %v3373_v61  ;;  %v3375_v63 = vpop.f32.mrb[27].mxu1 }
 0x2c7   :  { %3401 = vst [vmem:[#allocation3 + $0x168] sm:$0xff] %v3269_v62  ;;  %3403 = vst [vmem:[#allocation3 + $0x178] sm:$0xff] %v3375_v63 }
 0x2cb   :  { %v3273_v1 = vpop.f32.mrb[28].mxu0  ;;  %v3379_v2 = vpop.f32.mrb[28].mxu1 }
 0x2cc   :  { %3408 = vst [vmem:[#allocation3 + $0x1a0] sm:$0xff] %v3273_v1  ;;  %v3275_v56 = vpop.f32.mrb[29].mxu0  ;;  %3410 = vst [vmem:[#allocation3 + $0x1b0] sm:$0xff] %v3379_v2  ;;  %v3381_v3 = vpop.f32.mrb[29].mxu1 }
 0x2cd   :  { %3409 = vst [vmem:[#allocation3 + $0x1a8] sm:$0xff] %v3275_v56  ;;  %v3277_v35 = vpop.f32.mrb[30].mxu0  ;;  %3411 = vst [vmem:[#allocation3 + $0x1b8] sm:$0xff] %v3381_v3  ;;  %v3383_v5 = vpop.f32.mrb[30].mxu1 }
 0x2ce   :  { %3416 = vst [vmem:[#allocation3 + $0x1e0] sm:$0xff] %v3277_v35  ;;  %v3279_v6 = vpop.f32.mrb[31].mxu0  ;;  %3418 = vst [vmem:[#allocation3 + $0x1f0] sm:$0xff] %v3383_v5  ;;  %v3385_v8 = vpop.f32.mrb[31].mxu1 }
 0x2cf   :  { %3417 = vst [vmem:[#allocation3 + $0x1e8] sm:$0xff] %v3279_v6  ;;  %3419 = vst [vmem:[#allocation3 + $0x1f8] sm:$0xff] %v3385_v8 }
 0x2d0 LB: > { %v3604_v9 = vld [vmem:[%s15545_s2] sm:$0xff]  ;;  %v3605_v13 = vld [vmem:[%s15545_s2 + $0x8] sm:$0xff]  ;;  %v13815_v38 = vpack.c.bf16 %v13318_v31, %v13318_v31  ;;  %s11702_s19 = sshll.u32 %s13326_s23, 3  ;;  %s3533_s23 = sadd.s32 1, %s13326_s23   ;;  %s13326_s23 = sphi %s13764_s23, %s3533_s23   ;;  %v13322_v37 = vphi %v13746_v37, %v4590_v37   ;;  %v13318_v31 = vphi %v13749_v31, %v4591_v31   ;;  %v13314_v25 = vphi %v13740_v25, %v4586_v25   ;;  %v13310_v28 = vphi %v13742_v28, %v4587_v28  }
 0x2d1   : > { %v3608_v11 = vld [vmem:[%s15545_s2 + $0x20] sm:$0xff]  ;;  %v3609_v15 = vld [vmem:[%s15545_s2 + $0x28] sm:$0xff]  ;;  %s14178_s21 = sshra.s32 %s11702_s19, 3  ;;  %p3530_p6 = scmp.ge.s32.totalorder %s3533_s23, 8  }
 0x2d2   : > { %v11706_v14 = vcombine.high %v3604_v9, %v3608_v11  ;;  %v11705_v17 = vcombine.low %v3604_v9, %v3608_v11  ;;  %v3612_v18 = vld [vmem:[%s15545_s2 + $0x40] sm:$0xff]  ;;  %v11708_v21 = vcombine.high %v3605_v13, %v3609_v15  ;;  %v11707_v22 = vcombine.low %v3605_v13, %v3609_v15  ;;  %v3613_v24 = vld [vmem:[%s15545_s2 + $0x48] sm:$0xff]  ;;  %4404 = vmatprep.mubr.bf16.mxu0 %v13815_v38  ;;  %s12658_s8 = sshll.u32 %s14178_s21, 6  ;;  %s12659_s0 = sshll.u32 %s14178_s21, 4 }
 0x2d3   : > { %v3616_v20 = vld [vmem:[%s15545_s2 + $0x60] sm:$0xff]  ;;  %v3617_v26 = vld [vmem:[%s15545_s2 + $0x68] sm:$0xff]  ;;  %4445 = vmatprep.mubr.bf16.mxu1 %v13815_v38  ;;  %s14185_s20 = scalar_lea.vmem [#allocation3], %s12658_s8  ;;  %s4594_s10 = scalar_lea.vmem [#allocation2], %s12659_s0 }
 0x2d4   : > { %v11714_v23 = vcombine.high %v3612_v18, %v3616_v20  ;;  %v3620_v27 = vld [vmem:[%s15545_s2 + $0x80] sm:$0xff]  ;;  %4372 = vmatprep.subr.bf16.mxu0 %v11706_v14  ;;  %v11716_v29 = vcombine.high %v3613_v24, %v3617_v26  ;;  %v3621_v32 = vld [vmem:[%s15545_s2 + $0x88] sm:$0xff]  ;;  %4413 = vmatprep.subr.bf16.mxu1 %v11708_v21  ;;  %v11713_v34 = vcombine.low %v3612_v18, %v3616_v20  ;;  %s14811_s23 = smov (%p3530_p6), 1  }
 0x2d5   : > { %v3624_v59 = vld [vmem:[%s15545_s2 + $0xa0] sm:$0xff]  ;;  %v3625_v33 = vld [vmem:[%s15545_s2 + $0xa8] sm:$0xff]  ;;  %4373 = vmatpush1.bf16.msra.mxu0 %v11705_v17  ;;  %4414 = vmatpush1.bf16.msra.mxu1 %v11707_v22  ;;  %v11715_v40 = vcombine.low %v3613_v24, %v3617_v26 }
 0x2d6   : > { %4374 = vmatprep.subr.bf16.mxu0 %v11714_v23  ;;  %v11722_v39 = vcombine.high %v3620_v27, %v3624_v59  ;;  %4415 = vmatprep.subr.bf16.mxu1 %v11716_v29  ;;  %v11724_v45 = vcombine.high %v3621_v32, %v3625_v33  ;;  %v3628_v43 = vld [vmem:[%s15545_s2 + $0xc0] sm:$0xff]  ;;  %v3629_v31 = vld [vmem:[%s15545_s2 + $0xc8] sm:$0xff]  ;;  %v11721_v47 = vcombine.low %v3620_v27, %v3624_v59 }
 0x2d7   : > { %v3632_v44 = vld [vmem:[%s15545_s2 + $0xe0] sm:$0xff]  ;;  %v3633_v0 = vld [vmem:[%s15545_s2 + $0xe8] sm:$0xff]  ;;  %v11723_v48 = vcombine.low %v3621_v32, %v3625_v33 }
 0x2d8   : > { %v11730_v50 = vcombine.high %v3628_v43, %v3632_v44  ;;  %v11732_v10 = vcombine.high %v3629_v31, %v3633_v0  ;;  %v3636_v49 = vld [vmem:[%s15545_s2 + $0x100] sm:$0xff]  ;;  %v3637_v53 = vld [vmem:[%s15545_s2 + $0x108] sm:$0xff]  ;;  %v11729_v54 = vcombine.low %v3628_v43, %v3632_v44  ;;  %v11731_v55 = vcombine.low %v3629_v31, %v3633_v0 }
 0x2d9   : > { %4375 = vmatpush1.bf16.msra.mxu0 %v11713_v34  ;;  %4416 = vmatpush1.bf16.msra.mxu1 %v11715_v40  ;;  %v3640_v52 = vld [vmem:[%s15545_s2 + $0x120] sm:$0xff]  ;;  %v3641_v16 = vld [vmem:[%s15545_s2 + $0x128] sm:$0xff] }
 0x2da   : > { %4376 = vmatprep.subr.bf16.mxu0 %v11722_v39  ;;  %4417 = vmatprep.subr.bf16.mxu1 %v11724_v45  ;;  %v11738_v57 = vcombine.high %v3636_v49, %v3640_v52  ;;  %v11740_v58 = vcombine.high %v3637_v53, %v3641_v16  ;;  %v3644_v60 = vld [vmem:[%s15545_s2 + $0x140] sm:$0xff]  ;;  %v3645_v61 = vld [vmem:[%s15545_s2 + $0x148] sm:$0xff]  ;;  %v11737_v63 = vcombine.low %v3636_v49, %v3640_v52 }
 0x2db   : > { %v3648_v19 = vld [vmem:[%s15545_s2 + $0x160] sm:$0xff]  ;;  %v3649_v62 = vld [vmem:[%s15545_s2 + $0x168] sm:$0xff]  ;;  %v11739_v1 = vcombine.low %v3637_v53, %v3641_v16 }
 0x2dc   : > { %v11746_v2 = vcombine.high %v3644_v60, %v3648_v19  ;;  %v11748_v56 = vcombine.high %v3645_v61, %v3649_v62  ;;  %v3652_v3 = vld [vmem:[%s15545_s2 + $0x180] sm:$0xff]  ;;  %v3653_v5 = vld [vmem:[%s15545_s2 + $0x188] sm:$0xff]  ;;  %v11745_v8 = vcombine.low %v3644_v60, %v3648_v19  ;;  %v11747_v9 = vcombine.low %v3645_v61, %v3649_v62 }
 0x2dd   : > { %4377 = vmatpush1.bf16.msra.mxu0 %v11721_v47  ;;  %4418 = vmatpush1.bf16.msra.mxu1 %v11723_v48  ;;  %v3656_v35 = vld [vmem:[%s15545_s2 + $0x1a0] sm:$0xff]  ;;  %v3657_v6 = vld [vmem:[%s15545_s2 + $0x1a8] sm:$0xff] }
 0x2de   : > { %4378 = vmatprep.subr.bf16.mxu0 %v11730_v50  ;;  %4419 = vmatprep.subr.bf16.mxu1 %v11732_v10  ;;  %v11754_v11 = vcombine.high %v3652_v3, %v3656_v35  ;;  %v11756_v13 = vcombine.high %v3653_v5, %v3657_v6  ;;  %v3660_v14 = vld [vmem:[%s15545_s2 + $0x1c0] sm:$0xff]  ;;  %v3661_v17 = vld [vmem:[%s15545_s2 + $0x1c8] sm:$0xff]  ;;  %v11753_v20 = vcombine.low %v3652_v3, %v3656_v35 }
 0x2df   : > { %v3664_v15 = vld [vmem:[%s15545_s2 + $0x1e0] sm:$0xff]  ;;  %v3665_v18 = vld [vmem:[%s15545_s2 + $0x1e8] sm:$0xff]  ;;  %v11755_v21 = vcombine.low %v3653_v5, %v3657_v6 }
 0x2e0   : > { %v11762_v22 = vcombine.high %v3660_v14, %v3664_v15  ;;  %v11764_v23 = vcombine.high %v3661_v17, %v3665_v18  ;;  %v3668_v24 = vld [vmem:[%s15545_s2 + $0x200] sm:$0xff]  ;;  %v3669_v27 = vld [vmem:[%s15545_s2 + $0x208] sm:$0xff]  ;;  %v11761_v59 = vcombine.low %v3660_v14, %v3664_v15  ;;  %v11763_v32 = vcombine.low %v3661_v17, %v3665_v18 }
 0x2e1   : > { %4379 = vmatpush1.bf16.msra.mxu0 %v11729_v54  ;;  %4420 = vmatpush1.bf16.msra.mxu1 %v11731_v55  ;;  %v3672_v26 = vld [vmem:[%s15545_s2 + $0x220] sm:$0xff]  ;;  %v3673_v29 = vld [vmem:[%s15545_s2 + $0x228] sm:$0xff] }
 0x2e2   : > { %4380 = vmatprep.subr.bf16.mxu0 %v11738_v57  ;;  %4421 = vmatprep.subr.bf16.mxu1 %v11740_v58  ;;  %v11770_v33 = vcombine.high %v3668_v24, %v3672_v26  ;;  %v11772_v34 = vcombine.high %v3669_v27, %v3673_v29  ;;  %v3676_v40 = vld [vmem:[%s15545_s2 + $0x240] sm:$0xff]  ;;  %v3677_v45 = vld [vmem:[%s15545_s2 + $0x248] sm:$0xff]  ;;  %v11769_v44 = vcombine.low %v3668_v24, %v3672_v26 }
 0x2e3   : > { %v3680_v39 = vld [vmem:[%s15545_s2 + $0x260] sm:$0xff]  ;;  %v3681_v43 = vld [vmem:[%s15545_s2 + $0x268] sm:$0xff]  ;;  %v11771_v31 = vcombine.low %v3669_v27, %v3673_v29 }
 0x2e4   : > { %v11778_v0 = vcombine.high %v3676_v40, %v3680_v39  ;;  %v11780_v47 = vcombine.high %v3677_v45, %v3681_v43  ;;  %v3684_v48 = vld [vmem:[%s15545_s2 + $0x280] sm:$0xff]  ;;  %v3685_v10 = vld [vmem:[%s15545_s2 + $0x288] sm:$0xff]  ;;  %v11777_v52 = vcombine.low %v3676_v40, %v3680_v39  ;;  %v11779_v53 = vcombine.low %v3677_v45, %v3681_v43 }
 0x2e5   : > { %4381 = vmatpush1.bf16.msra.mxu0 %v11737_v63  ;;  %4422 = vmatpush1.bf16.msra.mxu1 %v11739_v1  ;;  %v3688_v50 = vld [vmem:[%s15545_s2 + $0x2a0] sm:$0xff]  ;;  %v3689_v49 = vld [vmem:[%s15545_s2 + $0x2a8] sm:$0xff] }
 0x2e6   : > { %4382 = vmatprep.subr.bf16.mxu0 %v11746_v2  ;;  %4423 = vmatprep.subr.bf16.mxu1 %v11748_v56  ;;  %v11786_v16 = vcombine.high %v3684_v48, %v3688_v50  ;;  %v11788_v54 = vcombine.high %v3685_v10, %v3689_v49  ;;  %v3692_v55 = vld [vmem:[%s15545_s2 + $0x2c0] sm:$0xff]  ;;  %v3693_v58 = vld [vmem:[%s15545_s2 + $0x2c8] sm:$0xff]  ;;  %v11785_v19 = vcombine.low %v3684_v48, %v3688_v50  ;;  %v3611_v48 = vld [vmem:[%s15545_s2 + $0x38] sm:$0xff] }
 0x2e7   : > { %v3696_v57 = vld [vmem:[%s15545_s2 + $0x2e0] sm:$0xff]  ;;  %v3697_v60 = vld [vmem:[%s15545_s2 + $0x2e8] sm:$0xff]  ;;  %v11787_v61 = vcombine.low %v3685_v10, %v3689_v49 }
 0x2e8   : > { %v11794_v62 = vcombine.high %v3692_v55, %v3696_v57  ;;  %v11796_v63 = vcombine.high %v3693_v58, %v3697_v60  ;;  %v3700_v1 = vld [vmem:[%s15545_s2 + $0x300] sm:$0xff]  ;;  %v3701_v56 = vld [vmem:[%s15545_s2 + $0x308] sm:$0xff]  ;;  %v11793_v35 = vcombine.low %v3692_v55, %v3696_v57  ;;  %v11795_v5 = vcombine.low %v3693_v58, %v3697_v60  ;;  %v3615_v55 = vld [vmem:[%s15545_s2 + $0x58] sm:$0xff] }
 0x2e9   : > { %4383 = vmatpush1.bf16.msra.mxu0 %v11745_v8  ;;  %4424 = vmatpush1.bf16.msra.mxu1 %v11747_v9  ;;  %v3704_v2 = vld [vmem:[%s15545_s2 + $0x320] sm:$0xff]  ;;  %v3705_v3 = vld [vmem:[%s15545_s2 + $0x328] sm:$0xff]  ;;  %v3619_v57 = vld [vmem:[%s15545_s2 + $0x78] sm:$0xff] }
 0x2ea   : > { %4384 = vmatprep.subr.bf16.mxu0 %v11754_v11  ;;  %4425 = vmatprep.subr.bf16.mxu1 %v11756_v13  ;;  %v11802_v6 = vcombine.high %v3700_v1, %v3704_v2  ;;  %v11804_v8 = vcombine.high %v3701_v56, %v3705_v3  ;;  %v3708_v9 = vld [vmem:[%s15545_s2 + $0x340] sm:$0xff]  ;;  %v3709_v13 = vld [vmem:[%s15545_s2 + $0x348] sm:$0xff]  ;;  %v11801_v15 = vcombine.low %v3700_v1, %v3704_v2  ;;  %v3627_v1 = vld [vmem:[%s15545_s2 + $0xb8] sm:$0xff] }
 0x2eb   : > { %v3712_v11 = vld [vmem:[%s15545_s2 + $0x360] sm:$0xff]  ;;  %v3713_v14 = vld [vmem:[%s15545_s2 + $0x368] sm:$0xff]  ;;  %v11803_v17 = vcombine.low %v3701_v56, %v3705_v3  ;;  %v11719_v56 = vcombine.low %v3615_v55, %v3619_v57 }
 0x2ec   : > { %v11810_v18 = vcombine.high %v3708_v9, %v3712_v11  ;;  %v3721_v24 = vld [vmem:[%s15545_s2 + $0x3a8] sm:$0xff]  ;;  %v11809_v26 = vcombine.low %v3708_v9, %v3712_v11  ;;  %v11811_v27 = vcombine.low %v3709_v13, %v3713_v14  ;;  %v3635_v9 = vld [vmem:[%s15545_s2 + $0xf8] sm:$0xff]  ;;  %v4705_v51 = vld [vmem:[#allocation6 + $0x300] sm:$0xff] (%p3530_p6) }
 0x2ed   : > { %4385 = vmatpush1.bf16.msra.mxu0 %v11753_v20  ;;  %4426 = vmatpush1.bf16.msra.mxu1 %v11755_v21  ;;  %v11812_v20 = vcombine.high %v3709_v13, %v3713_v14  ;;  %v3716_v21 = vld [vmem:[%s15545_s2 + $0x380] sm:$0xff]  ;;  %v3729_v40 = vld [vmem:[%s15545_s2 + $0x3e8] sm:$0xff] }
 0x2ee   : > { %4386 = vmatprep.subr.bf16.mxu0 %v11762_v22  ;;  %4427 = vmatprep.subr.bf16.mxu1 %v11764_v23  ;;  %v3720_v22 = vld [vmem:[%s15545_s2 + $0x3a0] sm:$0xff]  ;;  %v3717_v23 = vld [vmem:[%s15545_s2 + $0x388] sm:$0xff] }
 0x2ef   : > { %v11818_v29 = vcombine.high %v3716_v21, %v3720_v22  ;;  %v11817_v39 = vcombine.low %v3716_v21, %v3720_v22  ;;  %v11819_v45 = vcombine.low %v3717_v23, %v3721_v24 }
 0x2f1   : > { %4387 = vmatpush1.bf16.msra.mxu0 %v11761_v59  ;;  %4428 = vmatpush1.bf16.msra.mxu1 %v11763_v32  ;;  %v11820_v59 = vcombine.high %v3717_v23, %v3721_v24  ;;  %v3724_v32 = vld [vmem:[%s15545_s2 + $0x3c0] sm:$0xff] }
 0x2f2   : > { %4388 = vmatprep.subr.bf16.mxu0 %v11770_v33  ;;  %4429 = vmatprep.subr.bf16.mxu1 %v11772_v34  ;;  %v3728_v33 = vld [vmem:[%s15545_s2 + $0x3e0] sm:$0xff]  ;;  %v3725_v34 = vld [vmem:[%s15545_s2 + $0x3c8] sm:$0xff] }
 0x2f3   : > { %v11826_v43 = vcombine.high %v3724_v32, %v3728_v33  ;;  %v11825_v50 = vcombine.low %v3724_v32, %v3728_v33  ;;  %v11827_v10 = vcombine.low %v3725_v34, %v3729_v40 }
 0x2f5   : > { %4389 = vmatpush1.bf16.msra.mxu0 %v11769_v44  ;;  %4430 = vmatpush1.bf16.msra.mxu1 %v11771_v31  ;;  %v11828_v44 = vcombine.high %v3725_v34, %v3729_v40  ;;  %v3606_v31 = vld [vmem:[%s15545_s2 + $0x10] sm:$0xff] }
 0x2f6   : > { %4390 = vmatprep.subr.bf16.mxu0 %v11778_v0  ;;  %4431 = vmatprep.subr.bf16.mxu1 %v11780_v47  ;;  %v3610_v0 = vld [vmem:[%s15545_s2 + $0x30] sm:$0xff]  ;;  %v3607_v47 = vld [vmem:[%s15545_s2 + $0x18] sm:$0xff] }
 0x2f7   : > { %v11710_v49 = vcombine.high %v3606_v31, %v3610_v0  ;;  %v11709_v58 = vcombine.low %v3606_v31, %v3610_v0  ;;  %v11711_v60 = vcombine.low %v3607_v47, %v3611_v48 }
 0x2f9   : > { %4391 = vmatpush1.bf16.msra.mxu0 %v11777_v52  ;;  %4432 = vmatpush1.bf16.msra.mxu1 %v11779_v53  ;;  %v11712_v52 = vcombine.high %v3607_v47, %v3611_v48  ;;  %v3614_v53 = vld [vmem:[%s15545_s2 + $0x50] sm:$0xff] }
 0x2fa   : > { %4392 = vmatprep.subr.bf16.mxu0 %v11786_v16  ;;  %4433 = vmatprep.subr.bf16.mxu1 %v11788_v54  ;;  %v3618_v16 = vld [vmem:[%s15545_s2 + $0x70] sm:$0xff]  ;;  %v13995_v54 = vpack.c.bf16 %v13322_v37, %v13322_v37 }
 0x2fb   : > { %v3622_v37 = vld [vmem:[%s15545_s2 + $0x90] sm:$0xff]  ;;  %v11717_v2 = vcombine.low %v3614_v53, %v3618_v16 }
 0x2fd   : > { %4393 = vmatpush1.bf16.msra.mxu0 %v11785_v19  ;;  %4434 = vmatpush1.bf16.msra.mxu1 %v11787_v61  ;;  %v11718_v19 = vcombine.high %v3614_v53, %v3618_v16  ;;  %v11720_v61 = vcombine.high %v3615_v55, %v3619_v57 }
 0x2fe   : > { %4394 = vmatprep.subr.bf16.mxu0 %v11794_v62  ;;  %4435 = vmatprep.subr.bf16.mxu1 %v11796_v63  ;;  %v3626_v62 = vld [vmem:[%s15545_s2 + $0xb0] sm:$0xff]  ;;  %v3623_v63 = vld [vmem:[%s15545_s2 + $0x98] sm:$0xff] }
 0x2ff   : > { %v11726_v3 = vcombine.high %v3622_v37, %v3626_v62  ;;  %v11725_v11 = vcombine.low %v3622_v37, %v3626_v62  ;;  %v11727_v13 = vcombine.low %v3623_v63, %v3627_v1 }
 0x301   : > { %4395 = vmatpush1.bf16.msra.mxu0 %v11793_v35  ;;  %4436 = vmatpush1.bf16.msra.mxu1 %v11795_v5  ;;  %v11728_v35 = vcombine.high %v3623_v63, %v3627_v1  ;;  %v3630_v5 = vld [vmem:[%s15545_s2 + $0xd0] sm:$0xff] }
 0x302   : > { %4396 = vmatprep.subr.bf16.mxu0 %v11802_v6  ;;  %4437 = vmatprep.subr.bf16.mxu1 %v11804_v8  ;;  %v3634_v6 = vld [vmem:[%s15545_s2 + $0xf0] sm:$0xff]  ;;  %v3631_v8 = vld [vmem:[%s15545_s2 + $0xd8] sm:$0xff] }
 0x303   : > { %v11734_v14 = vcombine.high %v3630_v5, %v3634_v6  ;;  %v11733_v21 = vcombine.low %v3630_v5, %v3634_v6  ;;  %v11735_v22 = vcombine.low %v3631_v8, %v3635_v9 }
 0x305   : > { %4397 = vmatpush1.bf16.msra.mxu0 %v11801_v15  ;;  %4438 = vmatpush1.bf16.msra.mxu1 %v11803_v17  ;;  %v11736_v15 = vcombine.high %v3631_v8, %v3635_v9  ;;  %v3638_v17 = vld [vmem:[%s15545_s2 + $0x110] sm:$0xff] }
 0x306   : > { %4398 = vmatprep.subr.bf16.mxu0 %v11810_v18  ;;  %4439 = vmatprep.subr.bf16.mxu1 %v11812_v20  ;;  %v3642_v18 = vld [vmem:[%s15545_s2 + $0x130] sm:$0xff]  ;;  %v3643_v20 = vld [vmem:[%s15545_s2 + $0x138] sm:$0xff] }
 0x307   : > { %v11742_v23 = vcombine.high %v3638_v17, %v3642_v18  ;;  %v11741_v32 = vcombine.low %v3638_v17, %v3642_v18 }
 0x309   : > { %4399 = vmatpush1.bf16.msra.mxu0 %v11809_v26  ;;  %4440 = vmatpush1.bf16.msra.mxu1 %v11811_v27  ;;  %v3646_v26 = vld [vmem:[%s15545_s2 + $0x150] sm:$0xff] }
 0x30a   : > { %4400 = vmatprep.subr.bf16.mxu0 %v11818_v29  ;;  %4441 = vmatprep.subr.bf16.mxu1 %v11820_v59  ;;  %v3650_v27 = vld [vmem:[%s15545_s2 + $0x170] sm:$0xff]  ;;  %v3647_v29 = vld [vmem:[%s15545_s2 + $0x158] sm:$0xff] }
 0x30b   : > { %v3651_v59 = vld [vmem:[%s15545_s2 + $0x178] sm:$0xff]  ;;  %v11750_v34 = vcombine.high %v3646_v26, %v3650_v27  ;;  %v11749_v31 = vcombine.low %v3646_v26, %v3650_v27 }
 0x30c   : > { %v11752_v40 = vcombine.high %v3647_v29, %v3651_v59  ;;  %v11751_v0 = vcombine.low %v3647_v29, %v3651_v59 }
 0x30d   : > { %4401 = vmatpush1.bf16.msra.mxu0 %v11817_v39  ;;  %4442 = vmatpush1.bf16.msra.mxu1 %v11819_v45  ;;  %v3654_v39 = vld [vmem:[%s15545_s2 + $0x190] sm:$0xff] }
 0x30e   : > { %4402 = vmatprep.subr.bf16.mxu0 %v11826_v43  ;;  %4443 = vmatprep.subr.bf16.mxu1 %v11828_v44  ;;  %v3658_v45 = vld [vmem:[%s15545_s2 + $0x1b0] sm:$0xff]  ;;  %v3655_v43 = vld [vmem:[%s15545_s2 + $0x198] sm:$0xff] }
 0x30f   : > { %v3659_v44 = vld [vmem:[%s15545_s2 + $0x1b8] sm:$0xff]  ;;  %v11758_v47 = vcombine.high %v3654_v39, %v3658_v45  ;;  %v11757_v53 = vcombine.low %v3654_v39, %v3658_v45 }
 0x310   : > { %v11760_v48 = vcombine.high %v3655_v43, %v3659_v44  ;;  %v11759_v16 = vcombine.low %v3655_v43, %v3659_v44 }
 0x311   : > { %4403 = vmatpush1.bf16.msra.mxu0 %v11825_v50  ;;  %4444 = vmatpush1.bf16.msra.mxu1 %v11827_v10  ;;  %v3662_v50 = vld [vmem:[%s15545_s2 + $0x1d0] sm:$0xff] }
 0x312   : > { %4454 = vmatprep.subr.bf16.mxu0 %v11710_v49  ;;  %4495 = vmatprep.subr.bf16.mxu1 %v11712_v52  ;;  %v3666_v10 = vld [vmem:[%s15545_s2 + $0x1f0] sm:$0xff]  ;;  %v3663_v49 = vld [vmem:[%s15545_s2 + $0x1d8] sm:$0xff] }
 0x313   : > { %v3667_v52 = vld [vmem:[%s15545_s2 + $0x1f8] sm:$0xff]  ;;  %v11766_v55 = vcombine.high %v3662_v50, %v3666_v10  ;;  %v11765_v37 = vcombine.low %v3662_v50, %v3666_v10 }
 0x314   : > { %4405 = vmatmul.mubr.bf16.vlgmr.msra.gmra.mrb[0].mxu0 %v13995_v54  ;;  %4446 = vmatmul.mubr.bf16.vlgmr.msra.gmra.mrb[0].mxu1 %v13995_v54  ;;  %v11768_v57 = vcombine.high %v3663_v49, %v3667_v52  ;;  %v11767_v62 = vcombine.low %v3663_v49, %v3667_v52 }
 0x315   : > { %4455 = vmatpush1.bf16.msra.mxu0 %v11709_v58  ;;  %4496 = vmatpush1.bf16.msra.mxu1 %v11711_v60  ;;  %v3670_v58 = vld [vmem:[%s15545_s2 + $0x210] sm:$0xff] }
 0x316   : > { %4456 = vmatprep.subr.bf16.mxu0 %v11718_v19  ;;  %4497 = vmatprep.subr.bf16.mxu1 %v11720_v61  ;;  %v3674_v60 = vld [vmem:[%s15545_s2 + $0x230] sm:$0xff]  ;;  %v3671_v19 = vld [vmem:[%s15545_s2 + $0x218] sm:$0xff] }
 0x317   : > { %4486 = vmatprep.mubr.bf16.mxu0 %v13815_v38  ;;  %4527 = vmatprep.mubr.bf16.mxu1 %v13815_v38  ;;  %v3639_v38 = vld [vmem:[%s15545_s2 + $0x118] sm:$0xff]  ;;  %v11774_v63 = vcombine.high %v3670_v58, %v3674_v60  ;;  %v11773_v5 = vcombine.low %v3670_v58, %v3674_v60 }
 0x318   : > { %v11744_v24 = vcombine.high %v3639_v38, %v3643_v20  ;;  %v11743_v33 = vcombine.low %v3639_v38, %v3643_v20  ;;  %v3675_v61 = vld [vmem:[%s15545_s2 + $0x238] sm:$0xff] }
 0x319   : > { %4457 = vmatpush1.bf16.msra.mxu0 %v11717_v2  ;;  %4498 = vmatpush1.bf16.msra.mxu1 %v11719_v56  ;;  %v11776_v1 = vcombine.high %v3671_v19, %v3675_v61  ;;  %v3678_v2 = vld [vmem:[%s15545_s2 + $0x250] sm:$0xff]  ;;  %v11775_v6 = vcombine.low %v3671_v19, %v3675_v61 }
 0x31a   : > { %4458 = vmatprep.subr.bf16.mxu0 %v11726_v3  ;;  %4499 = vmatprep.subr.bf16.mxu1 %v11728_v35  ;;  %v3682_v56 = vld [vmem:[%s15545_s2 + $0x270] sm:$0xff]  ;;  %v3679_v3 = vld [vmem:[%s15545_s2 + $0x258] sm:$0xff] }
 0x31b   : > { %v3683_v35 = vld [vmem:[%s15545_s2 + $0x278] sm:$0xff]  ;;  %v11782_v8 = vcombine.high %v3678_v2, %v3682_v56  ;;  %v11781_v17 = vcombine.low %v3678_v2, %v3682_v56 }
 0x31c   : > { %v11784_v9 = vcombine.high %v3679_v3, %v3683_v35  ;;  %v11783_v18 = vcombine.low %v3679_v3, %v3683_v35 }
 0x31d   : > { %4459 = vmatpush1.bf16.msra.mxu0 %v11725_v11  ;;  %4500 = vmatpush1.bf16.msra.mxu1 %v11727_v13  ;;  %v3686_v11 = vld [vmem:[%s15545_s2 + $0x290] sm:$0xff] }
 0x31e   : > { %4460 = vmatprep.subr.bf16.mxu0 %v11734_v14  ;;  %4501 = vmatprep.subr.bf16.mxu1 %v11736_v15  ;;  %v3690_v13 = vld [vmem:[%s15545_s2 + $0x2b0] sm:$0xff]  ;;  %v3687_v14 = vld [vmem:[%s15545_s2 + $0x298] sm:$0xff] }
 0x31f   : > { %v3691_v15 = vld [vmem:[%s15545_s2 + $0x2b8] sm:$0xff]  ;;  %v11790_v38 = vcombine.high %v3686_v11, %v3690_v13  ;;  %v11789_v26 = vcombine.low %v3686_v11, %v3690_v13 }
 0x320   : > { %v11792_v20 = vcombine.high %v3687_v14, %v3691_v15  ;;  %v11791_v27 = vcombine.low %v3687_v14, %v3691_v15 }
 0x321   : > { %4461 = vmatpush1.bf16.msra.mxu0 %v11733_v21  ;;  %4502 = vmatpush1.bf16.msra.mxu1 %v11735_v22  ;;  %v3694_v21 = vld [vmem:[%s15545_s2 + $0x2d0] sm:$0xff] }
 0x322   : > { %4462 = vmatprep.subr.bf16.mxu0 %v11742_v23  ;;  %4503 = vmatprep.subr.bf16.mxu1 %v11744_v24  ;;  %v3698_v22 = vld [vmem:[%s15545_s2 + $0x2f0] sm:$0xff]  ;;  %v3695_v23 = vld [vmem:[%s15545_s2 + $0x2d8] sm:$0xff] }
 0x323   : > { %v3699_v24 = vld [vmem:[%s15545_s2 + $0x2f8] sm:$0xff]  ;;  %v11798_v29 = vcombine.high %v3694_v21, %v3698_v22  ;;  %v11797_v39 = vcombine.low %v3694_v21, %v3698_v22  ;;  %v3546_v22 = vld [vmem:[%s14185_s20 + $0x10] sm:$0xff] }
 0x324   : > { %v11800_v59 = vcombine.high %v3695_v23, %v3699_v24  ;;  %v11799_v45 = vcombine.low %v3695_v23, %v3699_v24  ;;  %v3545_v24 = vld [vmem:[%s14185_s20 + $0x8] sm:$0xff] }
 0x325   : > { %4463 = vmatpush1.bf16.msra.mxu0 %v11741_v32  ;;  %4504 = vmatpush1.bf16.msra.mxu1 %v11743_v33  ;;  %v3702_v32 = vld [vmem:[%s15545_s2 + $0x310] sm:$0xff] }
 0x326   : > { %4464 = vmatprep.subr.bf16.mxu0 %v11750_v34  ;;  %4505 = vmatprep.subr.bf16.mxu1 %v11752_v40  ;;  %v3706_v33 = vld [vmem:[%s15545_s2 + $0x330] sm:$0xff]  ;;  %v3703_v34 = vld [vmem:[%s15545_s2 + $0x318] sm:$0xff] }
 0x327   : > { %v3707_v40 = vld [vmem:[%s15545_s2 + $0x338] sm:$0xff]  ;;  %v11806_v43 = vcombine.high %v3702_v32, %v3706_v33  ;;  %v11805_v50 = vcombine.low %v3702_v32, %v3706_v33 }
 0x328   : > { %v11808_v44 = vcombine.high %v3703_v34, %v3707_v40  ;;  %v11807_v10 = vcombine.low %v3703_v34, %v3707_v40 }
 0x329   : > { %4465 = vmatpush1.bf16.msra.mxu0 %v11749_v31  ;;  %4506 = vmatpush1.bf16.msra.mxu1 %v11751_v0  ;;  %v3710_v31 = vld [vmem:[%s15545_s2 + $0x350] sm:$0xff] }
 0x32a   : > { %4466 = vmatprep.subr.bf16.mxu0 %v11758_v47  ;;  %4507 = vmatprep.subr.bf16.mxu1 %v11760_v48  ;;  %v3714_v0 = vld [vmem:[%s15545_s2 + $0x370] sm:$0xff]  ;;  %v3711_v47 = vld [vmem:[%s15545_s2 + $0x358] sm:$0xff] }
 0x32b   : > { %v3715_v48 = vld [vmem:[%s15545_s2 + $0x378] sm:$0xff]  ;;  %v11814_v49 = vcombine.high %v3710_v31, %v3714_v0  ;;  %v11813_v58 = vcombine.low %v3710_v31, %v3714_v0 }
 0x32c   : > { %v11816_v52 = vcombine.high %v3711_v47, %v3715_v48  ;;  %v11815_v60 = vcombine.low %v3711_v47, %v3715_v48 }
 0x32d   : > { %4467 = vmatpush1.bf16.msra.mxu0 %v11757_v53  ;;  %4508 = vmatpush1.bf16.msra.mxu1 %v11759_v16  ;;  %v3718_v53 = vld [vmem:[%s15545_s2 + $0x390] sm:$0xff] }
 0x32e   : > { %4468 = vmatprep.subr.bf16.mxu0 %v11766_v55  ;;  %4509 = vmatprep.subr.bf16.mxu1 %v11768_v57  ;;  %v3722_v16 = vld [vmem:[%s15545_s2 + $0x3b0] sm:$0xff]  ;;  %v3719_v55 = vld [vmem:[%s15545_s2 + $0x398] sm:$0xff] }
 0x32f   : > { %v3723_v57 = vld [vmem:[%s15545_s2 + $0x3b8] sm:$0xff]  ;;  %v11822_v19 = vcombine.high %v3718_v53, %v3722_v16  ;;  %v11821_v2 = vcombine.low %v3718_v53, %v3722_v16 }
 0x330   : > { %v11824_v61 = vcombine.high %v3719_v55, %v3723_v57  ;;  %v11823_v56 = vcombine.low %v3719_v55, %v3723_v57  ;;  %v3550_v57 = vld [vmem:[%s14185_s20 + $0x30] sm:$0xff] }
 0x331   : > { %4469 = vmatpush1.bf16.msra.mxu0 %v11765_v37  ;;  %4510 = vmatpush1.bf16.msra.mxu1 %v11767_v62  ;;  %v3726_v37 = vld [vmem:[%s15545_s2 + $0x3d0] sm:$0xff] }
 0x332   : > { %4470 = vmatprep.subr.bf16.mxu0 %v11774_v63  ;;  %4511 = vmatprep.subr.bf16.mxu1 %v11776_v1  ;;  %v3730_v62 = vld [vmem:[%s15545_s2 + $0x3f0] sm:$0xff]  ;;  %v3727_v63 = vld [vmem:[%s15545_s2 + $0x3d8] sm:$0xff] }
 0x333   : > { %v3731_v1 = vld [vmem:[%s15545_s2 + $0x3f8] sm:$0xff]  ;;  %v11830_v3 = vcombine.high %v3726_v37, %v3730_v62 }
 0x334   : > { %v11832_v35 = vcombine.high %v3727_v63, %v3731_v1 }
 0x335   : > { %4471 = vmatpush1.bf16.msra.mxu0 %v11773_v5  ;;  %4512 = vmatpush1.bf16.msra.mxu1 %v11775_v6  ;;  %v11829_v5 = vcombine.low %v3726_v37, %v3730_v62  ;;  %v11831_v6 = vcombine.low %v3727_v63, %v3731_v1 }
 0x336   : > { %4472 = vmatprep.subr.bf16.mxu0 %v11782_v8  ;;  %4513 = vmatprep.subr.bf16.mxu1 %v11784_v9 }
 0x339   : > { %4473 = vmatpush1.bf16.msra.mxu0 %v11781_v17  ;;  %4514 = vmatpush1.bf16.msra.mxu1 %v11783_v18 }
 0x33a   : > { %4474 = vmatprep.subr.bf16.mxu0 %v11790_v38  ;;  %4515 = vmatprep.subr.bf16.mxu1 %v11792_v20  ;;  %v3552_v38 = vld [vmem:[%s15546_s3] sm:$0xff] }
 0x33b   : > { %v3557_v20 = vrot.slane %v3552_v38, %v13686_v30  ;;  %v3565_v21 = vrot.slane %v3552_v38, %v13694_v4  ;;  %v3561_v23 = vrot.slane %v3552_v38, %v13697_v7  ;;  %v3577_v53 = vrot.slane %v3552_v38, %v13727_v46  ;;  %v4706_v46 = vld [vmem:[#allocation6 + $0x308] sm:$0xff] (%p3530_p6)  ;;  %v4721_v30 = vld [vmem:[#allocation6 + $0x380] sm:$0xff] (%p3530_p6) }
 0x33c   :  { %v4714_v7 = vld [vmem:[#allocation6 + $0x348] sm:$0xff] (%p3530_p6) }
 0x33d   : > { %4475 = vmatpush1.bf16.msra.mxu0 %v11789_v26  ;;  %4516 = vmatpush1.bf16.msra.mxu1 %v11791_v27  ;;  %v3569_v26 = vrot.slane %v3552_v38, %v13700_v12  ;;  %v3595_v32 = vadd.f32 %v3561_v23, %v3545_v24  ;;  %v4717_v12 = vld [vmem:[#allocation6 + $0x360] sm:$0xff] (%p3530_p6)  ;;  %v4718_v4 = vld [vmem:[#allocation6 + $0x368] sm:$0xff] (%p3530_p6) }
 0x33e   : > { %4476 = vmatprep.subr.bf16.mxu0 %v11798_v29  ;;  %4517 = vmatprep.subr.bf16.mxu1 %v11800_v59  ;;  %v3547_v29 = vld [vmem:[%s14185_s20 + $0x18] sm:$0xff]  ;;  %v3596_v59 = vadd.f32 %v3565_v21, %v3546_v22 }
 0x33f   : > { %v3597_v33 = vadd.f32 %v3569_v26, %v3547_v29 }
 0x341   : > { %4477 = vmatpush1.bf16.msra.mxu0 %v11797_v39  ;;  %4518 = vmatpush1.bf16.msra.mxu1 %v11799_v45 }
 0x342   : > { %4478 = vmatprep.subr.bf16.mxu0 %v11806_v43  ;;  %4519 = vmatprep.subr.bf16.mxu1 %v11808_v44 }
 0x345   : > { %4479 = vmatpush1.bf16.msra.mxu0 %v11805_v50  ;;  %4520 = vmatpush1.bf16.msra.mxu1 %v11807_v10  ;;  %v3573_v50 = vrot.slane %v3552_v38, %v13721_v36  ;;  %v4713_v36 = vld [vmem:[#allocation6 + $0x340] sm:$0xff] (%p3530_p6) }
 0x346   : > { %4480 = vmatprep.subr.bf16.mxu0 %v11814_v49  ;;  %4521 = vmatprep.subr.bf16.mxu1 %v11816_v52  ;;  %v3548_v49 = vld [vmem:[%s14185_s20 + $0x20] sm:$0xff]  ;;  %v3581_v52 = vrot.slane %v3552_v38, %v13724_v41  ;;  %v4710_v41 = vld [vmem:[#allocation6 + $0x328] sm:$0xff] (%p3530_p6) }
 0x347   : > { %v3598_v62 = vadd.f32 %v3573_v50, %v3548_v49 }
 0x348   : > { %v3600_v1 = vadd.f32 %v3581_v52, %v3550_v57  ;;  %v4617_v52 = vld [vmem:[#allocation6 + $0x40] sm:$0xff] (%p3530_p6) }
 0x349   : > { %4481 = vmatpush1.bf16.msra.mxu0 %v11813_v58  ;;  %4522 = vmatpush1.bf16.msra.mxu1 %v11815_v60  ;;  %v3549_v58 = vld [vmem:[%s14185_s20 + $0x28] sm:$0xff]  ;;  %v3585_v60 = vrot.slane %v3552_v38, %v13730_v42  ;;  %v4709_v42 = vld [vmem:[#allocation6 + $0x320] sm:$0xff] (%p3530_p6) }
 0x34a   : > { %4482 = vmatprep.subr.bf16.mxu0 %v11822_v19  ;;  %4523 = vmatprep.subr.bf16.mxu1 %v11824_v61  ;;  %v3551_v61 = vld [vmem:[%s14185_s20 + $0x38] sm:$0xff] }
 0x34d   : > { %4483 = vmatpush1.bf16.msra.mxu0 %v11821_v2  ;;  %4524 = vmatpush1.bf16.msra.mxu1 %v11823_v56  ;;  %v3599_v2 = vadd.f32 %v3577_v53, %v3549_v58  ;;  %v3601_v56 = vadd.f32 %v3585_v60, %v3551_v61  ;;  %v4621_v53 = vld [vmem:[#allocation6 + $0x60] sm:$0xff] (%p3530_p6)  ;;  %v4618_v58 = vld [vmem:[#allocation6 + $0x48] sm:$0xff] (%p3530_p6) }
 0x34e   : > { %4484 = vmatprep.subr.bf16.mxu0 %v11830_v3  ;;  %4525 = vmatprep.subr.bf16.mxu1 %v11832_v35  ;;  %v14224_v57 = vcombine.high (%p3530_p6), %v4617_v52, %v4621_v53  ;;  %v4622_v60 = vld [vmem:[#allocation6 + $0x68] sm:$0xff] (%p3530_p6) }
 0x34f   :  { %v4626_v61 = vld [vmem:[#allocation6 + $0x88] sm:$0xff] (%p3530_p6) }
 0x351   : > { %4485 = vmatpush1.bf16.msra.mxu0 %v11829_v5  ;;  %4526 = vmatpush1.bf16.msra.mxu1 %v11831_v6 }
 0x354   : > { %4487 = vmatmul.mubr.bf16.vlgmr.msra.gmra.mrb[4].mxu0 %v13995_v54  ;;  %4528 = vmatmul.mubr.bf16.vlgmr.msra.gmra.mrb[4].mxu1 %v13995_v54  ;;  %v3544_v54 = vld [vmem:[%s14185_s20] sm:$0xff] }
 0x355   : > { %v3594_v27 = vadd.f32 %v3557_v20, %v3544_v54 }
 0x3e7   : > { %v4406_v8 = vpop.f32.mrb[0].mxu0  ;;  %v4447_v9 = vpop.f32.mrb[0].mxu1 }
 0x3e8   : > { %v4408_v11 = vpop.f32.mrb[1].mxu0  ;;  %v4449_v13 = vpop.f32.mrb[1].mxu1  ;;  %v4536_v34 = vadd.f32 %v4406_v8, %v3594_v27  ;;  %v4538_v40 = vadd.f32 %v4447_v9, %v3596_v59 }
 0x3e9   : > { %v4410_v14 = vpop.f32.mrb[2].mxu0  ;;  %v4451_v15 = vpop.f32.mrb[2].mxu1  ;;  %v4537_v39 = vadd.f32 %v4408_v11, %v3595_v32  ;;  %v4539_v45 = vadd.f32 %v4449_v13, %v3597_v33 }
 0x3ea   : > { %v4411_v17 = vpop.f32.mrb[3].mxu0  ;;  %v4452_v18 = vpop.f32.mrb[3].mxu1  ;;  %v11833_v43 = vmul.f32 -1.442695, %v4536_v34  ;;  %v11835_v44 = vmul.f32 -1.442695, %v4538_v40 }
 0x3eb   : > { %v11834_v31 = vmul.f32 -1.442695, %v4537_v39  ;;  %v11836_v0 = vmul.f32 -1.442695, %v4539_v45 }
 0x3ec   : > { %12928 = vpow2.f32 %v11833_v43 }
 0x3ed   : > { %12930 = vpow2.f32 %v11835_v44 }
 0x3ee   : > { %12932 = vpow2.f32 %v11834_v31 }
 0x3ef   : > { %12934 = vpow2.f32 %v11836_v0  ;;  %v4609_v0 = vld [vmem:[#allocation6] sm:$0xff] (%p3530_p6) }
 0x3f6   : > { %v12929_v47 = vpop.eup %12928 }
 0x3f7   : > { %v12931_v48 = vpop.eup %12930  ;;  %v4550_v55 = vadd.f32 1.0, %v12929_v47  ;;  %v4613_v47 = vld [vmem:[#allocation6 + $0x20] sm:$0xff] (%p3530_p6) }
 0x3f8   : > { %v12933_v10 = vpop.eup %12932  ;;  %v4562_v19 = vadd.f32 1.0, %v12931_v48  ;;  %v4610_v48 = vld [vmem:[#allocation6 + $0x8] sm:$0xff] (%p3530_p6)  ;;  %v14216_v50 = vcombine.high (%p3530_p6), %v4609_v0, %v4613_v47  ;;  %v14218_v49 = vcombine.low (%p3530_p6), %v4609_v0, %v4613_v47  ;;  %v4665_v47 = vld [vmem:[#allocation6 + $0x1c0] sm:$0xff] (%p3530_p6) }
 0x3f9   : > { %v12935_v16 = vpop.eup %12934  ;;  %v4551_v37 = vadd.f32 1.0, %v12933_v10  ;;  %12936 = vrcp.f32 %v4550_v55  ;;  %v4614_v10 = vld [vmem:[#allocation6 + $0x28] sm:$0xff] (%p3530_p6) }
 0x3fa   : > { %v4563_v63 = vadd.f32 1.0, %v12935_v16  ;;  %12938 = vrcp.f32 %v4562_v19  ;;  %v14220_v16 = vcombine.high (%p3530_p6), %v4610_v48, %v4614_v10  ;;  %v14222_v55 = vcombine.low (%p3530_p6), %v4610_v48, %v4614_v10  ;;  %v4625_v19 = vld [vmem:[#allocation6 + $0x80] sm:$0xff] (%p3530_p6)  ;;  %5377 = vmatprep.subr.bf16.mxu0 (%p3530_p6), %v14216_v50 }
 0x3fb   : > { %12940 = vrcp.f32 %v4551_v37  ;;  %5378 = vmatpush1.bf16.msra.mxu0 (%p3530_p6), %v14218_v49  ;;  %v4669_v48 = vld [vmem:[#allocation6 + $0x1e0] sm:$0xff] (%p3530_p6) }
 0x3fc   : > { %12942 = vrcp.f32 %v4563_v63  ;;  %5430 = vmatprep.subr.bf16.mxu1 (%p3530_p6), %v14220_v16  ;;  %5379 = vmatprep.subr.bf16.mxu0 (%p3530_p6), %v14224_v57  ;;  %v14235_v63 = vcombine.low (%p3530_p6), %v4618_v58, %v4622_v60 }
 0x3fd   :  { %5431 = vmatpush1.bf16.msra.mxu1 (%p3530_p6), %v14222_v55 }
 0x403   : > { %v12937_v54 = vpop.eup %12936 }
 0x404   : > { %v12939_v21 = vpop.eup %12938 }
 0x405   : > { %v12941_v22 = vpop.eup %12940  ;;  %v4582_v27 = vmul.f32 %v13314_v25, %v12939_v21  ;;  %v4649_v21 = vld [vmem:[#allocation6 + $0x140] sm:$0xff] (%p3530_p6) }
 0x406   : > { %v12943_v23 = vpop.eup %12942 }
 0x407   : > { %v4583_v59 = vmul.f32 %v13310_v28, %v12943_v23  ;;  %v4650_v23 = vld [vmem:[#allocation6 + $0x148] sm:$0xff] (%p3530_p6) }
 0x427   : > { %v4488_v3 = vpop.f32.mrb[4].mxu0  ;;  %v4529_v5 = vpop.f32.mrb[4].mxu1 }
 0x428   : > { %v4540_v35 = vadd.f32 %v4488_v3, %v3598_v62  ;;  %v4490_v6 = vpop.f32.mrb[5].mxu0  ;;  %v4542_v8 = vadd.f32 %v4529_v5, %v3600_v1  ;;  %v4531_v11 = vpop.f32.mrb[5].mxu1  ;;  %v14231_v62 = vcombine.low (%p3530_p6), %v4617_v52, %v4621_v53  ;;  %v4637_v3 = vld [vmem:[#allocation6 + $0xe0] sm:$0xff] (%p3530_p6)  ;;  %v4638_v5 = vld [vmem:[#allocation6 + $0xe8] sm:$0xff] (%p3530_p6) }
 0x429   : > { %v4541_v9 = vadd.f32 %v4490_v6, %v3599_v2  ;;  %v4492_v13 = vpop.f32.mrb[6].mxu0  ;;  %v4543_v14 = vadd.f32 %v4531_v11, %v3601_v56  ;;  %v4533_v15 = vpop.f32.mrb[6].mxu1  ;;  %v4633_v56 = vld [vmem:[#allocation6 + $0xc0] sm:$0xff] (%p3530_p6)  ;;  %v4666_v52 = vld [vmem:[#allocation6 + $0x1c8] sm:$0xff] (%p3530_p6) }
 0x42a   : > { %12944 = vtanh.f32 %v4540_v35  ;;  %v4493_v17 = vpop.f32.mrb[7].mxu0  ;;  %v11837_v18 = vmul.f32 -1.442695, %v4542_v8  ;;  %v4534_v38 = vpop.f32.mrb[7].mxu1  ;;  %v4634_v35 = vld [vmem:[#allocation6 + $0xc8] sm:$0xff] (%p3530_p6)  ;;  %5380 = vmatpush1.bf16.msra.mxu0 (%p3530_p6), %v14231_v62  ;;  %v4641_v13 = vld [vmem:[#allocation6 + $0x100] sm:$0xff] (%p3530_p6) }
 0x42b   : > { %12946 = vtanh.f32 %v4541_v9  ;;  %v11838_v20 = vmul.f32 -1.442695, %v4543_v14  ;;  %v14249_v9 = vcombine.high (%p3530_p6), %v4633_v56, %v4637_v3  ;;  %v14252_v11 = vcombine.high (%p3530_p6), %v4634_v35, %v4638_v5  ;;  %v4645_v14 = vld [vmem:[#allocation6 + $0x120] sm:$0xff] (%p3530_p6)  ;;  %v4642_v15 = vld [vmem:[#allocation6 + $0x108] sm:$0xff] (%p3530_p6) }
 0x42c   : > { %12948 = vpow2.f32 %v11837_v18  ;;  %v4646_v17 = vld [vmem:[#allocation6 + $0x128] sm:$0xff] (%p3530_p6)  ;;  %v14255_v18 = vcombine.low (%p3530_p6), %v4633_v56, %v4637_v3  ;;  %v14259_v38 = vcombine.low (%p3530_p6), %v4634_v35, %v4638_v5  ;;  %v14307_v35 = vcombine.low (%p3530_p6), %v4665_v47, %v4669_v48 }
 0x42d   : > { %12950 = vpow2.f32 %v11838_v20  ;;  %v14261_v20 = vcombine.high (%p3530_p6), %v4641_v13, %v4645_v14  ;;  %v4670_v53 = vld [vmem:[#allocation6 + $0x1e8] sm:$0xff] (%p3530_p6) }
 0x42e   :  { %v4674_v56 = vld [vmem:[#allocation6 + $0x208] sm:$0xff] (%p3530_p6)  ;;  %v14311_v5 = vcombine.low (%p3530_p6), %v4666_v52, %v4670_v53 }
 0x42f   :  { %v4678_v3 = vld [vmem:[#allocation6 + $0x228] sm:$0xff] (%p3530_p6) }
 0x434   : > { %v12945_v24 = vpop.eup %12944 }
 0x435   : > { %v12947_v26 = vpop.eup %12946  ;;  %v4584_v29 = vmul.f32 %v12945_v24, %v12937_v54  ;;  %v14264_v54 = vcombine.high (%p3530_p6), %v4642_v15, %v4646_v17  ;;  %v4654_v24 = vld [vmem:[#allocation6 + $0x168] sm:$0xff] (%p3530_p6) }
 0x436   : > { %v4585_v32 = vmul.f32 %v12947_v26, %v12941_v22  ;;  %v12949_v33 = vpop.eup %12948  ;;  %v4653_v22 = vld [vmem:[#allocation6 + $0x160] sm:$0xff] (%p3530_p6)  ;;  %v14267_v26 = vcombine.low (%p3530_p6), %v4641_v13, %v4645_v14  ;;  %v14316_v14 = vcombine.high (%p3530_p6), %v4674_v56, %v4678_v3 }
 0x437   : > { %v4586_v25 = vadd.f32 %v4584_v29, %v4582_v27   ;;  %v12951_v34 = vpop.eup %12950  ;;  %v4576_v40 = vadd.f32 1.0, %v12949_v33  ;;  %v14271_v27 = vcombine.low (%p3530_p6), %v4642_v15, %v4646_v17  ;;  %v14273_v29 = vcombine.high (%p3530_p6), %v4649_v21, %v4653_v22  ;;  %v4661_v33 = vld [vmem:[#allocation6 + $0x1a0] sm:$0xff] (%p3530_p6) }
 0x438   : > { %v4587_v28 = vadd.f32 %v4585_v32, %v4583_v59   ;;  %v4577_v39 = vadd.f32 1.0, %v12951_v34  ;;  %v14276_v59 = vcombine.high (%p3530_p6), %v4650_v23, %v4654_v24  ;;  %v4657_v32 = vld [vmem:[#allocation6 + $0x180] sm:$0xff] (%p3530_p6)  ;;  %v4658_v34 = vld [vmem:[#allocation6 + $0x188] sm:$0xff] (%p3530_p6) }
 0x439   : > { %12952 = vtanh.f32 %v4586_v25  ;;  %v14227_v25 = vcombine.high (%p3530_p6), %v4618_v58, %v4622_v60  ;;  %v14293_v58 = vcombine.low (%p3530_p6), %v4657_v32, %v4661_v33  ;;  %v4681_v15 = vld [vmem:[#allocation6 + $0x240] sm:$0xff] (%p3530_p6) }
 0x43a   : > { %12954 = vrcp.f32 %v4576_v40  ;;  %v4662_v40 = vld [vmem:[#allocation6 + $0x1a8] sm:$0xff] (%p3530_p6)  ;;  %v4685_v17 = vld [vmem:[#allocation6 + $0x260] sm:$0xff] (%p3530_p6) }
 0x43b   : > { %12956 = vtanh.f32 %v4587_v28  ;;  %v4629_v28 = vld [vmem:[#allocation6 + $0xa0] sm:$0xff] (%p3530_p6)  ;;  %5432 = vmatprep.subr.bf16.mxu1 (%p3530_p6), %v14227_v25  ;;  %v14288_v0 = vcombine.high (%p3530_p6), %v4658_v34, %v4662_v40  ;;  %v14298_v60 = vcombine.low (%p3530_p6), %v4658_v34, %v4662_v40 }
 0x43c   : > { %12958 = vrcp.f32 %v4577_v39  ;;  %v14237_v1 = vcombine.high (%p3530_p6), %v4625_v19, %v4629_v28  ;;  %v14243_v6 = vcombine.low (%p3530_p6), %v4625_v19, %v4629_v28  ;;  %5433 = vmatpush1.bf16.msra.mxu1 (%p3530_p6), %v14235_v63  ;;  %v14279_v39 = vcombine.low (%p3530_p6), %v4649_v21, %v4653_v22  ;;  %v4682_v21 = vld [vmem:[#allocation6 + $0x248] sm:$0xff] (%p3530_p6)  ;;  %v4689_v34 = vld [vmem:[#allocation6 + $0x280] sm:$0xff] (%p3530_p6) }
 0x43d   :  { %v14300_v19 = vcombine.high (%p3530_p6), %v4665_v47, %v4669_v48  ;;  %v14303_v28 = vcombine.high (%p3530_p6), %v4666_v52, %v4670_v53  ;;  %v4686_v22 = vld [vmem:[#allocation6 + $0x268] sm:$0xff] (%p3530_p6)  ;;  %v4693_v40 = vld [vmem:[#allocation6 + $0x2a0] sm:$0xff] (%p3530_p6)  ;;  %v14331_v47 = vcombine.low (%p3530_p6), %v4681_v15, %v4685_v17 }
 0x43e   :  { %5381 = vmatprep.subr.bf16.mxu0 (%p3530_p6), %v14237_v1  ;;  %v14335_v48 = vcombine.low (%p3530_p6), %v4682_v21, %v4686_v22  ;;  %v14337_v52 = vcombine.high (%p3530_p6), %v4689_v34, %v4693_v40 }
 0x43f   :  { %5382 = vmatpush1.bf16.msra.mxu0 (%p3530_p6), %v14243_v6 }
 0x440   :  { %5383 = vmatprep.subr.bf16.mxu0 (%p3530_p6), %v14249_v9  ;;  %15721 = vst [vmem:[#allocation26_spill] sm:$0xff] (%p3530_p6), %v14337_v52 }
 0x443   : > { %v12953_v45 = vpop.eup %12952  ;;  %3532 = sbr.rel (!%p3530_p6) target bundleno = 720 (0x2d0), region = 118  ;;  %5384 = vmatpush1.bf16.msra.mxu0 (%p3530_p6), %v14255_v18 }
 0x444   : > { %v12955_v43 = vpop.eup %12954  ;;  %5385 = vmatprep.subr.bf16.mxu0 (%p3530_p6), %v14261_v20 }
 0x445   : > { %v12957_v44 = vpop.eup %12956  ;;  %v4590_v37 = vmul.f32 %v12955_v43, %v12953_v45   ;;  %v14283_v45 = vcombine.low (%p3530_p6), %v4650_v23, %v4654_v24  ;;  %v14285_v43 = vcombine.high (%p3530_p6), %v4657_v32, %v4661_v33  ;;  %v14323_v24 = vcombine.low (%p3530_p6), %v4674_v56, %v4678_v3  ;;  %v4698_v56 = vld [vmem:[#allocation6 + $0x2c8] sm:$0xff] (%p3530_p6) }
 0x446   : > { %v12959_v31 = vpop.eup %12958  ;;  %v14325_v32 = vcombine.high (%p3530_p6), %v4681_v15, %v4685_v17  ;;  %v14328_v33 = vcombine.high (%p3530_p6), %v4682_v21, %v4686_v22  ;;  %v4702_v3 = vld [vmem:[#allocation6 + $0x2e8] sm:$0xff] (%p3530_p6)  ;;  %v14343_v15 = vcombine.low (%p3530_p6), %v4689_v34, %v4693_v40 }
 0x447   : > { %4595 = vst [vmem:[%s4594_s10] sm:$0xff] %v4590_v37  ;;  %v4591_v31 = vmul.f32 %v12959_v31, %v12957_v44   ;;  %v4630_v37 = vld [vmem:[#allocation6 + $0xa8] sm:$0xff] (%p3530_p6)  ;;  %5386 = vmatpush1.bf16.msra.mxu0 (%p3530_p6), %v14267_v26  ;;  %v14352_v22 = vcombine.high (%p3530_p6), %v4698_v56, %v4702_v3  ;;  %v14359_v40 = vcombine.low (%p3530_p6), %v4698_v56, %v4702_v3 }
 0x448   :  { %v14240_v2 = vcombine.high (%p3530_p6), %v4626_v61, %v4630_v37  ;;  %v14247_v8 = vcombine.low (%p3530_p6), %v4626_v61, %v4630_v37  ;;  %5387 = vmatprep.subr.bf16.mxu0 (%p3530_p6), %v14273_v29  ;;  %v4673_v61 = vld [vmem:[#allocation6 + $0x200] sm:$0xff] (%p3530_p6)  ;;  %15723 = vst [vmem:[#allocation28_spill] sm:$0xff] (%p3530_p6), %v14343_v15  ;;  %v14373_v56 = vcombine.high (%p3530_p6), %v4713_v36, %v4717_v12 }
 0x449   : > { %4596 = vst [vmem:[%s4594_s10 + $0x8] sm:$0xff] %v4591_v31  ;;  %v4677_v37 = vld [vmem:[#allocation6 + $0x220] sm:$0xff] (%p3530_p6)  ;;  %15726 = vst [vmem:[#allocation31_spill] sm:$0xff] (%p3530_p6), %v14352_v22  ;;  %v14376_v3 = vcombine.high (%p3530_p6), %v4714_v7, %v4718_v4 }
 0x44a   :  { %5434 = vmatprep.subr.bf16.mxu1 %v14240_v2  ;;  %v14313_v13 = vcombine.high %v4673_v61, %v4677_v37  ;;  %v14319_v23 = vcombine.low %v4673_v61, %v4677_v37  ;;  %v4697_v61 = vld [vmem:[#allocation6 + $0x2c0] sm:$0xff]  ;;  %15728 = vst [vmem:[#allocation33_spill] sm:$0xff] %v14359_v40  ;;  %15733 = vst [vmem:[#allocation38_spill] sm:$0xff] %v14373_v56 }
 0x44b   :  { %5435 = vmatpush1.bf16.msra.mxu1 %v14247_v8  ;;  %5388 = vmatpush1.bf16.msra.mxu0 %v14279_v39  ;;  %v4701_v37 = vld [vmem:[#allocation6 + $0x2e0] sm:$0xff]  ;;  %15734 = vst [vmem:[#allocation39_spill] sm:$0xff] %v14376_v3 }
 0x44c   :  { %5436 = vmatprep.subr.bf16.mxu1 %v14252_v11  ;;  %5389 = vmatprep.subr.bf16.mxu0 %v14285_v43  ;;  %v14349_v21 = vcombine.high %v4697_v61, %v4701_v37  ;;  %v14355_v34 = vcombine.low %v4697_v61, %v4701_v37  ;;  %v14367_v61 = vcombine.low %v4705_v51, %v4709_v42 }
 0x44d   :  { %v14371_v37 = vcombine.low %v4706_v46, %v4710_v41 }
 0x44e   :  { %15725 = vst [vmem:[#allocation30_spill] sm:$0xff] %v14349_v21  ;;  %15727 = vst [vmem:[#allocation32_spill] sm:$0xff] %v14355_v34 }
 0x44f   :  { %5437 = vmatpush1.bf16.msra.mxu1 %v14259_v38  ;;  %5390 = vmatpush1.bf16.msra.mxu0 %v14293_v58  ;;  %15731 = vst [vmem:[#allocation36_spill] sm:$0xff] %v14367_v61  ;;  %15732 = vst [vmem:[#allocation37_spill] sm:$0xff] %v14371_v37 }
 0x450   :  { %5438 = vmatprep.subr.bf16.mxu1 %v14264_v54  ;;  %v4598_v44 = vld [vmem:[#allocation2 + $0x8] sm:$0xff]  ;;  %v4600_v31 = vld [vmem:[#allocation2 + $0x18] sm:$0xff]  ;;  %5391 = vmatprep.subr.bf16.mxu0 %v14300_v19 }
 0x451   :  { %v14290_v10 = vpack.c.bf16 %v4600_v31, %v4598_v44  ;;  %v4690_v44 = vld [vmem:[#allocation6 + $0x288] sm:$0xff] }
 0x452   :  { %v4694_v31 = vld [vmem:[#allocation6 + $0x2a8] sm:$0xff] }
 0x453   :  { %5439 = vmatpush1.bf16.msra.mxu1 %v14271_v27  ;;  %5409 = vmatprep.mubr.bf16.mxu0 %v14290_v10  ;;  %v14340_v53 = vcombine.high %v4690_v44, %v4694_v31  ;;  %v14347_v17 = vcombine.low %v4690_v44, %v4694_v31  ;;  %v14361_v44 = vcombine.high %v4705_v51, %v4709_v42 }
 0x454   :  { %5440 = vmatprep.subr.bf16.mxu1 %v14276_v59  ;;  %5462 = vmatprep.mubr.bf16.mxu1 %v14290_v10  ;;  %v14364_v31 = vcombine.high %v4706_v46, %v4710_v41  ;;  %v14379_v51 = vcombine.low %v4713_v36, %v4717_v12  ;;  %v14383_v41 = vcombine.low %v4714_v7, %v4718_v4 }
 0x455   :  { %5392 = vmatpush1.bf16.msra.mxu0 %v14307_v35  ;;  %15722 = vst [vmem:[#allocation27_spill] sm:$0xff] %v14340_v53  ;;  %15724 = vst [vmem:[#allocation29_spill] sm:$0xff] %v14347_v17 }
 0x456   :  { %5393 = vmatprep.subr.bf16.mxu0 %v14313_v13  ;;  %15729 = vst [vmem:[#allocation34_spill] sm:$0xff] %v14361_v44  ;;  %15730 = vst [vmem:[#allocation35_spill] sm:$0xff] %v14364_v31 }
 0x457   :  { %5441 = vmatpush1.bf16.msra.mxu1 %v14283_v45  ;;  %15735 = vst [vmem:[#allocation40_spill] sm:$0xff] %v14379_v51  ;;  %15736 = vst [vmem:[#allocation41_spill] sm:$0xff] %v14383_v41 }
 0x458   :  { %5442 = vmatprep.subr.bf16.mxu1 %v14288_v0 }
 0x459   :  { %5394 = vmatpush1.bf16.msra.mxu0 %v14319_v23 }
 0x45a   :  { %5395 = vmatprep.subr.bf16.mxu0 %v14325_v32 }
 0x45b   :  { %5443 = vmatpush1.bf16.msra.mxu1 %v14298_v60 }
 0x45c   :  { %5444 = vmatprep.subr.bf16.mxu1 %v14303_v28 }
 0x45d   :  { %5396 = vmatpush1.bf16.msra.mxu0 %v14331_v47 }
 0x45e   :  { %5397 = vmatprep.subr.bf16.mxu0 %v14337_v52  ;;  %v4647_v52 = vld [vmem:[#allocation6 + $0x130] sm:$0xff] }
 0x45f   :  { %5445 = vmatpush1.bf16.msra.mxu1 %v14311_v5 }
 0x460   :  { %5446 = vmatprep.subr.bf16.mxu1 %v14316_v14 }
 0x461   :  { %5398 = vmatpush1.bf16.msra.mxu0 %v14343_v15  ;;  %v4620_v15 = vld [vmem:[#allocation6 + $0x58] sm:$0xff] }
 0x462   :  { %5399 = vmatprep.subr.bf16.mxu0 %v14349_v21  ;;  %v4722_v21 = vld [vmem:[#allocation6 + $0x388] sm:$0xff] }
 0x463   :  { %5447 = vmatpush1.bf16.msra.mxu1 %v14323_v24 }
 0x464   :  { %5448 = vmatprep.subr.bf16.mxu1 %v14328_v33 }
 0x465   :  { %5400 = vmatpush1.bf16.msra.mxu0 %v14355_v34  ;;  %v4734_v34 = vld [vmem:[#allocation6 + $0x3e8] sm:$0xff] }
 0x466   :  { %5401 = vmatprep.subr.bf16.mxu0 %v14361_v44  ;;  %v4733_v44 = vld [vmem:[#allocation6 + $0x3e0] sm:$0xff] }
 0x467   :  { %5449 = vmatpush1.bf16.msra.mxu1 %v14335_v48 }
 0x468   :  { %5450 = vmatprep.subr.bf16.mxu1 %v14340_v53  ;;  %v4604_v53 = vld [vmem:[#allocation2 + $0x38] sm:$0xff] }
 0x469   :  { %5402 = vmatpush1.bf16.msra.mxu0 %v14367_v61  ;;  %v4616_v61 = vld [vmem:[#allocation6 + $0x38] sm:$0xff] }
 0x46a   :  { %5403 = vmatprep.subr.bf16.mxu0 %v14373_v56  ;;  %v4615_v56 = vld [vmem:[#allocation6 + $0x30] sm:$0xff] }
 0x46b   :  { %5451 = vmatpush1.bf16.msra.mxu1 %v14347_v17  ;;  %v4726_v17 = vld [vmem:[#allocation6 + $0x3a8] sm:$0xff] }
 0x46c   :  { %5452 = vmatprep.subr.bf16.mxu1 %v14352_v22  ;;  %v4725_v22 = vld [vmem:[#allocation6 + $0x3a0] sm:$0xff]  ;;  %v14388_v42 = vcombine.high %v4722_v21, %v4726_v17  ;;  %v14395_v4 = vcombine.low %v4722_v21, %v4726_v17 }
 0x46d   :  { %v14385_v46 = vcombine.high %v4721_v30, %v4725_v22  ;;  %5404 = vmatpush1.bf16.msra.mxu0 %v14379_v51  ;;  %v14391_v12 = vcombine.low %v4721_v30, %v4725_v22  ;;  %v4597_v22 = vld [vmem:[#allocation2] sm:$0xff]  ;;  %v4623_v51 = vld [vmem:[#allocation6 + $0x70] sm:$0xff] }
 0x46e   :  { %15738 = vst [vmem:[#allocation43_spill] sm:$0xff] %v14388_v42  ;;  %15740 = vst [vmem:[#allocation45_spill] sm:$0xff] %v14395_v4 }
 0x46f   :  { %5453 = vmatpush1.bf16.msra.mxu1 %v14359_v40  ;;  %15737 = vst [vmem:[#allocation42_spill] sm:$0xff] %v14385_v46  ;;  %v4730_v40 = vld [vmem:[#allocation6 + $0x3c8] sm:$0xff]  ;;  %15739 = vst [vmem:[#allocation44_spill] sm:$0xff] %v14391_v12  ;;  %5405 = vmatprep.subr.bf16.mxu0 %v14385_v46  ;;  %v4619_v46 = vld [vmem:[#allocation6 + $0x50] sm:$0xff] }
 0x470   :  { %5454 = vmatprep.subr.bf16.mxu1 %v14364_v31  ;;  %v4729_v31 = vld [vmem:[#allocation6 + $0x3c0] sm:$0xff]  ;;  %v14400_v36 = vcombine.high %v4730_v40, %v4734_v34  ;;  %v14407_v17 = vcombine.low %v4730_v40, %v4734_v34  ;;  %v14423_v40 = vcombine.high %v4619_v46, %v4623_v51 }
 0x471   :  { %v14397_v7 = vcombine.high %v4729_v31, %v4733_v44  ;;  %5406 = vmatpush1.bf16.msra.mxu0 %v14391_v12  ;;  %v14403_v30 = vcombine.low %v4729_v31, %v4733_v44  ;;  %v4624_v44 = vld [vmem:[#allocation6 + $0x78] sm:$0xff]  ;;  %v4602_v31 = vld [vmem:[#allocation2 + $0x28] sm:$0xff] }
 0x472   :  { %15742 = vst [vmem:[#allocation47_spill] sm:$0xff] %v14400_v36  ;;  %15744 = vst [vmem:[#allocation49_spill] sm:$0xff] %v14407_v17 }
 0x473   :  { %5455 = vmatpush1.bf16.msra.mxu1 %v14371_v37  ;;  %15741 = vst [vmem:[#allocation46_spill] sm:$0xff] %v14397_v7  ;;  %v4612_v37 = vld [vmem:[#allocation6 + $0x18] sm:$0xff]  ;;  %15743 = vst [vmem:[#allocation48_spill] sm:$0xff] %v14403_v30  ;;  %5407 = vmatprep.subr.bf16.mxu0 %v14397_v7  ;;  %v14428_v7 = vpack.c.bf16 %v4604_v53, %v4602_v31 }
 0x474   :  { %5456 = vmatprep.subr.bf16.mxu1 %v14376_v3  ;;  %v4611_v3 = vld [vmem:[#allocation6 + $0x10] sm:$0xff]  ;;  %v14421_v34 = vcombine.low %v4612_v37, %v4616_v61  ;;  %15749 = vst [vmem:[#allocation54_spill] sm:$0xff] %v14423_v40 }
 0x475   :  { %v14409_v21 = vcombine.high %v4611_v3, %v4615_v56  ;;  %5408 = vmatpush1.bf16.msra.mxu0 %v14403_v30  ;;  %v4639_v30 = vld [vmem:[#allocation6 + $0xf0] sm:$0xff] }
 0x476   :  { %15748 = vst [vmem:[#allocation53_spill] sm:$0xff] %v14421_v34 }
 0x477   :  { %5457 = vmatpush1.bf16.msra.mxu1 %v14383_v41  ;;  %v4599_v41 = vld [vmem:[#allocation2 + $0x10] sm:$0xff]  ;;  %15745 = vst [vmem:[#allocation50_spill] sm:$0xff] %v14409_v21  ;;  %5483 = vmatprep.subr.bf16.mxu0 %v14409_v21 }
 0x478   :  { %5458 = vmatprep.subr.bf16.mxu1 %v14388_v42  ;;  %v14412_v42 = vcombine.high %v4612_v37, %v4616_v61  ;;  %v14414_v12 = vpack.c.bf16 %v4599_v41, %v4597_v22  ;;  %v4627_v41 = vld [vmem:[#allocation6 + $0x90] sm:$0xff]  ;;  %v14433_v61 = vcombine.low %v4619_v46, %v4623_v51  ;;  %v4601_v37 = vld [vmem:[#allocation2 + $0x20] sm:$0xff]  ;;  %v4636_v51 = vld [vmem:[#allocation6 + $0xd8] sm:$0xff] }
 0x479   :  { %v4631_v22 = vld [vmem:[#allocation6 + $0xb0] sm:$0xff]  ;;  %v4640_v46 = vld [vmem:[#allocation6 + $0xf8] sm:$0xff] }
 0x47a   :  { %15746 = vst [vmem:[#allocation51_spill] sm:$0xff] %v14412_v42  ;;  %5410 = vmatmul.mubr.bf16.vlgmr.msra.gmra.mrb[0].mxu0 %v14414_v12  ;;  %v4603_v21 = vld [vmem:[#allocation2 + $0x30] sm:$0xff]  ;;  %v14439_v53 = vcombine.high %v4627_v41, %v4631_v22 }
 0x47b   :  { %5459 = vmatpush1.bf16.msra.mxu1 %v14395_v4  ;;  %v14417_v4 = vcombine.low %v4611_v3, %v4615_v56  ;;  %v4628_v56 = vld [vmem:[#allocation6 + $0x98] sm:$0xff]  ;;  %5419 = vmatprep.mubr.bf16.mxu0 %v14428_v7 }
 0x47c   :  { %5460 = vmatprep.subr.bf16.mxu1 %v14400_v36  ;;  %v14426_v36 = vcombine.high %v4620_v15, %v4624_v44  ;;  %v4632_v3 = vld [vmem:[#allocation6 + $0xb8] sm:$0xff]  ;;  %15752 = vst [vmem:[#allocation57_spill] sm:$0xff] %v14439_v53 }
 0x47d   :  { %15747 = vst [vmem:[#allocation52_spill] sm:$0xff] %v14417_v4  ;;  %5484 = vmatpush1.bf16.msra.mxu0 %v14417_v4  ;;  %v14442_v31 = vcombine.high %v4628_v56, %v4632_v3  ;;  %v14446_v4 = vpack.c.bf16 %v4603_v21, %v4601_v37  ;;  %v4644_v21 = vld [vmem:[#allocation6 + $0x118] sm:$0xff] }
 0x47e   :  { %15750 = vst [vmem:[#allocation55_spill] sm:$0xff] %v14426_v36  ;;  %5485 = vmatprep.subr.bf16.mxu0 %v14423_v40  ;;  %v14458_v40 = vcombine.high %v4636_v51, %v4640_v46  ;;  %v4648_v37 = vld [vmem:[#allocation6 + $0x138] sm:$0xff] }
 0x47f   :  { %5461 = vmatpush1.bf16.msra.mxu1 %v14407_v17  ;;  %15753 = vst [vmem:[#allocation58_spill] sm:$0xff] %v14442_v31  ;;  %v4635_v17 = vld [vmem:[#allocation6 + $0xd0] sm:$0xff] }
 0x480   :  { %5536 = vmatprep.subr.bf16.mxu1 %v14412_v42  ;;  %v14437_v42 = vcombine.low %v4620_v15, %v4624_v44  ;;  %v14449_v15 = vcombine.low %v4627_v41, %v4631_v22  ;;  %v14453_v44 = vcombine.low %v4628_v56, %v4632_v3  ;;  %15757 = vst [vmem:[#allocation62_spill] sm:$0xff] %v14458_v40 }
 0x481   :  { %5486 = vmatpush1.bf16.msra.mxu0 %v14433_v61  ;;  %v14462_v41 = vcombine.low %v4635_v17, %v4639_v30  ;;  %v14467_v22 = vcombine.low %v4636_v51, %v4640_v46  ;;  %v14472_v3 = vcombine.high %v4644_v21, %v4648_v37  ;;  %v14481_v51 = vcombine.low %v4644_v21, %v4648_v37 }
 0x482   :  { %5463 = vmatmul.mubr.bf16.vlgmr.msra.gmra.mrb[0].mxu1 %v14414_v12  ;;  %15751 = vst [vmem:[#allocation56_spill] sm:$0xff] %v14437_v42  ;;  %15754 = vst [vmem:[#allocation59_spill] sm:$0xff] %v14449_v15  ;;  %5487 = vmatprep.subr.bf16.mxu0 %v14439_v53  ;;  %v4655_v53 = vld [vmem:[#allocation6 + $0x170] sm:$0xff] }
 0x483   :  { %5537 = vmatpush1.bf16.msra.mxu1 %v14421_v34  ;;  %5472 = vmatprep.mubr.bf16.mxu1 %v14428_v7  ;;  %15755 = vst [vmem:[#allocation60_spill] sm:$0xff] %v14453_v44  ;;  %v4643_v34 = vld [vmem:[#allocation6 + $0x110] sm:$0xff]  ;;  %15758 = vst [vmem:[#allocation63_spill] sm:$0xff] %v14462_v41 }
 0x484   :  { %5538 = vmatprep.subr.bf16.mxu1 %v14426_v36  ;;  %v14455_v36 = vcombine.high %v4635_v17, %v4639_v30  ;;  %5420 = vmatmul.mubr.bf16.gmra.mrb[4].mxu0 %v14446_v4  ;;  %15759 = vst [vmem:[#allocation64_spill] sm:$0xff] %v14467_v22  ;;  %v14469_v56 = vcombine.high %v4643_v34, %v4647_v52  ;;  %15761 = vst [vmem:[#allocation66_spill] sm:$0xff] %v14472_v3  ;;  %v4652_v30 = vld [vmem:[#allocation6 + $0x158] sm:$0xff] }
 0x485   :  { %5488 = vmatpush1.bf16.msra.mxu0 %v14449_v15  ;;  %5515 = vmatprep.mubr.bf16.mxu0 %v14290_v10  ;;  %v4656_v17 = vld [vmem:[#allocation6 + $0x178] sm:$0xff]  ;;  %15763 = vst [vmem:[#allocation68_spill] sm:$0xff] %v14481_v51  ;;  %v4663_v15 = vld [vmem:[#allocation6 + $0x1b0] sm:$0xff] }
 0x486   :  { %15756 = vst [vmem:[#allocation61_spill] sm:$0xff] %v14455_v36  ;;  %5489 = vmatprep.subr.bf16.mxu0 %v14455_v36  ;;  %15760 = vst [vmem:[#allocation65_spill] sm:$0xff] %v14469_v56  ;;  %v4659_v36 = vld [vmem:[#allocation6 + $0x190] sm:$0xff] }
 0x487   :  { %5539 = vmatpush1.bf16.msra.mxu1 %v14437_v42  ;;  %v4660_v42 = vld [vmem:[#allocation6 + $0x198] sm:$0xff]  ;;  %v14495_v21 = vcombine.high %v4659_v36, %v4663_v15 }
 0x488   :  { %5540 = vmatprep.subr.bf16.mxu1 %v14442_v31  ;;  %v4651_v31 = vld [vmem:[#allocation6 + $0x150] sm:$0xff] }
 0x489   :  { %5490 = vmatpush1.bf16.msra.mxu0 %v14462_v41  ;;  %v14483_v46 = vcombine.high %v4651_v31, %v4655_v53  ;;  %15768 = vst [vmem:[#allocation73_spill] sm:$0xff] %v14495_v21  ;;  %v4672_v41 = vld [vmem:[#allocation6 + $0x1f8] sm:$0xff] }
 0x48a   :  { %5473 = vmatmul.mubr.bf16.gmra.mrb[4].mxu1 %v14446_v4  ;;  %5491 = vmatprep.subr.bf16.mxu0 %v14469_v56  ;;  %v4671_v56 = vld [vmem:[#allocation6 + $0x1f0] sm:$0xff] }
 0x48b   :  { %5541 = vmatpush1.bf16.msra.mxu1 %v14453_v44  ;;  %5568 = vmatprep.mubr.bf16.mxu1 %v14290_v10  ;;  %v14477_v44 = vcombine.low %v4643_v34, %v4647_v52  ;;  %15764 = vst [vmem:[#allocation69_spill] sm:$0xff] %v14483_v46  ;;  %v4664_v10 = vld [vmem:[#allocation6 + $0x1b8] sm:$0xff]  ;;  %v14489_v52 = vcombine.low %v4651_v31, %v4655_v53 }
 0x48c   :  { %5542 = vmatprep.subr.bf16.mxu1 %v14458_v40  ;;  %v14486_v40 = vcombine.high %v4652_v30, %v4656_v17  ;;  %v14493_v34 = vcombine.low %v4652_v30, %v4656_v17  ;;  %v14498_v37 = vcombine.high %v4660_v42, %v4664_v10  ;;  %v14501_v53 = vcombine.low %v4659_v36, %v4663_v15 }
 0x48d   :  { %15762 = vst [vmem:[#allocation67_spill] sm:$0xff] %v14477_v44  ;;  %5492 = vmatpush1.bf16.msra.mxu0 %v14477_v44  ;;  %15766 = vst [vmem:[#allocation71_spill] sm:$0xff] %v14489_v52  ;;  %v14505_v31 = vcombine.low %v4660_v42, %v4664_v10  ;;  %v4680_v44 = vld [vmem:[#allocation6 + $0x238] sm:$0xff] }
 0x48e   :  { %15765 = vst [vmem:[#allocation70_spill] sm:$0xff] %v14486_v40  ;;  %5493 = vmatprep.subr.bf16.mxu0 %v14483_v46  ;;  %15767 = vst [vmem:[#allocation72_spill] sm:$0xff] %v14493_v34  ;;  %v4679_v46 = vld [vmem:[#allocation6 + $0x230] sm:$0xff] }
 0x48f   :  { %5543 = vmatpush1.bf16.msra.mxu1 %v14467_v22  ;;  %15769 = vst [vmem:[#allocation74_spill] sm:$0xff] %v14498_v37  ;;  %v4668_v22 = vld [vmem:[#allocation6 + $0x1d8] sm:$0xff]  ;;  %15770 = vst [vmem:[#allocation75_spill] sm:$0xff] %v14501_v53 }
 0x490   :  { %5544 = vmatprep.subr.bf16.mxu1 %v14472_v3  ;;  %v4667_v3 = vld [vmem:[#allocation6 + $0x1d0] sm:$0xff]  ;;  %15771 = vst [vmem:[#allocation76_spill] sm:$0xff] %v14505_v31  ;;  %v14510_v17 = vcombine.high %v4668_v22, %v4672_v41  ;;  %v14517_v42 = vcombine.low %v4668_v22, %v4672_v41 }
 0x491   :  { %5494 = vmatpush1.bf16.msra.mxu0 %v14489_v52  ;;  %v14507_v30 = vcombine.high %v4667_v3, %v4671_v56  ;;  %v14513_v36 = vcombine.low %v4667_v3, %v4671_v56  ;;  %v4688_v52 = vld [vmem:[#allocation6 + $0x278] sm:$0xff] }
 0x492   :  { %5495 = vmatprep.subr.bf16.mxu0 %v14495_v21  ;;  %15773 = vst [vmem:[#allocation78_spill] sm:$0xff] %v14510_v17  ;;  %15775 = vst [vmem:[#allocation80_spill] sm:$0xff] %v14517_v42  ;;  %v4687_v21 = vld [vmem:[#allocation6 + $0x270] sm:$0xff] }
 0x493   :  { %5545 = vmatpush1.bf16.msra.mxu1 %v14481_v51  ;;  %15772 = vst [vmem:[#allocation77_spill] sm:$0xff] %v14507_v30  ;;  %v4676_v51 = vld [vmem:[#allocation6 + $0x218] sm:$0xff]  ;;  %15774 = vst [vmem:[#allocation79_spill] sm:$0xff] %v14513_v36 }
 0x494   :  { %5546 = vmatprep.subr.bf16.mxu1 %v14486_v40  ;;  %v4675_v40 = vld [vmem:[#allocation6 + $0x210] sm:$0xff]  ;;  %v14522_v10 = vcombine.high %v4676_v51, %v4680_v44  ;;  %v14529_v41 = vcombine.low %v4676_v51, %v4680_v44 }
 0x495   :  { %5496 = vmatpush1.bf16.msra.mxu0 %v14501_v53  ;;  %v14519_v15 = vcombine.high %v4675_v40, %v4679_v46  ;;  %v14525_v56 = vcombine.low %v4675_v40, %v4679_v46  ;;  %v4696_v53 = vld [vmem:[#allocation6 + $0x2b8] sm:$0xff] }
 0x496   :  { %5497 = vmatprep.subr.bf16.mxu0 %v14507_v30  ;;  %15777 = vst [vmem:[#allocation82_spill] sm:$0xff] %v14522_v10  ;;  %15779 = vst [vmem:[#allocation84_spill] sm:$0xff] %v14529_v41  ;;  %v4695_v30 = vld [vmem:[#allocation6 + $0x2b0] sm:$0xff] }
 0x497   :  { %5547 = vmatpush1.bf16.msra.mxu1 %v14493_v34  ;;  %15776 = vst [vmem:[#allocation81_spill] sm:$0xff] %v14519_v15  ;;  %v4684_v34 = vld [vmem:[#allocation6 + $0x258] sm:$0xff]  ;;  %15778 = vst [vmem:[#allocation83_spill] sm:$0xff] %v14525_v56 }
 0x498   :  { %5548 = vmatprep.subr.bf16.mxu1 %v14498_v37  ;;  %v4683_v37 = vld [vmem:[#allocation6 + $0x250] sm:$0xff]  ;;  %v14534_v3 = vcombine.high %v4684_v34, %v4688_v52  ;;  %v14541_v44 = vcombine.low %v4684_v34, %v4688_v52 }
 0x499   :  { %5498 = vmatpush1.bf16.msra.mxu0 %v14513_v36  ;;  %v14531_v22 = vcombine.high %v4683_v37, %v4687_v21  ;;  %v14537_v40 = vcombine.low %v4683_v37, %v4687_v21  ;;  %v4704_v36 = vld [vmem:[#allocation6 + $0x2f8] sm:$0xff] }
 0x49a   :  { %5499 = vmatprep.subr.bf16.mxu0 %v14519_v15  ;;  %15781 = vst [vmem:[#allocation86_spill] sm:$0xff] %v14534_v3  ;;  %15783 = vst [vmem:[#allocation88_spill] sm:$0xff] %v14541_v44  ;;  %v4703_v15 = vld [vmem:[#allocation6 + $0x2f0] sm:$0xff] }
 0x49b   :  { %5549 = vmatpush1.bf16.msra.mxu1 %v14505_v31  ;;  %15780 = vst [vmem:[#allocation85_spill] sm:$0xff] %v14531_v22  ;;  %v4692_v31 = vld [vmem:[#allocation6 + $0x298] sm:$0xff]  ;;  %15782 = vst [vmem:[#allocation87_spill] sm:$0xff] %v14537_v40 }
 0x49c   :  { %5550 = vmatprep.subr.bf16.mxu1 %v14510_v17  ;;  %v4691_v17 = vld [vmem:[#allocation6 + $0x290] sm:$0xff]  ;;  %v14546_v46 = vcombine.high %v4692_v31, %v4696_v53  ;;  %v14553_v52 = vcombine.low %v4692_v31, %v4696_v53 }
 0x49d   :  { %5500 = vmatpush1.bf16.msra.mxu0 %v14525_v56  ;;  %v14543_v51 = vcombine.high %v4691_v17, %v4695_v30  ;;  %v14549_v21 = vcombine.low %v4691_v17, %v4695_v30  ;;  %v4712_v56 = vld [vmem:[#allocation6 + $0x338] sm:$0xff] }
 0x49e   :  { %5501 = vmatprep.subr.bf16.mxu0 %v14531_v22  ;;  %15785 = vst [vmem:[#allocation90_spill] sm:$0xff] %v14546_v46  ;;  %15787 = vst [vmem:[#allocation92_spill] sm:$0xff] %v14553_v52  ;;  %v4711_v22 = vld [vmem:[#allocation6 + $0x330] sm:$0xff] }
 0x49f   :  { %5551 = vmatpush1.bf16.msra.mxu1 %v14517_v42  ;;  %15784 = vst [vmem:[#allocation89_spill] sm:$0xff] %v14543_v51  ;;  %v4700_v42 = vld [vmem:[#allocation6 + $0x2d8] sm:$0xff]  ;;  %15786 = vst [vmem:[#allocation91_spill] sm:$0xff] %v14549_v21 }
 0x4a0   :  { %5552 = vmatprep.subr.bf16.mxu1 %v14522_v10  ;;  %v4699_v10 = vld [vmem:[#allocation6 + $0x2d0] sm:$0xff]  ;;  %v14558_v37 = vcombine.high %v4700_v42, %v4704_v36  ;;  %v14565_v53 = vcombine.low %v4700_v42, %v4704_v36 }
 0x4a1   :  { %5502 = vmatpush1.bf16.msra.mxu0 %v14537_v40  ;;  %v14555_v34 = vcombine.high %v4699_v10, %v4703_v15  ;;  %v14561_v30 = vcombine.low %v4699_v10, %v4703_v15  ;;  %v4720_v40 = vld [vmem:[#allocation6 + $0x378] sm:$0xff] }
 0x4a2   :  { %5503 = vmatprep.subr.bf16.mxu0 %v14543_v51  ;;  %15789 = vst [vmem:[#allocation94_spill] sm:$0xff] %v14558_v37  ;;  %15791 = vst [vmem:[#allocation96_spill] sm:$0xff] %v14565_v53  ;;  %v4719_v51 = vld [vmem:[#allocation6 + $0x370] sm:$0xff] }
 0x4a3   :  { %5553 = vmatpush1.bf16.msra.mxu1 %v14529_v41  ;;  %15788 = vst [vmem:[#allocation93_spill] sm:$0xff] %v14555_v34  ;;  %v4708_v41 = vld [vmem:[#allocation6 + $0x318] sm:$0xff]  ;;  %15790 = vst [vmem:[#allocation95_spill] sm:$0xff] %v14561_v30 }
 0x4a4   :  { %5554 = vmatprep.subr.bf16.mxu1 %v14534_v3  ;;  %v4707_v3 = vld [vmem:[#allocation6 + $0x310] sm:$0xff]  ;;  %v14570_v17 = vcombine.high %v4708_v41, %v4712_v56  ;;  %v14577_v36 = vcombine.low %v4708_v41, %v4712_v56 }
 0x4a5   :  { %5504 = vmatpush1.bf16.msra.mxu0 %v14549_v21  ;;  %v14567_v31 = vcombine.high %v4707_v3, %v4711_v22  ;;  %v14573_v15 = vcombine.low %v4707_v3, %v4711_v22  ;;  %v4728_v21 = vld [vmem:[#allocation6 + $0x3b8] sm:$0xff] }
 0x4a6   :  { %5505 = vmatprep.subr.bf16.mxu0 %v14555_v34  ;;  %15793 = vst [vmem:[#allocation98_spill] sm:$0xff] %v14570_v17  ;;  %v4727_v34 = vld [vmem:[#allocation6 + $0x3b0] sm:$0xff] }
 0x4a7   :  { %5555 = vmatpush1.bf16.msra.mxu1 %v14541_v44  ;;  %15792 = vst [vmem:[#allocation97_spill] sm:$0xff] %v14567_v31  ;;  %v4716_v44 = vld [vmem:[#allocation6 + $0x358] sm:$0xff] }
 0x4a8   :  { %5556 = vmatprep.subr.bf16.mxu1 %v14546_v46  ;;  %v4715_v46 = vld [vmem:[#allocation6 + $0x350] sm:$0xff]  ;;  %v14582_v10 = vcombine.high %v4716_v44, %v4720_v40  ;;  %v14589_v56 = vcombine.low %v4716_v44, %v4720_v40 }
 0x4a9   :  { %5506 = vmatpush1.bf16.msra.mxu0 %v14561_v30  ;;  %v14579_v42 = vcombine.high %v4715_v46, %v4719_v51  ;;  %v14585_v22 = vcombine.low %v4715_v46, %v4719_v51  ;;  %v4736_v30 = vld [vmem:[#allocation6 + $0x3f8] sm:$0xff] }
 0x4aa   :  { %5507 = vmatprep.subr.bf16.mxu0 %v14567_v31  ;;  %15794 = vst [vmem:[#allocation99_spill] sm:$0xff] %v14582_v10  ;;  %v4735_v31 = vld [vmem:[#allocation6 + $0x3f0] sm:$0xff] }
 0x4ab   :  { %5557 = vmatpush1.bf16.msra.mxu1 %v14553_v52  ;;  %v4724_v52 = vld [vmem:[#allocation6 + $0x398] sm:$0xff] }
 0x4ac   :  { %5558 = vmatprep.subr.bf16.mxu1 %v14558_v37  ;;  %v4723_v37 = vld [vmem:[#allocation6 + $0x390] sm:$0xff]  ;;  %v14594_v3 = vcombine.high %v4724_v52, %v4728_v21  ;;  %v14601_v40 = vcombine.low %v4724_v52, %v4728_v21  ;;  %v5622_v21 = vld [vmem:[#allocation2 + $0x48] sm:$0xff]  ;;  %v15827_v52 = vld [vmem:[#allocation58_spill] sm:$0xff] }
 0x4ad   :  { %5508 = vmatpush1.bf16.msra.mxu0 %v14573_v15  ;;  %v14591_v41 = vcombine.high %v4723_v37, %v4727_v34  ;;  %v14597_v51 = vcombine.low %v4723_v37, %v4727_v34  ;;  %v15828_v37 = vld [vmem:[#allocation59_spill] sm:$0xff] }
 0x4ae   :  { %5509 = vmatprep.subr.bf16.mxu0 %v14579_v42 }
 0x4af   :  { %5559 = vmatpush1.bf16.msra.mxu1 %v14565_v53  ;;  %v4732_v53 = vld [vmem:[#allocation6 + $0x3d8] sm:$0xff] }
 0x4b0   :  { %5560 = vmatprep.subr.bf16.mxu1 %v14570_v17  ;;  %v4731_v17 = vld [vmem:[#allocation6 + $0x3d0] sm:$0xff]  ;;  %v14606_v46 = vcombine.high %v4732_v53, %v4736_v30  ;;  %v14613_v34 = vcombine.low %v4732_v53, %v4736_v30  ;;  %v15830_v53 = vld [vmem:[#allocation61_spill] sm:$0xff] }
 0x4b1   :  { %5510 = vmatpush1.bf16.msra.mxu0 %v14585_v22  ;;  %v14603_v44 = vcombine.high %v4731_v17, %v4735_v31  ;;  %v15829_v30 = vld [vmem:[#allocation60_spill] sm:$0xff] }
 0x4b2   :  { %5511 = vmatprep.subr.bf16.mxu0 %v14591_v41 }
 0x4b3   :  { %5561 = vmatpush1.bf16.msra.mxu1 %v14577_v36 }
 0x4b4   :  { %5562 = vmatprep.subr.bf16.mxu1 %v14582_v10  ;;  %v14609_v10 = vcombine.low %v4731_v17, %v4735_v31  ;;  %v15831_v31 = vld [vmem:[#allocation62_spill] sm:$0xff]  ;;  %v15833_v17 = vld [vmem:[#allocation64_spill] sm:$0xff] }
 0x4b5   :  { %5512 = vmatpush1.bf16.msra.mxu0 %v14597_v51 }
 0x4b6   :  { %5513 = vmatprep.subr.bf16.mxu0 %v14603_v44 }
 0x4b7   :  { %5563 = vmatpush1.bf16.msra.mxu1 %v14589_v56 }
 0x4b8   :  { %5564 = vmatprep.subr.bf16.mxu1 %v14594_v3 }
 0x4b9   :  { %5514 = vmatpush1.bf16.msra.mxu0 %v14609_v10 }
 0x4ba   :  { %6401 = vmatprep.subr.bf16.mxu0 %v14216_v50  ;;  %v5624_v50 = vld [vmem:[#allocation2 + $0x58] sm:$0xff] }
 0x4bb   :  { %5565 = vmatpush1.bf16.msra.mxu1 %v14601_v40 }
 0x4bc   :  { %5566 = vmatprep.subr.bf16.mxu1 %v14606_v46  ;;  %5516 = vmatmul.mubr.bf16.vlgmr.msra.gmra.mrb[8].mxu0 %v14414_v12 }
 0x4bd   :  { %6402 = vmatpush1.bf16.msra.mxu0 %v14218_v49  ;;  %5525 = vmatprep.mubr.bf16.mxu0 %v14428_v7  ;;  %v14632_v49 = vpack.c.bf16 %v5624_v50, %v5622_v21  ;;  %v15834_v21 = vld [vmem:[#allocation65_spill] sm:$0xff]  ;;  %v15835_v50 = vld [vmem:[#allocation66_spill] sm:$0xff] }
 0x4be   :  { %6403 = vmatprep.subr.bf16.mxu0 %v14224_v57  ;;  %v15797_v57 = vld [vmem:[#allocation28_spill] sm:$0xff] }
 0x4bf   :  { %5567 = vmatpush1.bf16.msra.mxu1 %v14613_v34 }
 0x4c0   :  { %6454 = vmatprep.subr.bf16.mxu1 %v14220_v16  ;;  %v15795_v16 = vld [vmem:[#allocation26_spill] sm:$0xff] }
 0x4c1   :  { %6404 = vmatpush1.bf16.msra.mxu0 %v14231_v62  ;;  %v15799_v62 = vld [vmem:[#allocation30_spill] sm:$0xff] }
 0x4c2   :  { %5569 = vmatmul.mubr.bf16.vlgmr.msra.gmra.mrb[8].mxu1 %v14414_v12  ;;  %6405 = vmatprep.subr.bf16.mxu0 %v14237_v1  ;;  %v15801_v1 = vld [vmem:[#allocation32_spill] sm:$0xff] }
 0x4c3   :  { %6455 = vmatpush1.bf16.msra.mxu1 %v14222_v55  ;;  %5578 = vmatprep.mubr.bf16.mxu1 %v14428_v7  ;;  %v15796_v55 = vld [vmem:[#allocation27_spill] sm:$0xff]  ;;  %v15826_v7 = vld [vmem:[#allocation57_spill] sm:$0xff] }
 0x4c4   :  { %6456 = vmatprep.subr.bf16.mxu1 %v14227_v25  ;;  %5526 = vmatmul.mubr.bf16.gmra.mrb[12].mxu0 %v14446_v4  ;;  %v15798_v25 = vld [vmem:[#allocation29_spill] sm:$0xff] }
 0x4c5   :  { %6406 = vmatpush1.bf16.msra.mxu0 %v14243_v6  ;;  %6433 = vmatprep.mubr.bf16.mxu0 %v14632_v49  ;;  %v15803_v6 = vld [vmem:[#allocation34_spill] sm:$0xff] }
 0x4c6   :  { %6407 = vmatprep.subr.bf16.mxu0 %v14249_v9  ;;  %v15805_v9 = vld [vmem:[#allocation36_spill] sm:$0xff] }
 0x4c7   :  { %6457 = vmatpush1.bf16.msra.mxu1 %v14235_v63  ;;  %v15800_v63 = vld [vmem:[#allocation31_spill] sm:$0xff] }
 0x4c8   :  { %6458 = vmatprep.subr.bf16.mxu1 %v14240_v2  ;;  %v15802_v2 = vld [vmem:[#allocation33_spill] sm:$0xff] }
 0x4c9   :  { %6408 = vmatpush1.bf16.msra.mxu0 %v14255_v18  ;;  %v15807_v18 = vld [vmem:[#allocation38_spill] sm:$0xff] }
 0x4ca   :  { %5579 = vmatmul.mubr.bf16.gmra.mrb[12].mxu1 %v14446_v4  ;;  %6409 = vmatprep.subr.bf16.mxu0 %v14261_v20  ;;  %v15809_v20 = vld [vmem:[#allocation40_spill] sm:$0xff] }
 0x4cb   :  { %6459 = vmatpush1.bf16.msra.mxu1 %v14247_v8  ;;  %6486 = vmatprep.mubr.bf16.mxu1 %v14632_v49  ;;  %v15804_v8 = vld [vmem:[#allocation35_spill] sm:$0xff]  ;;  %v15825_v4 = vld [vmem:[#allocation56_spill] sm:$0xff] }
 0x4cc   :  { %6460 = vmatprep.subr.bf16.mxu1 %v14252_v11  ;;  %v15806_v11 = vld [vmem:[#allocation37_spill] sm:$0xff] }
 0x4cd   :  { %6410 = vmatpush1.bf16.msra.mxu0 %v14267_v26  ;;  %v15811_v26 = vld [vmem:[#allocation42_spill] sm:$0xff] }
 0x4ce   :  { %6411 = vmatprep.subr.bf16.mxu0 %v14273_v29  ;;  %v15813_v29 = vld [vmem:[#allocation44_spill] sm:$0xff] }
 0x4cf   :  { %6461 = vmatpush1.bf16.msra.mxu1 %v14259_v38  ;;  %v15808_v38 = vld [vmem:[#allocation39_spill] sm:$0xff] }
 0x4d0   :  { %6462 = vmatprep.subr.bf16.mxu1 %v14264_v54  ;;  %v15810_v54 = vld [vmem:[#allocation41_spill] sm:$0xff] }
 0x4d1   :  { %6412 = vmatpush1.bf16.msra.mxu0 %v14279_v39  ;;  %v5623_v39 = vld [vmem:[#allocation2 + $0x50] sm:$0xff] }
 0x4d2   :  { %6413 = vmatprep.subr.bf16.mxu0 %v14285_v43  ;;  %v15815_v43 = vld [vmem:[#allocation46_spill] sm:$0xff] }
 0x4d3   :  { %6463 = vmatpush1.bf16.msra.mxu1 %v14271_v27  ;;  %v15812_v27 = vld [vmem:[#allocation43_spill] sm:$0xff] }
 0x4d4   :  { %6464 = vmatprep.subr.bf16.mxu1 %v14276_v59  ;;  %v5621_v59 = vld [vmem:[#allocation2 + $0x40] sm:$0xff] }
 0x4d5   :  { %6414 = vmatpush1.bf16.msra.mxu0 %v14293_v58  ;;  %v14690_v58 = vpack.c.bf16 %v5623_v39, %v5621_v59  ;;  %v15856_v59 = vld [vmem:[#allocation87_spill] sm:$0xff]  ;;  %v15857_v39 = vld [vmem:[#allocation88_spill] sm:$0xff] }
 0x4d6   :  { %6415 = vmatprep.subr.bf16.mxu0 %v14300_v19  ;;  %v5628_v19 = vld [vmem:[#allocation2 + $0x78] sm:$0xff] }
 0x4d7   :  { %6465 = vmatpush1.bf16.msra.mxu1 %v14283_v45  ;;  %v15814_v45 = vld [vmem:[#allocation45_spill] sm:$0xff] }
 0x4d8   :  { %6466 = vmatprep.subr.bf16.mxu1 %v14288_v0  ;;  %v15816_v0 = vld [vmem:[#allocation47_spill] sm:$0xff] }
 0x4d9   :  { %6416 = vmatpush1.bf16.msra.mxu0 %v14307_v35  ;;  %v15818_v35 = vld [vmem:[#allocation49_spill] sm:$0xff] }
 0x4da   :  { %6417 = vmatprep.subr.bf16.mxu0 %v14313_v13  ;;  %v15820_v13 = vld [vmem:[#allocation51_spill] sm:$0xff] }
 0x4db   :  { %6467 = vmatpush1.bf16.msra.mxu1 %v14298_v60  ;;  %v5626_v60 = vld [vmem:[#allocation2 + $0x68] sm:$0xff] }
 0x4dc   :  { %6468 = vmatprep.subr.bf16.mxu1 %v14303_v28  ;;  %v15817_v28 = vld [vmem:[#allocation48_spill] sm:$0xff] }
 0x4dd   :  { %6418 = vmatpush1.bf16.msra.mxu0 %v14319_v23  ;;  %v15821_v23 = vld [vmem:[#allocation52_spill] sm:$0xff] }
 0x4de   :  { %6419 = vmatprep.subr.bf16.mxu0 %v14325_v32  ;;  %v5627_v32 = vld [vmem:[#allocation2 + $0x70] sm:$0xff] }
 0x4df   :  { %6469 = vmatpush1.bf16.msra.mxu1 %v14311_v5  ;;  %v15819_v5 = vld [vmem:[#allocation50_spill] sm:$0xff] }
 0x4e0   :  { %6470 = vmatprep.subr.bf16.mxu1 %v14316_v14  ;;  %v14696_v14 = vpack.c.bf16 %v5628_v19, %v5626_v60  ;;  %v15861_v60 = vld [vmem:[#allocation92_spill] sm:$0xff]  ;;  %v15862_v19 = vld [vmem:[#allocation93_spill] sm:$0xff] }
 0x4e1   :  { %6420 = vmatpush1.bf16.msra.mxu0 %v14331_v47  ;;  %v15823_v47 = vld [vmem:[#allocation54_spill] sm:$0xff] }
 0x4e2   :  { %6421 = vmatprep.subr.bf16.mxu0 %v15795_v16  ;;  %v15836_v16 = vld [vmem:[#allocation67_spill] sm:$0xff] }
 0x4e3   :  { %6471 = vmatpush1.bf16.msra.mxu1 %v14323_v24  ;;  %v5625_v24 = vld [vmem:[#allocation2 + $0x60] sm:$0xff] }
 0x4e4   :  { %6472 = vmatprep.subr.bf16.mxu1 %v14328_v33  ;;  %v15822_v33 = vld [vmem:[#allocation53_spill] sm:$0xff]  ;;  %v14706_v12 = vpack.c.bf16 %v5627_v32, %v5625_v24  ;;  %v15868_v24 = vld [vmem:[#allocation99_spill] sm:$0xff] }
 0x4e5   :  { %6422 = vmatpush1.bf16.msra.mxu0 %v15797_v57  ;;  %v15838_v57 = vld [vmem:[#allocation69_spill] sm:$0xff] }
 0x4e6   :  { %6423 = vmatprep.subr.bf16.mxu0 %v15799_v62  ;;  %v15840_v62 = vld [vmem:[#allocation71_spill] sm:$0xff] }
 0x4e7   :  { %6473 = vmatpush1.bf16.msra.mxu1 %v14335_v48  ;;  %v15824_v48 = vld [vmem:[#allocation55_spill] sm:$0xff] }
 0x4e8   :  { %6474 = vmatprep.subr.bf16.mxu1 %v15796_v55  ;;  %v15837_v55 = vld [vmem:[#allocation68_spill] sm:$0xff] }
 0x4e9   :  { %6424 = vmatpush1.bf16.msra.mxu0 %v15801_v1  ;;  %v15843_v1 = vld [vmem:[#allocation74_spill] sm:$0xff] }
 0x4ea   :  { %6425 = vmatprep.subr.bf16.mxu0 %v15803_v6  ;;  %v15845_v6 = vld [vmem:[#allocation76_spill] sm:$0xff] }
 0x4eb   :  { %6475 = vmatpush1.bf16.msra.mxu1 %v15798_v25  ;;  %v15839_v25 = vld [vmem:[#allocation70_spill] sm:$0xff] }
 0x4ec   :  { %6476 = vmatprep.subr.bf16.mxu1 %v15800_v63  ;;  %v15841_v63 = vld [vmem:[#allocation72_spill] sm:$0xff] }
 0x4ed   :  { %6426 = vmatpush1.bf16.msra.mxu0 %v15805_v9  ;;  %v15847_v9 = vld [vmem:[#allocation78_spill] sm:$0xff] }
 0x4ee   :  { %6427 = vmatprep.subr.bf16.mxu0 %v15807_v18  ;;  %v15849_v18 = vld [vmem:[#allocation80_spill] sm:$0xff] }
 0x4ef   :  { %6477 = vmatpush1.bf16.msra.mxu1 %v15802_v2  ;;  %v15844_v2 = vld [vmem:[#allocation75_spill] sm:$0xff] }
 0x4f0   :  { %6478 = vmatprep.subr.bf16.mxu1 %v15804_v8  ;;  %v15846_v8 = vld [vmem:[#allocation77_spill] sm:$0xff] }
 0x4f1   :  { %6428 = vmatpush1.bf16.msra.mxu0 %v15809_v20  ;;  %v15851_v20 = vld [vmem:[#allocation82_spill] sm:$0xff] }
 0x4f2   :  { %6429 = vmatprep.subr.bf16.mxu0 %v15811_v26  ;;  %v15853_v26 = vld [vmem:[#allocation84_spill] sm:$0xff] }
 0x4f3   :  { %6479 = vmatpush1.bf16.msra.mxu1 %v15806_v11  ;;  %v15848_v11 = vld [vmem:[#allocation79_spill] sm:$0xff] }
 0x4f4   :  { %6480 = vmatprep.subr.bf16.mxu1 %v15808_v38  ;;  %v15850_v38 = vld [vmem:[#allocation81_spill] sm:$0xff] }
 0x4f5   :  { %6430 = vmatpush1.bf16.msra.mxu0 %v15813_v29  ;;  %v15855_v29 = vld [vmem:[#allocation86_spill] sm:$0xff] }
 0x4f6   :  { %6431 = vmatprep.subr.bf16.mxu0 %v15815_v43  ;;  %v15859_v43 = vld [vmem:[#allocation90_spill] sm:$0xff] }
 0x4f7   :  { %6481 = vmatpush1.bf16.msra.mxu1 %v15810_v54  ;;  %v15852_v54 = vld [vmem:[#allocation83_spill] sm:$0xff] }
 0x4f8   :  { %6482 = vmatprep.subr.bf16.mxu1 %v15812_v27  ;;  %v15854_v27 = vld [vmem:[#allocation85_spill] sm:$0xff] }
 0x4f9   :  { %6432 = vmatpush1.bf16.msra.mxu0 %v15817_v28  ;;  %v15863_v28 = vld [vmem:[#allocation94_spill] sm:$0xff] }
 0x4fa   :  { %6507 = vmatprep.subr.bf16.mxu0 %v15819_v5  ;;  %v15865_v5 = vld [vmem:[#allocation96_spill] sm:$0xff] }
 0x4fb   :  { %6483 = vmatpush1.bf16.msra.mxu1 %v15814_v45  ;;  %v15858_v45 = vld [vmem:[#allocation89_spill] sm:$0xff] }
 0x4fc   :  { %6484 = vmatprep.subr.bf16.mxu1 %v15816_v0  ;;  %6434 = vmatmul.mubr.bf16.vlgmr.msra.gmra.mrb[16].mxu0 %v14690_v58  ;;  %v15860_v0 = vld [vmem:[#allocation91_spill] sm:$0xff] }
 0x4fd   :  { %6508 = vmatpush1.bf16.msra.mxu0 %v15821_v23  ;;  %6443 = vmatprep.mubr.bf16.mxu0 %v14696_v14  ;;  %v15867_v23 = vld [vmem:[#allocation98_spill] sm:$0xff] }
 0x4fe   :  { %6509 = vmatprep.subr.bf16.mxu0 %v15823_v47  ;;  %v15869_v47 = vld [vmem:[#allocation18_spill] sm:$0xff] }
 0x4ff   :  { %6485 = vmatpush1.bf16.msra.mxu1 %v15818_v35  ;;  %v15864_v35 = vld [vmem:[#allocation95_spill] sm:$0xff] }
 0x500   :  { %6560 = vmatprep.subr.bf16.mxu1 %v15820_v13  ;;  %v15866_v13 = vld [vmem:[#allocation97_spill] sm:$0xff] }
 0x501   :  { %6510 = vmatpush1.bf16.msra.mxu0 %v14433_v61  ;;  %v15832_v61 = vld [vmem:[#allocation63_spill] sm:$0xff] }
 0x502   :  { %6487 = vmatmul.mubr.bf16.vlgmr.msra.gmra.mrb[16].mxu1 %v14690_v58  ;;  %6511 = vmatprep.subr.bf16.mxu0 %v15826_v7  ;;  %v15871_v7 = vld [vmem:[#allocation20_spill] sm:$0xff] }
 0x503   :  { %6561 = vmatpush1.bf16.msra.mxu1 %v15822_v33  ;;  %6496 = vmatprep.mubr.bf16.mxu1 %v14696_v14  ;;  %v6653_v33 = vld [vmem:[%s15549_s6] sm:$0xff] }
 0x504   :  { %6562 = vmatprep.subr.bf16.mxu1 %v15824_v48  ;;  %6444 = vmatmul.mubr.bf16.gmra.mrb[20].mxu0 %v14706_v12  ;;  %v6658_v48 = vrot.slane %v6653_v33, %v15869_v47 }
 0x505   :  { %6512 = vmatpush1.bf16.msra.mxu0 %v15828_v37  ;;  %6539 = vmatprep.mubr.bf16.mxu0 %v14632_v49  ;;  %v15872_v37 = vld [vmem:[#allocation21_spill] sm:$0xff] }
 0x506   :  { %6513 = vmatprep.subr.bf16.mxu0 %v15830_v53 }
 0x507   :  { %6563 = vmatpush1.bf16.msra.mxu1 %v15825_v4 }
 0x508   :  { %6564 = vmatprep.subr.bf16.mxu1 %v15827_v52  ;;  %v6662_v52 = vrot.slane %v6653_v33, %v15871_v7 }
 0x509   :  { %6514 = vmatpush1.bf16.msra.mxu0 %v15832_v61 }
 0x50a   :  { %6497 = vmatmul.mubr.bf16.gmra.mrb[20].mxu1 %v14706_v12  ;;  %6515 = vmatprep.subr.bf16.mxu0 %v15834_v21 }
 0x50b   :  { %6565 = vmatpush1.bf16.msra.mxu1 %v15829_v30  ;;  %6592 = vmatprep.mubr.bf16.mxu1 %v14632_v49  ;;  %v15842_v49 = vld [vmem:[#allocation73_spill] sm:$0xff]  ;;  %v6670_v30 = vrot.slane %v6653_v33, %v15872_v37 }
 0x50c   :  { %6566 = vmatprep.subr.bf16.mxu1 %v15831_v31 }
 0x50d   :  { %6516 = vmatpush1.bf16.msra.mxu0 %v15836_v16 }
 0x50e   :  { %6517 = vmatprep.subr.bf16.mxu0 %v15838_v57 }
 0x50f   :  { %6567 = vmatpush1.bf16.msra.mxu1 %v15833_v17 }
 0x510   :  { %6568 = vmatprep.subr.bf16.mxu1 %v15835_v50 }
 0x511   :  { %6518 = vmatpush1.bf16.msra.mxu0 %v15840_v62 }
 0x512   :  { %6519 = vmatprep.subr.bf16.mxu0 %v15842_v49 }
 0x513   :  { %6569 = vmatpush1.bf16.msra.mxu1 %v15837_v55 }
 0x514   :  { %6570 = vmatprep.subr.bf16.mxu1 %v15839_v25 }
 0x515   :  { %6520 = vmatpush1.bf16.msra.mxu0 %v15844_v2 }
 0x516   :  { %6521 = vmatprep.subr.bf16.mxu0 %v15846_v8 }
 0x517   :  { %6571 = vmatpush1.bf16.msra.mxu1 %v15841_v63 }
 0x518   :  { %6572 = vmatprep.subr.bf16.mxu1 %v15843_v1 }
 0x519   :  { %6522 = vmatpush1.bf16.msra.mxu0 %v15848_v11  ;;  %v15874_v11 = vld [vmem:[#allocation23_spill] sm:$0xff] }
 0x51a   :  { %6523 = vmatprep.subr.bf16.mxu0 %v15850_v38  ;;  %v15875_v38 = vld [vmem:[#allocation24_spill] sm:$0xff] }
 0x51b   :  { %6573 = vmatpush1.bf16.msra.mxu1 %v15845_v6  ;;  %v15873_v6 = vld [vmem:[#allocation22_spill] sm:$0xff] }
 0x51c   :  { %6574 = vmatprep.subr.bf16.mxu1 %v15847_v9  ;;  %v6674_v8 = vrot.slane %v6653_v33, %v15873_v6 }
 0x51d   :  { %6524 = vmatpush1.bf16.msra.mxu0 %v15852_v54  ;;  %v15876_v54 = vld [vmem:[#allocation25_spill] sm:$0xff] }
 0x51e   :  { %6525 = vmatprep.subr.bf16.mxu0 %v15854_v27 }
 0x51f   :  { %6575 = vmatpush1.bf16.msra.mxu1 %v15849_v18  ;;  %v6682_v18 = vrot.slane %v6653_v33, %v15874_v11 }
 0x520   :  { %6576 = vmatprep.subr.bf16.mxu1 %v15851_v20  ;;  %v6678_v20 = vrot.slane %v6653_v33, %v15875_v38 }
 0x521   :  { %6526 = vmatpush1.bf16.msra.mxu0 %v15856_v59 }
 0x522   :  { %6527 = vmatprep.subr.bf16.mxu0 %v15858_v45 }
 0x523   :  { %6577 = vmatpush1.bf16.msra.mxu1 %v15853_v26  ;;  %v6686_v26 = vrot.slane %v6653_v33, %v15876_v54 }
 0x524   :  { %6578 = vmatprep.subr.bf16.mxu1 %v15855_v29 }
 0x525   :  { %6528 = vmatpush1.bf16.msra.mxu0 %v15860_v0 }
 0x526   :  { %6529 = vmatprep.subr.bf16.mxu0 %v15862_v19 }
 0x527   :  { %6579 = vmatpush1.bf16.msra.mxu1 %v15857_v39 }
 0x528   :  { %6580 = vmatprep.subr.bf16.mxu1 %v15859_v43 }
 0x529   :  { %6530 = vmatpush1.bf16.msra.mxu0 %v15864_v35 }
 0x52a   :  { %6531 = vmatprep.subr.bf16.mxu0 %v15866_v13 }
 0x52b   :  { %6581 = vmatpush1.bf16.msra.mxu1 %v15861_v60 }
 0x52c   :  { %6582 = vmatprep.subr.bf16.mxu1 %v15863_v28 }
 0x52d   :  { %6532 = vmatpush1.bf16.msra.mxu0 %v14573_v15 }
 0x52e   :  { %6533 = vmatprep.subr.bf16.mxu0 %v14579_v42 }
 0x52f   :  { %6583 = vmatpush1.bf16.msra.mxu1 %v15865_v5 }
 0x530   :  { %6584 = vmatprep.subr.bf16.mxu1 %v15867_v23 }
 0x531   :  { %6534 = vmatpush1.bf16.msra.mxu0 %v14585_v22 }
 0x532   :  { %6535 = vmatprep.subr.bf16.mxu0 %v14591_v41 }
 0x533   :  { %6585 = vmatpush1.bf16.msra.mxu1 %v14577_v36 }
 0x534   :  { %6586 = vmatprep.subr.bf16.mxu1 %v15868_v24 }
 0x535   :  { %6536 = vmatpush1.bf16.msra.mxu0 %v14597_v51 }
 0x536   :  { %6537 = vmatprep.subr.bf16.mxu0 %v14603_v44 }
 0x537   :  { %6587 = vmatpush1.bf16.msra.mxu1 %v14589_v56 }
 0x538   :  { %6588 = vmatprep.subr.bf16.mxu1 %v14594_v3 }
 0x539   :  { %6538 = vmatpush1.bf16.msra.mxu0 %v14609_v10 }
 0x53b   :  { %6589 = vmatpush1.bf16.msra.mxu1 %v14601_v40 }
 0x53c   :  { %6590 = vmatprep.subr.bf16.mxu1 %v14606_v46  ;;  %6540 = vmatmul.mubr.bf16.vlgmr.msra.gmra.mrb[24].mxu0 %v14690_v58 }
 0x53d   :  { %6549 = vmatprep.mubr.bf16.mxu0 %v14696_v14 }
 0x53f   :  { %6591 = vmatpush1.bf16.msra.mxu1 %v14613_v34 }
 0x542   :  { %6593 = vmatmul.mubr.bf16.vlgmr.msra.gmra.mrb[24].mxu1 %v14690_v58 }
 0x543   :  { %6602 = vmatprep.mubr.bf16.mxu1 %v14696_v14 }
 0x544   :  { %6550 = vmatmul.mubr.bf16.gmra.mrb[28].mxu0 %v14706_v12 }
 0x54a   :  { %6603 = vmatmul.mubr.bf16.gmra.mrb[28].mxu1 %v14706_v12  ;;  %v15870_v12 = vld [vmem:[#allocation19_spill] sm:$0xff] }
 0x54b   :  { %v6666_v4 = vrot.slane %v6653_v33, %v15870_v12 }
 0x54d   :  { %v5411_v15 = vpop.f32.mrb[0].mxu0 }
 0x54e   :  { %5589 = vst [vmem:[#allocation3] sm:$0xff] %v5411_v15  ;;  %v5413_v42 = vpop.f32.mrb[1].mxu0  ;;  %v6695_v53 = vadd.f32 %v6658_v48, %v5411_v15 }
 0x54f   :  { %5590 = vst [vmem:[#allocation3 + $0x8] sm:$0xff] %v5413_v42  ;;  %v5415_v22 = vpop.f32.mrb[2].mxu0  ;;  %v6696_v61 = vadd.f32 %v6662_v52, %v5413_v42 }
 0x550   :  { %5597 = vst [vmem:[#allocation3 + $0x40] sm:$0xff] %v5415_v22  ;;  %v5417_v41 = vpop.f32.mrb[3].mxu0  ;;  %v12097_v21 = vmul.f32 -1.442695, %v6695_v53 }
 0x551   :  { %5598 = vst [vmem:[#allocation3 + $0x48] sm:$0xff] %v5417_v41  ;;  %v12098_v16 = vmul.f32 -1.442695, %v6696_v61 }
 0x552   :  { %12960 = vpow2.f32 %v12097_v21 }
 0x555   :  { %v5464_v36 = vpop.f32.mrb[0].mxu1 }
 0x556   :  { %5591 = vst [vmem:[#allocation3 + $0x10] sm:$0xff] %v5464_v36  ;;  %v5466_v10 = vpop.f32.mrb[1].mxu1  ;;  %v6697_v31 = vadd.f32 %v6666_v4, %v5464_v36 }
 0x557   :  { %5592 = vst [vmem:[#allocation3 + $0x18] sm:$0xff] %v5466_v10  ;;  %v5468_v56 = vpop.f32.mrb[2].mxu1  ;;  %v5421_v51 = vpop.f32.mrb[4].mxu0  ;;  %v6698_v17 = vadd.f32 %v6670_v30, %v5466_v10 }
 0x558   :  { %5599 = vst [vmem:[#allocation3 + $0x50] sm:$0xff] %v5468_v56  ;;  %v5470_v3 = vpop.f32.mrb[3].mxu1  ;;  %5605 = vst [vmem:[#allocation3 + $0x80] sm:$0xff] %v5421_v51  ;;  %v5423_v44 = vpop.f32.mrb[5].mxu0  ;;  %v12099_v50 = vmul.f32 -1.442695, %v6697_v31 }
 0x559   :  { %5600 = vst [vmem:[#allocation3 + $0x58] sm:$0xff] %v5470_v3  ;;  %5606 = vst [vmem:[#allocation3 + $0x88] sm:$0xff] %v5423_v44  ;;  %v5425_v34 = vpop.f32.mrb[6].mxu0  ;;  %v12100_v55 = vmul.f32 -1.442695, %v6698_v17 }
 0x55a   :  { %5613 = vst [vmem:[#allocation3 + $0xc0] sm:$0xff] %v5425_v34  ;;  %v5427_v14 = vpop.f32.mrb[7].mxu0  ;;  %12962 = vpow2.f32 %v12099_v50 }
 0x55b   :  { %5614 = vst [vmem:[#allocation3 + $0xc8] sm:$0xff] %v5427_v14  ;;  %12964 = vpow2.f32 %v12098_v16 }
 0x55c   :  { %12966 = vpow2.f32 %v12100_v55  ;;  %v12961_v57 = vpop.eup %12960 }
 0x55d   :  { %v5474_v40 = vpop.f32.mrb[4].mxu1  ;;  %v6709_v49 = vadd.f32 1.0, %v12961_v57 }
 0x55e   :  { %5607 = vst [vmem:[#allocation3 + $0x90] sm:$0xff] %v5474_v40  ;;  %v5476_v46 = vpop.f32.mrb[5].mxu1 }
 0x55f   :  { %5608 = vst [vmem:[#allocation3 + $0x98] sm:$0xff] %v5476_v46  ;;  %v5478_v58 = vpop.f32.mrb[6].mxu1  ;;  %12968 = vrcp.f32 %v6709_v49 }
 0x560   :  { %5615 = vst [vmem:[#allocation3 + $0xd0] sm:$0xff] %v5478_v58  ;;  %v5480_v32 = vpop.f32.mrb[7].mxu1 }
 0x561   :  { %5616 = vst [vmem:[#allocation3 + $0xd8] sm:$0xff] %v5480_v32 }
 0x564   :  { %v12963_v25 = vpop.eup %12962 }
 0x565   :  { %v12965_v62 = vpop.eup %12964  ;;  %v6721_v1 = vadd.f32 1.0, %v12963_v25 }
 0x566   :  { %v12967_v63 = vpop.eup %12966  ;;  %v6710_v2 = vadd.f32 1.0, %v12965_v62 }
 0x567   :  { %v6722_v9 = vadd.f32 1.0, %v12967_v63  ;;  %12970 = vrcp.f32 %v6721_v1 }
 0x568   :  { %12972 = vrcp.f32 %v6710_v2 }
 0x569   :  { %12974 = vrcp.f32 %v6722_v9  ;;  %v12969_v15 = vpop.eup %12968 }
 0x571   :  { %v12971_v10 = vpop.eup %12970 }
 0x572   :  { %v12973_v41 = vpop.eup %12972  ;;  %v6741_v58 = vmul.f32 0.0, %v12971_v10 }
 0x573   :  { %v12975_v40 = vpop.eup %12974 }
 0x574   :  { %v6742_v32 = vmul.f32 0.0, %v12975_v40 }
 0x58f   :  { %v5517_v27 = vpop.f32.mrb[8].mxu0 }
 0x590   :  { %5593 = vst [vmem:[#allocation3 + $0x20] sm:$0xff] %v5517_v27  ;;  %v6699_v29 = vadd.f32 %v6674_v8, %v5517_v27  ;;  %v5519_v39 = vpop.f32.mrb[9].mxu0 }
 0x591   :  { %5594 = vst [vmem:[#allocation3 + $0x28] sm:$0xff] %v5519_v39  ;;  %v6700_v43 = vadd.f32 %v6678_v20, %v5519_v39  ;;  %v5521_v60 = vpop.f32.mrb[10].mxu0 }
 0x592   :  { %12976 = vtanh.f32 %v6699_v29  ;;  %5601 = vst [vmem:[#allocation3 + $0x60] sm:$0xff] %v5521_v60  ;;  %v5523_v35 = vpop.f32.mrb[11].mxu0 }
 0x593   :  { %12978 = vtanh.f32 %v6700_v43  ;;  %5602 = vst [vmem:[#allocation3 + $0x68] sm:$0xff] %v5523_v35 }
 0x595   :  { %v5570_v59 = vpop.f32.mrb[8].mxu1 }
 0x596   :  { %5595 = vst [vmem:[#allocation3 + $0x30] sm:$0xff] %v5570_v59  ;;  %v6701_v45 = vadd.f32 %v6682_v18, %v5570_v59  ;;  %v5572_v0 = vpop.f32.mrb[9].mxu1 }
 0x597   :  { %5596 = vst [vmem:[#allocation3 + $0x38] sm:$0xff] %v5572_v0  ;;  %v6702_v19 = vadd.f32 %v6686_v26, %v5572_v0  ;;  %v5574_v28 = vpop.f32.mrb[10].mxu1  ;;  %v5527_v24 = vpop.f32.mrb[12].mxu0 }
 0x598   :  { %v12101_v5 = vmul.f32 -1.442695, %v6701_v45  ;;  %5603 = vst [vmem:[#allocation3 + $0x70] sm:$0xff] %v5574_v28  ;;  %v5576_v13 = vpop.f32.mrb[11].mxu1  ;;  %5609 = vst [vmem:[#allocation3 + $0xa0] sm:$0xff] %v5527_v24  ;;  %v5529_v42 = vpop.f32.mrb[13].mxu0 }
 0x599   :  { %v12102_v23 = vmul.f32 -1.442695, %v6702_v19  ;;  %5604 = vst [vmem:[#allocation3 + $0x78] sm:$0xff] %v5576_v13  ;;  %5610 = vst [vmem:[#allocation3 + $0xa8] sm:$0xff] %v5529_v42  ;;  %v5531_v56 = vpop.f32.mrb[14].mxu0 }
 0x59a   :  { %12980 = vpow2.f32 %v12101_v5  ;;  %5617 = vst [vmem:[#allocation3 + $0xe0] sm:$0xff] %v5531_v56  ;;  %v5533_v51 = vpop.f32.mrb[15].mxu0 }
 0x59b   :  { %12982 = vpow2.f32 %v12102_v23  ;;  %5618 = vst [vmem:[#allocation3 + $0xe8] sm:$0xff] %v5533_v51 }
 0x59c   :  { %v12977_v46 = vpop.eup %12976 }
 0x59d   :  { %v5580_v36 = vpop.f32.mrb[12].mxu1  ;;  %v12979_v34 = vpop.eup %12978  ;;  %v6743_v14 = vmul.f32 %v12977_v46, %v12969_v15 }
 0x59e   :  { %5611 = vst [vmem:[#allocation3 + $0xb0] sm:$0xff] %v5580_v36  ;;  %v5582_v22 = vpop.f32.mrb[13].mxu1  ;;  %v6744_v33 = vmul.f32 %v12979_v34, %v12973_v41 }
 0x59f   :  { %5612 = vst [vmem:[#allocation3 + $0xb8] sm:$0xff] %v5582_v22  ;;  %v5584_v3 = vpop.f32.mrb[14].mxu1  ;;  %v14787_v48 = vadd.f32 %v6743_v14, %v6741_v58  }
 0x5a0   :  { %5619 = vst [vmem:[#allocation3 + $0xf0] sm:$0xff] %v5584_v3  ;;  %v5586_v44 = vpop.f32.mrb[15].mxu1  ;;  %v14789_v7 = vadd.f32 %v6744_v33, %v6742_v32  }
 0x5a1   :  { %5620 = vst [vmem:[#allocation3 + $0xf8] sm:$0xff] %v5586_v44  ;;  %12984 = vtanh.f32 %v14787_v48 }
 0x5a4   :  { %v12981_v47 = vpop.eup %12980 }
 0x5a5   :  { %v12983_v12 = vpop.eup %12982  ;;  %v6735_v4 = vadd.f32 1.0, %v12981_v47 }
 0x5a6   :  { %v6736_v52 = vadd.f32 1.0, %v12983_v12 }
 0x5a7   :  { %12986 = vrcp.f32 %v6735_v4 }
 0x5a8   :  { %12988 = vtanh.f32 %v14789_v7 }
 0x5a9   :  { %12990 = vrcp.f32 %v6736_v52 }
 0x5ab   :  { %v12985_v37 = vpop.eup %12984 }
 0x5b1   :  { %v12987_v30 = vpop.eup %12986 }
 0x5b2   :  { %v12989_v53 = vpop.eup %12988  ;;  %v14793_v31 = vmul.f32 %v12987_v30, %v12985_v37  }
 0x5b3   :  { %v12991_v61 = vpop.eup %12990 }
 0x5b4   :  { %6751 = vst [vmem:[#allocation2] sm:$0xff] %v14793_v31  ;;  %v14796_v17 = vmul.f32 %v12991_v61, %v12989_v53  }
 0x5b6   :  { %6752 = vst [vmem:[#allocation2 + $0x8] sm:$0xff] %v14796_v17 }
 0x5cf   :  { %v6435_v21 = vpop.f32.mrb[16].mxu0 }
 0x5d0   :  { %6613 = vst [vmem:[#allocation3 + $0x100] sm:$0xff] %v6435_v21  ;;  %v6437_v16 = vpop.f32.mrb[17].mxu0 }
 0x5d1   :  { %6614 = vst [vmem:[#allocation3 + $0x108] sm:$0xff] %v6437_v16  ;;  %v6439_v57 = vpop.f32.mrb[18].mxu0 }
 0x5d2   :  { %6621 = vst [vmem:[#allocation3 + $0x140] sm:$0xff] %v6439_v57  ;;  %v6441_v62 = vpop.f32.mrb[19].mxu0 }
 0x5d3   :  { %6622 = vst [vmem:[#allocation3 + $0x148] sm:$0xff] %v6441_v62 }
 0x5d5   :  { %v6488_v50 = vpop.f32.mrb[16].mxu1 }
 0x5d6   :  { %6615 = vst [vmem:[#allocation3 + $0x110] sm:$0xff] %v6488_v50  ;;  %v6490_v55 = vpop.f32.mrb[17].mxu1 }
 0x5d7   :  { %6616 = vst [vmem:[#allocation3 + $0x118] sm:$0xff] %v6490_v55  ;;  %v6492_v25 = vpop.f32.mrb[18].mxu1  ;;  %v6445_v49 = vpop.f32.mrb[20].mxu0 }
 0x5d8   :  { %6623 = vst [vmem:[#allocation3 + $0x150] sm:$0xff] %v6492_v25  ;;  %v6494_v63 = vpop.f32.mrb[19].mxu1  ;;  %6629 = vst [vmem:[#allocation3 + $0x180] sm:$0xff] %v6445_v49  ;;  %v6447_v2 = vpop.f32.mrb[21].mxu0 }
 0x5d9   :  { %6624 = vst [vmem:[#allocation3 + $0x158] sm:$0xff] %v6494_v63  ;;  %6630 = vst [vmem:[#allocation3 + $0x188] sm:$0xff] %v6447_v2  ;;  %v6449_v8 = vpop.f32.mrb[22].mxu0 }
 0x5da   :  { %6637 = vst [vmem:[#allocation3 + $0x1c0] sm:$0xff] %v6449_v8  ;;  %v6451_v11 = vpop.f32.mrb[23].mxu0 }
 0x5db   :  { %6638 = vst [vmem:[#allocation3 + $0x1c8] sm:$0xff] %v6451_v11 }
 0x5dd   :  { %v6498_v1 = vpop.f32.mrb[20].mxu1 }
 0x5de   :  { %6631 = vst [vmem:[#allocation3 + $0x190] sm:$0xff] %v6498_v1  ;;  %v6500_v6 = vpop.f32.mrb[21].mxu1 }
 0x5df   :  { %6632 = vst [vmem:[#allocation3 + $0x198] sm:$0xff] %v6500_v6  ;;  %v6502_v9 = vpop.f32.mrb[22].mxu1 }
 0x5e0   :  { %6639 = vst [vmem:[#allocation3 + $0x1d0] sm:$0xff] %v6502_v9  ;;  %v6504_v18 = vpop.f32.mrb[23].mxu1 }
 0x5e1   :  { %6640 = vst [vmem:[#allocation3 + $0x1d8] sm:$0xff] %v6504_v18 }
 0x60f   :  { %v6541_v38 = vpop.f32.mrb[24].mxu0 }
 0x610   :  { %6617 = vst [vmem:[#allocation3 + $0x120] sm:$0xff] %v6541_v38  ;;  %v6543_v54 = vpop.f32.mrb[25].mxu0 }
 0x611   :  { %6618 = vst [vmem:[#allocation3 + $0x128] sm:$0xff] %v6543_v54  ;;  %v6545_v27 = vpop.f32.mrb[26].mxu0 }
 0x612   :  { %6625 = vst [vmem:[#allocation3 + $0x160] sm:$0xff] %v6545_v27  ;;  %v6547_v59 = vpop.f32.mrb[27].mxu0 }
 0x613   :  { %6626 = vst [vmem:[#allocation3 + $0x168] sm:$0xff] %v6547_v59 }
 0x615   :  { %v6594_v20 = vpop.f32.mrb[24].mxu1 }
 0x616   :  { %6619 = vst [vmem:[#allocation3 + $0x130] sm:$0xff] %v6594_v20  ;;  %v6596_v26 = vpop.f32.mrb[25].mxu1 }
 0x617   :  { %6620 = vst [vmem:[#allocation3 + $0x138] sm:$0xff] %v6596_v26  ;;  %v6598_v29 = vpop.f32.mrb[26].mxu1  ;;  %v6551_v45 = vpop.f32.mrb[28].mxu0 }
 0x618   :  { %6627 = vst [vmem:[#allocation3 + $0x170] sm:$0xff] %v6598_v29  ;;  %v6600_v39 = vpop.f32.mrb[27].mxu1  ;;  %6633 = vst [vmem:[#allocation3 + $0x1a0] sm:$0xff] %v6551_v45  ;;  %v6553_v0 = vpop.f32.mrb[29].mxu0 }
 0x619   :  { %6628 = vst [vmem:[#allocation3 + $0x178] sm:$0xff] %v6600_v39  ;;  %6634 = vst [vmem:[#allocation3 + $0x1a8] sm:$0xff] %v6553_v0  ;;  %v6555_v19 = vpop.f32.mrb[30].mxu0 }
 0x61a   :  { %6641 = vst [vmem:[#allocation3 + $0x1e0] sm:$0xff] %v6555_v19  ;;  %v6557_v35 = vpop.f32.mrb[31].mxu0 }
 0x61b   :  { %6642 = vst [vmem:[#allocation3 + $0x1e8] sm:$0xff] %v6557_v35 }
 0x61d   :  { %v6604_v43 = vpop.f32.mrb[28].mxu1 }
 0x61e   :  { %6635 = vst [vmem:[#allocation3 + $0x1b0] sm:$0xff] %v6604_v43  ;;  %v6606_v60 = vpop.f32.mrb[29].mxu1 }
 0x61f   :  { %6636 = vst [vmem:[#allocation3 + $0x1b8] sm:$0xff] %v6606_v60  ;;  %v6608_v28 = vpop.f32.mrb[30].mxu1 }
 0x620   :  { %6643 = vst [vmem:[#allocation3 + $0x1f0] sm:$0xff] %v6608_v28  ;;  %v6610_v5 = vpop.f32.mrb[31].mxu1 }
 0x621   :  { %6644 = vst [vmem:[#allocation3 + $0x1f8] sm:$0xff] %v6610_v5 }
 0x622 LB: > { %v6829_v13 = vld [vmem:[#allocation8] sm:$0xff]  ;;  %v6830_v24 = vld [vmem:[#allocation8 + $0x8] sm:$0xff]  ;;  %v14826_v32 = vpack.c.bf16 %v13338_v17, %v13338_v17  ;;  %s12103_s25 = sshll.u32 %s13346_s23, 3  ;;  %s6758_s23 = sadd.s32 1, %s13346_s23   ;;  %s13346_s23 = sphi %s14811_s23, %s6758_s23   ;;  %v13342_v31 = vphi %v14793_v31, %v7815_v31   ;;  %v13338_v17 = vphi %v14796_v17, %v7816_v17   ;;  %v13334_v48 = vphi %v14787_v48, %v7811_v48   ;;  %v13330_v7 = vphi %v14789_v7, %v7812_v7  }
 0x623   : > { %v6833_v23 = vld [vmem:[#allocation8 + $0x20] sm:$0xff]  ;;  %v6834_v36 = vld [vmem:[#allocation8 + $0x28] sm:$0xff]  ;;  %s14841_s7 = sshra.s32 %s12103_s25, 3  ;;  %p6755_p7 = scmp.ge.s32.totalorder %s6758_s23, 8  }
 0x624   : > { %v12107_v15 = vcombine.high %v6829_v13, %v6833_v23  ;;  %v12106_v42 = vcombine.low %v6829_v13, %v6833_v23  ;;  %v6837_v10 = vld [vmem:[#allocation8 + $0x40] sm:$0xff]  ;;  %v12109_v56 = vcombine.high %v6830_v24, %v6834_v36  ;;  %v12108_v41 = vcombine.low %v6830_v24, %v6834_v36  ;;  %v6838_v51 = vld [vmem:[#allocation8 + $0x48] sm:$0xff]  ;;  %7629 = vmatprep.mubr.bf16.mxu0 %v14826_v32  ;;  %s12660_s24 = sshll.u32 %s14841_s7, 6  ;;  %s12661_s4 = sshll.u32 %s14841_s7, 4 }
 0x625   : > { %v6841_v22 = vld [vmem:[#allocation8 + $0x60] sm:$0xff]  ;;  %v6842_v40 = vld [vmem:[#allocation8 + $0x68] sm:$0xff]  ;;  %7670 = vmatprep.mubr.bf16.mxu1 %v14826_v32  ;;  %s14848_s28 = scalar_lea.vmem [#allocation3], %s12660_s24  ;;  %s7819_s5 = scalar_lea.vmem [#allocation2], %s12661_s4 }
 0x626   : > { %v12115_v3 = vcombine.high %v6837_v10, %v6841_v22  ;;  %v6845_v44 = vld [vmem:[#allocation8 + $0x80] sm:$0xff]  ;;  %7597 = vmatprep.subr.bf16.mxu0 %v12107_v15  ;;  %v12117_v46 = vcombine.high %v6838_v51, %v6842_v40  ;;  %v6846_v58 = vld [vmem:[#allocation8 + $0x88] sm:$0xff]  ;;  %7638 = vmatprep.subr.bf16.mxu1 %v12109_v56  ;;  %v12114_v33 = vcombine.low %v6837_v10, %v6841_v22  ;;  %s15472_s22 = smov (%p6755_p7), 1  }
 0x627   : > { %v6849_v34 = vld [vmem:[#allocation8 + $0xa0] sm:$0xff]  ;;  %v6850_v14 = vld [vmem:[#allocation8 + $0xa8] sm:$0xff]  ;;  %7598 = vmatpush1.bf16.msra.mxu0 %v12106_v42  ;;  %7639 = vmatpush1.bf16.msra.mxu1 %v12108_v41  ;;  %v12116_v47 = vcombine.low %v6838_v51, %v6842_v40 }
 0x628   : > { %7599 = vmatprep.subr.bf16.mxu0 %v12115_v3  ;;  %v12123_v12 = vcombine.high %v6845_v44, %v6849_v34  ;;  %7640 = vmatprep.subr.bf16.mxu1 %v12117_v46  ;;  %v12125_v4 = vcombine.high %v6846_v58, %v6850_v14  ;;  %v6853_v52 = vld [vmem:[#allocation8 + $0xc0] sm:$0xff]  ;;  %v6854_v30 = vld [vmem:[#allocation8 + $0xc8] sm:$0xff]  ;;  %v12122_v61 = vcombine.low %v6845_v44, %v6849_v34 }
 0x629   : > { %v6857_v37 = vld [vmem:[#allocation8 + $0xe0] sm:$0xff]  ;;  %v6858_v53 = vld [vmem:[#allocation8 + $0xe8] sm:$0xff]  ;;  %v12124_v17 = vcombine.low %v6846_v58, %v6850_v14 }
 0x62a   : > { %v12131_v21 = vcombine.high %v6853_v52, %v6857_v37  ;;  %v12133_v50 = vcombine.high %v6854_v30, %v6858_v53  ;;  %v6861_v16 = vld [vmem:[#allocation8 + $0x100] sm:$0xff]  ;;  %v6862_v57 = vld [vmem:[#allocation8 + $0x108] sm:$0xff]  ;;  %v12130_v62 = vcombine.low %v6853_v52, %v6857_v37  ;;  %v12132_v63 = vcombine.low %v6854_v30, %v6858_v53 }
 0x62b   : > { %7600 = vmatpush1.bf16.msra.mxu0 %v12114_v33  ;;  %7641 = vmatpush1.bf16.msra.mxu1 %v12116_v47  ;;  %v6865_v55 = vld [vmem:[#allocation8 + $0x120] sm:$0xff]  ;;  %v6866_v25 = vld [vmem:[#allocation8 + $0x128] sm:$0xff] }
 0x62c   : > { %7601 = vmatprep.subr.bf16.mxu0 %v12123_v12  ;;  %7642 = vmatprep.subr.bf16.mxu1 %v12125_v4  ;;  %v12139_v49 = vcombine.high %v6861_v16, %v6865_v55  ;;  %v12141_v1 = vcombine.high %v6862_v57, %v6866_v25  ;;  %v6869_v2 = vld [vmem:[#allocation8 + $0x140] sm:$0xff]  ;;  %v6870_v8 = vld [vmem:[#allocation8 + $0x148] sm:$0xff]  ;;  %v12138_v11 = vcombine.low %v6861_v16, %v6865_v55 }
 0x62d   : > { %v6873_v6 = vld [vmem:[#allocation8 + $0x160] sm:$0xff]  ;;  %v6874_v9 = vld [vmem:[#allocation8 + $0x168] sm:$0xff]  ;;  %v12140_v18 = vcombine.low %v6862_v57, %v6866_v25 }
 0x62e   : > { %v12147_v38 = vcombine.high %v6869_v2, %v6873_v6  ;;  %v12149_v20 = vcombine.high %v6870_v8, %v6874_v9  ;;  %v6877_v54 = vld [vmem:[#allocation8 + $0x180] sm:$0xff]  ;;  %v6878_v27 = vld [vmem:[#allocation8 + $0x188] sm:$0xff]  ;;  %v12146_v59 = vcombine.low %v6869_v2, %v6873_v6  ;;  %v12148_v39 = vcombine.low %v6870_v8, %v6874_v9 }
 0x62f   : > { %7602 = vmatpush1.bf16.msra.mxu0 %v12122_v61  ;;  %7643 = vmatpush1.bf16.msra.mxu1 %v12124_v17  ;;  %v6881_v26 = vld [vmem:[#allocation8 + $0x1a0] sm:$0xff]  ;;  %v6882_v29 = vld [vmem:[#allocation8 + $0x1a8] sm:$0xff] }
 0x630   : > { %7603 = vmatprep.subr.bf16.mxu0 %v12131_v21  ;;  %7644 = vmatprep.subr.bf16.mxu1 %v12133_v50  ;;  %v12155_v45 = vcombine.high %v6877_v54, %v6881_v26  ;;  %v12157_v43 = vcombine.high %v6878_v27, %v6882_v29  ;;  %v6885_v0 = vld [vmem:[#allocation8 + $0x1c0] sm:$0xff]  ;;  %v6886_v19 = vld [vmem:[#allocation8 + $0x1c8] sm:$0xff]  ;;  %v12154_v35 = vcombine.low %v6877_v54, %v6881_v26 }
 0x631   : > { %v6889_v60 = vld [vmem:[#allocation8 + $0x1e0] sm:$0xff]  ;;  %v6890_v28 = vld [vmem:[#allocation8 + $0x1e8] sm:$0xff]  ;;  %v12156_v5 = vcombine.low %v6878_v27, %v6882_v29 }
 0x632   : > { %v12163_v13 = vcombine.high %v6885_v0, %v6889_v60  ;;  %v12165_v23 = vcombine.high %v6886_v19, %v6890_v28  ;;  %v6893_v24 = vld [vmem:[#allocation8 + $0x200] sm:$0xff]  ;;  %v6894_v36 = vld [vmem:[#allocation8 + $0x208] sm:$0xff]  ;;  %v12162_v10 = vcombine.low %v6885_v0, %v6889_v60  ;;  %v12164_v22 = vcombine.low %v6886_v19, %v6890_v28 }
 0x633   : > { %7604 = vmatpush1.bf16.msra.mxu0 %v12130_v62  ;;  %7645 = vmatpush1.bf16.msra.mxu1 %v12132_v63  ;;  %v6897_v15 = vld [vmem:[#allocation8 + $0x220] sm:$0xff]  ;;  %v6898_v42 = vld [vmem:[#allocation8 + $0x228] sm:$0xff] }
 0x634   : > { %7605 = vmatprep.subr.bf16.mxu0 %v12139_v49  ;;  %7646 = vmatprep.subr.bf16.mxu1 %v12141_v1  ;;  %v12171_v56 = vcombine.high %v6893_v24, %v6897_v15  ;;  %v12173_v41 = vcombine.high %v6894_v36, %v6898_v42  ;;  %v6901_v3 = vld [vmem:[#allocation8 + $0x240] sm:$0xff]  ;;  %v6902_v40 = vld [vmem:[#allocation8 + $0x248] sm:$0xff]  ;;  %v12170_v46 = vcombine.low %v6893_v24, %v6897_v15 }
 0x635   : > { %v6905_v51 = vld [vmem:[#allocation8 + $0x260] sm:$0xff]  ;;  %v6906_v44 = vld [vmem:[#allocation8 + $0x268] sm:$0xff]  ;;  %v12172_v34 = vcombine.low %v6894_v36, %v6898_v42 }
 0x636   : > { %v12179_v58 = vcombine.high %v6901_v3, %v6905_v51  ;;  %v12181_v14 = vcombine.high %v6902_v40, %v6906_v44  ;;  %v6909_v33 = vld [vmem:[#allocation8 + $0x280] sm:$0xff]  ;;  %v6910_v12 = vld [vmem:[#allocation8 + $0x288] sm:$0xff]  ;;  %v12178_v52 = vcombine.low %v6901_v3, %v6905_v51  ;;  %v12180_v37 = vcombine.low %v6902_v40, %v6906_v44 }
 0x637   : > { %7606 = vmatpush1.bf16.msra.mxu0 %v12138_v11  ;;  %7647 = vmatpush1.bf16.msra.mxu1 %v12140_v18  ;;  %v6913_v47 = vld [vmem:[#allocation8 + $0x2a0] sm:$0xff]  ;;  %v6914_v4 = vld [vmem:[#allocation8 + $0x2a8] sm:$0xff] }
 0x638   : > { %7607 = vmatprep.subr.bf16.mxu0 %v12147_v38  ;;  %7648 = vmatprep.subr.bf16.mxu1 %v12149_v20  ;;  %v12187_v30 = vcombine.high %v6909_v33, %v6913_v47  ;;  %v12189_v53 = vcombine.high %v6910_v12, %v6914_v4  ;;  %v6917_v61 = vld [vmem:[#allocation8 + $0x2c0] sm:$0xff]  ;;  %v6918_v21 = vld [vmem:[#allocation8 + $0x2c8] sm:$0xff]  ;;  %v12186_v16 = vcombine.low %v6909_v33, %v6913_v47  ;;  %v6844_v33 = vld [vmem:[#allocation8 + $0x78] sm:$0xff] }
 0x639   : > { %v6921_v17 = vld [vmem:[#allocation8 + $0x2e0] sm:$0xff]  ;;  %v6922_v50 = vld [vmem:[#allocation8 + $0x2e8] sm:$0xff]  ;;  %v12188_v55 = vcombine.low %v6910_v12, %v6914_v4 }
 0x63a   : > { %v12195_v57 = vcombine.high %v6917_v61, %v6921_v17  ;;  %v12197_v25 = vcombine.high %v6918_v21, %v6922_v50  ;;  %v6925_v62 = vld [vmem:[#allocation8 + $0x300] sm:$0xff]  ;;  %v6926_v49 = vld [vmem:[#allocation8 + $0x308] sm:$0xff]  ;;  %v12194_v2 = vcombine.low %v6917_v61, %v6921_v17  ;;  %v12196_v6 = vcombine.low %v6918_v21, %v6922_v50  ;;  %v6852_v61 = vld [vmem:[#allocation8 + $0xb8] sm:$0xff] }
 0x63b   : > { %7608 = vmatpush1.bf16.msra.mxu0 %v12146_v59  ;;  %7649 = vmatpush1.bf16.msra.mxu1 %v12148_v39  ;;  %v6929_v63 = vld [vmem:[#allocation8 + $0x320] sm:$0xff]  ;;  %v6930_v1 = vld [vmem:[#allocation8 + $0x328] sm:$0xff] }
 0x63c   : > { %7609 = vmatprep.subr.bf16.mxu0 %v12155_v45  ;;  %7650 = vmatprep.subr.bf16.mxu1 %v12157_v43  ;;  %v12203_v8 = vcombine.high %v6925_v62, %v6929_v63  ;;  %v12205_v9 = vcombine.high %v6926_v49, %v6930_v1  ;;  %v6933_v11 = vld [vmem:[#allocation8 + $0x340] sm:$0xff]  ;;  %v6934_v38 = vld [vmem:[#allocation8 + $0x348] sm:$0xff]  ;;  %v12202_v54 = vcombine.low %v6925_v62, %v6929_v63 }
 0x63d   : > { %v6937_v18 = vld [vmem:[#allocation8 + $0x360] sm:$0xff]  ;;  %v6938_v20 = vld [vmem:[#allocation8 + $0x368] sm:$0xff]  ;;  %v12204_v26 = vcombine.low %v6926_v49, %v6930_v1 }
 0x63e   : > { %v12211_v27 = vcombine.high %v6933_v11, %v6937_v18  ;;  %v12213_v29 = vcombine.high %v6934_v38, %v6938_v20  ;;  %v6941_v59 = vld [vmem:[#allocation8 + $0x380] sm:$0xff]  ;;  %v6942_v45 = vld [vmem:[#allocation8 + $0x388] sm:$0xff]  ;;  %v12210_v0 = vcombine.low %v6933_v11, %v6937_v18  ;;  %v12212_v60 = vcombine.low %v6934_v38, %v6938_v20  ;;  %v6871_v20 = vld [vmem:[#allocation8 + $0x150] sm:$0xff] }
 0x63f   : > { %7610 = vmatpush1.bf16.msra.mxu0 %v12154_v35  ;;  %7651 = vmatpush1.bf16.msra.mxu1 %v12156_v5  ;;  %v6945_v39 = vld [vmem:[#allocation8 + $0x3a0] sm:$0xff]  ;;  %v6946_v43 = vld [vmem:[#allocation8 + $0x3a8] sm:$0xff] }
 0x640   : > { %7611 = vmatprep.subr.bf16.mxu0 %v12163_v13  ;;  %7652 = vmatprep.subr.bf16.mxu1 %v12165_v23  ;;  %v12219_v19 = vcombine.high %v6941_v59, %v6945_v39  ;;  %v12221_v28 = vcombine.high %v6942_v45, %v6946_v43  ;;  %v6949_v35 = vld [vmem:[#allocation8 + $0x3c0] sm:$0xff]  ;;  %v6950_v13 = vld [vmem:[#allocation8 + $0x3c8] sm:$0xff]  ;;  %v12218_v24 = vcombine.low %v6941_v59, %v6945_v39 }
 0x641   : > { %v6953_v5 = vld [vmem:[#allocation8 + $0x3e0] sm:$0xff]  ;;  %v6954_v23 = vld [vmem:[#allocation8 + $0x3e8] sm:$0xff]  ;;  %v12220_v15 = vcombine.low %v6942_v45, %v6946_v43  ;;  %v6879_v43 = vld [vmem:[#allocation8 + $0x190] sm:$0xff] }
 0x642   : > { %v12227_v36 = vcombine.high %v6949_v35, %v6953_v5  ;;  %v12229_v42 = vcombine.high %v6950_v13, %v6954_v23  ;;  %v12226_v3 = vcombine.low %v6949_v35, %v6953_v5  ;;  %v12228_v51 = vcombine.low %v6950_v13, %v6954_v23  ;;  %v6887_v23 = vld [vmem:[#allocation8 + $0x1d0] sm:$0xff] }
 0x643   : > { %7612 = vmatpush1.bf16.msra.mxu0 %v12162_v10  ;;  %7653 = vmatpush1.bf16.msra.mxu1 %v12164_v22  ;;  %v6831_v10 = vld [vmem:[#allocation8 + $0x10] sm:$0xff] }
 0x644   : > { %7613 = vmatprep.subr.bf16.mxu0 %v12171_v56  ;;  %7654 = vmatprep.subr.bf16.mxu1 %v12173_v41  ;;  %v6835_v22 = vld [vmem:[#allocation8 + $0x30] sm:$0xff]  ;;  %v6832_v56 = vld [vmem:[#allocation8 + $0x18] sm:$0xff] }
 0x645   : > { %v6836_v41 = vld [vmem:[#allocation8 + $0x38] sm:$0xff]  ;;  %v12111_v40 = vcombine.high %v6831_v10, %v6835_v22  ;;  %v12110_v47 = vcombine.low %v6831_v10, %v6835_v22 }
 0x646   : > { %v12113_v44 = vcombine.high %v6832_v56, %v6836_v41  ;;  %v12112_v12 = vcombine.low %v6832_v56, %v6836_v41  ;;  %v6895_v41 = vld [vmem:[#allocation8 + $0x210] sm:$0xff] }
 0x647   : > { %7614 = vmatpush1.bf16.msra.mxu0 %v12170_v46  ;;  %7655 = vmatpush1.bf16.msra.mxu1 %v12172_v34  ;;  %v6839_v46 = vld [vmem:[#allocation8 + $0x50] sm:$0xff] }
 0x648   : > { %7615 = vmatprep.subr.bf16.mxu0 %v12179_v58  ;;  %7656 = vmatprep.subr.bf16.mxu1 %v12181_v14  ;;  %v6843_v34 = vld [vmem:[#allocation8 + $0x70] sm:$0xff]  ;;  %v14832_v58 = vpack.c.bf16 %v13342_v31, %v13342_v31  ;;  %v6840_v14 = vld [vmem:[#allocation8 + $0x58] sm:$0xff] }
 0x649   : > { %v12119_v4 = vcombine.high %v6839_v46, %v6843_v34  ;;  %v12118_v31 = vcombine.low %v6839_v46, %v6843_v34  ;;  %v12120_v17 = vcombine.low %v6840_v14, %v6844_v33 }
 0x64b   : > { %7616 = vmatpush1.bf16.msra.mxu0 %v12178_v52  ;;  %7657 = vmatpush1.bf16.msra.mxu1 %v12180_v37  ;;  %v12121_v52 = vcombine.high %v6840_v14, %v6844_v33  ;;  %v6847_v37 = vld [vmem:[#allocation8 + $0x90] sm:$0xff] }
 0x64c   : > { %7617 = vmatprep.subr.bf16.mxu0 %v12187_v30  ;;  %7658 = vmatprep.subr.bf16.mxu1 %v12189_v53  ;;  %v6851_v30 = vld [vmem:[#allocation8 + $0xb0] sm:$0xff]  ;;  %v6848_v53 = vld [vmem:[#allocation8 + $0x98] sm:$0xff] }
 0x64d   : > { %v12127_v21 = vcombine.high %v6847_v37, %v6851_v30  ;;  %v12129_v50 = vcombine.high %v6848_v53, %v6852_v61  ;;  %v12126_v62 = vcombine.low %v6847_v37, %v6851_v30  ;;  %v12128_v63 = vcombine.low %v6848_v53, %v6852_v61  ;;  %v6903_v33 = vld [vmem:[#allocation8 + $0x250] sm:$0xff] }
 0x64e   : > { %v6911_v61 = vld [vmem:[#allocation8 + $0x290] sm:$0xff] }
 0x64f   : > { %7618 = vmatpush1.bf16.msra.mxu0 %v12186_v16  ;;  %7659 = vmatpush1.bf16.msra.mxu1 %v12188_v55  ;;  %v6855_v16 = vld [vmem:[#allocation8 + $0xd0] sm:$0xff] }
 0x650   : > { %7619 = vmatprep.subr.bf16.mxu0 %v12195_v57  ;;  %7660 = vmatprep.subr.bf16.mxu1 %v12197_v25  ;;  %v6859_v55 = vld [vmem:[#allocation8 + $0xf0] sm:$0xff]  ;;  %v6856_v57 = vld [vmem:[#allocation8 + $0xd8] sm:$0xff] }
 0x651   : > { %v6860_v25 = vld [vmem:[#allocation8 + $0xf8] sm:$0xff]  ;;  %v12135_v49 = vcombine.high %v6855_v16, %v6859_v55  ;;  %v12134_v11 = vcombine.low %v6855_v16, %v6859_v55 }
 0x652   : > { %v12137_v1 = vcombine.high %v6856_v57, %v6860_v25  ;;  %v12136_v18 = vcombine.low %v6856_v57, %v6860_v25  ;;  %v6919_v25 = vld [vmem:[#allocation8 + $0x2d0] sm:$0xff] }
 0x653   : > { %7620 = vmatpush1.bf16.msra.mxu0 %v12194_v2  ;;  %7661 = vmatpush1.bf16.msra.mxu1 %v12196_v6  ;;  %v6863_v2 = vld [vmem:[#allocation8 + $0x110] sm:$0xff] }
 0x654   : > { %7621 = vmatprep.subr.bf16.mxu0 %v12203_v8  ;;  %7662 = vmatprep.subr.bf16.mxu1 %v12205_v9  ;;  %v6867_v6 = vld [vmem:[#allocation8 + $0x130] sm:$0xff]  ;;  %v6864_v8 = vld [vmem:[#allocation8 + $0x118] sm:$0xff] }
 0x655   : > { %v6868_v9 = vld [vmem:[#allocation8 + $0x138] sm:$0xff]  ;;  %v12143_v38 = vcombine.high %v6863_v2, %v6867_v6 }
 0x656   : > { %v12144_v59 = vcombine.low %v6864_v8, %v6868_v9 }
 0x657   : > { %7622 = vmatpush1.bf16.msra.mxu0 %v12202_v54  ;;  %7663 = vmatpush1.bf16.msra.mxu1 %v12204_v26  ;;  %v6875_v54 = vld [vmem:[#allocation8 + $0x170] sm:$0xff]  ;;  %v6872_v26 = vld [vmem:[#allocation8 + $0x158] sm:$0xff] }
 0x658   : > { %7623 = vmatprep.subr.bf16.mxu0 %v12211_v27  ;;  %7664 = vmatprep.subr.bf16.mxu1 %v12213_v29  ;;  %v6876_v27 = vld [vmem:[#allocation8 + $0x178] sm:$0xff]  ;;  %v12142_v29 = vcombine.low %v6863_v2, %v6867_v6  ;;  %v12151_v39 = vcombine.high %v6871_v20, %v6875_v54 }
 0x659   : > { %v12153_v45 = vcombine.high %v6872_v26, %v6876_v27  ;;  %v12152_v35 = vcombine.low %v6872_v26, %v6876_v27  ;;  %v6935_v27 = vld [vmem:[#allocation8 + $0x350] sm:$0xff] }
 0x65b   : > { %7624 = vmatpush1.bf16.msra.mxu0 %v12210_v0  ;;  %7665 = vmatpush1.bf16.msra.mxu1 %v12212_v60  ;;  %v6883_v0 = vld [vmem:[#allocation8 + $0x1b0] sm:$0xff]  ;;  %v6880_v60 = vld [vmem:[#allocation8 + $0x198] sm:$0xff] }
 0x65c   : > { %7625 = vmatprep.subr.bf16.mxu0 %v12219_v19  ;;  %7666 = vmatprep.subr.bf16.mxu1 %v12221_v28  ;;  %v6884_v19 = vld [vmem:[#allocation8 + $0x1b8] sm:$0xff]  ;;  %v12150_v28 = vcombine.low %v6871_v20, %v6875_v54  ;;  %v12159_v5 = vcombine.high %v6879_v43, %v6883_v0 }
 0x65d   : > { %v12161_v13 = vcombine.high %v6880_v60, %v6884_v19  ;;  %v12160_v10 = vcombine.low %v6880_v60, %v6884_v19  ;;  %v6943_v19 = vld [vmem:[#allocation8 + $0x390] sm:$0xff] }
 0x65f   : > { %7626 = vmatpush1.bf16.msra.mxu0 %v12218_v24  ;;  %7667 = vmatpush1.bf16.msra.mxu1 %v12220_v15  ;;  %v6891_v24 = vld [vmem:[#allocation8 + $0x1f0] sm:$0xff]  ;;  %v6888_v15 = vld [vmem:[#allocation8 + $0x1d8] sm:$0xff] }
 0x660   : > { %7627 = vmatprep.subr.bf16.mxu0 %v12227_v36  ;;  %7668 = vmatprep.subr.bf16.mxu1 %v12229_v42  ;;  %v6892_v36 = vld [vmem:[#allocation8 + $0x1f8] sm:$0xff]  ;;  %v12158_v42 = vcombine.low %v6879_v43, %v6883_v0  ;;  %v12167_v22 = vcombine.high %v6887_v23, %v6891_v24 }
 0x661   : > { %v12169_v56 = vcombine.high %v6888_v15, %v6892_v36  ;;  %v12168_v46 = vcombine.low %v6888_v15, %v6892_v36  ;;  %v6951_v36 = vld [vmem:[#allocation8 + $0x3d0] sm:$0xff] }
 0x663   : > { %7628 = vmatpush1.bf16.msra.mxu0 %v12226_v3  ;;  %7669 = vmatpush1.bf16.msra.mxu1 %v12228_v51  ;;  %v6899_v3 = vld [vmem:[#allocation8 + $0x230] sm:$0xff]  ;;  %v6896_v51 = vld [vmem:[#allocation8 + $0x218] sm:$0xff] }
 0x664   : > { %7679 = vmatprep.subr.bf16.mxu0 %v12111_v40  ;;  %7720 = vmatprep.subr.bf16.mxu1 %v12113_v44  ;;  %v6900_v40 = vld [vmem:[#allocation8 + $0x238] sm:$0xff]  ;;  %v12166_v44 = vcombine.low %v6887_v23, %v6891_v24  ;;  %v12175_v34 = vcombine.high %v6895_v41, %v6899_v3 }
 0x665   : > { %v12177_v14 = vcombine.high %v6896_v51, %v6900_v40  ;;  %v12176_v37 = vcombine.low %v6896_v51, %v6900_v40 }
 0x666   : > { %7630 = vmatmul.mubr.bf16.vlgmr.msra.gmra.mrb[0].mxu0 %v14832_v58  ;;  %7671 = vmatmul.mubr.bf16.vlgmr.msra.gmra.mrb[0].mxu1 %v14832_v58 }
 0x667   : > { %7680 = vmatpush1.bf16.msra.mxu0 %v12110_v47  ;;  %7721 = vmatpush1.bf16.msra.mxu1 %v12112_v12  ;;  %v6907_v47 = vld [vmem:[#allocation8 + $0x270] sm:$0xff]  ;;  %v6904_v12 = vld [vmem:[#allocation8 + $0x258] sm:$0xff] }
 0x668   : > { %7681 = vmatprep.subr.bf16.mxu0 %v12119_v4  ;;  %7722 = vmatprep.subr.bf16.mxu1 %v12121_v52  ;;  %v6908_v4 = vld [vmem:[#allocation8 + $0x278] sm:$0xff]  ;;  %v12174_v52 = vcombine.low %v6895_v41, %v6899_v3  ;;  %v12183_v30 = vcombine.high %v6903_v33, %v6907_v47 }
 0x669   : > { %7711 = vmatprep.mubr.bf16.mxu0 %v14826_v32  ;;  %7752 = vmatprep.mubr.bf16.mxu1 %v14826_v32  ;;  %v12145_v32 = vcombine.high %v6864_v8, %v6868_v9  ;;  %v12185_v53 = vcombine.high %v6904_v12, %v6908_v4  ;;  %v12184_v16 = vcombine.low %v6904_v12, %v6908_v4  ;;  %v6927_v9 = vld [vmem:[#allocation8 + $0x310] sm:$0xff] }
 0x66b   : > { %7682 = vmatpush1.bf16.msra.mxu0 %v12118_v31  ;;  %7723 = vmatpush1.bf16.msra.mxu1 %v12120_v17  ;;  %v6915_v31 = vld [vmem:[#allocation8 + $0x2b0] sm:$0xff]  ;;  %v6912_v17 = vld [vmem:[#allocation8 + $0x298] sm:$0xff] }
 0x66c   : > { %7683 = vmatprep.subr.bf16.mxu0 %v12127_v21  ;;  %7724 = vmatprep.subr.bf16.mxu1 %v12129_v50  ;;  %v6916_v21 = vld [vmem:[#allocation8 + $0x2b8] sm:$0xff]  ;;  %v12182_v50 = vcombine.low %v6903_v33, %v6907_v47  ;;  %v12191_v55 = vcombine.high %v6911_v61, %v6915_v31 }
 0x66d   : > { %v12193_v57 = vcombine.high %v6912_v17, %v6916_v21  ;;  %v12192_v2 = vcombine.low %v6912_v17, %v6916_v21  ;;  %v6771_v17 = vld [vmem:[%s14848_s28 + $0x10] sm:$0xff] }
 0x66e   : > { %v15879_v21 = vld [vmem:[#allocation20_spill] sm:$0xff] }
 0x66f   : > { %7684 = vmatpush1.bf16.msra.mxu0 %v12126_v62  ;;  %7725 = vmatpush1.bf16.msra.mxu1 %v12128_v63  ;;  %v6923_v62 = vld [vmem:[#allocation8 + $0x2f0] sm:$0xff]  ;;  %v6920_v63 = vld [vmem:[#allocation8 + $0x2d8] sm:$0xff] }
 0x670   : > { %7685 = vmatprep.subr.bf16.mxu0 %v12135_v49  ;;  %7726 = vmatprep.subr.bf16.mxu1 %v12137_v1  ;;  %v6924_v49 = vld [vmem:[#allocation8 + $0x2f8] sm:$0xff]  ;;  %v12190_v1 = vcombine.low %v6911_v61, %v6915_v31  ;;  %v12199_v6 = vcombine.high %v6919_v25, %v6923_v62  ;;  %v15878_v61 = vld [vmem:[#allocation19_spill] sm:$0xff] }
 0x671   : > { %v12201_v8 = vcombine.high %v6920_v63, %v6924_v49  ;;  %v12200_v20 = vcombine.low %v6920_v63, %v6924_v49 }
 0x673   : > { %7686 = vmatpush1.bf16.msra.mxu0 %v12134_v11  ;;  %7727 = vmatpush1.bf16.msra.mxu1 %v12136_v18  ;;  %v6931_v11 = vld [vmem:[#allocation8 + $0x330] sm:$0xff]  ;;  %v6928_v18 = vld [vmem:[#allocation8 + $0x318] sm:$0xff] }
 0x674   : > { %7687 = vmatprep.subr.bf16.mxu0 %v12143_v38  ;;  %7728 = vmatprep.subr.bf16.mxu1 %v12145_v32  ;;  %v6932_v38 = vld [vmem:[#allocation8 + $0x338] sm:$0xff]  ;;  %v12198_v32 = vcombine.low %v6919_v25, %v6923_v62  ;;  %v12207_v54 = vcombine.high %v6927_v9, %v6931_v11 }
 0x675   : > { %v12209_v26 = vcombine.high %v6928_v18, %v6932_v38  ;;  %v12208_v43 = vcombine.low %v6928_v18, %v6932_v38  ;;  %v6772_v62 = vld [vmem:[%s14848_s28 + $0x18] sm:$0xff] }
 0x677   : > { %7688 = vmatpush1.bf16.msra.mxu0 %v12142_v29  ;;  %7729 = vmatpush1.bf16.msra.mxu1 %v12144_v59  ;;  %v6939_v29 = vld [vmem:[#allocation8 + $0x370] sm:$0xff]  ;;  %v6936_v59 = vld [vmem:[#allocation8 + $0x358] sm:$0xff] }
 0x678   : > { %7689 = vmatprep.subr.bf16.mxu0 %v12151_v39  ;;  %7730 = vmatprep.subr.bf16.mxu1 %v12153_v45  ;;  %v6940_v39 = vld [vmem:[#allocation8 + $0x378] sm:$0xff]  ;;  %v12206_v45 = vcombine.low %v6927_v9, %v6931_v11  ;;  %v12215_v0 = vcombine.high %v6935_v27, %v6939_v29 }
 0x679   : > { %v12217_v60 = vcombine.high %v6936_v59, %v6940_v39  ;;  %v12216_v23 = vcombine.low %v6936_v59, %v6940_v39  ;;  %v6773_v59 = vld [vmem:[%s14848_s28 + $0x20] sm:$0xff]  ;;  %v15882_v39 = vld [vmem:[#allocation23_spill] sm:$0xff] }
 0x67b   : > { %7690 = vmatpush1.bf16.msra.mxu0 %v12150_v28  ;;  %7731 = vmatpush1.bf16.msra.mxu1 %v12152_v35  ;;  %v6947_v28 = vld [vmem:[#allocation8 + $0x3b0] sm:$0xff]  ;;  %v6944_v35 = vld [vmem:[#allocation8 + $0x398] sm:$0xff] }
 0x67c   : > { %7691 = vmatprep.subr.bf16.mxu0 %v12159_v5  ;;  %7732 = vmatprep.subr.bf16.mxu1 %v12161_v13  ;;  %v6948_v5 = vld [vmem:[#allocation8 + $0x3b8] sm:$0xff]  ;;  %v12214_v13 = vcombine.low %v6935_v27, %v6939_v29  ;;  %v12223_v24 = vcombine.high %v6943_v19, %v6947_v28 }
 0x67d   : > { %v12225_v15 = vcombine.high %v6944_v35, %v6948_v5  ;;  %v12224_v41 = vcombine.low %v6944_v35, %v6948_v5  ;;  %v6774_v35 = vld [vmem:[%s14848_s28 + $0x28] sm:$0xff]  ;;  %v15884_v5 = vld [vmem:[#allocation25_spill] sm:$0xff] }
 0x67f   : > { %7692 = vmatpush1.bf16.msra.mxu0 %v12158_v42  ;;  %7733 = vmatpush1.bf16.msra.mxu1 %v12160_v10  ;;  %v6955_v42 = vld [vmem:[#allocation8 + $0x3f0] sm:$0xff]  ;;  %v6952_v10 = vld [vmem:[#allocation8 + $0x3d8] sm:$0xff] }
 0x680   : > { %7693 = vmatprep.subr.bf16.mxu0 %v12167_v22  ;;  %7734 = vmatprep.subr.bf16.mxu1 %v12169_v56  ;;  %v6956_v22 = vld [vmem:[#allocation8 + $0x3f8] sm:$0xff]  ;;  %v12222_v56 = vcombine.low %v6943_v19, %v6947_v28  ;;  %v12231_v3 = vcombine.high %v6951_v36, %v6955_v42  ;;  %v12230_v40 = vcombine.low %v6951_v36, %v6955_v42  ;;  %v6775_v28 = vld [vmem:[%s14848_s28 + $0x30] sm:$0xff] }
 0x681   : > { %v12233_v51 = vcombine.high %v6952_v10, %v6956_v22 }
 0x683   : > { %7694 = vmatpush1.bf16.msra.mxu0 %v12166_v44  ;;  %7735 = vmatpush1.bf16.msra.mxu1 %v12168_v46  ;;  %v12232_v44 = vcombine.low %v6952_v10, %v6956_v22 }
 0x684   : > { %7695 = vmatprep.subr.bf16.mxu0 %v12175_v34  ;;  %7736 = vmatprep.subr.bf16.mxu1 %v12177_v14 }
 0x687   : > { %7696 = vmatpush1.bf16.msra.mxu0 %v12174_v52  ;;  %7737 = vmatpush1.bf16.msra.mxu1 %v12176_v37  ;;  %v6777_v37 = vld [vmem:[%s15549_s6] sm:$0xff] }
 0x688   : > { %7697 = vmatprep.subr.bf16.mxu0 %v12183_v30  ;;  %7738 = vmatprep.subr.bf16.mxu1 %v12185_v53  ;;  %v15877_v30 = vld [vmem:[#allocation18_spill] sm:$0xff]  ;;  %v6790_v31 = vrot.slane %v6777_v37, %v15878_v61 }
 0x689   : > { %v6782_v53 = vrot.slane %v6777_v37, %v15877_v30 }
 0x68a   : > { %v6821_v63 = vadd.f32 %v6790_v31, %v6771_v17 }
 0x68b   : > { %7698 = vmatpush1.bf16.msra.mxu0 %v12182_v50  ;;  %7739 = vmatpush1.bf16.msra.mxu1 %v12184_v16  ;;  %v6786_v50 = vrot.slane %v6777_v37, %v15879_v21  ;;  %v6770_v16 = vld [vmem:[%s14848_s28 + $0x8] sm:$0xff] }
 0x68c   : > { %7699 = vmatprep.subr.bf16.mxu0 %v12191_v55  ;;  %7740 = vmatprep.subr.bf16.mxu1 %v12193_v57  ;;  %v15880_v55 = vld [vmem:[#allocation21_spill] sm:$0xff] }
 0x68d   : > { %v6794_v57 = vrot.slane %v6777_v37, %v15880_v55  ;;  %v6820_v49 = vadd.f32 %v6786_v50, %v6770_v16 }
 0x68f   : > { %7700 = vmatpush1.bf16.msra.mxu0 %v12190_v1  ;;  %7741 = vmatpush1.bf16.msra.mxu1 %v12192_v2  ;;  %v6822_v1 = vadd.f32 %v6794_v57, %v6772_v62 }
 0x690   : > { %7701 = vmatprep.subr.bf16.mxu0 %v12199_v6  ;;  %7742 = vmatprep.subr.bf16.mxu1 %v12201_v8 }
 0x693   : > { %7702 = vmatpush1.bf16.msra.mxu0 %v12198_v32  ;;  %7743 = vmatpush1.bf16.msra.mxu1 %v12200_v20 }
 0x694   : > { %7703 = vmatprep.subr.bf16.mxu0 %v12207_v54  ;;  %7744 = vmatprep.subr.bf16.mxu1 %v12209_v26  ;;  %v15881_v26 = vld [vmem:[#allocation22_spill] sm:$0xff] }
 0x695   : > { %v6798_v27 = vrot.slane %v6777_v37, %v15881_v26 }
 0x697   : > { %7704 = vmatpush1.bf16.msra.mxu0 %v12206_v45  ;;  %7745 = vmatpush1.bf16.msra.mxu1 %v12208_v43  ;;  %v6806_v45 = vrot.slane %v6777_v37, %v15882_v39  ;;  %v15883_v43 = vld [vmem:[#allocation24_spill] sm:$0xff]  ;;  %v6823_v36 = vadd.f32 %v6798_v27, %v6773_v59  ;;  %v7843_v59 = vld [vmem:[#allocation9 + $0x48] sm:$0xff] (%p6755_p7) }
 0x698   : > { %7705 = vmatprep.subr.bf16.mxu0 %v12215_v0  ;;  %7746 = vmatprep.subr.bf16.mxu1 %v12217_v60  ;;  %v6802_v0 = vrot.slane %v6777_v37, %v15883_v43  ;;  %v7847_v39 = vld [vmem:[#allocation9 + $0x68] sm:$0xff] (%p6755_p7) }
 0x699   : > { %v6825_v10 = vadd.f32 %v6806_v45, %v6775_v28  ;;  %v7850_v45 = vld [vmem:[#allocation9 + $0x80] sm:$0xff] (%p6755_p7)  ;;  %v7851_v43 = vld [vmem:[#allocation9 + $0x88] sm:$0xff] (%p6755_p7) }
 0x69a   : > { %v6824_v22 = vadd.f32 %v6802_v0, %v6774_v35  ;;  %v7855_v0 = vld [vmem:[#allocation9 + $0xa8] sm:$0xff] (%p6755_p7) }
 0x69b   : > { %7706 = vmatpush1.bf16.msra.mxu0 %v12214_v13  ;;  %7747 = vmatpush1.bf16.msra.mxu1 %v12216_v23  ;;  %v6810_v13 = vrot.slane %v6777_v37, %v15884_v5  ;;  %v14903_v35 = vcombine.high (%p6755_p7), %v7851_v43, %v7855_v0  ;;  %v7858_v5 = vld [vmem:[#allocation9 + $0xc0] sm:$0xff] (%p6755_p7) }
 0x69c   : > { %7707 = vmatprep.subr.bf16.mxu0 %v12223_v24  ;;  %7748 = vmatprep.subr.bf16.mxu1 %v12225_v15  ;;  %v6776_v24 = vld [vmem:[%s14848_s28 + $0x38] sm:$0xff] }
 0x69f   : > { %7708 = vmatpush1.bf16.msra.mxu0 %v12222_v56  ;;  %7749 = vmatpush1.bf16.msra.mxu1 %v12224_v41  ;;  %v6826_v56 = vadd.f32 %v6810_v13, %v6776_v24  ;;  %v7862_v13 = vld [vmem:[#allocation9 + $0xe0] sm:$0xff] (%p6755_p7)  ;;  %v7863_v24 = vld [vmem:[#allocation9 + $0xe8] sm:$0xff] (%p6755_p7) }
 0x6a0   : > { %7709 = vmatprep.subr.bf16.mxu0 %v12231_v3  ;;  %7750 = vmatprep.subr.bf16.mxu1 %v12233_v51 }
 0x6a3   : > { %7710 = vmatpush1.bf16.msra.mxu0 %v12230_v40  ;;  %7751 = vmatpush1.bf16.msra.mxu1 %v12232_v44 }
 0x6a6   : > { %7712 = vmatmul.mubr.bf16.vlgmr.msra.gmra.mrb[4].mxu0 %v14832_v58  ;;  %7753 = vmatmul.mubr.bf16.vlgmr.msra.gmra.mrb[4].mxu1 %v14832_v58  ;;  %v6769_v58 = vld [vmem:[%s14848_s28] sm:$0xff] }
 0x6a7   : > { %v6819_v25 = vadd.f32 %v6782_v53, %v6769_v58 }
 0x739   : > { %v7631_v46 = vpop.f32.mrb[0].mxu0  ;;  %v7672_v34 = vpop.f32.mrb[0].mxu1 }
 0x73a   : > { %v7633_v14 = vpop.f32.mrb[1].mxu0  ;;  %v7674_v33 = vpop.f32.mrb[1].mxu1  ;;  %v7761_v2 = vadd.f32 %v7631_v46, %v6819_v25  ;;  %v7763_v6 = vadd.f32 %v7672_v34, %v6821_v63 }
 0x73b   : > { %v7635_v47 = vpop.f32.mrb[2].mxu0  ;;  %v7676_v12 = vpop.f32.mrb[2].mxu1  ;;  %v7762_v8 = vadd.f32 %v7633_v14, %v6820_v49  ;;  %v7764_v9 = vadd.f32 %v7674_v33, %v6822_v1 }
 0x73c   : > { %v7636_v4 = vpop.f32.mrb[3].mxu0  ;;  %v7677_v52 = vpop.f32.mrb[3].mxu1  ;;  %v12234_v11 = vmul.f32 -1.442695, %v7761_v2  ;;  %v12236_v18 = vmul.f32 -1.442695, %v7763_v6 }
 0x73d   : > { %v12235_v38 = vmul.f32 -1.442695, %v7762_v8  ;;  %v12237_v32 = vmul.f32 -1.442695, %v7764_v9  ;;  %v7834_v8 = vld [vmem:[#allocation9] sm:$0xff] (%p6755_p7) }
 0x73e   : > { %12992 = vpow2.f32 %v12234_v11  ;;  %v7838_v9 = vld [vmem:[#allocation9 + $0x20] sm:$0xff] (%p6755_p7)  ;;  %v7835_v11 = vld [vmem:[#allocation9 + $0x8] sm:$0xff] (%p6755_p7) }
 0x73f   : > { %12994 = vpow2.f32 %v12236_v18  ;;  %v14879_v18 = vcombine.high (%p6755_p7), %v7834_v8, %v7838_v9 }
 0x740   : > { %12996 = vpow2.f32 %v12235_v38  ;;  %v7839_v38 = vld [vmem:[#allocation9 + $0x28] sm:$0xff] (%p6755_p7) }
 0x741   : > { %12998 = vpow2.f32 %v12237_v32  ;;  %v14881_v32 = vcombine.low (%p6755_p7), %v7834_v8, %v7838_v9  ;;  %v14883_v26 = vcombine.high (%p6755_p7), %v7835_v11, %v7839_v38  ;;  %v14885_v27 = vcombine.low (%p6755_p7), %v7835_v11, %v7839_v38  ;;  %8602 = vmatprep.subr.bf16.mxu0 (%p6755_p7), %v14879_v18  ;;  %v7898_v9 = vld [vmem:[#allocation9 + $0x200] sm:$0xff] (%p6755_p7)  ;;  %v7899_v38 = vld [vmem:[#allocation9 + $0x208] sm:$0xff] (%p6755_p7) }
 0x742   :  { %v7902_v11 = vld [vmem:[#allocation9 + $0x220] sm:$0xff] (%p6755_p7) }
 0x743   :  { %8655 = vmatprep.subr.bf16.mxu1 (%p6755_p7), %v14883_v26  ;;  %8603 = vmatpush1.bf16.msra.mxu0 (%p6755_p7), %v14881_v32 }
 0x744   :  { %8656 = vmatpush1.bf16.msra.mxu1 (%p6755_p7), %v14885_v27 }
 0x748   : > { %v12993_v20 = vpop.eup %12992 }
 0x749   : > { %v12995_v54 = vpop.eup %12994  ;;  %v7775_v19 = vadd.f32 1.0, %v12993_v20  ;;  %v7842_v20 = vld [vmem:[#allocation9 + $0x40] sm:$0xff] (%p6755_p7) }
 0x74a   : > { %v12997_v29 = vpop.eup %12996  ;;  %v7787_v23 = vadd.f32 1.0, %v12995_v54  ;;  %v7846_v54 = vld [vmem:[#allocation9 + $0x60] sm:$0xff] (%p6755_p7) }
 0x74b   : > { %v12999_v60 = vpop.eup %12998  ;;  %v7776_v15 = vadd.f32 1.0, %v12997_v29  ;;  %13000 = vrcp.f32 %v7775_v19  ;;  %v14887_v29 = vcombine.high (%p6755_p7), %v7842_v20, %v7846_v54  ;;  %v14898_v19 = vcombine.low (%p6755_p7), %v7843_v59, %v7847_v39 }
 0x74c   : > { %v7788_v42 = vadd.f32 1.0, %v12999_v60  ;;  %13002 = vrcp.f32 %v7787_v23  ;;  %v14894_v60 = vcombine.low (%p6755_p7), %v7842_v20, %v7846_v54  ;;  %v7859_v23 = vld [vmem:[#allocation9 + $0xc8] sm:$0xff] (%p6755_p7) }
 0x74d   : > { %13004 = vrcp.f32 %v7776_v15  ;;  %8604 = vmatprep.subr.bf16.mxu0 (%p6755_p7), %v14887_v29  ;;  %v7903_v20 = vld [vmem:[#allocation9 + $0x228] sm:$0xff] (%p6755_p7) }
 0x74e   : > { %13006 = vrcp.f32 %v7788_v42  ;;  %8605 = vmatpush1.bf16.msra.mxu0 (%p6755_p7), %v14894_v60  ;;  %v14912_v42 = vcombine.high (%p6755_p7), %v7858_v5, %v7862_v13 }
 0x755   : > { %v13001_v30 = vpop.eup %13000 }
 0x756   : > { %v13003_v53 = vpop.eup %13002 }
 0x757   : > { %v13005_v58 = vpop.eup %13004  ;;  %v7807_v21 = vmul.f32 %v13334_v48, %v13003_v53  ;;  %v7886_v53 = vld [vmem:[#allocation9 + $0x1a0] sm:$0xff] (%p6755_p7) }
 0x758   : > { %v13007_v61 = vpop.eup %13006 }
 0x759   : > { %v7808_v16 = vmul.f32 %v13330_v7, %v13007_v61  ;;  %v7887_v61 = vld [vmem:[#allocation9 + $0x1a8] sm:$0xff] (%p6755_p7) }
 0x779   : > { %v7713_v41 = vpop.f32.mrb[4].mxu0  ;;  %v7754_v51 = vpop.f32.mrb[4].mxu1 }
 0x77a   : > { %v7765_v3 = vadd.f32 %v7713_v41, %v6823_v36  ;;  %v7715_v40 = vpop.f32.mrb[5].mxu0  ;;  %v7767_v44 = vadd.f32 %v7754_v51, %v6825_v10  ;;  %v7756_v34 = vpop.f32.mrb[5].mxu1  ;;  %v14910_v36 = vcombine.low (%p6755_p7), %v7851_v43, %v7855_v0  ;;  %v14915_v10 = vcombine.high (%p6755_p7), %v7859_v23, %v7863_v24  ;;  %v7867_v41 = vld [vmem:[#allocation9 + $0x108] sm:$0xff] (%p6755_p7)  ;;  %v7910_v43 = vld [vmem:[#allocation9 + $0x260] sm:$0xff] (%p6755_p7) }
 0x77b   : > { %v7766_v46 = vadd.f32 %v7715_v40, %v6824_v22  ;;  %v7717_v14 = vpop.f32.mrb[6].mxu0  ;;  %v7768_v33 = vadd.f32 %v7756_v34, %v6826_v56  ;;  %v7758_v47 = vpop.f32.mrb[6].mxu1  ;;  %v7866_v22 = vld [vmem:[#allocation9 + $0x100] sm:$0xff] (%p6755_p7)  ;;  %v14918_v51 = vcombine.low (%p6755_p7), %v7858_v5, %v7862_v13  ;;  %v14922_v40 = vcombine.low (%p6755_p7), %v7859_v23, %v7863_v24  ;;  %v7907_v0 = vld [vmem:[#allocation9 + $0x248] sm:$0xff] (%p6755_p7) }
 0x77c   : > { %13008 = vtanh.f32 %v7765_v3  ;;  %v7718_v12 = vpop.f32.mrb[7].mxu0  ;;  %v12238_v4 = vmul.f32 -1.442695, %v7767_v44  ;;  %v7759_v52 = vpop.f32.mrb[7].mxu1  ;;  %v7870_v56 = vld [vmem:[#allocation9 + $0x120] sm:$0xff] (%p6755_p7)  ;;  %v7871_v3 = vld [vmem:[#allocation9 + $0x128] sm:$0xff] (%p6755_p7)  ;;  %v14982_v13 = vcombine.low (%p6755_p7), %v7898_v9, %v7902_v11  ;;  %v14986_v23 = vcombine.low (%p6755_p7), %v7899_v38, %v7903_v20 }
 0x77d   : > { %13010 = vtanh.f32 %v7766_v46  ;;  %v12239_v37 = vmul.f32 -1.442695, %v7768_v33  ;;  %v14924_v44 = vcombine.high (%p6755_p7), %v7866_v22, %v7870_v56  ;;  %v14927_v46 = vcombine.high (%p6755_p7), %v7867_v41, %v7871_v3  ;;  %v7874_v34 = vld [vmem:[#allocation9 + $0x140] sm:$0xff] (%p6755_p7)  ;;  %v7875_v33 = vld [vmem:[#allocation9 + $0x148] sm:$0xff] (%p6755_p7) }
 0x77e   : > { %13012 = vpow2.f32 %v12238_v4  ;;  %v7878_v14 = vld [vmem:[#allocation9 + $0x160] sm:$0xff] (%p6755_p7)  ;;  %v7879_v47 = vld [vmem:[#allocation9 + $0x168] sm:$0xff] (%p6755_p7)  ;;  %v14930_v12 = vcombine.low (%p6755_p7), %v7866_v22, %v7870_v56  ;;  %v14934_v4 = vcombine.low (%p6755_p7), %v7867_v41, %v7871_v3 }
 0x77f   : > { %13014 = vpow2.f32 %v12239_v37  ;;  %v14936_v52 = vcombine.high (%p6755_p7), %v7874_v34, %v7878_v14  ;;  %v14939_v37 = vcombine.high (%p6755_p7), %v7875_v33, %v7879_v47  ;;  %v7911_v5 = vld [vmem:[#allocation9 + $0x268] sm:$0xff] (%p6755_p7)  ;;  %v7914_v56 = vld [vmem:[#allocation9 + $0x280] sm:$0xff] (%p6755_p7) }
 0x780   :  { %v14991_v22 = vcombine.high (%p6755_p7), %v7907_v0, %v7911_v5  ;;  %v7918_v41 = vld [vmem:[#allocation9 + $0x2a0] sm:$0xff] (%p6755_p7)  ;;  %v7915_v3 = vld [vmem:[#allocation9 + $0x288] sm:$0xff] (%p6755_p7) }
 0x786   : > { %v13009_v31 = vpop.eup %13008 }
 0x787   : > { %v13011_v17 = vpop.eup %13010  ;;  %v7809_v50 = vmul.f32 %v13009_v31, %v13001_v30  ;;  %v7882_v30 = vld [vmem:[#allocation9 + $0x180] sm:$0xff] (%p6755_p7) }
 0x788   : > { %v7810_v55 = vmul.f32 %v13011_v17, %v13005_v58  ;;  %v13013_v57 = vpop.eup %13012  ;;  %v7883_v58 = vld [vmem:[#allocation9 + $0x188] sm:$0xff] (%p6755_p7) }
 0x789   : > { %v7811_v48 = vadd.f32 %v7809_v50, %v7807_v21   ;;  %v13015_v25 = vpop.eup %13014  ;;  %v7801_v62 = vadd.f32 1.0, %v13013_v57  ;;  %v14948_v21 = vcombine.high (%p6755_p7), %v7882_v30, %v7886_v53  ;;  %v7890_v57 = vld [vmem:[#allocation9 + $0x1c0] sm:$0xff] (%p6755_p7) }
 0x78a   : > { %v7812_v7 = vadd.f32 %v7810_v55, %v7808_v16   ;;  %v7802_v63 = vadd.f32 1.0, %v13015_v25  ;;  %v14951_v55 = vcombine.high (%p6755_p7), %v7883_v58, %v7887_v61  ;;  %v7894_v25 = vld [vmem:[#allocation9 + $0x1e0] sm:$0xff] (%p6755_p7) }
 0x78b   : > { %13016 = vtanh.f32 %v7811_v48  ;;  %v14890_v48 = vcombine.high (%p6755_p7), %v7843_v59, %v7847_v39  ;;  %v14970_v54 = vcombine.low (%p6755_p7), %v7890_v57, %v7894_v25  ;;  %v14976_v39 = vcombine.high (%p6755_p7), %v7898_v9, %v7902_v11  ;;  %v7934_v9 = vld [vmem:[#allocation9 + $0x320] sm:$0xff] (%p6755_p7)  ;;  %v7931_v11 = vld [vmem:[#allocation9 + $0x308] sm:$0xff] (%p6755_p7) }
 0x78c   : > { %13018 = vrcp.f32 %v7801_v62 }
 0x78d   : > { %13020 = vtanh.f32 %v7812_v7  ;;  %v7854_v7 = vld [vmem:[#allocation9 + $0xa0] sm:$0xff] (%p6755_p7)  ;;  %8657 = vmatprep.subr.bf16.mxu1 (%p6755_p7), %v14890_v48 }
 0x78e   : > { %13022 = vrcp.f32 %v7802_v63  ;;  %v14900_v28 = vcombine.high (%p6755_p7), %v7850_v45, %v7854_v7  ;;  %v14906_v15 = vcombine.low (%p6755_p7), %v7850_v45, %v7854_v7  ;;  %8658 = vmatpush1.bf16.msra.mxu1 (%p6755_p7), %v14898_v19  ;;  %v7891_v63 = vld [vmem:[#allocation9 + $0x1c8] sm:$0xff] (%p6755_p7)  ;;  %v14979_v45 = vcombine.high (%p6755_p7), %v7899_v38, %v7903_v20  ;;  %v7906_v7 = vld [vmem:[#allocation9 + $0x240] sm:$0xff] (%p6755_p7) }
 0x78f   :  { %8659 = vmatprep.subr.bf16.mxu1 (%p6755_p7), %v14903_v35  ;;  %v14988_v24 = vcombine.high (%p6755_p7), %v7906_v7, %v7910_v43  ;;  %v7935_v38 = vld [vmem:[#allocation9 + $0x328] sm:$0xff] (%p6755_p7) }
 0x790   :  { %8606 = vmatprep.subr.bf16.mxu0 (%p6755_p7), %v14900_v28 }
 0x791   :  { %8607 = vmatpush1.bf16.msra.mxu0 (%p6755_p7), %v14906_v15 }
 0x792   :  { %8660 = vmatpush1.bf16.msra.mxu1 (%p6755_p7), %v14910_v36  ;;  %8608 = vmatprep.subr.bf16.mxu0 (%p6755_p7), %v14912_v42 }
 0x793   :  { %8661 = vmatprep.subr.bf16.mxu1 (%p6755_p7), %v14915_v10 }
 0x795   : > { %v13017_v49 = vpop.eup %13016  ;;  %6757 = sbr.rel (!%p6755_p7) target bundleno = 1570 (0x622), region = 129  ;;  %8609 = vmatpush1.bf16.msra.mxu0 (%p6755_p7), %v14918_v51 }
 0x796   : > { %v13019_v1 = vpop.eup %13018  ;;  %8662 = vmatpush1.bf16.msra.mxu1 (%p6755_p7), %v14922_v40  ;;  %8610 = vmatprep.subr.bf16.mxu0 (%p6755_p7), %v14924_v44 }
 0x797   : > { %v13021_v2 = vpop.eup %13020  ;;  %v7815_v31 = vmul.f32 %v13019_v1, %v13017_v49   ;;  %8663 = vmatprep.subr.bf16.mxu1 (%p6755_p7), %v14927_v46  ;;  %v7895_v49 = vld [vmem:[#allocation9 + $0x1e8] sm:$0xff] (%p6755_p7)  ;;  %v14956_v1 = vcombine.low (%p6755_p7), %v7882_v30, %v7886_v53  ;;  %v7922_v53 = vld [vmem:[#allocation9 + $0x2c0] sm:$0xff] (%p6755_p7) }
 0x798   : > { %v13023_v6 = vpop.eup %13022  ;;  %v14966_v8 = vcombine.high (%p6755_p7), %v7891_v63, %v7895_v49  ;;  %v14974_v59 = vcombine.low (%p6755_p7), %v7891_v63, %v7895_v49  ;;  %v7930_v49 = vld [vmem:[#allocation9 + $0x300] sm:$0xff] (%p6755_p7) }
 0x799   : > { %7820 = vst [vmem:[%s7819_s5] sm:$0xff] %v7815_v31  ;;  %v7816_v17 = vmul.f32 %v13023_v6, %v13021_v2   ;;  %8611 = vmatpush1.bf16.msra.mxu0 (%p6755_p7), %v14930_v12  ;;  %v14942_v31 = vcombine.low (%p6755_p7), %v7874_v34, %v7878_v14  ;;  %v14961_v2 = vcombine.low (%p6755_p7), %v7883_v58, %v7887_v61  ;;  %v7919_v34 = vld [vmem:[#allocation9 + $0x2a8] sm:$0xff] (%p6755_p7)  ;;  %v7926_v58 = vld [vmem:[#allocation9 + $0x2e0] sm:$0xff] (%p6755_p7) }
 0x79a   :  { %8664 = vmatpush1.bf16.msra.mxu1 (%p6755_p7), %v14934_v4  ;;  %8612 = vmatprep.subr.bf16.mxu0 (%p6755_p7), %v14936_v52  ;;  %v14963_v6 = vcombine.high (%p6755_p7), %v7890_v57, %v7894_v25  ;;  %v14994_v14 = vcombine.low (%p6755_p7), %v7906_v7, %v7910_v43  ;;  %v15003_v30 = vcombine.high (%p6755_p7), %v7915_v3, %v7919_v34  ;;  %v7923_v61 = vld [vmem:[#allocation9 + $0x2c8] sm:$0xff] (%p6755_p7) }
 0x79b   : > { %7821 = vst [vmem:[%s7819_s5 + $0x8] sm:$0xff] %v7816_v17  ;;  %v14946_v17 = vcombine.low (%p6755_p7), %v7875_v33, %v7879_v47  ;;  %8665 = vmatprep.subr.bf16.mxu1 (%p6755_p7), %v14939_v37  ;;  %v14998_v33 = vcombine.low (%p6755_p7), %v7907_v0, %v7911_v5  ;;  %v15000_v47 = vcombine.high (%p6755_p7), %v7914_v56, %v7918_v41  ;;  %v7938_v5 = vld [vmem:[#allocation9 + $0x340] sm:$0xff] (%p6755_p7) }
 0x79c   :  { %15886 = vst [vmem:[#allocation27_spill] sm:$0xff] %v15003_v30  ;;  %v15010_v57 = vcombine.low %v7915_v3, %v7919_v34  ;;  %v15012_v25 = vcombine.high %v7922_v53, %v7926_v58  ;;  %v15018_v20 = vcombine.low %v7922_v53, %v7926_v58  ;;  %v15024_v43 = vcombine.high %v7930_v49, %v7934_v9  ;;  %v7943_v3 = vld [vmem:[#allocation9 + $0x368] sm:$0xff] }
 0x79d   :  { %8613 = vmatpush1.bf16.msra.mxu0 %v14942_v31  ;;  %15885 = vst [vmem:[#allocation26_spill] sm:$0xff] %v15000_v47  ;;  %v15027_v0 = vcombine.high %v7931_v11, %v7935_v38  ;;  %v15030_v34 = vcombine.low %v7930_v49, %v7934_v9  ;;  %v15034_v53 = vcombine.low %v7931_v11, %v7935_v38 }
 0x79e   :  { %8666 = vmatpush1.bf16.msra.mxu1 %v14946_v17  ;;  %8614 = vmatprep.subr.bf16.mxu0 %v14948_v21  ;;  %15888 = vst [vmem:[#allocation29_spill] sm:$0xff] %v15010_v57  ;;  %15889 = vst [vmem:[#allocation30_spill] sm:$0xff] %v15012_v25 }
 0x79f   :  { %8667 = vmatprep.subr.bf16.mxu1 %v14951_v55  ;;  %15891 = vst [vmem:[#allocation32_spill] sm:$0xff] %v15018_v20  ;;  %15893 = vst [vmem:[#allocation34_spill] sm:$0xff] %v15024_v43 }
 0x7a0   :  { %15894 = vst [vmem:[#allocation35_spill] sm:$0xff] %v15027_v0  ;;  %15895 = vst [vmem:[#allocation36_spill] sm:$0xff] %v15030_v34 }
 0x7a1   :  { %8615 = vmatpush1.bf16.msra.mxu0 %v14956_v1  ;;  %15896 = vst [vmem:[#allocation37_spill] sm:$0xff] %v15034_v53 }
 0x7a2   :  { %v7823_v50 = vld [vmem:[#allocation2 + $0x8] sm:$0xff]  ;;  %v7825_v16 = vld [vmem:[#allocation2 + $0x18] sm:$0xff]  ;;  %8668 = vmatpush1.bf16.msra.mxu1 %v14961_v2  ;;  %8616 = vmatprep.subr.bf16.mxu0 %v14963_v6 }
 0x7a3   :  { %v14953_v62 = vpack.c.bf16 %v7825_v16, %v7823_v50  ;;  %8669 = vmatprep.subr.bf16.mxu1 %v14966_v8  ;;  %v7927_v50 = vld [vmem:[#allocation9 + $0x2e8] sm:$0xff]  ;;  %v15006_v16 = vcombine.low %v7914_v56, %v7918_v41  ;;  %v7942_v56 = vld [vmem:[#allocation9 + $0x360] sm:$0xff] }
 0x7a4   :  { %v15015_v63 = vcombine.high %v7923_v61, %v7927_v50  ;;  %v15022_v7 = vcombine.low %v7923_v61, %v7927_v50  ;;  %v7939_v41 = vld [vmem:[#allocation9 + $0x348] sm:$0xff]  ;;  %v15036_v58 = vcombine.high %v7938_v5, %v7942_v56  ;;  %v7946_v50 = vld [vmem:[#allocation9 + $0x380] sm:$0xff]  ;;  %v15042_v49 = vcombine.low %v7938_v5, %v7942_v56 }
 0x7a5   :  { %8634 = vmatprep.mubr.bf16.mxu0 %v14953_v62  ;;  %8687 = vmatprep.mubr.bf16.mxu1 %v14953_v62  ;;  %15887 = vst [vmem:[#allocation28_spill] sm:$0xff] %v15006_v16  ;;  %v15039_v61 = vcombine.high %v7939_v41, %v7943_v3  ;;  %v15046_v9 = vcombine.low %v7939_v41, %v7943_v3 }
 0x7a6   :  { %8617 = vmatpush1.bf16.msra.mxu0 %v14970_v54  ;;  %8670 = vmatpush1.bf16.msra.mxu1 %v14974_v59  ;;  %15890 = vst [vmem:[#allocation31_spill] sm:$0xff] %v15015_v63  ;;  %15892 = vst [vmem:[#allocation33_spill] sm:$0xff] %v15022_v7 }
 0x7a7   :  { %8618 = vmatprep.subr.bf16.mxu0 %v14976_v39  ;;  %8671 = vmatprep.subr.bf16.mxu1 %v14979_v45  ;;  %15897 = vst [vmem:[#allocation38_spill] sm:$0xff] %v15036_v58  ;;  %15898 = vst [vmem:[#allocation39_spill] sm:$0xff] %v15039_v61 }
 0x7a8   :  { %15899 = vst [vmem:[#allocation40_spill] sm:$0xff] %v15042_v49  ;;  %15900 = vst [vmem:[#allocation41_spill] sm:$0xff] %v15046_v9 }
 0x7aa   :  { %8619 = vmatpush1.bf16.msra.mxu0 %v14982_v13  ;;  %8672 = vmatpush1.bf16.msra.mxu1 %v14986_v23 }
 0x7ab   :  { %8620 = vmatprep.subr.bf16.mxu0 %v14988_v24  ;;  %8673 = vmatprep.subr.bf16.mxu1 %v14991_v22 }
 0x7ae   :  { %8621 = vmatpush1.bf16.msra.mxu0 %v14994_v14  ;;  %8674 = vmatpush1.bf16.msra.mxu1 %v14998_v33 }
 0x7af   :  { %8622 = vmatprep.subr.bf16.mxu0 %v15000_v47  ;;  %8675 = vmatprep.subr.bf16.mxu1 %v15003_v30  ;;  %v7829_v30 = vld [vmem:[#allocation2 + $0x38] sm:$0xff]  ;;  %v7872_v47 = vld [vmem:[#allocation9 + $0x130] sm:$0xff] }
 0x7b2   :  { %8623 = vmatpush1.bf16.msra.mxu0 %v15006_v16  ;;  %8676 = vmatpush1.bf16.msra.mxu1 %v15010_v57  ;;  %v7951_v57 = vld [vmem:[#allocation9 + $0x3a8] sm:$0xff]  ;;  %v7845_v16 = vld [vmem:[#allocation9 + $0x58] sm:$0xff] }
 0x7b3   :  { %8624 = vmatprep.subr.bf16.mxu0 %v15012_v25  ;;  %8677 = vmatprep.subr.bf16.mxu1 %v15015_v63  ;;  %v7950_v63 = vld [vmem:[#allocation9 + $0x3a0] sm:$0xff]  ;;  %v7947_v25 = vld [vmem:[#allocation9 + $0x388] sm:$0xff] }
 0x7b4   :  { %v15048_v11 = vcombine.high %v7946_v50, %v7950_v63  ;;  %v15051_v38 = vcombine.high %v7947_v25, %v7951_v57  ;;  %v15054_v5 = vcombine.low %v7946_v50, %v7950_v63  ;;  %v15058_v56 = vcombine.low %v7947_v25, %v7951_v57  ;;  %v7822_v50 = vld [vmem:[#allocation2] sm:$0xff] }
 0x7b6   :  { %8625 = vmatpush1.bf16.msra.mxu0 %v15018_v20  ;;  %8678 = vmatpush1.bf16.msra.mxu1 %v15022_v7  ;;  %15901 = vst [vmem:[#allocation42_spill] sm:$0xff] %v15048_v11  ;;  %15902 = vst [vmem:[#allocation43_spill] sm:$0xff] %v15051_v38  ;;  %v7955_v7 = vld [vmem:[#allocation9 + $0x3c8] sm:$0xff] }
 0x7b7   :  { %8626 = vmatprep.subr.bf16.mxu0 %v15024_v43  ;;  %8679 = vmatprep.subr.bf16.mxu1 %v15027_v0  ;;  %v7954_v0 = vld [vmem:[#allocation9 + $0x3c0] sm:$0xff]  ;;  %v7959_v20 = vld [vmem:[#allocation9 + $0x3e8] sm:$0xff]  ;;  %15903 = vst [vmem:[#allocation44_spill] sm:$0xff] %v15054_v5  ;;  %15904 = vst [vmem:[#allocation45_spill] sm:$0xff] %v15058_v56 }
 0x7b8   :  { %v7958_v43 = vld [vmem:[#allocation9 + $0x3e0] sm:$0xff]  ;;  %v15063_v3 = vcombine.high %v7955_v7, %v7959_v20  ;;  %v15070_v57 = vcombine.low %v7955_v7, %v7959_v20 }
 0x7b9   :  { %v15060_v41 = vcombine.high %v7954_v0, %v7958_v43  ;;  %v15066_v63 = vcombine.low %v7954_v0, %v7958_v43  ;;  %v7849_v43 = vld [vmem:[#allocation9 + $0x78] sm:$0xff]  ;;  %v7827_v0 = vld [vmem:[#allocation2 + $0x28] sm:$0xff] }
 0x7ba   :  { %8627 = vmatpush1.bf16.msra.mxu0 %v15030_v34  ;;  %8680 = vmatpush1.bf16.msra.mxu1 %v15034_v53  ;;  %15906 = vst [vmem:[#allocation47_spill] sm:$0xff] %v15063_v3  ;;  %v7837_v53 = vld [vmem:[#allocation9 + $0x18] sm:$0xff]  ;;  %15908 = vst [vmem:[#allocation49_spill] sm:$0xff] %v15070_v57 }
 0x7bb   :  { %8628 = vmatprep.subr.bf16.mxu0 %v15036_v58  ;;  %8681 = vmatprep.subr.bf16.mxu1 %v15039_v61  ;;  %15905 = vst [vmem:[#allocation46_spill] sm:$0xff] %v15060_v41  ;;  %v7836_v61 = vld [vmem:[#allocation9 + $0x10] sm:$0xff]  ;;  %v7841_v34 = vld [vmem:[#allocation9 + $0x38] sm:$0xff]  ;;  %15907 = vst [vmem:[#allocation48_spill] sm:$0xff] %v15066_v63 }
 0x7bc   :  { %v7840_v58 = vld [vmem:[#allocation9 + $0x30] sm:$0xff]  ;;  %v15084_v20 = vcombine.low %v7837_v53, %v7841_v34 }
 0x7bd   :  { %v15072_v25 = vcombine.high %v7836_v61, %v7840_v58 }
 0x7be   :  { %8629 = vmatpush1.bf16.msra.mxu0 %v15042_v49  ;;  %8682 = vmatpush1.bf16.msra.mxu1 %v15046_v9  ;;  %v7824_v9 = vld [vmem:[#allocation2 + $0x10] sm:$0xff]  ;;  %15912 = vst [vmem:[#allocation53_spill] sm:$0xff] %v15084_v20 }
 0x7bf   :  { %8630 = vmatprep.subr.bf16.mxu0 %v15048_v11  ;;  %8683 = vmatprep.subr.bf16.mxu1 %v15051_v38  ;;  %15909 = vst [vmem:[#allocation50_spill] sm:$0xff] %v15072_v25  ;;  %v15075_v38 = vcombine.high %v7837_v53, %v7841_v34  ;;  %v7844_v11 = vld [vmem:[#allocation9 + $0x50] sm:$0xff]  ;;  %v7826_v53 = vld [vmem:[#allocation2 + $0x20] sm:$0xff] }
 0x7c0   :  { %v7848_v49 = vld [vmem:[#allocation9 + $0x70] sm:$0xff] }
 0x7c1   :  { %15910 = vst [vmem:[#allocation51_spill] sm:$0xff] %v15075_v38  ;;  %v15086_v7 = vcombine.high %v7844_v11, %v7848_v49  ;;  %v15096_v34 = vcombine.low %v7844_v11, %v7848_v49  ;;  %v7861_v49 = vld [vmem:[#allocation9 + $0xd8] sm:$0xff] }
 0x7c2   :  { %8631 = vmatpush1.bf16.msra.mxu0 %v15054_v5  ;;  %8684 = vmatpush1.bf16.msra.mxu1 %v15058_v56  ;;  %v15077_v5 = vpack.c.bf16 %v7824_v9, %v7822_v50  ;;  %v15080_v56 = vcombine.low %v7836_v61, %v7840_v58  ;;  %v7852_v9 = vld [vmem:[#allocation9 + $0x90] sm:$0xff]  ;;  %v7853_v58 = vld [vmem:[#allocation9 + $0x98] sm:$0xff] }
 0x7c3   :  { %8632 = vmatprep.subr.bf16.mxu0 %v15060_v41  ;;  %8685 = vmatprep.subr.bf16.mxu1 %v15063_v3  ;;  %15913 = vst [vmem:[#allocation54_spill] sm:$0xff] %v15086_v7  ;;  %v15089_v3 = vcombine.high %v7845_v16, %v7849_v43  ;;  %v7856_v50 = vld [vmem:[#allocation9 + $0xb0] sm:$0xff]  ;;  %v15091_v41 = vpack.c.bf16 %v7829_v30, %v7827_v0  ;;  %v7857_v61 = vld [vmem:[#allocation9 + $0xb8] sm:$0xff] }
 0x7c4   :  { %15911 = vst [vmem:[#allocation52_spill] sm:$0xff] %v15080_v56  ;;  %v15102_v30 = vcombine.high %v7852_v9, %v7856_v50  ;;  %v15105_v0 = vcombine.high %v7853_v58, %v7857_v61  ;;  %v7865_v11 = vld [vmem:[#allocation9 + $0xf8] sm:$0xff] }
 0x7c5   :  { %15914 = vst [vmem:[#allocation55_spill] sm:$0xff] %v15089_v3 }
 0x7c6   :  { %8633 = vmatpush1.bf16.msra.mxu0 %v15066_v63  ;;  %8686 = vmatpush1.bf16.msra.mxu1 %v15070_v57  ;;  %15916 = vst [vmem:[#allocation57_spill] sm:$0xff] %v15102_v30  ;;  %15917 = vst [vmem:[#allocation58_spill] sm:$0xff] %v15105_v0  ;;  %v7860_v57 = vld [vmem:[#allocation9 + $0xd0] sm:$0xff] }
 0x7c7   :  { %8708 = vmatprep.subr.bf16.mxu0 %v15072_v25  ;;  %8761 = vmatprep.subr.bf16.mxu1 %v15075_v38  ;;  %v7828_v25 = vld [vmem:[#allocation2 + $0x30] sm:$0xff]  ;;  %v15100_v38 = vcombine.low %v7845_v16, %v7849_v43  ;;  %v15112_v16 = vcombine.low %v7852_v9, %v7856_v50  ;;  %v15116_v43 = vcombine.low %v7853_v58, %v7857_v61 }
 0x7c8   :  { %v7864_v63 = vld [vmem:[#allocation9 + $0xf0] sm:$0xff]  ;;  %v15130_v50 = vcombine.low %v7861_v49, %v7865_v11 }
 0x7c9   :  { %8635 = vmatmul.mubr.bf16.vlgmr.msra.gmra.mrb[0].mxu0 %v15077_v5  ;;  %8688 = vmatmul.mubr.bf16.vlgmr.msra.gmra.mrb[0].mxu1 %v15077_v5  ;;  %15915 = vst [vmem:[#allocation56_spill] sm:$0xff] %v15100_v38  ;;  %15918 = vst [vmem:[#allocation59_spill] sm:$0xff] %v15112_v16  ;;  %v15125_v9 = vcombine.low %v7860_v57, %v7864_v63 }
 0x7ca   :  { %8709 = vmatpush1.bf16.msra.mxu0 %v15080_v56  ;;  %8762 = vmatpush1.bf16.msra.mxu1 %v15084_v20  ;;  %v15109_v56 = vpack.c.bf16 %v7828_v25, %v7826_v53  ;;  %15919 = vst [vmem:[#allocation60_spill] sm:$0xff] %v15116_v43  ;;  %v7868_v20 = vld [vmem:[#allocation9 + $0x110] sm:$0xff]  ;;  %v7869_v25 = vld [vmem:[#allocation9 + $0x118] sm:$0xff]  ;;  %15923 = vst [vmem:[#allocation64_spill] sm:$0xff] %v15130_v50 }
 0x7cb   :  { %8710 = vmatprep.subr.bf16.mxu0 %v15086_v7  ;;  %8763 = vmatprep.subr.bf16.mxu1 %v15089_v3  ;;  %v15118_v3 = vcombine.high %v7860_v57, %v7864_v63  ;;  %v15121_v7 = vcombine.high %v7861_v49, %v7865_v11  ;;  %v7873_v53 = vld [vmem:[#allocation9 + $0x138] sm:$0xff]  ;;  %15922 = vst [vmem:[#allocation63_spill] sm:$0xff] %v15125_v9 }
 0x7cc   :  { %8644 = vmatprep.mubr.bf16.mxu0 %v15091_v41  ;;  %8697 = vmatprep.mubr.bf16.mxu1 %v15091_v41  ;;  %v15132_v58 = vcombine.high %v7868_v20, %v7872_v47  ;;  %v15135_v61 = vcombine.high %v7869_v25, %v7873_v53  ;;  %v7877_v63 = vld [vmem:[#allocation9 + $0x158] sm:$0xff]  ;;  %v15144_v49 = vcombine.low %v7869_v25, %v7873_v53 }
 0x7cd   :  { %15920 = vst [vmem:[#allocation61_spill] sm:$0xff] %v15118_v3  ;;  %15921 = vst [vmem:[#allocation62_spill] sm:$0xff] %v15121_v7  ;;  %v7881_v57 = vld [vmem:[#allocation9 + $0x178] sm:$0xff] }
 0x7ce   :  { %8711 = vmatpush1.bf16.msra.mxu0 %v15096_v34  ;;  %8764 = vmatpush1.bf16.msra.mxu1 %v15100_v38  ;;  %15924 = vst [vmem:[#allocation65_spill] sm:$0xff] %v15132_v58  ;;  %15925 = vst [vmem:[#allocation66_spill] sm:$0xff] %v15135_v61  ;;  %v7885_v38 = vld [vmem:[#allocation9 + $0x198] sm:$0xff] }
 0x7cf   :  { %8712 = vmatprep.subr.bf16.mxu0 %v15102_v30  ;;  %8765 = vmatprep.subr.bf16.mxu1 %v15105_v0  ;;  %v7876_v0 = vld [vmem:[#allocation9 + $0x150] sm:$0xff]  ;;  %15927 = vst [vmem:[#allocation68_spill] sm:$0xff] %v15144_v49 }
 0x7d0   :  { %v7880_v30 = vld [vmem:[#allocation9 + $0x170] sm:$0xff] }
 0x7d1   :  { %8645 = vmatmul.mubr.bf16.gmra.mrb[4].mxu0 %v15109_v56  ;;  %8698 = vmatmul.mubr.bf16.gmra.mrb[4].mxu1 %v15109_v56  ;;  %v15146_v11 = vcombine.high %v7876_v0, %v7880_v30 }
 0x7d2   :  { %8713 = vmatpush1.bf16.msra.mxu0 %v15112_v16  ;;  %8766 = vmatpush1.bf16.msra.mxu1 %v15116_v43  ;;  %v15140_v43 = vcombine.low %v7868_v20, %v7872_v47  ;;  %v7888_v16 = vld [vmem:[#allocation9 + $0x1b0] sm:$0xff]  ;;  %v15152_v47 = vcombine.low %v7876_v0, %v7880_v30  ;;  %v15156_v20 = vcombine.low %v7877_v63, %v7881_v57 }
 0x7d3   :  { %8714 = vmatprep.subr.bf16.mxu0 %v15118_v3  ;;  %8767 = vmatprep.subr.bf16.mxu1 %v15121_v7  ;;  %15928 = vst [vmem:[#allocation69_spill] sm:$0xff] %v15146_v11  ;;  %v15149_v7 = vcombine.high %v7877_v63, %v7881_v57  ;;  %v7884_v3 = vld [vmem:[#allocation9 + $0x190] sm:$0xff] }
 0x7d4   :  { %8740 = vmatprep.mubr.bf16.mxu0 %v14953_v62  ;;  %8793 = vmatprep.mubr.bf16.mxu1 %v14953_v62  ;;  %15926 = vst [vmem:[#allocation67_spill] sm:$0xff] %v15140_v43  ;;  %v7889_v62 = vld [vmem:[#allocation9 + $0x1b8] sm:$0xff]  ;;  %15930 = vst [vmem:[#allocation71_spill] sm:$0xff] %v15152_v47  ;;  %v15158_v25 = vcombine.high %v7884_v3, %v7888_v16  ;;  %v15164_v30 = vcombine.low %v7884_v3, %v7888_v16 }
 0x7d5   :  { %15929 = vst [vmem:[#allocation70_spill] sm:$0xff] %v15149_v7  ;;  %15931 = vst [vmem:[#allocation72_spill] sm:$0xff] %v15156_v20  ;;  %v15161_v53 = vcombine.high %v7885_v38, %v7889_v62  ;;  %v15168_v0 = vcombine.low %v7885_v38, %v7889_v62 }
 0x7d6   :  { %8715 = vmatpush1.bf16.msra.mxu0 %v15125_v9  ;;  %8768 = vmatpush1.bf16.msra.mxu1 %v15130_v50  ;;  %15932 = vst [vmem:[#allocation73_spill] sm:$0xff] %v15158_v25  ;;  %v7893_v50 = vld [vmem:[#allocation9 + $0x1d8] sm:$0xff]  ;;  %15934 = vst [vmem:[#allocation75_spill] sm:$0xff] %v15164_v30 }
 0x7d7   :  { %8716 = vmatprep.subr.bf16.mxu0 %v15132_v58  ;;  %8769 = vmatprep.subr.bf16.mxu1 %v15135_v61  ;;  %15933 = vst [vmem:[#allocation74_spill] sm:$0xff] %v15161_v53  ;;  %v7892_v61 = vld [vmem:[#allocation9 + $0x1d0] sm:$0xff]  ;;  %v7897_v9 = vld [vmem:[#allocation9 + $0x1f8] sm:$0xff]  ;;  %15935 = vst [vmem:[#allocation76_spill] sm:$0xff] %v15168_v0 }
 0x7d8   :  { %v7896_v58 = vld [vmem:[#allocation9 + $0x1f0] sm:$0xff]  ;;  %v15173_v57 = vcombine.high %v7893_v50, %v7897_v9  ;;  %v15180_v38 = vcombine.low %v7893_v50, %v7897_v9 }
 0x7d9   :  { %v15170_v63 = vcombine.high %v7892_v61, %v7896_v58  ;;  %v15176_v3 = vcombine.low %v7892_v61, %v7896_v58 }
 0x7da   :  { %8717 = vmatpush1.bf16.msra.mxu0 %v15140_v43  ;;  %8770 = vmatpush1.bf16.msra.mxu1 %v15144_v49  ;;  %15937 = vst [vmem:[#allocation78_spill] sm:$0xff] %v15173_v57  ;;  %v7901_v49 = vld [vmem:[#allocation9 + $0x218] sm:$0xff]  ;;  %15939 = vst [vmem:[#allocation80_spill] sm:$0xff] %v15180_v38 }
 0x7db   :  { %8718 = vmatprep.subr.bf16.mxu0 %v15146_v11  ;;  %8771 = vmatprep.subr.bf16.mxu1 %v15149_v7  ;;  %15936 = vst [vmem:[#allocation77_spill] sm:$0xff] %v15170_v63  ;;  %v7900_v7 = vld [vmem:[#allocation9 + $0x210] sm:$0xff]  ;;  %v7905_v43 = vld [vmem:[#allocation9 + $0x238] sm:$0xff]  ;;  %15938 = vst [vmem:[#allocation79_spill] sm:$0xff] %v15176_v3 }
 0x7dc   :  { %v7904_v11 = vld [vmem:[#allocation9 + $0x230] sm:$0xff]  ;;  %v15185_v62 = vcombine.high %v7901_v49, %v7905_v43  ;;  %v15192_v9 = vcombine.low %v7901_v49, %v7905_v43 }
 0x7dd   :  { %v15182_v16 = vcombine.high %v7900_v7, %v7904_v11  ;;  %v15188_v58 = vcombine.low %v7900_v7, %v7904_v11 }
 0x7de   :  { %8719 = vmatpush1.bf16.msra.mxu0 %v15152_v47  ;;  %8772 = vmatpush1.bf16.msra.mxu1 %v15156_v20  ;;  %15941 = vst [vmem:[#allocation82_spill] sm:$0xff] %v15185_v62  ;;  %v7909_v20 = vld [vmem:[#allocation9 + $0x258] sm:$0xff]  ;;  %15943 = vst [vmem:[#allocation84_spill] sm:$0xff] %v15192_v9 }
 0x7df   :  { %8720 = vmatprep.subr.bf16.mxu0 %v15158_v25  ;;  %8773 = vmatprep.subr.bf16.mxu1 %v15161_v53  ;;  %15940 = vst [vmem:[#allocation81_spill] sm:$0xff] %v15182_v16  ;;  %v7908_v53 = vld [vmem:[#allocation9 + $0x250] sm:$0xff]  ;;  %v7913_v47 = vld [vmem:[#allocation9 + $0x278] sm:$0xff]  ;;  %15942 = vst [vmem:[#allocation83_spill] sm:$0xff] %v15188_v58 }
 0x7e0   :  { %v7912_v25 = vld [vmem:[#allocation9 + $0x270] sm:$0xff]  ;;  %v15197_v61 = vcombine.high %v7909_v20, %v7913_v47  ;;  %v15204_v43 = vcombine.low %v7909_v20, %v7913_v47 }
 0x7e1   :  { %v15194_v50 = vcombine.high %v7908_v53, %v7912_v25  ;;  %v15200_v7 = vcombine.low %v7908_v53, %v7912_v25 }
 0x7e2   :  { %8721 = vmatpush1.bf16.msra.mxu0 %v15164_v30  ;;  %8774 = vmatpush1.bf16.msra.mxu1 %v15168_v0  ;;  %15945 = vst [vmem:[#allocation86_spill] sm:$0xff] %v15197_v61  ;;  %v7917_v0 = vld [vmem:[#allocation9 + $0x298] sm:$0xff]  ;;  %15947 = vst [vmem:[#allocation88_spill] sm:$0xff] %v15204_v43 }
 0x7e3   :  { %8722 = vmatprep.subr.bf16.mxu0 %v15170_v63  ;;  %8775 = vmatprep.subr.bf16.mxu1 %v15173_v57  ;;  %15944 = vst [vmem:[#allocation85_spill] sm:$0xff] %v15194_v50  ;;  %v7916_v57 = vld [vmem:[#allocation9 + $0x290] sm:$0xff]  ;;  %v7921_v30 = vld [vmem:[#allocation9 + $0x2b8] sm:$0xff]  ;;  %15946 = vst [vmem:[#allocation87_spill] sm:$0xff] %v15200_v7 }
 0x7e4   :  { %v7920_v63 = vld [vmem:[#allocation9 + $0x2b0] sm:$0xff]  ;;  %v15209_v11 = vcombine.high %v7917_v0, %v7921_v30  ;;  %v15216_v47 = vcombine.low %v7917_v0, %v7921_v30 }
 0x7e5   :  { %v15206_v49 = vcombine.high %v7916_v57, %v7920_v63  ;;  %v15212_v25 = vcombine.low %v7916_v57, %v7920_v63 }
 0x7e6   :  { %8723 = vmatpush1.bf16.msra.mxu0 %v15176_v3  ;;  %8776 = vmatpush1.bf16.msra.mxu1 %v15180_v38  ;;  %15949 = vst [vmem:[#allocation90_spill] sm:$0xff] %v15209_v11  ;;  %v7925_v38 = vld [vmem:[#allocation9 + $0x2d8] sm:$0xff]  ;;  %15951 = vst [vmem:[#allocation92_spill] sm:$0xff] %v15216_v47 }
 0x7e7   :  { %8724 = vmatprep.subr.bf16.mxu0 %v15182_v16  ;;  %8777 = vmatprep.subr.bf16.mxu1 %v15185_v62  ;;  %15948 = vst [vmem:[#allocation89_spill] sm:$0xff] %v15206_v49  ;;  %v7924_v62 = vld [vmem:[#allocation9 + $0x2d0] sm:$0xff]  ;;  %v7929_v3 = vld [vmem:[#allocation9 + $0x2f8] sm:$0xff]  ;;  %15950 = vst [vmem:[#allocation91_spill] sm:$0xff] %v15212_v25 }
 0x7e8   :  { %v7928_v16 = vld [vmem:[#allocation9 + $0x2f0] sm:$0xff]  ;;  %v15221_v53 = vcombine.high %v7925_v38, %v7929_v3  ;;  %v15228_v30 = vcombine.low %v7925_v38, %v7929_v3 }
 0x7e9   :  { %v15218_v20 = vcombine.high %v7924_v62, %v7928_v16  ;;  %v15224_v63 = vcombine.low %v7924_v62, %v7928_v16 }
 0x7ea   :  { %8725 = vmatpush1.bf16.msra.mxu0 %v15188_v58  ;;  %8778 = vmatpush1.bf16.msra.mxu1 %v15192_v9  ;;  %15953 = vst [vmem:[#allocation94_spill] sm:$0xff] %v15221_v53  ;;  %v7933_v9 = vld [vmem:[#allocation9 + $0x318] sm:$0xff]  ;;  %15955 = vst [vmem:[#allocation96_spill] sm:$0xff] %v15228_v30 }
 0x7eb   :  { %8726 = vmatprep.subr.bf16.mxu0 %v15194_v50  ;;  %8779 = vmatprep.subr.bf16.mxu1 %v15197_v61  ;;  %15952 = vst [vmem:[#allocation93_spill] sm:$0xff] %v15218_v20  ;;  %v7932_v61 = vld [vmem:[#allocation9 + $0x310] sm:$0xff]  ;;  %v7937_v58 = vld [vmem:[#allocation9 + $0x338] sm:$0xff]  ;;  %15954 = vst [vmem:[#allocation95_spill] sm:$0xff] %v15224_v63 }
 0x7ec   :  { %v7936_v50 = vld [vmem:[#allocation9 + $0x330] sm:$0xff]  ;;  %v15233_v57 = vcombine.high %v7933_v9, %v7937_v58  ;;  %v15240_v3 = vcombine.low %v7933_v9, %v7937_v58 }
 0x7ed   :  { %v15230_v0 = vcombine.high %v7932_v61, %v7936_v50  ;;  %v15236_v16 = vcombine.low %v7932_v61, %v7936_v50 }
 0x7ee   :  { %8727 = vmatpush1.bf16.msra.mxu0 %v15200_v7  ;;  %8780 = vmatpush1.bf16.msra.mxu1 %v15204_v43  ;;  %15957 = vst [vmem:[#allocation98_spill] sm:$0xff] %v15233_v57  ;;  %v7941_v43 = vld [vmem:[#allocation9 + $0x358] sm:$0xff] }
 0x7ef   :  { %8728 = vmatprep.subr.bf16.mxu0 %v15206_v49  ;;  %8781 = vmatprep.subr.bf16.mxu1 %v15209_v11  ;;  %15956 = vst [vmem:[#allocation97_spill] sm:$0xff] %v15230_v0  ;;  %v7940_v11 = vld [vmem:[#allocation9 + $0x350] sm:$0xff]  ;;  %v7945_v7 = vld [vmem:[#allocation9 + $0x378] sm:$0xff] }
 0x7f0   :  { %v7944_v49 = vld [vmem:[#allocation9 + $0x370] sm:$0xff]  ;;  %v15245_v62 = vcombine.high %v7941_v43, %v7945_v7  ;;  %v15252_v58 = vcombine.low %v7941_v43, %v7945_v7 }
 0x7f1   :  { %v15242_v38 = vcombine.high %v7940_v11, %v7944_v49  ;;  %v15248_v50 = vcombine.low %v7940_v11, %v7944_v49 }
 0x7f2   :  { %8729 = vmatpush1.bf16.msra.mxu0 %v15212_v25  ;;  %8782 = vmatpush1.bf16.msra.mxu1 %v15216_v47  ;;  %15958 = vst [vmem:[#allocation99_spill] sm:$0xff] %v15245_v62  ;;  %v7949_v47 = vld [vmem:[#allocation9 + $0x398] sm:$0xff] }
 0x7f3   :  { %8730 = vmatprep.subr.bf16.mxu0 %v15218_v20  ;;  %8783 = vmatprep.subr.bf16.mxu1 %v15221_v53  ;;  %v7948_v53 = vld [vmem:[#allocation9 + $0x390] sm:$0xff]  ;;  %v7953_v25 = vld [vmem:[#allocation9 + $0x3b8] sm:$0xff] }
 0x7f4   :  { %v7952_v20 = vld [vmem:[#allocation9 + $0x3b0] sm:$0xff]  ;;  %v15257_v61 = vcombine.high %v7949_v47, %v7953_v25  ;;  %v15264_v7 = vcombine.low %v7949_v47, %v7953_v25  ;;  %v8847_v25 = vld [vmem:[#allocation2 + $0x48] sm:$0xff]  ;;  %v15991_v47 = vld [vmem:[#allocation58_spill] sm:$0xff] }
 0x7f5   :  { %v15254_v9 = vcombine.high %v7948_v53, %v7952_v20  ;;  %v15260_v49 = vcombine.low %v7948_v53, %v7952_v20  ;;  %v15992_v53 = vld [vmem:[#allocation59_spill] sm:$0xff] }
 0x7f6   :  { %8731 = vmatpush1.bf16.msra.mxu0 %v15224_v63  ;;  %8784 = vmatpush1.bf16.msra.mxu1 %v15228_v30  ;;  %v7957_v30 = vld [vmem:[#allocation9 + $0x3d8] sm:$0xff] }
 0x7f7   :  { %8732 = vmatprep.subr.bf16.mxu0 %v15230_v0  ;;  %8785 = vmatprep.subr.bf16.mxu1 %v15233_v57  ;;  %v7956_v57 = vld [vmem:[#allocation9 + $0x3d0] sm:$0xff]  ;;  %v7961_v63 = vld [vmem:[#allocation9 + $0x3f8] sm:$0xff] }
 0x7f8   :  { %v7960_v0 = vld [vmem:[#allocation9 + $0x3f0] sm:$0xff]  ;;  %v15269_v11 = vcombine.high %v7957_v30, %v7961_v63  ;;  %v15276_v20 = vcombine.low %v7957_v30, %v7961_v63  ;;  %v15994_v30 = vld [vmem:[#allocation61_spill] sm:$0xff] }
 0x7f9   :  { %v15266_v43 = vcombine.high %v7956_v57, %v7960_v0  ;;  %v15993_v63 = vld [vmem:[#allocation60_spill] sm:$0xff] }
 0x7fa   :  { %8733 = vmatpush1.bf16.msra.mxu0 %v15236_v16  ;;  %8786 = vmatpush1.bf16.msra.mxu1 %v15240_v3 }
 0x7fb   :  { %8734 = vmatprep.subr.bf16.mxu0 %v15242_v38  ;;  %8787 = vmatprep.subr.bf16.mxu1 %v15245_v62  ;;  %v15272_v62 = vcombine.low %v7956_v57, %v7960_v0  ;;  %v15995_v0 = vld [vmem:[#allocation62_spill] sm:$0xff]  ;;  %v15997_v57 = vld [vmem:[#allocation64_spill] sm:$0xff] }
 0x7fe   :  { %8735 = vmatpush1.bf16.msra.mxu0 %v15248_v50  ;;  %8788 = vmatpush1.bf16.msra.mxu1 %v15252_v58 }
 0x7ff   :  { %8736 = vmatprep.subr.bf16.mxu0 %v15254_v9  ;;  %8789 = vmatprep.subr.bf16.mxu1 %v15257_v61 }
 0x802   :  { %8737 = vmatpush1.bf16.msra.mxu0 %v15260_v49  ;;  %8790 = vmatpush1.bf16.msra.mxu1 %v15264_v7 }
 0x803   :  { %8738 = vmatprep.subr.bf16.mxu0 %v15266_v43  ;;  %8791 = vmatprep.subr.bf16.mxu1 %v15269_v11 }
 0x806   :  { %8739 = vmatpush1.bf16.msra.mxu0 %v15272_v62  ;;  %8792 = vmatpush1.bf16.msra.mxu1 %v15276_v20 }
 0x807   :  { %9626 = vmatprep.subr.bf16.mxu0 %v14879_v18  ;;  %9679 = vmatprep.subr.bf16.mxu1 %v14883_v26  ;;  %v8849_v18 = vld [vmem:[#allocation2 + $0x58] sm:$0xff]  ;;  %v15959_v26 = vld [vmem:[#allocation26_spill] sm:$0xff] }
 0x809   :  { %8741 = vmatmul.mubr.bf16.vlgmr.msra.gmra.mrb[8].mxu0 %v15077_v5  ;;  %8794 = vmatmul.mubr.bf16.vlgmr.msra.gmra.mrb[8].mxu1 %v15077_v5 }
 0x80a   :  { %9627 = vmatpush1.bf16.msra.mxu0 %v14881_v32  ;;  %9680 = vmatpush1.bf16.msra.mxu1 %v14885_v27  ;;  %v15295_v32 = vpack.c.bf16 %v8849_v18, %v8847_v25  ;;  %v15960_v27 = vld [vmem:[#allocation27_spill] sm:$0xff]  ;;  %v15998_v25 = vld [vmem:[#allocation65_spill] sm:$0xff]  ;;  %v15999_v18 = vld [vmem:[#allocation66_spill] sm:$0xff] }
 0x80b   :  { %9628 = vmatprep.subr.bf16.mxu0 %v14887_v29  ;;  %9681 = vmatprep.subr.bf16.mxu1 %v14890_v48  ;;  %v15961_v29 = vld [vmem:[#allocation28_spill] sm:$0xff]  ;;  %v15962_v48 = vld [vmem:[#allocation29_spill] sm:$0xff] }
 0x80c   :  { %8750 = vmatprep.mubr.bf16.mxu0 %v15091_v41  ;;  %8803 = vmatprep.mubr.bf16.mxu1 %v15091_v41  ;;  %v15990_v41 = vld [vmem:[#allocation57_spill] sm:$0xff] }
 0x80e   :  { %9629 = vmatpush1.bf16.msra.mxu0 %v14894_v60  ;;  %9682 = vmatpush1.bf16.msra.mxu1 %v14898_v19  ;;  %v15963_v60 = vld [vmem:[#allocation30_spill] sm:$0xff]  ;;  %v15964_v19 = vld [vmem:[#allocation31_spill] sm:$0xff] }
 0x80f   :  { %9630 = vmatprep.subr.bf16.mxu0 %v14900_v28  ;;  %9683 = vmatprep.subr.bf16.mxu1 %v14903_v35  ;;  %v15965_v28 = vld [vmem:[#allocation32_spill] sm:$0xff]  ;;  %v15966_v35 = vld [vmem:[#allocation33_spill] sm:$0xff] }
 0x811   :  { %8751 = vmatmul.mubr.bf16.gmra.mrb[12].mxu0 %v15109_v56  ;;  %8804 = vmatmul.mubr.bf16.gmra.mrb[12].mxu1 %v15109_v56  ;;  %v15989_v56 = vld [vmem:[#allocation56_spill] sm:$0xff] }
 0x812   :  { %9631 = vmatpush1.bf16.msra.mxu0 %v14906_v15  ;;  %9684 = vmatpush1.bf16.msra.mxu1 %v14910_v36  ;;  %v15967_v15 = vld [vmem:[#allocation34_spill] sm:$0xff]  ;;  %v15968_v36 = vld [vmem:[#allocation35_spill] sm:$0xff] }
 0x813   :  { %9632 = vmatprep.subr.bf16.mxu0 %v14912_v42  ;;  %9685 = vmatprep.subr.bf16.mxu1 %v14915_v10  ;;  %v15969_v42 = vld [vmem:[#allocation36_spill] sm:$0xff]  ;;  %v15970_v10 = vld [vmem:[#allocation37_spill] sm:$0xff] }
 0x814   :  { %9658 = vmatprep.mubr.bf16.mxu0 %v15295_v32  ;;  %9711 = vmatprep.mubr.bf16.mxu1 %v15295_v32 }
 0x816   :  { %9633 = vmatpush1.bf16.msra.mxu0 %v14918_v51  ;;  %9686 = vmatpush1.bf16.msra.mxu1 %v14922_v40  ;;  %v15971_v51 = vld [vmem:[#allocation38_spill] sm:$0xff]  ;;  %v15972_v40 = vld [vmem:[#allocation39_spill] sm:$0xff] }
 0x817   :  { %9634 = vmatprep.subr.bf16.mxu0 %v14924_v44  ;;  %9687 = vmatprep.subr.bf16.mxu1 %v14927_v46  ;;  %v15973_v44 = vld [vmem:[#allocation40_spill] sm:$0xff]  ;;  %v15974_v46 = vld [vmem:[#allocation41_spill] sm:$0xff] }
 0x81a   :  { %9635 = vmatpush1.bf16.msra.mxu0 %v14930_v12  ;;  %9688 = vmatpush1.bf16.msra.mxu1 %v14934_v4  ;;  %v15975_v12 = vld [vmem:[#allocation42_spill] sm:$0xff]  ;;  %v15976_v4 = vld [vmem:[#allocation43_spill] sm:$0xff] }
 0x81b   :  { %9636 = vmatprep.subr.bf16.mxu0 %v14936_v52  ;;  %9689 = vmatprep.subr.bf16.mxu1 %v14939_v37  ;;  %v15977_v52 = vld [vmem:[#allocation44_spill] sm:$0xff]  ;;  %v8846_v37 = vld [vmem:[#allocation2 + $0x40] sm:$0xff] }
 0x81e   :  { %9637 = vmatpush1.bf16.msra.mxu0 %v14942_v31  ;;  %9690 = vmatpush1.bf16.msra.mxu1 %v14946_v17  ;;  %v8848_v31 = vld [vmem:[#allocation2 + $0x50] sm:$0xff]  ;;  %v15978_v17 = vld [vmem:[#allocation45_spill] sm:$0xff] }
 0x81f   :  { %9638 = vmatprep.subr.bf16.mxu0 %v14948_v21  ;;  %9691 = vmatprep.subr.bf16.mxu1 %v14951_v55  ;;  %v15979_v21 = vld [vmem:[#allocation46_spill] sm:$0xff]  ;;  %v15980_v55 = vld [vmem:[#allocation47_spill] sm:$0xff] }
 0x822   :  { %9639 = vmatpush1.bf16.msra.mxu0 %v14956_v1  ;;  %9692 = vmatpush1.bf16.msra.mxu1 %v14961_v2  ;;  %v15353_v1 = vpack.c.bf16 %v8848_v31, %v8846_v37  ;;  %v8851_v2 = vld [vmem:[#allocation2 + $0x68] sm:$0xff]  ;;  %v16021_v31 = vld [vmem:[#allocation88_spill] sm:$0xff] }
 0x823   :  { %9640 = vmatprep.subr.bf16.mxu0 %v14963_v6  ;;  %9693 = vmatprep.subr.bf16.mxu1 %v14966_v8  ;;  %v8853_v6 = vld [vmem:[#allocation2 + $0x78] sm:$0xff]  ;;  %v15981_v8 = vld [vmem:[#allocation48_spill] sm:$0xff]  ;;  %v16020_v37 = vld [vmem:[#allocation87_spill] sm:$0xff] }
 0x826   :  { %9641 = vmatpush1.bf16.msra.mxu0 %v14970_v54  ;;  %9694 = vmatpush1.bf16.msra.mxu1 %v14974_v59  ;;  %v15982_v54 = vld [vmem:[#allocation49_spill] sm:$0xff]  ;;  %v15983_v59 = vld [vmem:[#allocation50_spill] sm:$0xff] }
 0x827   :  { %9642 = vmatprep.subr.bf16.mxu0 %v14976_v39  ;;  %9695 = vmatprep.subr.bf16.mxu1 %v14979_v45  ;;  %v15984_v39 = vld [vmem:[#allocation51_spill] sm:$0xff]  ;;  %v15359_v45 = vpack.c.bf16 %v8853_v6, %v8851_v2  ;;  %v16025_v2 = vld [vmem:[#allocation92_spill] sm:$0xff]  ;;  %v16026_v6 = vld [vmem:[#allocation93_spill] sm:$0xff] }
 0x82a   :  { %9643 = vmatpush1.bf16.msra.mxu0 %v14982_v13  ;;  %9696 = vmatpush1.bf16.msra.mxu1 %v14986_v23  ;;  %v15985_v13 = vld [vmem:[#allocation52_spill] sm:$0xff]  ;;  %v8850_v23 = vld [vmem:[#allocation2 + $0x60] sm:$0xff] }
 0x82b   :  { %9644 = vmatprep.subr.bf16.mxu0 %v14988_v24  ;;  %9697 = vmatprep.subr.bf16.mxu1 %v14991_v22  ;;  %v8852_v24 = vld [vmem:[#allocation2 + $0x70] sm:$0xff]  ;;  %v15986_v22 = vld [vmem:[#allocation53_spill] sm:$0xff] }
 0x82c   :  { %v15369_v5 = vpack.c.bf16 %v8852_v24, %v8850_v23  ;;  %v16032_v23 = vld [vmem:[#allocation99_spill] sm:$0xff] }
 0x82e   :  { %9645 = vmatpush1.bf16.msra.mxu0 %v14994_v14  ;;  %9698 = vmatpush1.bf16.msra.mxu1 %v14998_v33  ;;  %v15987_v14 = vld [vmem:[#allocation54_spill] sm:$0xff]  ;;  %v15988_v33 = vld [vmem:[#allocation55_spill] sm:$0xff] }
 0x82f   :  { %9646 = vmatprep.subr.bf16.mxu0 %v15959_v26  ;;  %9699 = vmatprep.subr.bf16.mxu1 %v15960_v27  ;;  %v16000_v26 = vld [vmem:[#allocation67_spill] sm:$0xff]  ;;  %v16001_v27 = vld [vmem:[#allocation68_spill] sm:$0xff] }
 0x832   :  { %9647 = vmatpush1.bf16.msra.mxu0 %v15961_v29  ;;  %9700 = vmatpush1.bf16.msra.mxu1 %v15962_v48  ;;  %v16002_v29 = vld [vmem:[#allocation69_spill] sm:$0xff]  ;;  %v16003_v48 = vld [vmem:[#allocation70_spill] sm:$0xff] }
 0x833   :  { %9648 = vmatprep.subr.bf16.mxu0 %v15963_v60  ;;  %9701 = vmatprep.subr.bf16.mxu1 %v15964_v19  ;;  %v16004_v60 = vld [vmem:[#allocation71_spill] sm:$0xff]  ;;  %v16005_v19 = vld [vmem:[#allocation72_spill] sm:$0xff] }
 0x836   :  { %9649 = vmatpush1.bf16.msra.mxu0 %v15965_v28  ;;  %9702 = vmatpush1.bf16.msra.mxu1 %v15966_v35  ;;  %v16007_v28 = vld [vmem:[#allocation74_spill] sm:$0xff]  ;;  %v16008_v35 = vld [vmem:[#allocation75_spill] sm:$0xff] }
 0x837   :  { %9650 = vmatprep.subr.bf16.mxu0 %v15967_v15  ;;  %9703 = vmatprep.subr.bf16.mxu1 %v15968_v36  ;;  %v16009_v15 = vld [vmem:[#allocation76_spill] sm:$0xff]  ;;  %v16010_v36 = vld [vmem:[#allocation77_spill] sm:$0xff] }
 0x83a   :  { %9651 = vmatpush1.bf16.msra.mxu0 %v15969_v42  ;;  %9704 = vmatpush1.bf16.msra.mxu1 %v15970_v10  ;;  %v16011_v42 = vld [vmem:[#allocation78_spill] sm:$0xff]  ;;  %v16012_v10 = vld [vmem:[#allocation79_spill] sm:$0xff] }
 0x83b   :  { %9652 = vmatprep.subr.bf16.mxu0 %v15971_v51  ;;  %9705 = vmatprep.subr.bf16.mxu1 %v15972_v40  ;;  %v16013_v51 = vld [vmem:[#allocation80_spill] sm:$0xff]  ;;  %v16014_v40 = vld [vmem:[#allocation81_spill] sm:$0xff] }
 0x83e   :  { %9653 = vmatpush1.bf16.msra.mxu0 %v15973_v44  ;;  %9706 = vmatpush1.bf16.msra.mxu1 %v15974_v46  ;;  %v16015_v44 = vld [vmem:[#allocation82_spill] sm:$0xff]  ;;  %v16016_v46 = vld [vmem:[#allocation83_spill] sm:$0xff] }
 0x83f   :  { %9654 = vmatprep.subr.bf16.mxu0 %v15975_v12  ;;  %9707 = vmatprep.subr.bf16.mxu1 %v15976_v4  ;;  %v16017_v12 = vld [vmem:[#allocation84_spill] sm:$0xff]  ;;  %v16018_v4 = vld [vmem:[#allocation85_spill] sm:$0xff] }
 0x842   :  { %9655 = vmatpush1.bf16.msra.mxu0 %v15977_v52  ;;  %9708 = vmatpush1.bf16.msra.mxu1 %v15978_v17  ;;  %v16019_v52 = vld [vmem:[#allocation86_spill] sm:$0xff]  ;;  %v16022_v17 = vld [vmem:[#allocation89_spill] sm:$0xff] }
 0x843   :  { %9656 = vmatprep.subr.bf16.mxu0 %v15979_v21  ;;  %9709 = vmatprep.subr.bf16.mxu1 %v15980_v55  ;;  %v16023_v21 = vld [vmem:[#allocation90_spill] sm:$0xff]  ;;  %v16024_v55 = vld [vmem:[#allocation91_spill] sm:$0xff] }
 0x846   :  { %9657 = vmatpush1.bf16.msra.mxu0 %v15981_v8  ;;  %9710 = vmatpush1.bf16.msra.mxu1 %v15982_v54  ;;  %v16027_v8 = vld [vmem:[#allocation94_spill] sm:$0xff]  ;;  %v16028_v54 = vld [vmem:[#allocation95_spill] sm:$0xff] }
 0x847   :  { %9732 = vmatprep.subr.bf16.mxu0 %v15983_v59  ;;  %9785 = vmatprep.subr.bf16.mxu1 %v15984_v39  ;;  %v16029_v59 = vld [vmem:[#allocation96_spill] sm:$0xff]  ;;  %v16030_v39 = vld [vmem:[#allocation97_spill] sm:$0xff] }
 0x849   :  { %9659 = vmatmul.mubr.bf16.vlgmr.msra.gmra.mrb[16].mxu0 %v15353_v1  ;;  %9712 = vmatmul.mubr.bf16.vlgmr.msra.gmra.mrb[16].mxu1 %v15353_v1 }
 0x84a   :  { %9733 = vmatpush1.bf16.msra.mxu0 %v15985_v13  ;;  %9786 = vmatpush1.bf16.msra.mxu1 %v15986_v22  ;;  %v16031_v13 = vld [vmem:[#allocation98_spill] sm:$0xff] }
 0x84b   :  { %9734 = vmatprep.subr.bf16.mxu0 %v15987_v14  ;;  %9787 = vmatprep.subr.bf16.mxu1 %v15988_v33  ;;  %v9878_v22 = vld [vmem:[%s15552_s9] sm:$0xff] }
 0x84c   :  { %9668 = vmatprep.mubr.bf16.mxu0 %v15359_v45  ;;  %9721 = vmatprep.mubr.bf16.mxu1 %v15359_v45  ;;  %v16033_v14 = vld [vmem:[#allocation18_spill] sm:$0xff] }
 0x84d   :  { %v9883_v33 = vrot.slane %v9878_v22, %v16033_v14 }
 0x84e   :  { %9735 = vmatpush1.bf16.msra.mxu0 %v15096_v34  ;;  %9788 = vmatpush1.bf16.msra.mxu1 %v15989_v56  ;;  %v15996_v34 = vld [vmem:[#allocation63_spill] sm:$0xff] }
 0x84f   :  { %9736 = vmatprep.subr.bf16.mxu0 %v15990_v41  ;;  %9789 = vmatprep.subr.bf16.mxu1 %v15991_v47  ;;  %v16035_v41 = vld [vmem:[#allocation20_spill] sm:$0xff] }
 0x850   :  { %v9887_v47 = vrot.slane %v9878_v22, %v16035_v41 }
 0x851   :  { %9669 = vmatmul.mubr.bf16.gmra.mrb[20].mxu0 %v15369_v5  ;;  %9722 = vmatmul.mubr.bf16.gmra.mrb[20].mxu1 %v15369_v5 }
 0x852   :  { %9737 = vmatpush1.bf16.msra.mxu0 %v15992_v53  ;;  %9790 = vmatpush1.bf16.msra.mxu1 %v15993_v63  ;;  %v16036_v53 = vld [vmem:[#allocation21_spill] sm:$0xff] }
 0x853   :  { %9738 = vmatprep.subr.bf16.mxu0 %v15994_v30  ;;  %9791 = vmatprep.subr.bf16.mxu1 %v15995_v0  ;;  %v9895_v63 = vrot.slane %v9878_v22, %v16036_v53 }
 0x854   :  { %9764 = vmatprep.mubr.bf16.mxu0 %v15295_v32  ;;  %9817 = vmatprep.mubr.bf16.mxu1 %v15295_v32  ;;  %v16006_v32 = vld [vmem:[#allocation73_spill] sm:$0xff] }
 0x856   :  { %9739 = vmatpush1.bf16.msra.mxu0 %v15996_v34  ;;  %9792 = vmatpush1.bf16.msra.mxu1 %v15997_v57 }
 0x857   :  { %9740 = vmatprep.subr.bf16.mxu0 %v15998_v25  ;;  %9793 = vmatprep.subr.bf16.mxu1 %v15999_v18 }
 0x85a   :  { %9741 = vmatpush1.bf16.msra.mxu0 %v16000_v26  ;;  %9794 = vmatpush1.bf16.msra.mxu1 %v16001_v27 }
 0x85b   :  { %9742 = vmatprep.subr.bf16.mxu0 %v16002_v29  ;;  %9795 = vmatprep.subr.bf16.mxu1 %v16003_v48 }
 0x85e   :  { %9743 = vmatpush1.bf16.msra.mxu0 %v16004_v60  ;;  %9796 = vmatpush1.bf16.msra.mxu1 %v16005_v19 }
 0x85f   :  { %9744 = vmatprep.subr.bf16.mxu0 %v16006_v32  ;;  %9797 = vmatprep.subr.bf16.mxu1 %v16007_v28 }
 0x862   :  { %9745 = vmatpush1.bf16.msra.mxu0 %v16008_v35  ;;  %9798 = vmatpush1.bf16.msra.mxu1 %v16009_v15  ;;  %v16037_v15 = vld [vmem:[#allocation22_spill] sm:$0xff] }
 0x863   :  { %9746 = vmatprep.subr.bf16.mxu0 %v16010_v36  ;;  %9799 = vmatprep.subr.bf16.mxu1 %v16011_v42  ;;  %v9899_v36 = vrot.slane %v9878_v22, %v16037_v15 }
 0x866   :  { %9747 = vmatpush1.bf16.msra.mxu0 %v16012_v10  ;;  %9800 = vmatpush1.bf16.msra.mxu1 %v16013_v51  ;;  %v16038_v10 = vld [vmem:[#allocation23_spill] sm:$0xff] }
 0x867   :  { %9748 = vmatprep.subr.bf16.mxu0 %v16014_v40  ;;  %9801 = vmatprep.subr.bf16.mxu1 %v16015_v44  ;;  %v9907_v51 = vrot.slane %v9878_v22, %v16038_v10  ;;  %v16039_v40 = vld [vmem:[#allocation24_spill] sm:$0xff] }
 0x868   :  { %v9903_v44 = vrot.slane %v9878_v22, %v16039_v40 }
 0x86a   :  { %9749 = vmatpush1.bf16.msra.mxu0 %v16016_v46  ;;  %9802 = vmatpush1.bf16.msra.mxu1 %v16017_v12  ;;  %v16040_v46 = vld [vmem:[#allocation25_spill] sm:$0xff] }
 0x86b   :  { %9750 = vmatprep.subr.bf16.mxu0 %v16018_v4  ;;  %9803 = vmatprep.subr.bf16.mxu1 %v16019_v52  ;;  %v9911_v12 = vrot.slane %v9878_v22, %v16040_v46 }
 0x86e   :  { %9751 = vmatpush1.bf16.msra.mxu0 %v16020_v37  ;;  %9804 = vmatpush1.bf16.msra.mxu1 %v16021_v31 }
 0x86f   :  { %9752 = vmatprep.subr.bf16.mxu0 %v16022_v17  ;;  %9805 = vmatprep.subr.bf16.mxu1 %v16023_v21 }
 0x872   :  { %9753 = vmatpush1.bf16.msra.mxu0 %v16024_v55  ;;  %9806 = vmatpush1.bf16.msra.mxu1 %v16025_v2 }
 0x873   :  { %9754 = vmatprep.subr.bf16.mxu0 %v16026_v6  ;;  %9807 = vmatprep.subr.bf16.mxu1 %v16027_v8 }
 0x876   :  { %9755 = vmatpush1.bf16.msra.mxu0 %v16028_v54  ;;  %9808 = vmatpush1.bf16.msra.mxu1 %v16029_v59 }
 0x877   :  { %9756 = vmatprep.subr.bf16.mxu0 %v16030_v39  ;;  %9809 = vmatprep.subr.bf16.mxu1 %v16031_v13 }
 0x87a   :  { %9757 = vmatpush1.bf16.msra.mxu0 %v15236_v16  ;;  %9810 = vmatpush1.bf16.msra.mxu1 %v15240_v3 }
 0x87b   :  { %9758 = vmatprep.subr.bf16.mxu0 %v15242_v38  ;;  %9811 = vmatprep.subr.bf16.mxu1 %v16032_v23 }
 0x87e   :  { %9759 = vmatpush1.bf16.msra.mxu0 %v15248_v50  ;;  %9812 = vmatpush1.bf16.msra.mxu1 %v15252_v58 }
 0x87f   :  { %9760 = vmatprep.subr.bf16.mxu0 %v15254_v9  ;;  %9813 = vmatprep.subr.bf16.mxu1 %v15257_v61 }
 0x882   :  { %9761 = vmatpush1.bf16.msra.mxu0 %v15260_v49  ;;  %9814 = vmatpush1.bf16.msra.mxu1 %v15264_v7 }
 0x883   :  { %9762 = vmatprep.subr.bf16.mxu0 %v15266_v43  ;;  %9815 = vmatprep.subr.bf16.mxu1 %v15269_v11 }
 0x886   :  { %9763 = vmatpush1.bf16.msra.mxu0 %v15272_v62  ;;  %9816 = vmatpush1.bf16.msra.mxu1 %v15276_v20 }
 0x889   :  { %9765 = vmatmul.mubr.bf16.vlgmr.msra.gmra.mrb[24].mxu0 %v15353_v1  ;;  %9818 = vmatmul.mubr.bf16.vlgmr.msra.gmra.mrb[24].mxu1 %v15353_v1 }
 0x88a   :  { %9774 = vmatprep.mubr.bf16.mxu0 %v15359_v45  ;;  %9827 = vmatprep.mubr.bf16.mxu1 %v15359_v45 }
 0x891   :  { %9775 = vmatmul.mubr.bf16.gmra.mrb[28].mxu0 %v15369_v5  ;;  %9828 = vmatmul.mubr.bf16.gmra.mrb[28].mxu1 %v15369_v5  ;;  %v16034_v5 = vld [vmem:[#allocation19_spill] sm:$0xff] }
 0x892   :  { %v9891_v56 = vrot.slane %v9878_v22, %v16034_v5 }
 0x89c   :  { %v8636_v16 = vpop.f32.mrb[0].mxu0  ;;  %v8689_v3 = vpop.f32.mrb[0].mxu1 }
 0x89d   :  { %8814 = vst [vmem:[#allocation3] sm:$0xff] %v8636_v16  ;;  %v8638_v38 = vpop.f32.mrb[1].mxu0  ;;  %8816 = vst [vmem:[#allocation3 + $0x10] sm:$0xff] %v8689_v3  ;;  %v8691_v62 = vpop.f32.mrb[1].mxu1  ;;  %v9920_v30 = vadd.f32 %v9883_v33, %v8636_v16  ;;  %v9922_v0 = vadd.f32 %v9891_v56, %v8689_v3 }
 0x89e   :  { %8815 = vst [vmem:[#allocation3 + $0x8] sm:$0xff] %v8638_v38  ;;  %v8640_v50 = vpop.f32.mrb[2].mxu0  ;;  %8817 = vst [vmem:[#allocation3 + $0x18] sm:$0xff] %v8691_v62  ;;  %v8693_v58 = vpop.f32.mrb[2].mxu1  ;;  %v9921_v34 = vadd.f32 %v9887_v47, %v8638_v38  ;;  %v9923_v57 = vadd.f32 %v9895_v63, %v8691_v62 }
 0x89f   :  { %8822 = vst [vmem:[#allocation3 + $0x40] sm:$0xff] %v8640_v50  ;;  %v8642_v9 = vpop.f32.mrb[3].mxu0  ;;  %8824 = vst [vmem:[#allocation3 + $0x50] sm:$0xff] %v8693_v58  ;;  %v8695_v61 = vpop.f32.mrb[3].mxu1  ;;  %v12498_v25 = vmul.f32 -1.442695, %v9920_v30 }
 0x8a0   :  { %8823 = vst [vmem:[#allocation3 + $0x48] sm:$0xff] %v8642_v9  ;;  %8825 = vst [vmem:[#allocation3 + $0x58] sm:$0xff] %v8695_v61  ;;  %v12500_v18 = vmul.f32 -1.442695, %v9922_v0  ;;  %v12499_v26 = vmul.f32 -1.442695, %v9921_v34 }
 0x8a1   :  { %v12501_v27 = vmul.f32 -1.442695, %v9923_v57  ;;  %13024 = vpow2.f32 %v12498_v25 }
 0x8a2   :  { %13026 = vpow2.f32 %v12500_v18 }
 0x8a3   :  { %13028 = vpow2.f32 %v12499_v26 }
 0x8a4   :  { %v8646_v49 = vpop.f32.mrb[4].mxu0  ;;  %v8699_v7 = vpop.f32.mrb[4].mxu1  ;;  %13030 = vpow2.f32 %v12501_v27 }
 0x8a5   :  { %8830 = vst [vmem:[#allocation3 + $0x80] sm:$0xff] %v8646_v49  ;;  %v8648_v43 = vpop.f32.mrb[5].mxu0  ;;  %8832 = vst [vmem:[#allocation3 + $0x90] sm:$0xff] %v8699_v7  ;;  %v8701_v11 = vpop.f32.mrb[5].mxu1 }
 0x8a6   :  { %8831 = vst [vmem:[#allocation3 + $0x88] sm:$0xff] %v8648_v43  ;;  %v8650_v20 = vpop.f32.mrb[6].mxu0  ;;  %8833 = vst [vmem:[#allocation3 + $0x98] sm:$0xff] %v8701_v11  ;;  %v8703_v1 = vpop.f32.mrb[6].mxu1 }
 0x8a7   :  { %8838 = vst [vmem:[#allocation3 + $0xc0] sm:$0xff] %v8650_v20  ;;  %v8652_v45 = vpop.f32.mrb[7].mxu0  ;;  %8840 = vst [vmem:[#allocation3 + $0xd0] sm:$0xff] %v8703_v1  ;;  %v8705_v24 = vpop.f32.mrb[7].mxu1 }
 0x8a8   :  { %8839 = vst [vmem:[#allocation3 + $0xc8] sm:$0xff] %v8652_v45  ;;  %8841 = vst [vmem:[#allocation3 + $0xd8] sm:$0xff] %v8705_v24 }
 0x8ab   :  { %v13025_v29 = vpop.eup %13024 }
 0x8ac   :  { %v13027_v48 = vpop.eup %13026  ;;  %v9934_v32 = vadd.f32 1.0, %v13025_v29 }
 0x8ad   :  { %v13029_v60 = vpop.eup %13028  ;;  %v9946_v28 = vadd.f32 1.0, %v13027_v48 }
 0x8ae   :  { %v13031_v19 = vpop.eup %13030  ;;  %v9935_v35 = vadd.f32 1.0, %v13029_v60  ;;  %13032 = vrcp.f32 %v9934_v32 }
 0x8af   :  { %v9947_v42 = vadd.f32 1.0, %v13031_v19  ;;  %13034 = vrcp.f32 %v9946_v28 }
 0x8b0   :  { %13036 = vrcp.f32 %v9935_v35 }
 0x8b1   :  { %13038 = vrcp.f32 %v9947_v42 }
 0x8b8   :  { %v13033_v16 = vpop.eup %13032 }
 0x8b9   :  { %v13035_v62 = vpop.eup %13034 }
 0x8ba   :  { %v13037_v9 = vpop.eup %13036  ;;  %v9966_v1 = vmul.f32 0.0, %v13035_v62 }
 0x8bb   :  { %v13039_v7 = vpop.eup %13038 }
 0x8bc   :  { %v9967_v24 = vmul.f32 0.0, %v13039_v7 }
 0x8dc   :  { %v8742_v4 = vpop.f32.mrb[8].mxu0  ;;  %v8795_v37 = vpop.f32.mrb[8].mxu1 }
 0x8dd   :  { %8818 = vst [vmem:[#allocation3 + $0x20] sm:$0xff] %v8742_v4  ;;  %v9924_v52 = vadd.f32 %v9899_v36, %v8742_v4  ;;  %v8744_v31 = vpop.f32.mrb[9].mxu0  ;;  %8820 = vst [vmem:[#allocation3 + $0x30] sm:$0xff] %v8795_v37  ;;  %v9926_v17 = vadd.f32 %v9907_v51, %v8795_v37  ;;  %v8797_v55 = vpop.f32.mrb[9].mxu1 }
 0x8de   :  { %8819 = vst [vmem:[#allocation3 + $0x28] sm:$0xff] %v8744_v31  ;;  %v9925_v21 = vadd.f32 %v9903_v44, %v8744_v31  ;;  %v8746_v2 = vpop.f32.mrb[10].mxu0  ;;  %8821 = vst [vmem:[#allocation3 + $0x38] sm:$0xff] %v8797_v55  ;;  %v9927_v6 = vadd.f32 %v9911_v12, %v8797_v55  ;;  %v8799_v8 = vpop.f32.mrb[10].mxu1 }
 0x8df   :  { %13040 = vtanh.f32 %v9924_v52  ;;  %8826 = vst [vmem:[#allocation3 + $0x60] sm:$0xff] %v8746_v2  ;;  %v8748_v54 = vpop.f32.mrb[11].mxu0  ;;  %v12502_v59 = vmul.f32 -1.442695, %v9926_v17  ;;  %8828 = vst [vmem:[#allocation3 + $0x70] sm:$0xff] %v8799_v8  ;;  %v8801_v39 = vpop.f32.mrb[11].mxu1 }
 0x8e0   :  { %13042 = vtanh.f32 %v9925_v21  ;;  %8827 = vst [vmem:[#allocation3 + $0x68] sm:$0xff] %v8748_v54  ;;  %v12503_v13 = vmul.f32 -1.442695, %v9927_v6  ;;  %8829 = vst [vmem:[#allocation3 + $0x78] sm:$0xff] %v8801_v39 }
 0x8e1   :  { %13044 = vpow2.f32 %v12502_v59 }
 0x8e2   :  { %13046 = vpow2.f32 %v12503_v13 }
 0x8e4   :  { %v8752_v23 = vpop.f32.mrb[12].mxu0  ;;  %v8805_v3 = vpop.f32.mrb[12].mxu1 }
 0x8e5   :  { %8834 = vst [vmem:[#allocation3 + $0xa0] sm:$0xff] %v8752_v23  ;;  %v8754_v38 = vpop.f32.mrb[13].mxu0  ;;  %8836 = vst [vmem:[#allocation3 + $0xb0] sm:$0xff] %v8805_v3  ;;  %v8807_v50 = vpop.f32.mrb[13].mxu1 }
 0x8e6   :  { %8835 = vst [vmem:[#allocation3 + $0xa8] sm:$0xff] %v8754_v38  ;;  %v8756_v58 = vpop.f32.mrb[14].mxu0  ;;  %8837 = vst [vmem:[#allocation3 + $0xb8] sm:$0xff] %v8807_v50  ;;  %v8809_v61 = vpop.f32.mrb[14].mxu1 }
 0x8e7   :  { %8842 = vst [vmem:[#allocation3 + $0xe0] sm:$0xff] %v8756_v58  ;;  %v8758_v49 = vpop.f32.mrb[15].mxu0  ;;  %8844 = vst [vmem:[#allocation3 + $0xf0] sm:$0xff] %v8809_v61  ;;  %v8811_v43 = vpop.f32.mrb[15].mxu1 }
 0x8e8   :  { %8843 = vst [vmem:[#allocation3 + $0xe8] sm:$0xff] %v8758_v49  ;;  %8845 = vst [vmem:[#allocation3 + $0xf8] sm:$0xff] %v8811_v43 }
 0x8e9   :  { %v13041_v11 = vpop.eup %13040 }
 0x8ea   :  { %v13043_v20 = vpop.eup %13042  ;;  %v9968_v45 = vmul.f32 %v13041_v11, %v13033_v16 }
 0x8eb   :  { %v9969_v22 = vmul.f32 %v13043_v20, %v13037_v9  ;;  %v13045_v14 = vpop.eup %13044 }
 0x8ec   :  { %v15450_v33 = vadd.f32 %v9968_v45, %v9966_v1   ;;  %v13047_v5 = vpop.eup %13046  ;;  %v9960_v56 = vadd.f32 1.0, %v13045_v14 }
 0x8ed   :  { %v15452_v41 = vadd.f32 %v9969_v22, %v9967_v24   ;;  %v9961_v47 = vadd.f32 1.0, %v13047_v5 }
 0x8ee   :  { %13048 = vtanh.f32 %v15450_v33 }
 0x8ef   :  { %13050 = vrcp.f32 %v9960_v56 }
 0x8f0   :  { %13052 = vtanh.f32 %v15452_v41 }
 0x8f1   :  { %13054 = vrcp.f32 %v9961_v47 }
 0x8f8   :  { %v13049_v53 = vpop.eup %13048 }
 0x8f9   :  { %v13051_v63 = vpop.eup %13050 }
 0x8fa   :  { %v13053_v30 = vpop.eup %13052  ;;  %v15456_v0 = vmul.f32 %v13051_v63, %v13049_v53  }
 0x8fb   :  { %v13055_v34 = vpop.eup %13054 }
 0x8fc   :  { %v15458_v57 = vmul.f32 %v13055_v34, %v13053_v30  }
 0x91c   :  { %v9660_v25 = vpop.f32.mrb[16].mxu0  ;;  %v9713_v18 = vpop.f32.mrb[16].mxu1 }
 0x91d   :  { %9838 = vst [vmem:[#allocation3 + $0x100] sm:$0xff] %v9660_v25  ;;  %v9662_v26 = vpop.f32.mrb[17].mxu0  ;;  %9840 = vst [vmem:[#allocation3 + $0x110] sm:$0xff] %v9713_v18  ;;  %v9715_v27 = vpop.f32.mrb[17].mxu1 }
 0x91e   :  { %9839 = vst [vmem:[#allocation3 + $0x108] sm:$0xff] %v9662_v26  ;;  %v9664_v29 = vpop.f32.mrb[18].mxu0  ;;  %9841 = vst [vmem:[#allocation3 + $0x118] sm:$0xff] %v9715_v27  ;;  %v9717_v48 = vpop.f32.mrb[18].mxu1 }
 0x91f   :  { %9846 = vst [vmem:[#allocation3 + $0x140] sm:$0xff] %v9664_v29  ;;  %v9666_v60 = vpop.f32.mrb[19].mxu0  ;;  %9848 = vst [vmem:[#allocation3 + $0x150] sm:$0xff] %v9717_v48  ;;  %v9719_v19 = vpop.f32.mrb[19].mxu1 }
 0x920   :  { %9847 = vst [vmem:[#allocation3 + $0x148] sm:$0xff] %v9666_v60  ;;  %9849 = vst [vmem:[#allocation3 + $0x158] sm:$0xff] %v9719_v19 }
 0x924   :  { %v9670_v32 = vpop.f32.mrb[20].mxu0  ;;  %v9723_v28 = vpop.f32.mrb[20].mxu1 }
 0x925   :  { %9854 = vst [vmem:[#allocation3 + $0x180] sm:$0xff] %v9670_v32  ;;  %v9672_v35 = vpop.f32.mrb[21].mxu0  ;;  %9856 = vst [vmem:[#allocation3 + $0x190] sm:$0xff] %v9723_v28  ;;  %v9725_v15 = vpop.f32.mrb[21].mxu1 }
 0x926   :  { %9855 = vst [vmem:[#allocation3 + $0x188] sm:$0xff] %v9672_v35  ;;  %v9674_v36 = vpop.f32.mrb[22].mxu0  ;;  %9857 = vst [vmem:[#allocation3 + $0x198] sm:$0xff] %v9725_v15  ;;  %v9727_v42 = vpop.f32.mrb[22].mxu1 }
 0x927   :  { %9862 = vst [vmem:[#allocation3 + $0x1c0] sm:$0xff] %v9674_v36  ;;  %v9676_v10 = vpop.f32.mrb[23].mxu0  ;;  %9864 = vst [vmem:[#allocation3 + $0x1d0] sm:$0xff] %v9727_v42  ;;  %v9729_v51 = vpop.f32.mrb[23].mxu1 }
 0x928   :  { %9863 = vst [vmem:[#allocation3 + $0x1c8] sm:$0xff] %v9676_v10  ;;  %9865 = vst [vmem:[#allocation3 + $0x1d8] sm:$0xff] %v9729_v51 }
 0x95c   :  { %v9766_v40 = vpop.f32.mrb[24].mxu0  ;;  %v9819_v44 = vpop.f32.mrb[24].mxu1 }
 0x95d   :  { %9842 = vst [vmem:[#allocation3 + $0x120] sm:$0xff] %v9766_v40  ;;  %v9768_v46 = vpop.f32.mrb[25].mxu0  ;;  %9844 = vst [vmem:[#allocation3 + $0x130] sm:$0xff] %v9819_v44  ;;  %v9821_v12 = vpop.f32.mrb[25].mxu1 }
 0x95e   :  { %9843 = vst [vmem:[#allocation3 + $0x128] sm:$0xff] %v9768_v46  ;;  %v9770_v4 = vpop.f32.mrb[26].mxu0  ;;  %9845 = vst [vmem:[#allocation3 + $0x138] sm:$0xff] %v9821_v12  ;;  %v9823_v52 = vpop.f32.mrb[26].mxu1 }
 0x95f   :  { %9850 = vst [vmem:[#allocation3 + $0x160] sm:$0xff] %v9770_v4  ;;  %v9772_v37 = vpop.f32.mrb[27].mxu0  ;;  %9852 = vst [vmem:[#allocation3 + $0x170] sm:$0xff] %v9823_v52  ;;  %v9825_v31 = vpop.f32.mrb[27].mxu1 }
 0x960   :  { %9851 = vst [vmem:[#allocation3 + $0x168] sm:$0xff] %v9772_v37  ;;  %9853 = vst [vmem:[#allocation3 + $0x178] sm:$0xff] %v9825_v31 }
 0x964   :  { %v9776_v17 = vpop.f32.mrb[28].mxu0  ;;  %v9829_v21 = vpop.f32.mrb[28].mxu1 }
 0x965   :  { %9858 = vst [vmem:[#allocation3 + $0x1a0] sm:$0xff] %v9776_v17  ;;  %v9778_v55 = vpop.f32.mrb[29].mxu0  ;;  %9860 = vst [vmem:[#allocation3 + $0x1b0] sm:$0xff] %v9829_v21  ;;  %v9831_v2 = vpop.f32.mrb[29].mxu1 }
 0x966   :  { %9859 = vst [vmem:[#allocation3 + $0x1a8] sm:$0xff] %v9778_v55  ;;  %v9780_v6 = vpop.f32.mrb[30].mxu0  ;;  %9861 = vst [vmem:[#allocation3 + $0x1b8] sm:$0xff] %v9831_v2  ;;  %v9833_v8 = vpop.f32.mrb[30].mxu1 }
 0x967   :  { %9866 = vst [vmem:[#allocation3 + $0x1e0] sm:$0xff] %v9780_v6  ;;  %v9782_v54 = vpop.f32.mrb[31].mxu0  ;;  %9868 = vst [vmem:[#allocation3 + $0x1f0] sm:$0xff] %v9833_v8  ;;  %v9835_v59 = vpop.f32.mrb[31].mxu1 }
 0x968   :  { %9867 = vst [vmem:[#allocation3 + $0x1e8] sm:$0xff] %v9782_v54  ;;  %9869 = vst [vmem:[#allocation3 + $0x1f8] sm:$0xff] %v9835_v59 }
 0x969 LB: > { %v10052_v39 = vld [vmem:[#allocation11] sm:$0xff]  ;;  %v10053_v23 = vld [vmem:[#allocation11 + $0x8] sm:$0xff]  ;;  %v15487_v24 = vpack.c.bf16 %v13358_v57, %v13358_v57  ;;  %s12504_s29 = sshll.u32 %s13366_s22, 3  ;;  %s9981_s22 = sadd.s32 1, %s13366_s22   ;;  %s13366_s22 = sphi %s15472_s22, %s9981_s22   ;;  %v13362_v0 = vphi %v15456_v0, %v16050_v0   ;;  %v13358_v57 = vphi %v15458_v57, %v16049_v57   ;;  %v13354_v33 = vphi %v15450_v33, %v11034_v33   ;;  %v13350_v41 = vphi %v15452_v41, %v11035_v41  }
 0x96a   : > { %v10056_v13 = vld [vmem:[#allocation11 + $0x20] sm:$0xff]  ;;  %v10057_v3 = vld [vmem:[#allocation11 + $0x28] sm:$0xff]  ;;  %s9987_s13 = sshra.s32 %s12504_s29, 3  ;;  %p9978_p8 = scmp.ge.s32.totalorder %s9981_s22, 8  }
 0x96b   : > { %v12508_v16 = vcombine.high %v10052_v39, %v10056_v13  ;;  %v12507_v38 = vcombine.low %v10052_v39, %v10056_v13  ;;  %v10060_v62 = vld [vmem:[#allocation11 + $0x40] sm:$0xff]  ;;  %v12510_v58 = vcombine.high %v10053_v23, %v10057_v3  ;;  %v12509_v9 = vcombine.low %v10053_v23, %v10057_v3  ;;  %v10061_v49 = vld [vmem:[#allocation11 + $0x48] sm:$0xff]  ;;  %10852 = vmatprep.mubr.bf16.mxu0 %v15487_v24  ;;  %s12662_s17 = sshll.u32 %s9987_s13, 6 }
 0x96c   : > { %v10064_v50 = vld [vmem:[#allocation11 + $0x60] sm:$0xff]  ;;  %v10065_v7 = vld [vmem:[#allocation11 + $0x68] sm:$0xff]  ;;  %10893 = vmatprep.mubr.bf16.mxu1 %v15487_v24  ;;  %s15506_s30 = scalar_lea.vmem [#allocation3], %s12662_s17 }
 0x96d   : > { %v12516_v61 = vcombine.high %v10060_v62, %v10064_v50  ;;  %v10068_v43 = vld [vmem:[#allocation11 + $0x80] sm:$0xff]  ;;  %10820 = vmatprep.subr.bf16.mxu0 %v12508_v16  ;;  %v12518_v11 = vcombine.high %v10061_v49, %v10065_v7  ;;  %v10069_v1 = vld [vmem:[#allocation11 + $0x88] sm:$0xff]  ;;  %10861 = vmatprep.subr.bf16.mxu1 %v12510_v58  ;;  %v12515_v22 = vcombine.low %v10060_v62, %v10064_v50 }
 0x96e   : > { %v10072_v20 = vld [vmem:[#allocation11 + $0xa0] sm:$0xff]  ;;  %v10073_v45 = vld [vmem:[#allocation11 + $0xa8] sm:$0xff]  ;;  %10821 = vmatpush1.bf16.msra.mxu0 %v12507_v38  ;;  %10862 = vmatpush1.bf16.msra.mxu1 %v12509_v9  ;;  %v12517_v14 = vcombine.low %v10061_v49, %v10065_v7 }
 0x96f   : > { %10822 = vmatprep.subr.bf16.mxu0 %v12516_v61  ;;  %v12524_v5 = vcombine.high %v10068_v43, %v10072_v20  ;;  %10863 = vmatprep.subr.bf16.mxu1 %v12518_v11  ;;  %v12526_v56 = vcombine.high %v10069_v1, %v10073_v45  ;;  %v10076_v47 = vld [vmem:[#allocation11 + $0xc0] sm:$0xff]  ;;  %v10077_v63 = vld [vmem:[#allocation11 + $0xc8] sm:$0xff]  ;;  %v12523_v34 = vcombine.low %v10068_v43, %v10072_v20 }
 0x970   : > { %v10080_v53 = vld [vmem:[#allocation11 + $0xe0] sm:$0xff]  ;;  %v10081_v30 = vld [vmem:[#allocation11 + $0xe8] sm:$0xff]  ;;  %v12525_v57 = vcombine.low %v10069_v1, %v10073_v45 }
 0x971   : > { %v12532_v25 = vcombine.high %v10076_v47, %v10080_v53  ;;  %v12534_v18 = vcombine.high %v10077_v63, %v10081_v30  ;;  %v10084_v26 = vld [vmem:[#allocation11 + $0x100] sm:$0xff]  ;;  %v10085_v29 = vld [vmem:[#allocation11 + $0x108] sm:$0xff]  ;;  %v12531_v60 = vcombine.low %v10076_v47, %v10080_v53  ;;  %v12533_v19 = vcombine.low %v10077_v63, %v10081_v30 }
 0x972   : > { %10823 = vmatpush1.bf16.msra.mxu0 %v12515_v22  ;;  %10864 = vmatpush1.bf16.msra.mxu1 %v12517_v14  ;;  %v10088_v27 = vld [vmem:[#allocation11 + $0x120] sm:$0xff]  ;;  %v10089_v48 = vld [vmem:[#allocation11 + $0x128] sm:$0xff] }
 0x973   : > { %10824 = vmatprep.subr.bf16.mxu0 %v12524_v5  ;;  %10865 = vmatprep.subr.bf16.mxu1 %v12526_v56  ;;  %v12540_v32 = vcombine.high %v10084_v26, %v10088_v27  ;;  %v12542_v28 = vcombine.high %v10085_v29, %v10089_v48  ;;  %v10092_v35 = vld [vmem:[#allocation11 + $0x140] sm:$0xff]  ;;  %v10093_v36 = vld [vmem:[#allocation11 + $0x148] sm:$0xff]  ;;  %v12539_v10 = vcombine.low %v10084_v26, %v10088_v27 }
 0x974   : > { %v10096_v15 = vld [vmem:[#allocation11 + $0x160] sm:$0xff]  ;;  %v10097_v42 = vld [vmem:[#allocation11 + $0x168] sm:$0xff]  ;;  %v12541_v51 = vcombine.low %v10085_v29, %v10089_v48 }
 0x975   : > { %v12548_v40 = vcombine.high %v10092_v35, %v10096_v15  ;;  %v12550_v44 = vcombine.high %v10093_v36, %v10097_v42  ;;  %v10100_v46 = vld [vmem:[#allocation11 + $0x180] sm:$0xff]  ;;  %v10101_v4 = vld [vmem:[#allocation11 + $0x188] sm:$0xff]  ;;  %v12547_v37 = vcombine.low %v10092_v35, %v10096_v15  ;;  %v12549_v31 = vcombine.low %v10093_v36, %v10097_v42 }
 0x976   : > { %10825 = vmatpush1.bf16.msra.mxu0 %v12523_v34  ;;  %10866 = vmatpush1.bf16.msra.mxu1 %v12525_v57  ;;  %v10104_v12 = vld [vmem:[#allocation11 + $0x1a0] sm:$0xff]  ;;  %v10105_v52 = vld [vmem:[#allocation11 + $0x1a8] sm:$0xff] }
 0x977   : > { %10826 = vmatprep.subr.bf16.mxu0 %v12532_v25  ;;  %10867 = vmatprep.subr.bf16.mxu1 %v12534_v18  ;;  %v12556_v17 = vcombine.high %v10100_v46, %v10104_v12  ;;  %v12558_v21 = vcombine.high %v10101_v4, %v10105_v52  ;;  %v10108_v55 = vld [vmem:[#allocation11 + $0x1c0] sm:$0xff]  ;;  %v10109_v6 = vld [vmem:[#allocation11 + $0x1c8] sm:$0xff]  ;;  %v12555_v54 = vcombine.low %v10100_v46, %v10104_v12 }
 0x978   : > { %v10112_v2 = vld [vmem:[#allocation11 + $0x1e0] sm:$0xff]  ;;  %v10113_v8 = vld [vmem:[#allocation11 + $0x1e8] sm:$0xff]  ;;  %v12557_v59 = vcombine.low %v10101_v4, %v10105_v52 }
 0x979   : > { %v12564_v39 = vcombine.high %v10108_v55, %v10112_v2  ;;  %v12566_v13 = vcombine.high %v10109_v6, %v10113_v8  ;;  %v10116_v23 = vld [vmem:[#allocation11 + $0x200] sm:$0xff]  ;;  %v10117_v3 = vld [vmem:[#allocation11 + $0x208] sm:$0xff]  ;;  %v12563_v62 = vcombine.low %v10108_v55, %v10112_v2  ;;  %v12565_v50 = vcombine.low %v10109_v6, %v10113_v8 }
 0x97a   : > { %10827 = vmatpush1.bf16.msra.mxu0 %v12531_v60  ;;  %10868 = vmatpush1.bf16.msra.mxu1 %v12533_v19  ;;  %v10120_v16 = vld [vmem:[#allocation11 + $0x220] sm:$0xff]  ;;  %v10121_v38 = vld [vmem:[#allocation11 + $0x228] sm:$0xff] }
 0x97b   : > { %10828 = vmatprep.subr.bf16.mxu0 %v12540_v32  ;;  %10869 = vmatprep.subr.bf16.mxu1 %v12542_v28  ;;  %v12572_v58 = vcombine.high %v10116_v23, %v10120_v16  ;;  %v12574_v9 = vcombine.high %v10117_v3, %v10121_v38  ;;  %v10124_v61 = vld [vmem:[#allocation11 + $0x240] sm:$0xff]  ;;  %v10125_v7 = vld [vmem:[#allocation11 + $0x248] sm:$0xff]  ;;  %v12571_v11 = vcombine.low %v10116_v23, %v10120_v16 }
 0x97c   : > { %v10128_v49 = vld [vmem:[#allocation11 + $0x260] sm:$0xff]  ;;  %v10129_v43 = vld [vmem:[#allocation11 + $0x268] sm:$0xff]  ;;  %v12573_v20 = vcombine.low %v10117_v3, %v10121_v38 }
 0x97d   : > { %v12580_v1 = vcombine.high %v10124_v61, %v10128_v49  ;;  %v12582_v45 = vcombine.high %v10125_v7, %v10129_v43  ;;  %v10132_v22 = vld [vmem:[#allocation11 + $0x280] sm:$0xff]  ;;  %v10133_v5 = vld [vmem:[#allocation11 + $0x288] sm:$0xff]  ;;  %v12579_v47 = vcombine.low %v10124_v61, %v10128_v49  ;;  %v12581_v53 = vcombine.low %v10125_v7, %v10129_v43 }
 0x97e   : > { %10829 = vmatpush1.bf16.msra.mxu0 %v12539_v10  ;;  %10870 = vmatpush1.bf16.msra.mxu1 %v12541_v51  ;;  %v10136_v14 = vld [vmem:[#allocation11 + $0x2a0] sm:$0xff]  ;;  %v10137_v56 = vld [vmem:[#allocation11 + $0x2a8] sm:$0xff] }
 0x97f   : > { %10830 = vmatprep.subr.bf16.mxu0 %v12548_v40  ;;  %10871 = vmatprep.subr.bf16.mxu1 %v12550_v44  ;;  %v12588_v63 = vcombine.high %v10132_v22, %v10136_v14  ;;  %v12590_v30 = vcombine.high %v10133_v5, %v10137_v56  ;;  %v10140_v34 = vld [vmem:[#allocation11 + $0x2c0] sm:$0xff]  ;;  %v10141_v25 = vld [vmem:[#allocation11 + $0x2c8] sm:$0xff]  ;;  %v12587_v26 = vcombine.low %v10132_v22, %v10136_v14  ;;  %v10067_v22 = vld [vmem:[#allocation11 + $0x78] sm:$0xff] }
 0x980   : > { %v10144_v57 = vld [vmem:[#allocation11 + $0x2e0] sm:$0xff]  ;;  %v10145_v18 = vld [vmem:[#allocation11 + $0x2e8] sm:$0xff]  ;;  %v12589_v27 = vcombine.low %v10133_v5, %v10137_v56 }
 0x981   : > { %v12596_v29 = vcombine.high %v10140_v34, %v10144_v57  ;;  %v12598_v48 = vcombine.high %v10141_v25, %v10145_v18  ;;  %v10148_v60 = vld [vmem:[#allocation11 + $0x300] sm:$0xff]  ;;  %v10149_v32 = vld [vmem:[#allocation11 + $0x308] sm:$0xff]  ;;  %v12595_v35 = vcombine.low %v10140_v34, %v10144_v57  ;;  %v12597_v15 = vcombine.low %v10141_v25, %v10145_v18  ;;  %v10075_v34 = vld [vmem:[#allocation11 + $0xb8] sm:$0xff] }
 0x982   : > { %10831 = vmatpush1.bf16.msra.mxu0 %v12547_v37  ;;  %10872 = vmatpush1.bf16.msra.mxu1 %v12549_v31  ;;  %v10152_v19 = vld [vmem:[#allocation11 + $0x320] sm:$0xff]  ;;  %v10153_v28 = vld [vmem:[#allocation11 + $0x328] sm:$0xff] }
 0x983   : > { %10832 = vmatprep.subr.bf16.mxu0 %v12556_v17  ;;  %10873 = vmatprep.subr.bf16.mxu1 %v12558_v21  ;;  %v12604_v36 = vcombine.high %v10148_v60, %v10152_v19  ;;  %v12606_v42 = vcombine.high %v10149_v32, %v10153_v28  ;;  %v10156_v10 = vld [vmem:[#allocation11 + $0x340] sm:$0xff]  ;;  %v10157_v40 = vld [vmem:[#allocation11 + $0x348] sm:$0xff]  ;;  %v12603_v46 = vcombine.low %v10148_v60, %v10152_v19 }
 0x984   : > { %v10160_v51 = vld [vmem:[#allocation11 + $0x360] sm:$0xff]  ;;  %v10161_v44 = vld [vmem:[#allocation11 + $0x368] sm:$0xff]  ;;  %v12605_v12 = vcombine.low %v10149_v32, %v10153_v28 }
 0x985   : > { %v12612_v4 = vcombine.high %v10156_v10, %v10160_v51  ;;  %v12614_v52 = vcombine.high %v10157_v40, %v10161_v44  ;;  %v10164_v37 = vld [vmem:[#allocation11 + $0x380] sm:$0xff]  ;;  %v10165_v17 = vld [vmem:[#allocation11 + $0x388] sm:$0xff]  ;;  %v12611_v55 = vcombine.low %v10156_v10, %v10160_v51  ;;  %v12613_v2 = vcombine.low %v10157_v40, %v10161_v44  ;;  %v10094_v44 = vld [vmem:[#allocation11 + $0x150] sm:$0xff] }
 0x986   : > { %10833 = vmatpush1.bf16.msra.mxu0 %v12555_v54  ;;  %10874 = vmatpush1.bf16.msra.mxu1 %v12557_v59  ;;  %v10168_v31 = vld [vmem:[#allocation11 + $0x3a0] sm:$0xff]  ;;  %v10169_v21 = vld [vmem:[#allocation11 + $0x3a8] sm:$0xff] }
 0x987   : > { %10834 = vmatprep.subr.bf16.mxu0 %v12564_v39  ;;  %10875 = vmatprep.subr.bf16.mxu1 %v12566_v13  ;;  %v12620_v6 = vcombine.high %v10164_v37, %v10168_v31  ;;  %v12622_v8 = vcombine.high %v10165_v17, %v10169_v21  ;;  %v10172_v54 = vld [vmem:[#allocation11 + $0x3c0] sm:$0xff]  ;;  %v10173_v39 = vld [vmem:[#allocation11 + $0x3c8] sm:$0xff]  ;;  %v12619_v23 = vcombine.low %v10164_v37, %v10168_v31 }
 0x988   : > { %v10176_v59 = vld [vmem:[#allocation11 + $0x3e0] sm:$0xff]  ;;  %v10177_v13 = vld [vmem:[#allocation11 + $0x3e8] sm:$0xff]  ;;  %v12621_v16 = vcombine.low %v10165_v17, %v10169_v21  ;;  %v10102_v21 = vld [vmem:[#allocation11 + $0x190] sm:$0xff] }
 0x989   : > { %v12628_v3 = vcombine.high %v10172_v54, %v10176_v59  ;;  %v12630_v38 = vcombine.high %v10173_v39, %v10177_v13  ;;  %v12627_v61 = vcombine.low %v10172_v54, %v10176_v59  ;;  %v12629_v49 = vcombine.low %v10173_v39, %v10177_v13  ;;  %v10110_v13 = vld [vmem:[#allocation11 + $0x1d0] sm:$0xff] }
 0x98a   : > { %10835 = vmatpush1.bf16.msra.mxu0 %v12563_v62  ;;  %10876 = vmatpush1.bf16.msra.mxu1 %v12565_v50  ;;  %v10054_v62 = vld [vmem:[#allocation11 + $0x10] sm:$0xff] }
 0x98b   : > { %10836 = vmatprep.subr.bf16.mxu0 %v12572_v58  ;;  %10877 = vmatprep.subr.bf16.mxu1 %v12574_v9  ;;  %v10058_v50 = vld [vmem:[#allocation11 + $0x30] sm:$0xff]  ;;  %v10055_v58 = vld [vmem:[#allocation11 + $0x18] sm:$0xff] }
 0x98c   : > { %v10059_v9 = vld [vmem:[#allocation11 + $0x38] sm:$0xff]  ;;  %v12512_v7 = vcombine.high %v10054_v62, %v10058_v50  ;;  %v12511_v14 = vcombine.low %v10054_v62, %v10058_v50 }
 0x98d   : > { %v12514_v43 = vcombine.high %v10055_v58, %v10059_v9  ;;  %v12513_v5 = vcombine.low %v10055_v58, %v10059_v9  ;;  %v10118_v9 = vld [vmem:[#allocation11 + $0x210] sm:$0xff] }
 0x98e   : > { %10837 = vmatpush1.bf16.msra.mxu0 %v12571_v11  ;;  %10878 = vmatpush1.bf16.msra.mxu1 %v12573_v20  ;;  %v10062_v11 = vld [vmem:[#allocation11 + $0x50] sm:$0xff] }
 0x98f   : > { %10838 = vmatprep.subr.bf16.mxu0 %v12580_v1  ;;  %10879 = vmatprep.subr.bf16.mxu1 %v12582_v45  ;;  %v10066_v20 = vld [vmem:[#allocation11 + $0x70] sm:$0xff]  ;;  %v15493_v1 = vpack.c.bf16 %v13362_v0, %v13362_v0  ;;  %v10063_v45 = vld [vmem:[#allocation11 + $0x58] sm:$0xff] }
 0x990   : > { %v12520_v56 = vcombine.high %v10062_v11, %v10066_v20  ;;  %v12519_v0 = vcombine.low %v10062_v11, %v10066_v20  ;;  %v12521_v57 = vcombine.low %v10063_v45, %v10067_v22 }
 0x992   : > { %10839 = vmatpush1.bf16.msra.mxu0 %v12579_v47  ;;  %10880 = vmatpush1.bf16.msra.mxu1 %v12581_v53  ;;  %v12522_v47 = vcombine.high %v10063_v45, %v10067_v22  ;;  %v10070_v53 = vld [vmem:[#allocation11 + $0x90] sm:$0xff] }
 0x993   : > { %10840 = vmatprep.subr.bf16.mxu0 %v12588_v63  ;;  %10881 = vmatprep.subr.bf16.mxu1 %v12590_v30  ;;  %v10074_v63 = vld [vmem:[#allocation11 + $0xb0] sm:$0xff]  ;;  %v10071_v30 = vld [vmem:[#allocation11 + $0x98] sm:$0xff] }
 0x994   : > { %v12528_v25 = vcombine.high %v10070_v53, %v10074_v63  ;;  %v12530_v18 = vcombine.high %v10071_v30, %v10075_v34  ;;  %v12527_v60 = vcombine.low %v10070_v53, %v10074_v63  ;;  %v12529_v19 = vcombine.low %v10071_v30, %v10075_v34  ;;  %v10126_v22 = vld [vmem:[#allocation11 + $0x250] sm:$0xff] }
 0x995   : > { %v10134_v34 = vld [vmem:[#allocation11 + $0x290] sm:$0xff] }
 0x996   : > { %10841 = vmatpush1.bf16.msra.mxu0 %v12587_v26  ;;  %10882 = vmatpush1.bf16.msra.mxu1 %v12589_v27  ;;  %v10078_v26 = vld [vmem:[#allocation11 + $0xd0] sm:$0xff] }
 0x997   : > { %10842 = vmatprep.subr.bf16.mxu0 %v12596_v29  ;;  %10883 = vmatprep.subr.bf16.mxu1 %v12598_v48  ;;  %v10082_v27 = vld [vmem:[#allocation11 + $0xf0] sm:$0xff]  ;;  %v10079_v29 = vld [vmem:[#allocation11 + $0xd8] sm:$0xff] }
 0x998   : > { %v10083_v48 = vld [vmem:[#allocation11 + $0xf8] sm:$0xff]  ;;  %v12536_v32 = vcombine.high %v10078_v26, %v10082_v27  ;;  %v12535_v10 = vcombine.low %v10078_v26, %v10082_v27 }
 0x999   : > { %v12538_v28 = vcombine.high %v10079_v29, %v10083_v48  ;;  %v12537_v51 = vcombine.low %v10079_v29, %v10083_v48  ;;  %v10142_v48 = vld [vmem:[#allocation11 + $0x2d0] sm:$0xff] }
 0x99a   : > { %10843 = vmatpush1.bf16.msra.mxu0 %v12595_v35  ;;  %10884 = vmatpush1.bf16.msra.mxu1 %v12597_v15  ;;  %v10086_v35 = vld [vmem:[#allocation11 + $0x110] sm:$0xff] }
 0x99b   : > { %10844 = vmatprep.subr.bf16.mxu0 %v12604_v36  ;;  %10885 = vmatprep.subr.bf16.mxu1 %v12606_v42  ;;  %v10090_v15 = vld [vmem:[#allocation11 + $0x130] sm:$0xff]  ;;  %v10087_v36 = vld [vmem:[#allocation11 + $0x118] sm:$0xff] }
 0x99c   : > { %v10091_v42 = vld [vmem:[#allocation11 + $0x138] sm:$0xff]  ;;  %v12544_v40 = vcombine.high %v10086_v35, %v10090_v15 }
 0x99d   : > { %v12545_v37 = vcombine.low %v10087_v36, %v10091_v42 }
 0x99e   : > { %10845 = vmatpush1.bf16.msra.mxu0 %v12603_v46  ;;  %10886 = vmatpush1.bf16.msra.mxu1 %v12605_v12  ;;  %v10098_v46 = vld [vmem:[#allocation11 + $0x170] sm:$0xff]  ;;  %v10095_v12 = vld [vmem:[#allocation11 + $0x158] sm:$0xff] }
 0x99f   : > { %10846 = vmatprep.subr.bf16.mxu0 %v12612_v4  ;;  %10887 = vmatprep.subr.bf16.mxu1 %v12614_v52  ;;  %v10099_v4 = vld [vmem:[#allocation11 + $0x178] sm:$0xff]  ;;  %v12543_v52 = vcombine.low %v10086_v35, %v10090_v15  ;;  %v12552_v31 = vcombine.high %v10094_v44, %v10098_v46 }
 0x9a0   : > { %v12554_v17 = vcombine.high %v10095_v12, %v10099_v4  ;;  %v12553_v54 = vcombine.low %v10095_v12, %v10099_v4  ;;  %v10158_v4 = vld [vmem:[#allocation11 + $0x350] sm:$0xff] }
 0x9a2   : > { %10847 = vmatpush1.bf16.msra.mxu0 %v12611_v55  ;;  %10888 = vmatpush1.bf16.msra.mxu1 %v12613_v2  ;;  %v10106_v55 = vld [vmem:[#allocation11 + $0x1b0] sm:$0xff]  ;;  %v10103_v2 = vld [vmem:[#allocation11 + $0x198] sm:$0xff] }
 0x9a3   : > { %10848 = vmatprep.subr.bf16.mxu0 %v12620_v6  ;;  %10889 = vmatprep.subr.bf16.mxu1 %v12622_v8  ;;  %v10107_v6 = vld [vmem:[#allocation11 + $0x1b8] sm:$0xff]  ;;  %v12551_v8 = vcombine.low %v10094_v44, %v10098_v46  ;;  %v12560_v59 = vcombine.high %v10102_v21, %v10106_v55 }
 0x9a4   : > { %v12562_v39 = vcombine.high %v10103_v2, %v10107_v6  ;;  %v12561_v62 = vcombine.low %v10103_v2, %v10107_v6  ;;  %v10166_v6 = vld [vmem:[#allocation11 + $0x390] sm:$0xff] }
 0x9a6   : > { %10849 = vmatpush1.bf16.msra.mxu0 %v12619_v23  ;;  %10890 = vmatpush1.bf16.msra.mxu1 %v12621_v16  ;;  %v10114_v23 = vld [vmem:[#allocation11 + $0x1f0] sm:$0xff]  ;;  %v10111_v16 = vld [vmem:[#allocation11 + $0x1d8] sm:$0xff] }
 0x9a7   : > { %10850 = vmatprep.subr.bf16.mxu0 %v12628_v3  ;;  %10891 = vmatprep.subr.bf16.mxu1 %v12630_v38  ;;  %v10115_v3 = vld [vmem:[#allocation11 + $0x1f8] sm:$0xff]  ;;  %v12559_v38 = vcombine.low %v10102_v21, %v10106_v55  ;;  %v12568_v50 = vcombine.high %v10110_v13, %v10114_v23 }
 0x9a8   : > { %v12570_v58 = vcombine.high %v10111_v16, %v10115_v3  ;;  %v12569_v11 = vcombine.low %v10111_v16, %v10115_v3  ;;  %v10174_v3 = vld [vmem:[#allocation11 + $0x3d0] sm:$0xff] }
 0x9aa   : > { %10851 = vmatpush1.bf16.msra.mxu0 %v12627_v61  ;;  %10892 = vmatpush1.bf16.msra.mxu1 %v12629_v49  ;;  %v10122_v61 = vld [vmem:[#allocation11 + $0x230] sm:$0xff]  ;;  %v10119_v49 = vld [vmem:[#allocation11 + $0x218] sm:$0xff] }
 0x9ab   : > { %10902 = vmatprep.subr.bf16.mxu0 %v12512_v7  ;;  %10943 = vmatprep.subr.bf16.mxu1 %v12514_v43  ;;  %v10123_v7 = vld [vmem:[#allocation11 + $0x238] sm:$0xff]  ;;  %v12567_v43 = vcombine.low %v10110_v13, %v10114_v23  ;;  %v12576_v20 = vcombine.high %v10118_v9, %v10122_v61 }
 0x9ac   : > { %v12578_v45 = vcombine.high %v10119_v49, %v10123_v7  ;;  %v12577_v53 = vcombine.low %v10119_v49, %v10123_v7 }
 0x9ad   : > { %10853 = vmatmul.mubr.bf16.vlgmr.msra.gmra.mrb[0].mxu0 %v15493_v1  ;;  %10894 = vmatmul.mubr.bf16.vlgmr.msra.gmra.mrb[0].mxu1 %v15493_v1 }
 0x9ae   : > { %10903 = vmatpush1.bf16.msra.mxu0 %v12511_v14  ;;  %10944 = vmatpush1.bf16.msra.mxu1 %v12513_v5  ;;  %v10130_v14 = vld [vmem:[#allocation11 + $0x270] sm:$0xff]  ;;  %v10127_v5 = vld [vmem:[#allocation11 + $0x258] sm:$0xff] }
 0x9af   : > { %10904 = vmatprep.subr.bf16.mxu0 %v12520_v56  ;;  %10945 = vmatprep.subr.bf16.mxu1 %v12522_v47  ;;  %v10131_v56 = vld [vmem:[#allocation11 + $0x278] sm:$0xff]  ;;  %v12575_v47 = vcombine.low %v10118_v9, %v10122_v61  ;;  %v12584_v63 = vcombine.high %v10126_v22, %v10130_v14 }
 0x9b0   : > { %10934 = vmatprep.mubr.bf16.mxu0 %v15487_v24  ;;  %10975 = vmatprep.mubr.bf16.mxu1 %v15487_v24  ;;  %v12546_v24 = vcombine.high %v10087_v36, %v10091_v42  ;;  %v12586_v30 = vcombine.high %v10127_v5, %v10131_v56  ;;  %v12585_v26 = vcombine.low %v10127_v5, %v10131_v56  ;;  %v10150_v42 = vld [vmem:[#allocation11 + $0x310] sm:$0xff] }
 0x9b2   : > { %10905 = vmatpush1.bf16.msra.mxu0 %v12519_v0  ;;  %10946 = vmatpush1.bf16.msra.mxu1 %v12521_v57  ;;  %v10138_v0 = vld [vmem:[#allocation11 + $0x2b0] sm:$0xff]  ;;  %v10135_v57 = vld [vmem:[#allocation11 + $0x298] sm:$0xff] }
 0x9b3   : > { %10906 = vmatprep.subr.bf16.mxu0 %v12528_v25  ;;  %10947 = vmatprep.subr.bf16.mxu1 %v12530_v18  ;;  %v10139_v25 = vld [vmem:[#allocation11 + $0x2b8] sm:$0xff]  ;;  %v12583_v18 = vcombine.low %v10126_v22, %v10130_v14  ;;  %v12592_v27 = vcombine.high %v10134_v34, %v10138_v0 }
 0x9b4   : > { %v12594_v29 = vcombine.high %v10135_v57, %v10139_v25  ;;  %v12593_v35 = vcombine.low %v10135_v57, %v10139_v25  ;;  %v9994_v57 = vld [vmem:[%s15506_s30 + $0x10] sm:$0xff] }
 0x9b5   : > { %v16043_v25 = vld [vmem:[#allocation20_spill] sm:$0xff] }
 0x9b6   : > { %10907 = vmatpush1.bf16.msra.mxu0 %v12527_v60  ;;  %10948 = vmatpush1.bf16.msra.mxu1 %v12529_v19  ;;  %v10146_v60 = vld [vmem:[#allocation11 + $0x2f0] sm:$0xff]  ;;  %v10143_v19 = vld [vmem:[#allocation11 + $0x2d8] sm:$0xff] }
 0x9b7   : > { %10908 = vmatprep.subr.bf16.mxu0 %v12536_v32  ;;  %10949 = vmatprep.subr.bf16.mxu1 %v12538_v28  ;;  %v10147_v32 = vld [vmem:[#allocation11 + $0x2f8] sm:$0xff]  ;;  %v12591_v28 = vcombine.low %v10134_v34, %v10138_v0  ;;  %v12600_v15 = vcombine.high %v10142_v48, %v10146_v60  ;;  %v16042_v34 = vld [vmem:[#allocation19_spill] sm:$0xff] }
 0x9b8   : > { %v12602_v36 = vcombine.high %v10143_v19, %v10147_v32  ;;  %v12601_v44 = vcombine.low %v10143_v19, %v10147_v32 }
 0x9ba   : > { %10909 = vmatpush1.bf16.msra.mxu0 %v12535_v10  ;;  %10950 = vmatpush1.bf16.msra.mxu1 %v12537_v51  ;;  %v10154_v10 = vld [vmem:[#allocation11 + $0x330] sm:$0xff]  ;;  %v10151_v51 = vld [vmem:[#allocation11 + $0x318] sm:$0xff] }
 0x9bb   : > { %10910 = vmatprep.subr.bf16.mxu0 %v12544_v40  ;;  %10951 = vmatprep.subr.bf16.mxu1 %v12546_v24  ;;  %v10155_v40 = vld [vmem:[#allocation11 + $0x338] sm:$0xff]  ;;  %v12599_v24 = vcombine.low %v10142_v48, %v10146_v60  ;;  %v12608_v46 = vcombine.high %v10150_v42, %v10154_v10 }
 0x9bc   : > { %v12610_v12 = vcombine.high %v10151_v51, %v10155_v40  ;;  %v12609_v21 = vcombine.low %v10151_v51, %v10155_v40  ;;  %v9995_v60 = vld [vmem:[%s15506_s30 + $0x18] sm:$0xff] }
 0x9be   : > { %10911 = vmatpush1.bf16.msra.mxu0 %v12543_v52  ;;  %10952 = vmatpush1.bf16.msra.mxu1 %v12545_v37  ;;  %v10162_v52 = vld [vmem:[#allocation11 + $0x370] sm:$0xff]  ;;  %v10159_v37 = vld [vmem:[#allocation11 + $0x358] sm:$0xff] }
 0x9bf   : > { %10912 = vmatprep.subr.bf16.mxu0 %v12552_v31  ;;  %10953 = vmatprep.subr.bf16.mxu1 %v12554_v17  ;;  %v10163_v31 = vld [vmem:[#allocation11 + $0x378] sm:$0xff]  ;;  %v12607_v17 = vcombine.low %v10150_v42, %v10154_v10  ;;  %v12616_v55 = vcombine.high %v10158_v4, %v10162_v52 }
 0x9c0   : > { %v12618_v2 = vcombine.high %v10159_v37, %v10163_v31  ;;  %v12617_v13 = vcombine.low %v10159_v37, %v10163_v31  ;;  %v9996_v37 = vld [vmem:[%s15506_s30 + $0x20] sm:$0xff]  ;;  %v16046_v31 = vld [vmem:[#allocation23_spill] sm:$0xff] }
 0x9c2   : > { %10913 = vmatpush1.bf16.msra.mxu0 %v12551_v8  ;;  %10954 = vmatpush1.bf16.msra.mxu1 %v12553_v54  ;;  %v10170_v8 = vld [vmem:[#allocation11 + $0x3b0] sm:$0xff]  ;;  %v10167_v54 = vld [vmem:[#allocation11 + $0x398] sm:$0xff] }
 0x9c3   : > { %10914 = vmatprep.subr.bf16.mxu0 %v12560_v59  ;;  %10955 = vmatprep.subr.bf16.mxu1 %v12562_v39  ;;  %v10171_v59 = vld [vmem:[#allocation11 + $0x3b8] sm:$0xff]  ;;  %v12615_v39 = vcombine.low %v10158_v4, %v10162_v52  ;;  %v12624_v23 = vcombine.high %v10166_v6, %v10170_v8 }
 0x9c4   : > { %v12626_v16 = vcombine.high %v10167_v54, %v10171_v59  ;;  %v12625_v9 = vcombine.low %v10167_v54, %v10171_v59  ;;  %v9997_v54 = vld [vmem:[%s15506_s30 + $0x28] sm:$0xff]  ;;  %v16048_v59 = vld [vmem:[#allocation25_spill] sm:$0xff] }
 0x9c6   : > { %10915 = vmatpush1.bf16.msra.mxu0 %v12559_v38  ;;  %10956 = vmatpush1.bf16.msra.mxu1 %v12561_v62  ;;  %v10178_v38 = vld [vmem:[#allocation11 + $0x3f0] sm:$0xff]  ;;  %v10175_v62 = vld [vmem:[#allocation11 + $0x3d8] sm:$0xff] }
 0x9c7   : > { %10916 = vmatprep.subr.bf16.mxu0 %v12568_v50  ;;  %10957 = vmatprep.subr.bf16.mxu1 %v12570_v58  ;;  %v10179_v50 = vld [vmem:[#allocation11 + $0x3f8] sm:$0xff]  ;;  %v12623_v58 = vcombine.low %v10166_v6, %v10170_v8  ;;  %v12632_v61 = vcombine.high %v10174_v3, %v10178_v38  ;;  %v12631_v7 = vcombine.low %v10174_v3, %v10178_v38  ;;  %v9998_v8 = vld [vmem:[%s15506_s30 + $0x30] sm:$0xff] }
 0x9c8   : > { %v12634_v49 = vcombine.high %v10175_v62, %v10179_v50 }
 0x9ca   : > { %10917 = vmatpush1.bf16.msra.mxu0 %v12567_v43  ;;  %10958 = vmatpush1.bf16.msra.mxu1 %v12569_v11  ;;  %v12633_v43 = vcombine.low %v10175_v62, %v10179_v50 }
 0x9cb   : > { %10918 = vmatprep.subr.bf16.mxu0 %v12576_v20  ;;  %10959 = vmatprep.subr.bf16.mxu1 %v12578_v45 }
 0x9ce   : > { %10919 = vmatpush1.bf16.msra.mxu0 %v12575_v47  ;;  %10960 = vmatpush1.bf16.msra.mxu1 %v12577_v53  ;;  %v10000_v53 = vld [vmem:[%s15552_s9] sm:$0xff] }
 0x9cf   : > { %10920 = vmatprep.subr.bf16.mxu0 %v12584_v63  ;;  %10961 = vmatprep.subr.bf16.mxu1 %v12586_v30  ;;  %v16041_v63 = vld [vmem:[#allocation18_spill] sm:$0xff]  ;;  %v10013_v0 = vrot.slane %v10000_v53, %v16042_v34 }
 0x9d0   : > { %v10005_v30 = vrot.slane %v10000_v53, %v16041_v63 }
 0x9d1   : > { %v10044_v19 = vadd.f32 %v10013_v0, %v9994_v57 }
 0x9d2   : > { %10921 = vmatpush1.bf16.msra.mxu0 %v12583_v18  ;;  %10962 = vmatpush1.bf16.msra.mxu1 %v12585_v26  ;;  %v10009_v18 = vrot.slane %v10000_v53, %v16043_v25  ;;  %v9993_v26 = vld [vmem:[%s15506_s30 + $0x8] sm:$0xff] }
 0x9d3   : > { %10922 = vmatprep.subr.bf16.mxu0 %v12592_v27  ;;  %10963 = vmatprep.subr.bf16.mxu1 %v12594_v29  ;;  %v16044_v27 = vld [vmem:[#allocation21_spill] sm:$0xff] }
 0x9d4   : > { %v10017_v29 = vrot.slane %v10000_v53, %v16044_v27  ;;  %v10043_v32 = vadd.f32 %v10009_v18, %v9993_v26 }
 0x9d6   : > { %10923 = vmatpush1.bf16.msra.mxu0 %v12591_v28  ;;  %10964 = vmatpush1.bf16.msra.mxu1 %v12593_v35  ;;  %v10045_v28 = vadd.f32 %v10017_v29, %v9995_v60 }
 0x9d7   : > { %10924 = vmatprep.subr.bf16.mxu0 %v12600_v15  ;;  %10965 = vmatprep.subr.bf16.mxu1 %v12602_v36 }
 0x9da   : > { %10925 = vmatpush1.bf16.msra.mxu0 %v12599_v24  ;;  %10966 = vmatpush1.bf16.msra.mxu1 %v12601_v44 }
 0x9db   : > { %10926 = vmatprep.subr.bf16.mxu0 %v12608_v46  ;;  %10967 = vmatprep.subr.bf16.mxu1 %v12610_v12  ;;  %v16045_v12 = vld [vmem:[#allocation22_spill] sm:$0xff] }
 0x9dc   : > { %v10021_v4 = vrot.slane %v10000_v53, %v16045_v12  ;;  %v13093_v12 = vld [vmem:[#allocation12 + $0x10] sm:$0xff] (%p9978_p8)  }
 0x9de   : > { %10927 = vmatpush1.bf16.msra.mxu0 %v12607_v17  ;;  %10968 = vmatpush1.bf16.msra.mxu1 %v12609_v21  ;;  %v10029_v17 = vrot.slane %v10000_v53, %v16046_v31  ;;  %v16047_v21 = vld [vmem:[#allocation24_spill] sm:$0xff]  ;;  %v10046_v3 = vadd.f32 %v10021_v4, %v9996_v37  ;;  %v13094_v4 = vld [vmem:[#allocation12 + $0x58] sm:$0xff] (%p9978_p8)   ;;  %v13096_v37 = vld [vmem:[#allocation12 + $0x60] sm:$0xff] (%p9978_p8)  }
 0x9df   : > { %10928 = vmatprep.subr.bf16.mxu0 %v12616_v55  ;;  %10969 = vmatprep.subr.bf16.mxu1 %v12618_v2  ;;  %v10025_v55 = vrot.slane %v10000_v53, %v16047_v21  ;;  %v13097_v31 = vld [vmem:[#allocation12 + $0x20] sm:$0xff] (%p9978_p8)   ;;  %v13101_v21 = vld [vmem:[#allocation12 + $0x30] sm:$0xff] (%p9978_p8)  }
 0x9e0   : > { %v10048_v62 = vadd.f32 %v10029_v17, %v9998_v8  ;;  %v13100_v17 = vld [vmem:[#allocation12 + $0x70] sm:$0xff] (%p9978_p8)   ;;  %v16051_v8 = vlaneseq (%p9978_p8) }
 0x9e1   : > { %v10047_v50 = vadd.f32 %v10025_v55, %v9997_v54  ;;  %v13102_v55 = vld [vmem:[#allocation12 + $0x78] sm:$0xff] (%p9978_p8)  }
 0x9e2   : > { %10929 = vmatpush1.bf16.msra.mxu0 %v12615_v39  ;;  %10970 = vmatpush1.bf16.msra.mxu1 %v12617_v13  ;;  %v10033_v39 = vrot.slane %v10000_v53, %v16048_v59  ;;  %v11218_v54 = vand.u32 (%p9978_p8), 127, %v16051_v8 }
 0x9e3   : > { %10930 = vmatprep.subr.bf16.mxu0 %v12624_v23  ;;  %10971 = vmatprep.subr.bf16.mxu1 %v12626_v16  ;;  %v9999_v23 = vld [vmem:[%s15506_s30 + $0x38] sm:$0xff] }
 0x9e4   :  { %vm11219_vm0 = vcmp.lt.s32.totalorder (%p9978_p8), %v11218_v54, 2 }
 0x9e6   : > { %10931 = vmatpush1.bf16.msra.mxu0 %v12623_v58  ;;  %10972 = vmatpush1.bf16.msra.mxu1 %v12625_v9  ;;  %v10049_v58 = vadd.f32 %v10033_v39, %v9999_v23 }
 0x9e7   : > { %10932 = vmatprep.subr.bf16.mxu0 %v12632_v61  ;;  %10973 = vmatprep.subr.bf16.mxu1 %v12634_v49 }
 0x9ea   : > { %10933 = vmatpush1.bf16.msra.mxu0 %v12631_v7  ;;  %10974 = vmatpush1.bf16.msra.mxu1 %v12633_v43 }
 0x9ed   : > { %10935 = vmatmul.mubr.bf16.vlgmr.msra.gmra.mrb[4].mxu0 %v15493_v1  ;;  %10976 = vmatmul.mubr.bf16.vlgmr.msra.gmra.mrb[4].mxu1 %v15493_v1  ;;  %v9992_v1 = vld [vmem:[%s15506_s30] sm:$0xff] }
 0x9ee   : > { %v10042_v48 = vadd.f32 %v10005_v30, %v9992_v1 }
 0xa80   : > { %v10854_v11 = vpop.f32.mrb[0].mxu0  ;;  %v10895_v20 = vpop.f32.mrb[0].mxu1 }
 0xa81   : > { %v10856_v45 = vpop.f32.mrb[1].mxu0  ;;  %v10897_v22 = vpop.f32.mrb[1].mxu1  ;;  %v10984_v35 = vadd.f32 %v10854_v11, %v10042_v48  ;;  %v10986_v15 = vadd.f32 %v10895_v20, %v10044_v19 }
 0xa82   : > { %v10858_v14 = vpop.f32.mrb[2].mxu0  ;;  %v10899_v5 = vpop.f32.mrb[2].mxu1  ;;  %v10985_v36 = vadd.f32 %v10856_v45, %v10043_v32  ;;  %v10987_v42 = vadd.f32 %v10897_v22, %v10045_v28 }
 0xa83   : > { %v10859_v56 = vpop.f32.mrb[3].mxu0  ;;  %v10900_v47 = vpop.f32.mrb[3].mxu1  ;;  %v12635_v10 = vmul.f32 -1.442695, %v10984_v35  ;;  %v12637_v51 = vmul.f32 -1.442695, %v10986_v15 }
 0xa84   : > { %v12636_v40 = vmul.f32 -1.442695, %v10985_v36  ;;  %v12638_v24 = vmul.f32 -1.442695, %v10987_v42 }
 0xa85   : > { %13056 = vpow2.f32 %v12635_v10  ;;  %v13088_v10 = vld [vmem:[#allocation12 + $0x40] sm:$0xff] (%p9978_p8)  }
 0xa86   : > { %13058 = vpow2.f32 %v12637_v51  ;;  %12663 = vmatprep.subr.bf16.mxu0 (%p9978_p8), %v13088_v10 }
 0xa87   : > { %13060 = vpow2.f32 %v12636_v40  ;;  %v13089_v40 = vld [vmem:[#allocation12] sm:$0xff] (%p9978_p8)  }
 0xa88   : > { %13062 = vpow2.f32 %v12638_v24  ;;  %v13090_v24 = vld [vmem:[#allocation12 + $0x48] sm:$0xff] (%p9978_p8)   ;;  %12664 = vmatpush3.bf16.msra.mxu0 (%p9978_p8), %v13089_v40 }
 0xa89   :  { %12665 = vmatprep.subr.bf16.mxu0 (%p9978_p8), %v13090_v24 }
 0xa8f   : > { %v13057_v44 = vpop.eup %13056 }
 0xa90   : > { %v13059_v46 = vpop.eup %13058  ;;  %v10998_v6 = vadd.f32 1.0, %v13057_v44  ;;  %v13091_v44 = vld [vmem:[#allocation12 + $0x8] sm:$0xff] (%p9978_p8)  }
 0xa91   : > { %v13061_v52 = vpop.eup %13060  ;;  %v11010_v13 = vadd.f32 1.0, %v13059_v46  ;;  %v13092_v46 = vld [vmem:[#allocation12 + $0x50] sm:$0xff] (%p9978_p8)   ;;  %12666 = vmatpush3.bf16.msra.mxu0 (%p9978_p8), %v13091_v44 }
 0xa92   : > { %v13063_v2 = vpop.eup %13062  ;;  %v10999_v16 = vadd.f32 1.0, %v13061_v52  ;;  %13064 = vrcp.f32 %v10998_v6  ;;  %12667 = vmatprep.subr.bf16.mxu0 (%p9978_p8), %v13092_v46  ;;  %v13095_v52 = vld [vmem:[#allocation12 + $0x18] sm:$0xff] (%p9978_p8)  }
 0xa93   : > { %v11011_v38 = vadd.f32 1.0, %v13063_v2  ;;  %13066 = vrcp.f32 %v11010_v13  ;;  %v13103_v2 = vld [vmem:[#allocation12 + $0x38] sm:$0xff] (%p9978_p8)   ;;  %v12641_v13 = vld [vmem:[%s15554_s11] ss:$0 sm:$0xff] (%p9978_p8) }
 0xa94   : > { %13068 = vrcp.f32 %v10999_v16 }
 0xa95   : > { %13070 = vrcp.f32 %v11011_v38  ;;  %12668 = vmatpush3.bf16.msra.mxu0 (%p9978_p8), %v13093_v12 }
 0xa96   :  { %12669 = vmatprep.subr.bf16.mxu0 (%p9978_p8), %v13094_v4 }
 0xa99   :  { %12670 = vmatpush3.bf16.msra.mxu0 (%p9978_p8), %v13095_v52 }
 0xa9a   :  { %12671 = vmatprep.subr.bf16.mxu0 (%p9978_p8), %v13096_v37 }
 0xa9c   : > { %v13065_v63 = vpop.eup %13064 }
 0xa9d   : > { %v13067_v30 = vpop.eup %13066  ;;  %12672 = vmatpush3.bf16.msra.mxu0 (%p9978_p8), %v13097_v31 }
 0xa9e   : > { %v13069_v1 = vpop.eup %13068  ;;  %v11030_v25 = vmul.f32 %v13354_v33, %v13067_v30 }
 0xa9f   : > { %v13071_v34 = vpop.eup %13070 }
 0xaa0   : > { %v11031_v26 = vmul.f32 %v13350_v41, %v13071_v34 }
 0xac0   : > { %v10936_v9 = vpop.f32.mrb[4].mxu0  ;;  %v10977_v49 = vpop.f32.mrb[4].mxu1 }
 0xac1   : > { %v10988_v61 = vadd.f32 %v10936_v9, %v10046_v3  ;;  %v10938_v7 = vpop.f32.mrb[5].mxu0  ;;  %v10990_v43 = vadd.f32 %v10977_v49, %v10048_v62  ;;  %v10979_v20 = vpop.f32.mrb[5].mxu1 }
 0xac2   : > { %v10989_v11 = vadd.f32 %v10938_v7, %v10047_v50  ;;  %v10940_v45 = vpop.f32.mrb[6].mxu0  ;;  %v10991_v22 = vadd.f32 %v10979_v20, %v10049_v58  ;;  %v10981_v14 = vpop.f32.mrb[6].mxu1 }
 0xac3   : > { %13072 = vtanh.f32 %v10988_v61  ;;  %v10941_v5 = vpop.f32.mrb[7].mxu0  ;;  %v12639_v56 = vmul.f32 -1.442695, %v10990_v43  ;;  %v10982_v47 = vpop.f32.mrb[7].mxu1 }
 0xac4   : > { %13074 = vtanh.f32 %v10989_v11  ;;  %v12640_v53 = vmul.f32 -1.442695, %v10991_v22 }
 0xac5   : > { %13076 = vpow2.f32 %v12639_v56 }
 0xac6   : > { %13078 = vpow2.f32 %v12640_v53 }
 0xacd   : > { %v13073_v0 = vpop.eup %13072 }
 0xace   : > { %v13075_v57 = vpop.eup %13074  ;;  %v11032_v18 = vmul.f32 %v13073_v0, %v13065_v63 }
 0xacf   : > { %v11033_v27 = vmul.f32 %v13075_v57, %v13069_v1  ;;  %v13077_v29 = vpop.eup %13076 }
 0xad0   : > { %v11034_v33 = vadd.f32 %v11032_v18, %v11030_v25   ;;  %v13079_v48 = vpop.eup %13078  ;;  %v11024_v60 = vadd.f32 1.0, %v13077_v29 }
 0xad1   : > { %v11035_v41 = vadd.f32 %v11033_v27, %v11031_v26   ;;  %v11025_v19 = vadd.f32 1.0, %v13079_v48 }
 0xad2   : > { %13080 = vtanh.f32 %v11034_v33  ;;  %v13098_v33 = vld [vmem:[#allocation12 + $0x68] sm:$0xff] (%p9978_p8)  }
 0xad3   : > { %13082 = vrcp.f32 %v11024_v60  ;;  %12673 = vmatprep.subr.bf16.mxu0 (%p9978_p8), %v13098_v33 }
 0xad4   : > { %13084 = vtanh.f32 %v11035_v41  ;;  %v13099_v41 = vld [vmem:[#allocation12 + $0x28] sm:$0xff] (%p9978_p8)  }
 0xad5   : > { %13086 = vrcp.f32 %v11025_v19  ;;  %12674 = vmatpush3.bf16.msra.mxu0 (%p9978_p8), %v13099_v41 }
 0xad6   :  { %12675 = vmatprep.subr.bf16.mxu0 (%p9978_p8), %v13100_v17 }
 0xad9   :  { %12676 = vmatpush3.bf16.msra.mxu0 (%p9978_p8), %v13101_v21 }
 0xada   :  { %12677 = vmatprep.subr.bf16.mxu0 (%p9978_p8), %v13102_v55 }
 0xadc   : > { %v13081_v32 = vpop.eup %13080  ;;  %9980 = sbr.rel (!%p9978_p8) target bundleno = 2409 (0x969), region = 140 }
 0xadd   : > { %v13083_v28 = vpop.eup %13082  ;;  %12678 = vmatpush3.bf16.msra.mxu0 (%p9978_p8), %v13103_v2 }
 0xade   : > { %v13085_v35 = vpop.eup %13084  ;;  %v11038_v15 = vmul.f32 %v13083_v28, %v13081_v32  }
 0xadf   : > { %v13087_v36 = vpop.eup %13086 }
 0xae0   : > { %v11039_v42 = vmul.f32 %v13087_v36, %v13085_v35   ;;  %v16050_v0 = vmov %v11038_v15  ;;  %v11040_v6 = vpack.c.bf16 (%p9978_p8), %v11038_v15, %v11038_v15 }
 0xae2   : > { %v16049_v57 = vmov %v11039_v42  ;;  %v11041_v51 = vpack.c.bf16 (%p9978_p8), %v11039_v42, %v11039_v42 }
 0xae4   :  { %11209 = vmatprep.mubr.bf16.mxu0 %v11041_v51 }
 0xae5   :  { %11210 = vmatmul.mubr.bf16.vlgmr.msra.gmra.mrb[0].mxu0 %v11040_v6 }
 0xbb8   :  { %v12679_v59 = vpop.f32.mrb[0].mxu0 }
 0xbb9   :  { %v12680_v39 = vpop.f32.mrb[1].mxu0 }
 0xbba   :  { %v12681_v23 = vadd.f32 %v12680_v39, %v12679_v59  ;;  %v12682_v16 = vpop.f32.mrb[2].mxu0 }
 0xbbb   :  { %v12683_v3 = vpop.f32.mrb[3].mxu0 }
 0xbbc   :  { %v11212_v38 = vadd.f32 %v12681_v23, %v12641_v13 }
 0xbbe   :  { %v11220_v62 = vsel %vm11219_vm0, %v11212_v38, -1e+30 }
 0xbbf   :  { %11221 = vmax.xlane.f32.xlu0 %v11220_v62 }
 0xc4c   :  { %v11222_v50 = vpop.xlane.xlu0 %11221 }
 0xc4d   :  { %v11223_v58 = vsub.f32 %v11220_v62, %v11222_v50 }
 0xc4f   :  { %v11224_v9 = vmul.f32 1.442695, %v11223_v58 }
 0xc51   :  { %13104 = vpow2.f32 %v11224_v9 }
 0xc5b   :  { %v13105_v61 = vpop.eup %13104 }
 0xc5c   :  { %11226 = vadd.xlane.f32.xlu0 %v13105_v61 }
 0xce9   :  { %v11227_v49 = vpop.xlane.xlu0 %11226 }
 0xcea   :  { %13106 = vrcp.f32 %v11227_v49 }
 0xcf4   :  { %v13107_v7 = vpop.eup %13106 }
 0xcf5   :  { %v11229_v43 = vmul.f32 %v13107_v7, %v13105_v61 }
 0xcf7   :  { %11230 = vst [vmem:[%s15555_s12] sm:$0xff] %v11229_v43 }
 0xcf8   :  { %11235 = vsyncpa [#allocation5], 1 }
 0xcf9   :  { %11236 = vsyncpa [#allocation7], 1 }
 0xcfa   :  { %11237 = vsyncpa [#allocation10], 1 }
 0xcfb   :  { %11238 = vsyncpa [#allocation13], 1 }

</bundles_post_ra>
